<compile_context>
chip_gen: v5e
topology: v5e:2x2
jax: 0.10.0
libtpu: 0.0.40
codegen_flags: <defaults>
</compile_context>

<pallas_src>
import jax
import jax.numpy as jnp
from jax.experimental import pallas as pl
from jax.experimental.pallas import tpu as pltpu

LAYER_DIMS = [784, 128, 64, 36, 18, 9, 18, 36, 64, 128, 784]
# ReLU after every Linear except the encoder bottleneck (->9, no activation)
# and the final decoder layer (sigmoid instead).
RELU_FLAGS = [True, True, True, True, False, True, True, True, True, False]
N_LAYERS = 10

TILE_B_MAX = 512   # upper bound on batch rows per grid step
TILE_B_MIN = 16    # keep tiles even/sublane-aligned for the two-half split


def _round_up(x, m):
    return ((x + m - 1) // m) * m


# Lane-padded feature dims: input stays 784 (full-array block), hidden dims
# padded up to 128, final output kept at its true 784 width (block last dim
# equals the full array dim, so it is legal and lane-slicing is unnecessary).
PAD_DIMS = (
    [LAYER_DIMS[0]]
    + [_round_up(d, 128) for d in LAYER_DIMS[1:-1]]
    + [LAYER_DIMS[-1]]
)


def _choose_tile_b(batch):
    """Tile that (a) caps VMEM, (b) gives >=4 grid steps when batch allows
    (so both v7x TensorCores get >=2 pipelined steps), (c) stays a multiple
    of 16 so the two-half split is sublane-aligned."""
    tile = _round_up(max(TILE_B_MIN, -(-batch // 4)), 16)
    return min(TILE_B_MAX, tile)


def ae_kernel(x_ref, *refs):
    ws = refs[0:N_LAYERS]               # bf16 (in_pad, out_pad) weights, VMEM-resident
    bs = refs[N_LAYERS:2 * N_LAYERS]    # f32 (1, out_pad) bias rows, VMEM-resident
    out_ref = refs[2 * N_LAYERS]        # (tile_b, 784) f32 output tile

    # Two independent row-halves interleaved through the layer loop so the
    # MXU always has a second chain in flight (hides MRF drain on v5e/v6e).
    half = x_ref.shape[0] // 2
    h0 = x_ref[0:half, :]               # bf16 input tile halves
    h1 = x_ref[half:, :]

    for i in range(N_LAYERS):
        w = ws[i][...]                  # bf16
        b = bs[i][...]                  # f32
        d0 = jnp.dot(h0, w, preferred_element_type=jnp.float32) + b
        d1 = jnp.dot(h1, w, preferred_element_type=jnp.float32) + b
        if RELU_FLAGS[i]:
            d0 = jnp.maximum(d0, 0.0)
            d1 = jnp.maximum(d1, 0.0)
        if i < N_LAYERS - 1:
            # Next matmul's LHS in bf16 (MXU-native); keep f32 on the last layer.
            h0 = d0.astype(jnp.bfloat16)
            h1 = d1.astype(jnp.bfloat16)
        else:
            h0, h1 = d0, d1

    # Sigmoid: exp on the EUP, exact reciprocal (VALU has slack here).
    out_ref[0:half, :] = pl.reciprocal(1.0 + jnp.exp(-h0), approx=False).astype(out_ref.dtype)
    out_ref[half:, :] = pl.reciprocal(1.0 + jnp.exp(-h1), approx=False).astype(out_ref.dtype)


def _pad_params(weights, biases):
    """Zero-pad params to lane-dense hidden dims; weights cast to bf16."""
    pw, pb = [], []
    for i in range(N_LAYERS):
        in_t, out_t = LAYER_DIMS[i], LAYER_DIMS[i + 1]
        in_p, out_p = PAD_DIMS[i], PAD_DIMS[i + 1]
        w = jnp.pad(weights[i], ((0, in_p - in_t), (0, out_p - out_t)))
        b = jnp.pad(biases[i], ((0, 0), (0, out_p - out_t)))
        pw.append(w.astype(jnp.bfloat16))
        pb.append(b.astype(jnp.float32))
    return pw, pb


def ae_forward(x, weights, biases, *, tile_b=None):
    B = x.shape[0]
    if tile_b is None:
        tile_b = _choose_tile_b(B)
    grid_b = pl.cdiv(B, tile_b)
    b_pad = grid_b * tile_b
    # Batch-pad only when B is ragged w.r.t. tile_b (the adaptive tile divides
    # typical batches, so this path is normally skipped -> no extra HBM copy).
    if b_pad != B:
        x = jnp.pad(x, ((0, b_pad - B), (0, 0)))
    x = x.astype(jnp.bfloat16)  # halves input HBM traffic; MXU is bf16-native

    pw, pb = _pad_params(weights, biases)

    in_specs = [pl.BlockSpec((tile_b, LAYER_DIMS[0]), lambda i: (i, 0))]
    # Weights: full-array blocks, constant index_map -> resident in VMEM.
    for li in range(N_LAYERS):
        in_specs.append(
            pl.BlockSpec((PAD_DIMS[li], PAD_DIMS[li + 1]), lambda i: (0, 0)))
    # Biases: (1, out_pad) rows, constant index_map.
    for li in range(N_LAYERS):
        in_specs.append(
            pl.BlockSpec((1, PAD_DIMS[li + 1]), lambda i: (0, 0)))

    out_spec = pl.BlockSpec((tile_b, PAD_DIMS[-1]), lambda i: (i, 0))

    out = pl.pallas_call(
        ae_kernel,
        out_shape=jax.ShapeDtypeStruct((b_pad, PAD_DIMS[-1]), jnp.float32),
        grid_spec=pltpu.PrefetchScalarGridSpec(
            num_scalar_prefetch=0,
            grid=(grid_b,),
            in_specs=in_specs,
            out_specs=out_spec,
        ),
        compiler_params=pltpu.CompilerParams(
            dimension_semantics=("parallel",),
            vmem_limit_bytes=32 * 1024 * 1024,
        ),
    )(x, *pw, *pb)

    if b_pad != B:
        out = out[:B]
    return out


def init_params(key):
    """Deterministic init mimicking nn.Linear's U(-1/sqrt(fan_in), +1/sqrt(fan_in))."""
    weights, biases = [], []
    for i in range(N_LAYERS):
        fan_in, fan_out = LAYER_DIMS[i], LAYER_DIMS[i + 1]
        key, kw, kb = jax.random.split(key, 3)
        bound = 1.0 / float(fan_in) ** 0.5
        w = jax.random.uniform(kw, (fan_in, fan_out), jnp.float32, -bound, bound)
        b = jax.random.uniform(kb, (1, fan_out), jnp.float32, -bound, bound)
        weights.append(w)
        biases.append(b)
    return weights, biases


def ae_reference(x, weights, biases):
    """Pure f32 JAX reference (unquantized)."""
    h = x
    for i in range(N_LAYERS):
        h = h @ weights[i] + biases[i]
        if RELU_FLAGS[i]:
            h = jnp.maximum(h, 0.0)
    return 1.0 / (1.0 + jnp.exp(-h))


if __name__ == "__main__":
    key = jax.random.PRNGKey(0)
    key, kx, kp = jax.random.split(key, 3)

    B = 512  # -> tile_b=128, grid=4 (>=2 steps per TC on v7x)
    x = jax.random.uniform(kx, (B, 28 * 28), jnp.float32)  # flattened images
    weights, biases = init_params(kp)

    out = ae_forward(x, weights, biases)
    out = jax.block_until_ready(out)

    ref = ae_reference(x, weights, biases)
    assert out.shape == (B, 28 * 28)
    # bf16 matmul operands (f32 accumulate) vs pure-f32 reference: sigmoid
    # outputs agree to well under 1e-2 absolute; tolerance relaxed accordingly.
    assert jnp.allclose(out, ref, rtol=0.0, atol=2e-2), "mismatch vs JAX reference"

    print("KERNEL_OK")
</pallas_src>

<mosaic_0001>
module attributes {stable_mosaic.version = 11 : i64} {
  func.func @ae_kernel(%arg0: i32, %arg1: memref<128x784xbf16, #tpu.memory_space<vmem>>, %arg2: memref<784x128xbf16, #tpu.memory_space<vmem>>, %arg3: memref<128x128xbf16, #tpu.memory_space<vmem>>, %arg4: memref<128x128xbf16, #tpu.memory_space<vmem>>, %arg5: memref<128x128xbf16, #tpu.memory_space<vmem>>, %arg6: memref<128x128xbf16, #tpu.memory_space<vmem>>, %arg7: memref<128x128xbf16, #tpu.memory_space<vmem>>, %arg8: memref<128x128xbf16, #tpu.memory_space<vmem>>, %arg9: memref<128x128xbf16, #tpu.memory_space<vmem>>, %arg10: memref<128x128xbf16, #tpu.memory_space<vmem>>, %arg11: memref<128x784xbf16, #tpu.memory_space<vmem>>, %arg12: memref<1x128xf32, #tpu.memory_space<vmem>>, %arg13: memref<1x128xf32, #tpu.memory_space<vmem>>, %arg14: memref<1x128xf32, #tpu.memory_space<vmem>>, %arg15: memref<1x128xf32, #tpu.memory_space<vmem>>, %arg16: memref<1x128xf32, #tpu.memory_space<vmem>>, %arg17: memref<1x128xf32, #tpu.memory_space<vmem>>, %arg18: memref<1x128xf32, #tpu.memory_space<vmem>>, %arg19: memref<1x128xf32, #tpu.memory_space<vmem>>, %arg20: memref<1x128xf32, #tpu.memory_space<vmem>>, %arg21: memref<1x784xf32, #tpu.memory_space<vmem>>, %arg22: memref<128x784xf32, #tpu.memory_space<vmem>>) attributes {dimension_semantics = [#tpu.dimension_semantics<parallel>], iteration_bounds = array<i64: 4>, scalar_prefetch = 0 : i64, scratch_operands = 0 : i64, tpu.core_type = #tpu.core_type<tc>, window_params = [{transform_indices = @transform_0, window_bounds = array<i64: 128, 784>}, {pipeline_mode = #tpu.pipeline_mode<synchronous>, transform_indices = @transform_1, window_bounds = array<i64: 784, 128>}, {pipeline_mode = #tpu.pipeline_mode<synchronous>, transform_indices = @transform_2, window_bounds = array<i64: 128, 128>}, {pipeline_mode = #tpu.pipeline_mode<synchronous>, transform_indices = @transform_3, window_bounds = array<i64: 128, 128>}, {pipeline_mode = #tpu.pipeline_mode<synchronous>, transform_indices = @transform_4, window_bounds = array<i64: 128, 128>}, {pipeline_mode = #tpu.pipeline_mode<synchronous>, transform_indices = @transform_5, window_bounds = array<i64: 128, 128>}, {pipeline_mode = #tpu.pipeline_mode<synchronous>, transform_indices = @transform_6, window_bounds = array<i64: 128, 128>}, {pipeline_mode = #tpu.pipeline_mode<synchronous>, transform_indices = @transform_7, window_bounds = array<i64: 128, 128>}, {pipeline_mode = #tpu.pipeline_mode<synchronous>, transform_indices = @transform_8, window_bounds = array<i64: 128, 128>}, {pipeline_mode = #tpu.pipeline_mode<synchronous>, transform_indices = @transform_9, window_bounds = array<i64: 128, 128>}, {pipeline_mode = #tpu.pipeline_mode<synchronous>, transform_indices = @transform_10, window_bounds = array<i64: 128, 784>}, {pipeline_mode = #tpu.pipeline_mode<synchronous>, transform_indices = @transform_11, window_bounds = array<i64: 1, 128>}, {pipeline_mode = #tpu.pipeline_mode<synchronous>, transform_indices = @transform_12, window_bounds = array<i64: 1, 128>}, {pipeline_mode = #tpu.pipeline_mode<synchronous>, transform_indices = @transform_13, window_bounds = array<i64: 1, 128>}, {pipeline_mode = #tpu.pipeline_mode<synchronous>, transform_indices = @transform_14, window_bounds = array<i64: 1, 128>}, {pipeline_mode = #tpu.pipeline_mode<synchronous>, transform_indices = @transform_15, window_bounds = array<i64: 1, 128>}, {pipeline_mode = #tpu.pipeline_mode<synchronous>, transform_indices = @transform_16, window_bounds = array<i64: 1, 128>}, {pipeline_mode = #tpu.pipeline_mode<synchronous>, transform_indices = @transform_17, window_bounds = array<i64: 1, 128>}, {pipeline_mode = #tpu.pipeline_mode<synchronous>, transform_indices = @transform_18, window_bounds = array<i64: 1, 128>}, {pipeline_mode = #tpu.pipeline_mode<synchronous>, transform_indices = @transform_19, window_bounds = array<i64: 1, 128>}, {pipeline_mode = #tpu.pipeline_mode<synchronous>, transform_indices = @transform_20, window_bounds = array<i64: 1, 784>}, {transform_indices = @transform_21, window_bounds = array<i64: 128, 784>}]} {
    %c0 = arith.constant 0 : index
    %c0_0 = arith.constant 0 : index
    %0 = vector.load %arg1[%c0, %c0_0] : memref<128x784xbf16, #tpu.memory_space<vmem>>, vector<64x784xbf16>
    %c64 = arith.constant 64 : index
    %c0_1 = arith.constant 0 : index
    %1 = vector.load %arg1[%c64, %c0_1] : memref<128x784xbf16, #tpu.memory_space<vmem>>, vector<64x784xbf16>
    %c0_2 = arith.constant 0 : index
    %c0_3 = arith.constant 0 : index
    %2 = vector.load %arg2[%c0_2, %c0_3] : memref<784x128xbf16, #tpu.memory_space<vmem>>, vector<784x128xbf16>
    %c0_4 = arith.constant 0 : index
    %c0_5 = arith.constant 0 : index
    %3 = vector.load %arg12[%c0_4, %c0_5] : memref<1x128xf32, #tpu.memory_space<vmem>>, vector<1x128xf32>
    %cst = arith.constant dense<0.000000e+00> : vector<64x128xf32>
    %4 = tpu.matmul %0, %2, %cst {dimension_numbers = #tpu.dot_dimension_numbers<[1], [0], [0], [1], [0, 0, 1, 1], [], []>} : vector<64x784xbf16>, vector<784x128xbf16>, vector<64x128xf32> -> vector<64x128xf32>
    %5 = vector.broadcast %3 : vector<1x128xf32> to vector<64x128xf32>
    %6 = arith.addf %4, %5 : vector<64x128xf32>
    %cst_6 = arith.constant dense<0.000000e+00> : vector<64x128xf32>
    %7 = tpu.matmul %1, %2, %cst_6 {dimension_numbers = #tpu.dot_dimension_numbers<[1], [0], [0], [1], [0, 0, 1, 1], [], []>} : vector<64x784xbf16>, vector<784x128xbf16>, vector<64x128xf32> -> vector<64x128xf32>
    %8 = vector.broadcast %3 : vector<1x128xf32> to vector<64x128xf32>
    %9 = arith.addf %7, %8 : vector<64x128xf32>
    %cst_7 = arith.constant 0.000000e+00 : f32
    %10 = vector.broadcast %cst_7 : f32 to vector<64x128xf32>
    %11 = arith.maximumf %6, %10 : vector<64x128xf32>
    %cst_8 = arith.constant 0.000000e+00 : f32
    %12 = vector.broadcast %cst_8 : f32 to vector<64x128xf32>
    %13 = arith.maximumf %9, %12 : vector<64x128xf32>
    %14 = arith.truncf %11 : vector<64x128xf32> to vector<64x128xbf16>
    %15 = arith.truncf %13 : vector<64x128xf32> to vector<64x128xbf16>
    %c0_9 = arith.constant 0 : index
    %c0_10 = arith.constant 0 : index
    %16 = vector.load %arg3[%c0_9, %c0_10] : memref<128x128xbf16, #tpu.memory_space<vmem>>, vector<128x128xbf16>
    %c0_11 = arith.constant 0 : index
    %c0_12 = arith.constant 0 : index
    %17 = vector.load %arg13[%c0_11, %c0_12] : memref<1x128xf32, #tpu.memory_space<vmem>>, vector<1x128xf32>
    %cst_13 = arith.constant dense<0.000000e+00> : vector<64x128xf32>
    %18 = tpu.matmul %14, %16, %cst_13 {dimension_numbers = #tpu.dot_dimension_numbers<[1], [0], [0], [1], [0, 0, 1, 1], [], []>} : vector<64x128xbf16>, vector<128x128xbf16>, vector<64x128xf32> -> vector<64x128xf32>
    %19 = vector.broadcast %17 : vector<1x128xf32> to vector<64x128xf32>
    %20 = arith.addf %18, %19 : vector<64x128xf32>
    %cst_14 = arith.constant dense<0.000000e+00> : vector<64x128xf32>
    %21 = tpu.matmul %15, %16, %cst_14 {dimension_numbers = #tpu.dot_dimension_numbers<[1], [0], [0], [1], [0, 0, 1, 1], [], []>} : vector<64x128xbf16>, vector<128x128xbf16>, vector<64x128xf32> -> vector<64x128xf32>
    %22 = vector.broadcast %17 : vector<1x128xf32> to vector<64x128xf32>
    %23 = arith.addf %21, %22 : vector<64x128xf32>
    %cst_15 = arith.constant 0.000000e+00 : f32
    %24 = vector.broadcast %cst_15 : f32 to vector<64x128xf32>
    %25 = arith.maximumf %20, %24 : vector<64x128xf32>
    %cst_16 = arith.constant 0.000000e+00 : f32
    %26 = vector.broadcast %cst_16 : f32 to vector<64x128xf32>
    %27 = arith.maximumf %23, %26 : vector<64x128xf32>
    %28 = arith.truncf %25 : vector<64x128xf32> to vector<64x128xbf16>
    %29 = arith.truncf %27 : vector<64x128xf32> to vector<64x128xbf16>
    %c0_17 = arith.constant 0 : index
    %c0_18 = arith.constant 0 : index
    %30 = vector.load %arg4[%c0_17, %c0_18] : memref<128x128xbf16, #tpu.memory_space<vmem>>, vector<128x128xbf16>
    %c0_19 = arith.constant 0 : index
    %c0_20 = arith.constant 0 : index
    %31 = vector.load %arg14[%c0_19, %c0_20] : memref<1x128xf32, #tpu.memory_space<vmem>>, vector<1x128xf32>
    %cst_21 = arith.constant dense<0.000000e+00> : vector<64x128xf32>
    %32 = tpu.matmul %28, %30, %cst_21 {dimension_numbers = #tpu.dot_dimension_numbers<[1], [0], [0], [1], [0, 0, 1, 1], [], []>} : vector<64x128xbf16>, vector<128x128xbf16>, vector<64x128xf32> -> vector<64x128xf32>
    %33 = vector.broadcast %31 : vector<1x128xf32> to vector<64x128xf32>
    %34 = arith.addf %32, %33 : vector<64x128xf32>
    %cst_22 = arith.constant dense<0.000000e+00> : vector<64x128xf32>
    %35 = tpu.matmul %29, %30, %cst_22 {dimension_numbers = #tpu.dot_dimension_numbers<[1], [0], [0], [1], [0, 0, 1, 1], [], []>} : vector<64x128xbf16>, vector<128x128xbf16>, vector<64x128xf32> -> vector<64x128xf32>
    %36 = vector.broadcast %31 : vector<1x128xf32> to vector<64x128xf32>
    %37 = arith.addf %35, %36 : vector<64x128xf32>
    %cst_23 = arith.constant 0.000000e+00 : f32
    %38 = vector.broadcast %cst_23 : f32 to vector<64x128xf32>
    %39 = arith.maximumf %34, %38 : vector<64x128xf32>
    %cst_24 = arith.constant 0.000000e+00 : f32
    %40 = vector.broadcast %cst_24 : f32 to vector<64x128xf32>
    %41 = arith.maximumf %37, %40 : vector<64x128xf32>
    %42 = arith.truncf %39 : vector<64x128xf32> to vector<64x128xbf16>
    %43 = arith.truncf %41 : vector<64x128xf32> to vector<64x128xbf16>
    %c0_25 = arith.constant 0 : index
    %c0_26 = arith.constant 0 : index
    %44 = vector.load %arg5[%c0_25, %c0_26] : memref<128x128xbf16, #tpu.memory_space<vmem>>, vector<128x128xbf16>
    %c0_27 = arith.constant 0 : index
    %c0_28 = arith.constant 0 : index
    %45 = vector.load %arg15[%c0_27, %c0_28] : memref<1x128xf32, #tpu.memory_space<vmem>>, vector<1x128xf32>
    %cst_29 = arith.constant dense<0.000000e+00> : vector<64x128xf32>
    %46 = tpu.matmul %42, %44, %cst_29 {dimension_numbers = #tpu.dot_dimension_numbers<[1], [0], [0], [1], [0, 0, 1, 1], [], []>} : vector<64x128xbf16>, vector<128x128xbf16>, vector<64x128xf32> -> vector<64x128xf32>
    %47 = vector.broadcast %45 : vector<1x128xf32> to vector<64x128xf32>
    %48 = arith.addf %46, %47 : vector<64x128xf32>
    %cst_30 = arith.constant dense<0.000000e+00> : vector<64x128xf32>
    %49 = tpu.matmul %43, %44, %cst_30 {dimension_numbers = #tpu.dot_dimension_numbers<[1], [0], [0], [1], [0, 0, 1, 1], [], []>} : vector<64x128xbf16>, vector<128x128xbf16>, vector<64x128xf32> -> vector<64x128xf32>
    %50 = vector.broadcast %45 : vector<1x128xf32> to vector<64x128xf32>
    %51 = arith.addf %49, %50 : vector<64x128xf32>
    %cst_31 = arith.constant 0.000000e+00 : f32
    %52 = vector.broadcast %cst_31 : f32 to vector<64x128xf32>
    %53 = arith.maximumf %48, %52 : vector<64x128xf32>
    %cst_32 = arith.constant 0.000000e+00 : f32
    %54 = vector.broadcast %cst_32 : f32 to vector<64x128xf32>
    %55 = arith.maximumf %51, %54 : vector<64x128xf32>
    %56 = arith.truncf %53 : vector<64x128xf32> to vector<64x128xbf16>
    %57 = arith.truncf %55 : vector<64x128xf32> to vector<64x128xbf16>
    %c0_33 = arith.constant 0 : index
    %c0_34 = arith.constant 0 : index
    %58 = vector.load %arg6[%c0_33, %c0_34] : memref<128x128xbf16, #tpu.memory_space<vmem>>, vector<128x128xbf16>
    %c0_35 = arith.constant 0 : index
    %c0_36 = arith.constant 0 : index
    %59 = vector.load %arg16[%c0_35, %c0_36] : memref<1x128xf32, #tpu.memory_space<vmem>>, vector<1x128xf32>
    %cst_37 = arith.constant dense<0.000000e+00> : vector<64x128xf32>
    %60 = tpu.matmul %56, %58, %cst_37 {dimension_numbers = #tpu.dot_dimension_numbers<[1], [0], [0], [1], [0, 0, 1, 1], [], []>} : vector<64x128xbf16>, vector<128x128xbf16>, vector<64x128xf32> -> vector<64x128xf32>
    %61 = vector.broadcast %59 : vector<1x128xf32> to vector<64x128xf32>
    %62 = arith.addf %60, %61 : vector<64x128xf32>
    %cst_38 = arith.constant dense<0.000000e+00> : vector<64x128xf32>
    %63 = tpu.matmul %57, %58, %cst_38 {dimension_numbers = #tpu.dot_dimension_numbers<[1], [0], [0], [1], [0, 0, 1, 1], [], []>} : vector<64x128xbf16>, vector<128x128xbf16>, vector<64x128xf32> -> vector<64x128xf32>
    %64 = vector.broadcast %59 : vector<1x128xf32> to vector<64x128xf32>
    %65 = arith.addf %63, %64 : vector<64x128xf32>
    %66 = arith.truncf %62 : vector<64x128xf32> to vector<64x128xbf16>
    %67 = arith.truncf %65 : vector<64x128xf32> to vector<64x128xbf16>
    %c0_39 = arith.constant 0 : index
    %c0_40 = arith.constant 0 : index
    %68 = vector.load %arg7[%c0_39, %c0_40] : memref<128x128xbf16, #tpu.memory_space<vmem>>, vector<128x128xbf16>
    %c0_41 = arith.constant 0 : index
    %c0_42 = arith.constant 0 : index
    %69 = vector.load %arg17[%c0_41, %c0_42] : memref<1x128xf32, #tpu.memory_space<vmem>>, vector<1x128xf32>
    %cst_43 = arith.constant dense<0.000000e+00> : vector<64x128xf32>
    %70 = tpu.matmul %66, %68, %cst_43 {dimension_numbers = #tpu.dot_dimension_numbers<[1], [0], [0], [1], [0, 0, 1, 1], [], []>} : vector<64x128xbf16>, vector<128x128xbf16>, vector<64x128xf32> -> vector<64x128xf32>
    %71 = vector.broadcast %69 : vector<1x128xf32> to vector<64x128xf32>
    %72 = arith.addf %70, %71 : vector<64x128xf32>
    %cst_44 = arith.constant dense<0.000000e+00> : vector<64x128xf32>
    %73 = tpu.matmul %67, %68, %cst_44 {dimension_numbers = #tpu.dot_dimension_numbers<[1], [0], [0], [1], [0, 0, 1, 1], [], []>} : vector<64x128xbf16>, vector<128x128xbf16>, vector<64x128xf32> -> vector<64x128xf32>
    %74 = vector.broadcast %69 : vector<1x128xf32> to vector<64x128xf32>
    %75 = arith.addf %73, %74 : vector<64x128xf32>
    %cst_45 = arith.constant 0.000000e+00 : f32
    %76 = vector.broadcast %cst_45 : f32 to vector<64x128xf32>
    %77 = arith.maximumf %72, %76 : vector<64x128xf32>
    %cst_46 = arith.constant 0.000000e+00 : f32
    %78 = vector.broadcast %cst_46 : f32 to vector<64x128xf32>
    %79 = arith.maximumf %75, %78 : vector<64x128xf32>
    %80 = arith.truncf %77 : vector<64x128xf32> to vector<64x128xbf16>
    %81 = arith.truncf %79 : vector<64x128xf32> to vector<64x128xbf16>
    %c0_47 = arith.constant 0 : index
    %c0_48 = arith.constant 0 : index
    %82 = vector.load %arg8[%c0_47, %c0_48] : memref<128x128xbf16, #tpu.memory_space<vmem>>, vector<128x128xbf16>
    %c0_49 = arith.constant 0 : index
    %c0_50 = arith.constant 0 : index
    %83 = vector.load %arg18[%c0_49, %c0_50] : memref<1x128xf32, #tpu.memory_space<vmem>>, vector<1x128xf32>
    %cst_51 = arith.constant dense<0.000000e+00> : vector<64x128xf32>
    %84 = tpu.matmul %80, %82, %cst_51 {dimension_numbers = #tpu.dot_dimension_numbers<[1], [0], [0], [1], [0, 0, 1, 1], [], []>} : vector<64x128xbf16>, vector<128x128xbf16>, vector<64x128xf32> -> vector<64x128xf32>
    %85 = vector.broadcast %83 : vector<1x128xf32> to vector<64x128xf32>
    %86 = arith.addf %84, %85 : vector<64x128xf32>
    %cst_52 = arith.constant dense<0.000000e+00> : vector<64x128xf32>
    %87 = tpu.matmul %81, %82, %cst_52 {dimension_numbers = #tpu.dot_dimension_numbers<[1], [0], [0], [1], [0, 0, 1, 1], [], []>} : vector<64x128xbf16>, vector<128x128xbf16>, vector<64x128xf32> -> vector<64x128xf32>
    %88 = vector.broadcast %83 : vector<1x128xf32> to vector<64x128xf32>
    %89 = arith.addf %87, %88 : vector<64x128xf32>
    %cst_53 = arith.constant 0.000000e+00 : f32
    %90 = vector.broadcast %cst_53 : f32 to vector<64x128xf32>
    %91 = arith.maximumf %86, %90 : vector<64x128xf32>
    %cst_54 = arith.constant 0.000000e+00 : f32
    %92 = vector.broadcast %cst_54 : f32 to vector<64x128xf32>
    %93 = arith.maximumf %89, %92 : vector<64x128xf32>
    %94 = arith.truncf %91 : vector<64x128xf32> to vector<64x128xbf16>
    %95 = arith.truncf %93 : vector<64x128xf32> to vector<64x128xbf16>
    %c0_55 = arith.constant 0 : index
    %c0_56 = arith.constant 0 : index
    %96 = vector.load %arg9[%c0_55, %c0_56] : memref<128x128xbf16, #tpu.memory_space<vmem>>, vector<128x128xbf16>
    %c0_57 = arith.constant 0 : index
    %c0_58 = arith.constant 0 : index
    %97 = vector.load %arg19[%c0_57, %c0_58] : memref<1x128xf32, #tpu.memory_space<vmem>>, vector<1x128xf32>
    %cst_59 = arith.constant dense<0.000000e+00> : vector<64x128xf32>
    %98 = tpu.matmul %94, %96, %cst_59 {dimension_numbers = #tpu.dot_dimension_numbers<[1], [0], [0], [1], [0, 0, 1, 1], [], []>} : vector<64x128xbf16>, vector<128x128xbf16>, vector<64x128xf32> -> vector<64x128xf32>
    %99 = vector.broadcast %97 : vector<1x128xf32> to vector<64x128xf32>
    %100 = arith.addf %98, %99 : vector<64x128xf32>
    %cst_60 = arith.constant dense<0.000000e+00> : vector<64x128xf32>
    %101 = tpu.matmul %95, %96, %cst_60 {dimension_numbers = #tpu.dot_dimension_numbers<[1], [0], [0], [1], [0, 0, 1, 1], [], []>} : vector<64x128xbf16>, vector<128x128xbf16>, vector<64x128xf32> -> vector<64x128xf32>
    %102 = vector.broadcast %97 : vector<1x128xf32> to vector<64x128xf32>
    %103 = arith.addf %101, %102 : vector<64x128xf32>
    %cst_61 = arith.constant 0.000000e+00 : f32
    %104 = vector.broadcast %cst_61 : f32 to vector<64x128xf32>
    %105 = arith.maximumf %100, %104 : vector<64x128xf32>
    %cst_62 = arith.constant 0.000000e+00 : f32
    %106 = vector.broadcast %cst_62 : f32 to vector<64x128xf32>
    %107 = arith.maximumf %103, %106 : vector<64x128xf32>
    %108 = arith.truncf %105 : vector<64x128xf32> to vector<64x128xbf16>
    %109 = arith.truncf %107 : vector<64x128xf32> to vector<64x128xbf16>
    %c0_63 = arith.constant 0 : index
    %c0_64 = arith.constant 0 : index
    %110 = vector.load %arg10[%c0_63, %c0_64] : memref<128x128xbf16, #tpu.memory_space<vmem>>, vector<128x128xbf16>
    %c0_65 = arith.constant 0 : index
    %c0_66 = arith.constant 0 : index
    %111 = vector.load %arg20[%c0_65, %c0_66] : memref<1x128xf32, #tpu.memory_space<vmem>>, vector<1x128xf32>
    %cst_67 = arith.constant dense<0.000000e+00> : vector<64x128xf32>
    %112 = tpu.matmul %108, %110, %cst_67 {dimension_numbers = #tpu.dot_dimension_numbers<[1], [0], [0], [1], [0, 0, 1, 1], [], []>} : vector<64x128xbf16>, vector<128x128xbf16>, vector<64x128xf32> -> vector<64x128xf32>
    %113 = vector.broadcast %111 : vector<1x128xf32> to vector<64x128xf32>
    %114 = arith.addf %112, %113 : vector<64x128xf32>
    %cst_68 = arith.constant dense<0.000000e+00> : vector<64x128xf32>
    %115 = tpu.matmul %109, %110, %cst_68 {dimension_numbers = #tpu.dot_dimension_numbers<[1], [0], [0], [1], [0, 0, 1, 1], [], []>} : vector<64x128xbf16>, vector<128x128xbf16>, vector<64x128xf32> -> vector<64x128xf32>
    %116 = vector.broadcast %111 : vector<1x128xf32> to vector<64x128xf32>
    %117 = arith.addf %115, %116 : vector<64x128xf32>
    %cst_69 = arith.constant 0.000000e+00 : f32
    %118 = vector.broadcast %cst_69 : f32 to vector<64x128xf32>
    %119 = arith.maximumf %114, %118 : vector<64x128xf32>
    %cst_70 = arith.constant 0.000000e+00 : f32
    %120 = vector.broadcast %cst_70 : f32 to vector<64x128xf32>
    %121 = arith.maximumf %117, %120 : vector<64x128xf32>
    %122 = arith.truncf %119 : vector<64x128xf32> to vector<64x128xbf16>
    %123 = arith.truncf %121 : vector<64x128xf32> to vector<64x128xbf16>
    %c0_71 = arith.constant 0 : index
    %c0_72 = arith.constant 0 : index
    %124 = vector.load %arg11[%c0_71, %c0_72] : memref<128x784xbf16, #tpu.memory_space<vmem>>, vector<128x784xbf16>
    %c0_73 = arith.constant 0 : index
    %c0_74 = arith.constant 0 : index
    %125 = vector.load %arg21[%c0_73, %c0_74] : memref<1x784xf32, #tpu.memory_space<vmem>>, vector<1x784xf32>
    %cst_75 = arith.constant dense<0.000000e+00> : vector<64x784xf32>
    %126 = tpu.matmul %122, %124, %cst_75 {dimension_numbers = #tpu.dot_dimension_numbers<[1], [0], [0], [1], [0, 0, 1, 1], [], []>} : vector<64x128xbf16>, vector<128x784xbf16>, vector<64x784xf32> -> vector<64x784xf32>
    %127 = vector.broadcast %125 : vector<1x784xf32> to vector<64x784xf32>
    %128 = arith.addf %126, %127 : vector<64x784xf32>
    %cst_76 = arith.constant dense<0.000000e+00> : vector<64x784xf32>
    %129 = tpu.matmul %123, %124, %cst_76 {dimension_numbers = #tpu.dot_dimension_numbers<[1], [0], [0], [1], [0, 0, 1, 1], [], []>} : vector<64x128xbf16>, vector<128x784xbf16>, vector<64x784xf32> -> vector<64x784xf32>
    %130 = vector.broadcast %125 : vector<1x784xf32> to vector<64x784xf32>
    %131 = arith.addf %129, %130 : vector<64x784xf32>
    %cst_77 = arith.constant 0.000000e+00 : f32
    %132 = vector.broadcast %cst_77 : f32 to vector<64x784xf32>
    %133 = arith.subf %132, %128 : vector<64x784xf32>
    %134 = math.exp %133 : vector<64x784xf32>
    %cst_78 = arith.constant 1.000000e+00 : f32
    %135 = vector.broadcast %cst_78 : f32 to vector<64x784xf32>
    %136 = arith.addf %135, %134 : vector<64x784xf32>
    %137 = tpu.reciprocal %136 : vector<64x784xf32> -> vector<64x784xf32>
    %c0_79 = arith.constant 0 : index
    %c0_80 = arith.constant 0 : index
    %138 = vector.load %arg22[%c0_79, %c0_80] : memref<128x784xf32, #tpu.memory_space<vmem>>, vector<64x784xf32>
    tpu.vector_store %arg22[%c0_79, %c0_80], %137 {strides = array<i32>} : memref<128x784xf32, #tpu.memory_space<vmem>>, vector<64x784xf32>,
    %cst_81 = arith.constant 0.000000e+00 : f32
    %139 = vector.broadcast %cst_81 : f32 to vector<64x784xf32>
    %140 = arith.subf %139, %131 : vector<64x784xf32>
    %141 = math.exp %140 : vector<64x784xf32>
    %cst_82 = arith.constant 1.000000e+00 : f32
    %142 = vector.broadcast %cst_82 : f32 to vector<64x784xf32>
    %143 = arith.addf %142, %141 : vector<64x784xf32>
    %144 = tpu.reciprocal %143 : vector<64x784xf32> -> vector<64x784xf32>
    %c64_83 = arith.constant 64 : index
    %c0_84 = arith.constant 0 : index
    %145 = vector.load %arg22[%c64_83, %c0_84] : memref<128x784xf32, #tpu.memory_space<vmem>>, vector<64x784xf32>
    tpu.vector_store %arg22[%c64_83, %c0_84], %144 {strides = array<i32>} : memref<128x784xf32, #tpu.memory_space<vmem>>, vector<64x784xf32>,
    return
  }
  func.func @transform_0(%arg0: i32) -> (i32, i32) {
    %c0_i32 = arith.constant 0 : i32
    %c0_i32_0 = arith.constant 0 : i32
    return %arg0, %c0_i32 : i32, i32
  }
  func.func @transform_1(%arg0: i32) -> (i32, i32) {
    %c0_i32 = arith.constant 0 : i32
    %c0_i32_0 = arith.constant 0 : i32
    %c0_i32_1 = arith.constant 0 : i32
    return %c0_i32, %c0_i32_0 : i32, i32
  }
  func.func @transform_2(%arg0: i32) -> (i32, i32) {
    %c0_i32 = arith.constant 0 : i32
    %c0_i32_0 = arith.constant 0 : i32
    %c0_i32_1 = arith.constant 0 : i32
    return %c0_i32, %c0_i32_0 : i32, i32
  }
  func.func @transform_3(%arg0: i32) -> (i32, i32) {
    %c0_i32 = arith.constant 0 : i32
    %c0_i32_0 = arith.constant 0 : i32
    %c0_i32_1 = arith.constant 0 : i32
    return %c0_i32, %c0_i32_0 : i32, i32
  }
  func.func @transform_4(%arg0: i32) -> (i32, i32) {
    %c0_i32 = arith.constant 0 : i32
    %c0_i32_0 = arith.constant 0 : i32
    %c0_i32_1 = arith.constant 0 : i32
    return %c0_i32, %c0_i32_0 : i32, i32
  }
  func.func @transform_5(%arg0: i32) -> (i32, i32) {
    %c0_i32 = arith.constant 0 : i32
    %c0_i32_0 = arith.constant 0 : i32
    %c0_i32_1 = arith.constant 0 : i32
    return %c0_i32, %c0_i32_0 : i32, i32
  }
  func.func @transform_6(%arg0: i32) -> (i32, i32) {
    %c0_i32 = arith.constant 0 : i32
    %c0_i32_0 = arith.constant 0 : i32
    %c0_i32_1 = arith.constant 0 : i32
    return %c0_i32, %c0_i32_0 : i32, i32
  }
  func.func @transform_7(%arg0: i32) -> (i32, i32) {
    %c0_i32 = arith.constant 0 : i32
    %c0_i32_0 = arith.constant 0 : i32
    %c0_i32_1 = arith.constant 0 : i32
    return %c0_i32, %c0_i32_0 : i32, i32
  }
  func.func @transform_8(%arg0: i32) -> (i32, i32) {
    %c0_i32 = arith.constant 0 : i32
    %c0_i32_0 = arith.constant 0 : i32
    %c0_i32_1 = arith.constant 0 : i32
    return %c0_i32, %c0_i32_0 : i32, i32
  }
  func.func @transform_9(%arg0: i32) -> (i32, i32) {
    %c0_i32 = arith.constant 0 : i32
    %c0_i32_0 = arith.constant 0 : i32
    %c0_i32_1 = arith.constant 0 : i32
    return %c0_i32, %c0_i32_0 : i32, i32
  }
  func.func @transform_10(%arg0: i32) -> (i32, i32) {
    %c0_i32 = arith.constant 0 : i32
    %c0_i32_0 = arith.constant 0 : i32
    %c0_i32_1 = arith.constant 0 : i32
    return %c0_i32, %c0_i32_0 : i32, i32
  }
  func.func @transform_11(%arg0: i32) -> (i32, i32) {
    %c0_i32 = arith.constant 0 : i32
    %c0_i32_0 = arith.constant 0 : i32
    %c0_i32_1 = arith.constant 0 : i32
    return %c0_i32, %c0_i32_0 : i32, i32
  }
  func.func @transform_12(%arg0: i32) -> (i32, i32) {
    %c0_i32 = arith.constant 0 : i32
    %c0_i32_0 = arith.constant 0 : i32
    %c0_i32_1 = arith.constant 0 : i32
    return %c0_i32, %c0_i32_0 : i32, i32
  }
  func.func @transform_13(%arg0: i32) -> (i32, i32) {
    %c0_i32 = arith.constant 0 : i32
    %c0_i32_0 = arith.constant 0 : i32
    %c0_i32_1 = arith.constant 0 : i32
    return %c0_i32, %c0_i32_0 : i32, i32
  }
  func.func @transform_14(%arg0: i32) -> (i32, i32) {
    %c0_i32 = arith.constant 0 : i32
    %c0_i32_0 = arith.constant 0 : i32
    %c0_i32_1 = arith.constant 0 : i32
    return %c0_i32, %c0_i32_0 : i32, i32
  }
  func.func @transform_15(%arg0: i32) -> (i32, i32) {
    %c0_i32 = arith.constant 0 : i32
    %c0_i32_0 = arith.constant 0 : i32
    %c0_i32_1 = arith.constant 0 : i32
    return %c0_i32, %c0_i32_0 : i32, i32
  }
  func.func @transform_16(%arg0: i32) -> (i32, i32) {
    %c0_i32 = arith.constant 0 : i32
    %c0_i32_0 = arith.constant 0 : i32
    %c0_i32_1 = arith.constant 0 : i32
    return %c0_i32, %c0_i32_0 : i32, i32
  }
  func.func @transform_17(%arg0: i32) -> (i32, i32) {
    %c0_i32 = arith.constant 0 : i32
    %c0_i32_0 = arith.constant 0 : i32
    %c0_i32_1 = arith.constant 0 : i32
    return %c0_i32, %c0_i32_0 : i32, i32
  }
  func.func @transform_18(%arg0: i32) -> (i32, i32) {
    %c0_i32 = arith.constant 0 : i32
    %c0_i32_0 = arith.constant 0 : i32
    %c0_i32_1 = arith.constant 0 : i32
    return %c0_i32, %c0_i32_0 : i32, i32
  }
  func.func @transform_19(%arg0: i32) -> (i32, i32) {
    %c0_i32 = arith.constant 0 : i32
    %c0_i32_0 = arith.constant 0 : i32
    %c0_i32_1 = arith.constant 0 : i32
    return %c0_i32, %c0_i32_0 : i32, i32
  }
  func.func @transform_20(%arg0: i32) -> (i32, i32) {
    %c0_i32 = arith.constant 0 : i32
    %c0_i32_0 = arith.constant 0 : i32
    %c0_i32_1 = arith.constant 0 : i32
    return %c0_i32, %c0_i32_0 : i32, i32
  }
  func.func @transform_21(%arg0: i32) -> (i32, i32) {
    %c0_i32 = arith.constant 0 : i32
    %c0_i32_0 = arith.constant 0 : i32
    return %arg0, %c0_i32 : i32, i32
  }
}

</mosaic_0001>

<bundles_post_ra>
// kernel: tpu_custom_call.1
= control target key start
LH: loop header
LB: loop body
LE: loop exit
PB: predicated region body
PF: predicated region fallthrough
CT: control target
= control target key end

     0   :  { %s11246_s0 = inlined_call_operand.vmem [shape: bf16[512,784], index: 0, kind: input, shape index: {}]   ;;  %s11247_s1 = inlined_call_operand.vmem [shape: bf16[784,128], index: 1, kind: input, shape index: {}]   ;;  %s11248_s2 = inlined_call_operand.vmem [shape: bf16[128,128], index: 2, kind: input, shape index: {}]   ;;  %s11249_s3 = inlined_call_operand.vmem [shape: bf16[128,128], index: 3, kind: input, shape index: {}]   ;;  %s11250_s4 = inlined_call_operand.vmem [shape: bf16[128,128], index: 4, kind: input, shape index: {}]   ;;  %s11251_s5 = inlined_call_operand.vmem [shape: bf16[128,128], index: 5, kind: input, shape index: {}]   ;;  %s11252_s6 = inlined_call_operand.vmem [shape: bf16[128,128], index: 6, kind: input, shape index: {}]   ;;  %s11253_s7 = inlined_call_operand.vmem [shape: bf16[128,128], index: 7, kind: input, shape index: {}]   ;;  %s11254_s8 = inlined_call_operand.vmem [shape: bf16[128,128], index: 8, kind: input, shape index: {}]   ;;  %s11255_s9 = inlined_call_operand.vmem [shape: bf16[128,128], index: 9, kind: input, shape index: {}]   ;;  %s11256_s10 = inlined_call_operand.vmem [shape: bf16[128,784], index: 10, kind: input, shape index: {}]   ;;  %s11257_s11 = inlined_call_operand.vmem [shape: f32[1,128], index: 11, kind: input, shape index: {}]   ;;  %s11258_s12 = inlined_call_operand.vmem [shape: f32[1,128], index: 12, kind: input, shape index: {}]   ;;  %s11259_s13 = inlined_call_operand.vmem [shape: f32[1,128], index: 13, kind: input, shape index: {}]   ;;  %s11260_s14 = inlined_call_operand.vmem [shape: f32[1,128], index: 14, kind: input, shape index: {}]   ;;  %s11261_s15 = inlined_call_operand.vmem [shape: f32[1,128], index: 15, kind: input, shape index: {}]   ;;  %s11262_s16 = inlined_call_operand.vmem [shape: f32[1,128], index: 16, kind: input, shape index: {}]   ;;  %s11263_s17 = inlined_call_operand.vmem [shape: f32[1,128], index: 17, kind: input, shape index: {}]   ;;  %s11264_s18 = inlined_call_operand.vmem [shape: f32[1,128], index: 18, kind: input, shape index: {}]   ;;  %s11265_s19 = inlined_call_operand.vmem [shape: f32[1,128], index: 19, kind: input, shape index: {}]   ;;  %s11266_s20 = inlined_call_operand.vmem [shape: f32[1,784], index: 20, kind: input, shape index: {}]   ;;  %s11267_s21 = inlined_call_operand.vmem [shape: f32[512,784], index: 21, kind: output, shape index: {}]  }
   0x1   :  { %11281 = sst [smem:[#allocation8_spill]] %s11246_s0 }
   0x2   :  { %11282 = sst [smem:[#allocation9_spill]] %s11247_s1 }
   0x3   :  { %11283 = sst [smem:[#allocation10_spill]] %s11248_s2  ;;  %s7735_s2 = smov 0  }
   0x4   :  { %11284 = sst [smem:[#allocation11_spill]] %s11249_s3 }
   0x5   :  { %11285 = sst [smem:[#allocation12_spill]] %s11250_s4 }
   0x6   :  { %11286 = sst [smem:[#allocation13_spill]] %s11251_s5 }
   0x7 LB: > { %s6005_s25 = sadd.s32 4294967295, %s7623_s2   ;;  %p6009_p0 = scmp.ge.s32.totalorder %s7623_s2, 1  ;;  %s7623_s2 = sphi %s7735_s2, %s31_s2  }
   0x8   : > { %p589_p1 = scmp.lt.s32.totalorder %s7623_s2, 5 }
   0xa   : > { %p590_p2 = pnand %p6009_p0, %p589_p1 }
   0xc   : > { %593 = sbr.rel (%p590_p2) target bundleno = 2065 (0x811), region = 104 }
  0x11   : > { %s11287_s3 = sld [smem:[#allocation9_spill]]  ;;  %s6010_s26 = sshll.u32 %s6005_s25, 4  ;;  %vm1266_vm0 = vcmask 130048  }
  0x12   : > { %p652_p3 = scmp.lt.s32.totalorder %s6010_s26, 63  ;;  %s11288_s5 = sld [smem:[#allocation8_spill]] }
  0x13   : > { %s11290_s24 = sld [smem:[#allocation11_spill]] }
  0x14   : > { %s11490_s26 = smov (!%p652_p3, %s6010_s26), 63  ;;  %s11292_s1 = sld [smem:[#allocation13_spill]] }
  0x15   : > { %s7149_s22 = smul.u32 28, %s11490_s26 }
  0x17   : > { %v7746_v0 = vld [vmem:[%s11287_s3 + $0x38] sm:$0xff]  ;;  %v7768_v4 = vld [vmem:[%s11287_s3 + $0x30] sm:$0xff]  ;;  %v7792_v8 = vld [vmem:[%s11287_s3 + $0x28] sm:$0xff] }
  0x18   : > { %v7751_v1 = vld [vmem:[%s11287_s3 + $0x78] sm:$0xff]  ;;  %1279 = vmatpush.bf16.msra.mxu0 %v7746_v0  ;;  %v7773_v5 = vld [vmem:[%s11287_s3 + $0x70] sm:$0xff]  ;;  %v7797_v9 = vld [vmem:[%s11287_s3 + $0x68] sm:$0xff]  ;;  %s7901_s23 = scalar_lea.vmem %s11288_s5, %s7149_s22  ;;  %s11289_s22 = sld [smem:[#allocation10_spill]] }
  0x19   : > { %v7756_v2 = vld [vmem:[%s11287_s3 + $0xb8] sm:$0xff]  ;;  %1308 = vmatpush.bf16.msra.mxu1 %v7751_v1  ;;  %v7780_v6 = vld [vmem:[%s11287_s3 + $0xb0] sm:$0xff]  ;;  %v7804_v10 = vld [vmem:[%s11287_s3 + $0xa8] sm:$0xff]  ;;  %s7150_s5 = smul.u32 56, %s11490_s26 }
  0x1a   : > { %v7761_v3 = vld [vmem:[%s11287_s3 + $0xf8] sm:$0xff]  ;;  %1337 = vmatpush.bf16.msra.mxu2 %v7756_v2  ;;  %v7785_v7 = vld [vmem:[%s11287_s3 + $0xf0] sm:$0xff]  ;;  %v7809_v11 = vld [vmem:[%s11287_s3 + $0xe8] sm:$0xff] }
  0x1b   : > { %1366 = vmatpush.bf16.msra.mxu3 %v7761_v3  ;;  %v7816_v12 = vld [vmem:[%s11287_s3 + $0x20] sm:$0xff]  ;;  %v7840_v16 = vld [vmem:[%s11287_s3 + $0x18] sm:$0xff]  ;;  %v7866_v20 = vld [vmem:[%s11287_s3 + $0x10] sm:$0xff] }
  0x1c   : > { %1280 = vmatpush.bf16.msra.mxu0 %v7768_v4  ;;  %v7821_v13 = vld [vmem:[%s11287_s3 + $0x60] sm:$0xff]  ;;  %v7845_v17 = vld [vmem:[%s11287_s3 + $0x58] sm:$0xff]  ;;  %v7871_v21 = vld [vmem:[%s11287_s3 + $0x50] sm:$0xff] }
  0x1d   : > { %1309 = vmatpush.bf16.msra.mxu1 %v7773_v5  ;;  %v7828_v14 = vld [vmem:[%s11287_s3 + $0xa0] sm:$0xff]  ;;  %v7854_v18 = vld [vmem:[%s11287_s3 + $0x98] sm:$0xff]  ;;  %v7879_v22 = vld [vmem:[%s11287_s3 + $0x90] sm:$0xff] }
  0x1e   : > { %1338 = vmatpush.bf16.msra.mxu2 %v7780_v6  ;;  %v7833_v15 = vld [vmem:[%s11287_s3 + $0xe0] sm:$0xff]  ;;  %v7859_v19 = vld [vmem:[%s11287_s3 + $0xd8] sm:$0xff]  ;;  %v7884_v23 = vld [vmem:[%s11287_s3 + $0xd0] sm:$0xff] }
  0x1f   : > { %1367 = vmatpush.bf16.msra.mxu3 %v7785_v7  ;;  %v7889_v24 = vld [vmem:[%s11287_s3 + $0x8] sm:$0xff]  ;;  %v7918_v28 = vld [vmem:[%s11287_s3] sm:$0xff]  ;;  %v6927_v33 = vld [vmem:[%s7901_s23 + $0x18] sm:$0xf0] }
  0x20   : > { %1281 = vmatpush.bf16.msra.mxu0 %v7792_v8  ;;  %v7896_v25 = vld [vmem:[%s11287_s3 + $0x48] sm:$0xff]  ;;  %v7923_v29 = vld [vmem:[%s11287_s3 + $0x40] sm:$0xff]  ;;  %v7955_v41 = vld [vmem:[%s11287_s3 + $0x138] sm:$0xff] }
  0x21   : > { %1310 = vmatpush.bf16.msra.mxu1 %v7797_v9  ;;  %v7908_v26 = vld [vmem:[%s11287_s3 + $0x88] sm:$0xff]  ;;  %v7928_v30 = vld [vmem:[%s11287_s3 + $0x80] sm:$0xff]  ;;  %v7964_v46 = vld [vmem:[%s11287_s3 + $0x178] sm:$0xff] }
  0x22   : > { %1339 = vmatpush.bf16.msra.mxu2 %v7804_v10  ;;  %v7913_v27 = vld [vmem:[%s11287_s3 + $0xc8] sm:$0xff]  ;;  %v7933_v31 = vld [vmem:[%s11287_s3 + $0xc0] sm:$0xff]  ;;  %v7971_v47 = vld [vmem:[%s11287_s3 + $0x130] sm:$0xff] }
  0x23   : > { %1368 = vmatpush.bf16.msra.mxu3 %v7809_v11  ;;  %v6016_v32 = vld [vmem:[%s7901_s23] sm:$0xf]  ;;  %v6924_v34 = vld [vmem:[%s7901_s23 + $0x4] sm:$0xf]  ;;  %v6024_v36 = vld [vmem:[%s7901_s23 + $0x8] sm:$0xf] }
  0x24   : > { %1282 = vmatpush.bf16.msra.mxu0 %v7816_v12  ;;  %v6018_v35 = vld [vmem:[%s7901_s23 + $0x1c] sm:$0xf0]  ;;  %v6928_v37 = vld [vmem:[%s7901_s23 + $0x20] sm:$0xf0]  ;;  %v6925_v38 = vld [vmem:[%s7901_s23 + $0xc] sm:$0xf]  ;;  %v6017_v42 = vor.u32 %v6927_v33, %v6016_v32 }
  0x25   : > { %1311 = vmatpush.bf16.msra.mxu1 %v7821_v13  ;;  %v6026_v39 = vld [vmem:[%s7901_s23 + $0x24] sm:$0xf0]  ;;  %v7950_v40 = vld [vmem:[%s11287_s3 + $0x180] sm:$0xff]  ;;  %v6021_v43 = vor.u32 %v6924_v34, %v6018_v35  ;;  %v6025_v44 = vor.u32 %v6928_v37, %v6024_v36  ;;  %v7977_v48 = vld [vmem:[%s11287_s3 + $0x170] sm:$0xff] }
  0x26   : > { %1340 = vmatpush.bf16.msra.mxu2 %v7828_v14  ;;  %v6029_v45 = vor.u32 %v6925_v38, %v6026_v39  ;;  %v7984_v49 = vld [vmem:[%s11287_s3 + $0x128] sm:$0xff]  ;;  %v7998_v51 = vld [vmem:[%s11287_s3 + $0x120] sm:$0xff]  ;;  %v6044_v52 = vld [vmem:[%s7901_s23 + $0x38] sm:$0xf] }
  0x27   : > { %1369 = vmatpush.bf16.msra.mxu3 %v7833_v15  ;;  %v7991_v50 = vld [vmem:[%s11287_s3 + $0x168] sm:$0xff]  ;;  %v6934_v53 = vld [vmem:[%s7901_s23 + $0x50] sm:$0xf0]  ;;  %v6931_v54 = vld [vmem:[%s7901_s23 + $0x3c] sm:$0xf] }
  0x28   : > { %1283 = vmatpush.bf16.msra.mxu0 %v7840_v16  ;;  %v6046_v55 = vld [vmem:[%s7901_s23 + $0x54] sm:$0xf0]  ;;  %v6052_v56 = vld [vmem:[%s7901_s23 + $0x40] sm:$0xf]  ;;  %v6935_v57 = vld [vmem:[%s7901_s23 + $0x58] sm:$0xf0]  ;;  %v6045_v62 = vor.u32 %v6934_v53, %v6044_v52 }
  0x29   : > { %1312 = vmatpush.bf16.msra.mxu1 %v7845_v17  ;;  %v6932_v58 = vld [vmem:[%s7901_s23 + $0x44] sm:$0xf]  ;;  %v6054_v59 = vld [vmem:[%s7901_s23 + $0x5c] sm:$0xf0]  ;;  %v8020_v61 = vld [vmem:[%s11287_s3 + $0x118] sm:$0xff]  ;;  %v6049_v63 = vor.u32 %v6931_v54, %v6046_v55 }
  0x2a   : > { %1341 = vmatpush.bf16.msra.mxu2 %v7854_v18  ;;  %v8013_v60 = vld [vmem:[%s11287_s3 + $0x160] sm:$0xff]  ;;  %v6938_v32 = vld [vmem:[%s7901_s23 + $0x74] sm:$0xf]  ;;  %v6074_v33 = vld [vmem:[%s7901_s23 + $0x8c] sm:$0xf0] }
  0x2b   : > { %1370 = vmatpush.bf16.msra.mxu3 %v7859_v19  ;;  %v6080_v34 = vld [vmem:[%s7901_s23 + $0x78] sm:$0xf]  ;;  %v6942_v35 = vld [vmem:[%s7901_s23 + $0x90] sm:$0xf0]  ;;  %v6939_v36 = vld [vmem:[%s7901_s23 + $0x7c] sm:$0xf]  ;;  %v6077_v38 = vor.u32 %v6938_v32, %v6074_v33 }
  0x2c   : > { %1284 = vmatpush.bf16.msra.mxu0 %v7866_v20  ;;  %v6082_v37 = vld [vmem:[%s7901_s23 + $0x94] sm:$0xf0]  ;;  %v6081_v39 = vor.u32 %v6942_v35, %v6080_v34  ;;  %v6062_v52 = vld [vmem:[%s7901_s23 + $0x64] sm:$0xf0]  ;;  %v6068_v53 = vld [vmem:[%s7901_s23 + $0x50] sm:$0xf] }
  0x2d   : > { %1313 = vmatpush.bf16.msra.mxu1 %v7871_v21  ;;  %v6937_v54 = vld [vmem:[%s7901_s23 + $0x68] sm:$0xf0]  ;;  %v6356_v55 = vld [vmem:[%s7901_s23 + $0x118] sm:$0xf]  ;;  %v6124_v32 = vld [vmem:[%s7901_s23 + $0xc0] sm:$0xf] }
  0x2e   : > { %1342 = vmatpush.bf16.msra.mxu2 %v7879_v22  ;;  %v6412_v33 = vld [vmem:[%s7901_s23 + $0x188] sm:$0xf]  ;;  %v6976_v34 = vld [vmem:[%s7901_s23 + $0x1a0] sm:$0xf0] }
  0x2f   : > { %1371 = vmatpush.bf16.msra.mxu3 %v7884_v23 }
  0x30   : > { %1285 = vmatpush.bf16.msra.mxu0 %v7889_v24 }
  0x31   : > { %1314 = vmatpush.bf16.msra.mxu1 %v7896_v25 }
  0x32   : > { %1343 = vmatpush.bf16.msra.mxu2 %v7908_v26 }
  0x33   : > { %1372 = vmatpush.bf16.msra.mxu3 %v7913_v27 }
  0x34   : > { %1286 = vmatpush.bf16.msra.mxu0 %v7918_v28 }
  0x35   : > { %1315 = vmatpush.bf16.msra.mxu1 %v7923_v29 }
  0x36   : > { %1344 = vmatpush.bf16.msra.mxu2 %v7928_v30 }
  0x37   : > { %1373 = vmatpush.bf16.msra.mxu3 %v7933_v31  ;;  %1287 = vmatmul.bf16.vlgmr.msra.gmra.mxu0 %v6017_v42  ;;  %v6085_v42 = vor.u32 %v6939_v36, %v6082_v37 }
  0x38   : > { %1395 = vmatpush.bf16.msrb.mxu0 %v7955_v41  ;;  %1316 = vmatmul.bf16.vlgmr.msra.gmra.mxu1 %v6021_v43  ;;  %v6946_v43 = vld [vmem:[%s7901_s23 + $0xb4] sm:$0xf] }
  0x39   : > { %1345 = vmatmul.bf16.vlgmr.msra.gmra.mxu2 %v6025_v44  ;;  %1424 = vmatpush.bf16.msrb.mxu1 %v7964_v46  ;;  %v6040_v44 = vld [vmem:[%s7901_s23 + $0x18] sm:$0xf] }
  0x3a   : > { %1460 = vmatpush.bf16.msrb.mxu2 %v7950_v40  ;;  %1374 = vmatmul.bf16.vlgmr.msra.gmra.mxu3 %v6029_v45  ;;  %v6930_v45 = vld [vmem:[%s7901_s23 + $0x30] sm:$0xf0] }
  0x3b   : > { %1634 = vmatpush.bf16.msrb.mxu3 %v7746_v0  ;;  %v6053_v0 = vor.u32 %v6935_v57, %v6052_v56  ;;  %v6962_v56 = vld [vmem:[%s7901_s23 + $0x130] sm:$0xf0] }
  0x3c   : > { %1396 = vmatpush.bf16.msrb.mxu0 %v7971_v47  ;;  %v6357_v57 = vor.u32 %v6962_v56, %v6356_v55 }
  0x3d   : > { %1425 = vmatpush.bf16.msrb.mxu1 %v7977_v48 }
  0x3e   : > { %1721 = vmatpush.bf16.msra.mxu2 %v7761_v3  ;;  %v6057_v3 = vor.u32 %v6932_v58, %v6054_v59  ;;  %v6943_v58 = vld [vmem:[%s7901_s23 + $0x98] sm:$0xf0]  ;;  %v6940_v59 = vld [vmem:[%s7901_s23 + $0x84] sm:$0xf] }
  0x3f   : > { %1635 = vmatpush.bf16.msrb.mxu3 %v7768_v4  ;;  %v8027_v4 = vld [vmem:[%s11287_s3 + $0x158] sm:$0xff] }
  0x40   : > { %1397 = vmatpush.bf16.msrb.mxu0 %v7984_v49 }
  0x41   : > { %1426 = vmatpush.bf16.msrb.mxu1 %v7991_v50 }
  0x42   : > { %1722 = vmatpush.bf16.msra.mxu2 %v7785_v7  ;;  %v8034_v7 = vld [vmem:[%s11287_s3 + $0x110] sm:$0xff] }
  0x43   : > { %1636 = vmatpush.bf16.msrb.mxu3 %v7792_v8  ;;  %v8041_v8 = vld [vmem:[%s11287_s3 + $0x150] sm:$0xff] }
  0x44   : > { %1398 = vmatpush.bf16.msrb.mxu0 %v7998_v51 }
  0x45   : > { %1427 = vmatpush.bf16.msrb.mxu1 %v8013_v60 }
  0x46   : > { %1723 = vmatpush.bf16.msra.mxu2 %v7809_v11  ;;  %v8048_v11 = vld [vmem:[%s11287_s3 + $0x108] sm:$0xff] }
  0x47   : > { %1637 = vmatpush.bf16.msrb.mxu3 %v7816_v12  ;;  %1292 = vmatmul.bf16.gmra.mxu0 %v6045_v62  ;;  %v8055_v12 = vld [vmem:[%s11287_s3 + $0x148] sm:$0xff] }
  0x48   : > { %1399 = vmatpush.bf16.msrb.mxu0 %v8020_v61  ;;  %1321 = vmatmul.bf16.gmra.mxu1 %v6049_v63  ;;  %v6096_v62 = vld [vmem:[%s7901_s23 + $0x88] sm:$0xf]  ;;  %v6944_v63 = vld [vmem:[%s7901_s23 + $0xa0] sm:$0xf0] }
  0x49   : > { %1350 = vmatmul.bf16.gmra.mxu2 %v6053_v0  ;;  %1428 = vmatpush.bf16.msrb.mxu1 %v8027_v4  ;;  %v6969_v0 = vld [vmem:[%s7901_s23 + $0x168] sm:$0xf0] }
  0x4a   : > { %1724 = vmatpush.bf16.msra.mxu2 %v7833_v15  ;;  %1379 = vmatmul.bf16.gmra.mxu3 %v6057_v3  ;;  %v8062_v15 = vld [vmem:[%s11287_s3 + $0x100] sm:$0xff] }
  0x4b   : > { %1638 = vmatpush.bf16.msrb.mxu3 %v7840_v16  ;;  %v6072_v16 = vld [vmem:[%s7901_s23 + $0x70] sm:$0xf] }
  0x4c   : > { %1400 = vmatpush.bf16.msrb.mxu0 %v8034_v7 }
  0x4d   : > { %1429 = vmatpush.bf16.msrb.mxu1 %v8041_v8 }
  0x4e   : > { %1725 = vmatpush.bf16.msra.mxu2 %v7859_v19  ;;  %v6941_v19 = vld [vmem:[%s7901_s23 + $0x88] sm:$0xf0] }
  0x4f   : > { %1639 = vmatpush.bf16.msrb.mxu3 %v7866_v20  ;;  %v8078_v20 = vld [vmem:[%s11287_s3 + $0x140] sm:$0xff]  ;;  %s9368_s3 = scalar_lea.vmem %s11267_s21, %s7150_s5 }
  0x50   : > { %1401 = vmatpush.bf16.msrb.mxu0 %v8048_v11 }
  0x51   : > { %1430 = vmatpush.bf16.msrb.mxu1 %v8055_v12 }
  0x52   : > { %1726 = vmatpush.bf16.msra.mxu2 %v7884_v23  ;;  %v6073_v23 = vor.u32 %v6941_v19, %v6072_v16  ;;  %v6947_v16 = vld [vmem:[%s7901_s23 + $0xbc] sm:$0xf]  ;;  %v6118_v19 = vld [vmem:[%s7901_s23 + $0xd4] sm:$0xf0] }
  0x53   : > { %1640 = vmatpush.bf16.msrb.mxu3 %v7889_v24  ;;  %v6945_v24 = vld [vmem:[%s7901_s23 + $0xac] sm:$0xf]  ;;  %v6121_v36 = vor.u32 %v6947_v16, %v6118_v19  ;;  %v6967_v16 = vld [vmem:[%s7901_s23 + $0x15c] sm:$0xf]  ;;  %v6394_v19 = vld [vmem:[%s7901_s23 + $0x174] sm:$0xf0] }
  0x54   : > { %1402 = vmatpush.bf16.msrb.mxu0 %v8062_v15 }
  0x55   : > { %1431 = vmatpush.bf16.msrb.mxu1 %v8078_v20 }
  0x56   : > { %1727 = vmatpush.bf16.msra.mxu2 %v7913_v27  ;;  %v6102_v27 = vld [vmem:[%s7901_s23 + $0xc4] sm:$0xf0] }
  0x57   : > { %1641 = vmatpush.bf16.msrb.mxu3 %v7918_v28  ;;  %1297 = vmatmul.bf16.gmra.mxu0 %v6073_v23  ;;  %v6108_v28 = vld [vmem:[%s7901_s23 + $0xb0] sm:$0xf]  ;;  %v7036_v23 = vld [vmem:[%s11289_s22 + $0x38] sm:$0xff] }
  0x58   : > { %1663 = vmatpush.bf16.msra.mxu0 %v7751_v1  ;;  %1326 = vmatmul.bf16.gmra.mxu1 %v6077_v38  ;;  %v6100_v1 = vld [vmem:[%s7901_s23 + $0xa8] sm:$0xf]  ;;  %v8168_v38 = vld [vmem:[%s11257_s11] ss:$0 sm:$0xff] }
  0x59   : > { %1692 = vmatpush.bf16.msra.mxu1 %v7756_v2  ;;  %1355 = vmatmul.bf16.gmra.mxu2 %v6081_v39  ;;  %v6948_v2 = vld [vmem:[%s7901_s23 + $0xc0] sm:$0xf0] }
  0x5a   : > { %1384 = vmatmul.bf16.gmra.mxu3 %v6085_v42  ;;  %1728 = vmatpush.bf16.msra.mxu2 %v7933_v31  ;;  %v6952_v39 = vld [vmem:[%s7901_s23 + $0xe4] sm:$0xf]  ;;  %v6330_v42 = vld [vmem:[%s7901_s23 + $0xfc] sm:$0xf0] }
  0x5b   : > { %1750 = vmatpush.bf16.msra.mxu3 %v7955_v41  ;;  %v6949_v41 = vld [vmem:[%s7901_s23 + $0xc8] sm:$0xf0] }
  0x5c   : > { %1664 = vmatpush.bf16.msra.mxu0 %v7773_v5  ;;  %v6110_v5 = vld [vmem:[%s7901_s23 + $0xcc] sm:$0xf0] }
  0x5d   : > { %1693 = vmatpush.bf16.msra.mxu1 %v7780_v6  ;;  %v6101_v6 = vor.u32 %v6948_v2, %v6100_v1  ;;  %v6113_v31 = vor.u32 %v6946_v43, %v6110_v5  ;;  %v7035_v1 = vld [vmem:[%s11289_s22 + $0x30] sm:$0xff]  ;;  %v6336_v2 = vld [vmem:[%s7901_s23 + $0xe8] sm:$0xf]  ;;  %v6957_v43 = vld [vmem:[%s7901_s23 + $0x108] sm:$0xf0]  ;;  %v6333_v5 = vor.u32 %v6952_v39, %v6330_v42 }
  0x5f   : > { %1751 = vmatpush.bf16.msra.mxu3 %v7971_v47  ;;  %v6328_v47 = vld [vmem:[%s7901_s23 + $0xe0] sm:$0xf] }
  0x60   : > { %1665 = vmatpush.bf16.msra.mxu0 %v7797_v9  ;;  %v6105_v9 = vor.u32 %v6945_v24, %v6102_v27  ;;  %v6956_v24 = vld [vmem:[%s7901_s23 + $0x100] sm:$0xf0]  ;;  %v6953_v27 = vld [vmem:[%s7901_s23 + $0xec] sm:$0xf] }
  0x61   : > { %1694 = vmatpush.bf16.msra.mxu1 %v7804_v10  ;;  %v6109_v10 = vor.u32 %v6949_v41, %v6108_v28  ;;  %v6338_v28 = vld [vmem:[%s7901_s23 + $0x104] sm:$0xf0]  ;;  %v6344_v41 = vld [vmem:[%s7901_s23 + $0xf0] sm:$0xf] }
  0x63   : > { %1752 = vmatpush.bf16.msra.mxu3 %v7984_v49  ;;  %v6955_v49 = vld [vmem:[%s7901_s23 + $0xf8] sm:$0xf0] }
  0x64   : > { %1666 = vmatpush.bf16.msra.mxu0 %v7821_v13  ;;  %v6032_v13 = vld [vmem:[%s7901_s23 + $0x10] sm:$0xf] }
  0x65   : > { %1695 = vmatpush.bf16.msra.mxu1 %v7828_v14  ;;  %v6929_v14 = vld [vmem:[%s7901_s23 + $0x28] sm:$0xf0] }
  0x67   : > { %1753 = vmatpush.bf16.msra.mxu3 %v7998_v51  ;;  %1302 = vmatmul.bf16.gmra.mxu0 %v6101_v6  ;;  %v6933_v51 = vld [vmem:[%s7901_s23 + $0x4c] sm:$0xf]  ;;  %v6337_v6 = vor.u32 %v6956_v24, %v6336_v2 }
  0x68   : > { %1667 = vmatpush.bf16.msra.mxu0 %v7845_v17  ;;  %1331 = vmatmul.bf16.gmra.mxu1 %v6105_v9  ;;  %v6926_v17 = vld [vmem:[%s7901_s23 + $0x14] sm:$0xf]  ;;  %v7030_v2 = vld [vmem:[%s11289_s22 + $0x8] sm:$0xff] }
  0x69   : > { %1696 = vmatpush.bf16.msra.mxu1 %v7854_v18  ;;  %1360 = vmatmul.bf16.gmra.mxu2 %v6109_v10  ;;  %v6034_v18 = vld [vmem:[%s7901_s23 + $0x2c] sm:$0xf0] }
  0x6a   : > { %1389 = vmatmul.bf16.gmra.mxu3 %v6113_v31  ;;  %v6341_v31 = vor.u32 %v6953_v27, %v6338_v28 }
  0x6b   : > { %1754 = vmatpush.bf16.msra.mxu3 %v8020_v61  ;;  %v6090_v61 = vld [vmem:[%s7901_s23 + $0x9c] sm:$0xf0] }
  0x6c   : > { %1668 = vmatpush.bf16.msra.mxu0 %v7871_v21  ;;  %v6033_v21 = vor.u32 %v6929_v14, %v6032_v13  ;;  %v6345_v13 = vor.u32 %v6957_v43, %v6344_v41 }
  0x6d   : > { %1697 = vmatpush.bf16.msra.mxu1 %v7879_v22  ;;  %v6037_v22 = vor.u32 %v6926_v17, %v6034_v18  ;;  %v7034_v18 = vld [vmem:[%s11289_s22 + $0x28] sm:$0xff] }
  0x6f   : > { %1755 = vmatpush.bf16.msra.mxu3 %v8034_v7  ;;  %v6097_v7 = vor.u32 %v6944_v63, %v6096_v62 }
  0x70   : > { %1669 = vmatpush.bf16.msra.mxu0 %v7896_v25  ;;  %v6041_v25 = vor.u32 %v6930_v45, %v6040_v44 }
  0x71   : > { %1698 = vmatpush.bf16.msra.mxu1 %v7908_v26  ;;  %v6329_v26 = vor.u32 %v6955_v49, %v6328_v47 }
  0x73   : > { %1756 = vmatpush.bf16.msra.mxu3 %v8048_v11  ;;  %v6116_v11 = vld [vmem:[%s7901_s23 + $0xb8] sm:$0xf] }
  0x74   : > { %1670 = vmatpush.bf16.msra.mxu0 %v7923_v29  ;;  %v6060_v29 = vld [vmem:[%s7901_s23 + $0x48] sm:$0xf] }
  0x75   : > { %1699 = vmatpush.bf16.msra.mxu1 %v7928_v30  ;;  %v6936_v30 = vld [vmem:[%s7901_s23 + $0x60] sm:$0xf0] }
  0x77   : > { %1757 = vmatpush.bf16.msra.mxu3 %v8062_v15  ;;  %1403 = vmatmul.bf16.vlgmr.msrb.gmra.mxu0 %v6033_v21  ;;  %v6950_v15 = vld [vmem:[%s7901_s23 + $0xd0] sm:$0xf0]  ;;  %v6959_v21 = vld [vmem:[%s7901_s23 + $0x11c] sm:$0xf] }
  0x78   : > { %1432 = vmatmul.bf16.vlgmr.msrb.gmra.mxu1 %v6037_v22  ;;  %1779 = vmatpush.bf16.msrb.mxu0 %v7964_v46  ;;  %v6061_v46 = vor.u32 %v6936_v30, %v6060_v29  ;;  %v6117_v35 = vor.u32 %v6950_v15, %v6116_v11  ;;  %v6358_v22 = vld [vmem:[%s7901_s23 + $0x134] sm:$0xf0]  ;;  %v6963_v29 = vld [vmem:[%s7901_s23 + $0x138] sm:$0xf0]  ;;  %v6960_v30 = vld [vmem:[%s7901_s23 + $0x124] sm:$0xf] }
  0x79   : > { %6322 = vmatmul.msk.bf16.vlgmr.msrb.gmra.mxu2 %vm1266_vm0, %v6041_v25  ;;  %1815 = vmatpush.bf16.msrb.mxu1 %v7950_v40  ;;  %v6065_v40 = vor.u32 %v6933_v51, %v6062_v52  ;;  %v7033_v25 = vld [vmem:[%s11289_s22 + $0x20] sm:$0xff]  ;;  %v6361_v56 = vor.u32 %v6959_v21, %v6358_v22  ;;  %v6392_v11 = vld [vmem:[%s7901_s23 + $0x158] sm:$0xf]  ;;  %v6970_v15 = vld [vmem:[%s7901_s23 + $0x170] sm:$0xf0] }
  0x7a   : > { %1642 = vmatmul.bf16.vlgmr.msrb.gmra.mxu3 %v6329_v26  ;;  %1929 = vmatpush.bf16.msrb.mxu2 %v7036_v23  ;;  %v6364_v26 = vld [vmem:[%s7901_s23 + $0x120] sm:$0xf] }
  0x7b   : > { %1958 = vmatpush.bf16.msrb.mxu3 %v7036_v23  ;;  %v6366_v52 = vld [vmem:[%s7901_s23 + $0x13c] sm:$0xf0] }
  0x7c   : > { %1780 = vmatpush.bf16.msrb.mxu0 %v7977_v48  ;;  %v6069_v48 = vor.u32 %v6937_v54, %v6068_v53  ;;  %v6372_v53 = vld [vmem:[%s7901_s23 + $0x128] sm:$0xf]  ;;  %v6964_v54 = vld [vmem:[%s7901_s23 + $0x140] sm:$0xf0] }
  0x7e   : > { %1930 = vmatpush.bf16.msrb.mxu2 %v7035_v1 }
  0x7f   : > { %1959 = vmatpush.bf16.msrb.mxu3 %v7035_v1 }
  0x80   : > { %1781 = vmatpush.bf16.msrb.mxu0 %v7991_v50  ;;  %v6088_v50 = vld [vmem:[%s7901_s23 + $0x80] sm:$0xf] }
  0x81   : > { %v6089_v3 = vor.u32 %v6943_v58, %v6088_v50  ;;  %v6373_v50 = vor.u32 %v6964_v54, %v6372_v53 }
  0x82   : > { %1931 = vmatpush.bf16.msrb.mxu2 %v7034_v18 }
  0x83   : > { %1960 = vmatpush.bf16.msrb.mxu3 %v7034_v18  ;;  %v6978_v18 = vld [vmem:[%s7901_s23 + $0x1b0] sm:$0xf0] }
  0x84   : > { %1782 = vmatpush.bf16.msrb.mxu0 %v8013_v60  ;;  %v6384_v60 = vld [vmem:[%s7901_s23 + $0x150] sm:$0xf] }
  0x86   : > { %1932 = vmatpush.bf16.msrb.mxu2 %v7033_v25 }
  0x87   : > { %1408 = vmatmul.bf16.gmra.mxu0 %v6061_v46  ;;  %1961 = vmatpush.bf16.msrb.mxu3 %v7033_v25  ;;  %v6365_v46 = vor.u32 %v6963_v29, %v6364_v26 }
  0x88   : > { %1437 = vmatmul.bf16.gmra.mxu1 %v6065_v40  ;;  %1783 = vmatpush.bf16.msrb.mxu0 %v8027_v4  ;;  %v6093_v4 = vor.u32 %v6940_v59, %v6090_v61  ;;  %v7032_v61 = vld [vmem:[%s11289_s22 + $0x18] sm:$0xff] }
  0x89   : > { %6323 = vmatmul.msk.bf16.gmra.mxu2 %vm1266_vm0, %v6069_v48 }
  0x8a   : > { %1647 = vmatmul.bf16.gmra.mxu3 %v6357_v57  ;;  %v6369_v57 = vor.u32 %v6960_v30, %v6366_v52  ;;  %1933 = vmatpush.bf16.msrb.mxu2 %v7032_v61 }
  0x8b   : > { %1962 = vmatpush.bf16.msrb.mxu3 %v7032_v61 }
  0x8c   : > { %1784 = vmatpush.bf16.msrb.mxu0 %v8041_v8  ;;  %v6385_v8 = vor.u32 %v6969_v0, %v6384_v60 }
  0x90   : > { %1785 = vmatpush.bf16.msrb.mxu0 %v8055_v12  ;;  %v6951_v12 = vld [vmem:[%s7901_s23 + $0xd8] sm:$0xf0] }
  0x91   : > { %v6125_v37 = vor.u32 %v6951_v12, %v6124_v32  ;;  %v6400_v32 = vld [vmem:[%s7901_s23 + $0x160] sm:$0xf]  ;;  %v6971_v12 = vld [vmem:[%s7901_s23 + $0x178] sm:$0xf0] }
  0x92   : > { %v6401_v23 = vor.u32 %v6971_v12, %v6400_v32 }
  0x94   : > { %1786 = vmatpush.bf16.msrb.mxu0 %v8078_v20  ;;  %v6413_v20 = vor.u32 %v6976_v34, %v6412_v33 }
  0x97   : > { %1413 = vmatmul.bf16.gmra.mxu0 %v6089_v3 }
  0x98   : > { %1442 = vmatmul.bf16.gmra.mxu1 %v6093_v4  ;;  %v6966_v4 = vld [vmem:[%s7901_s23 + $0x154] sm:$0xf] }
  0x99   : > { %6324 = vmatmul.msk.bf16.gmra.mxu2 %vm1266_vm0, %v6097_v7  ;;  %v6386_v7 = vld [vmem:[%s7901_s23 + $0x16c] sm:$0xf0] }
  0x9a   : > { %1652 = vmatmul.bf16.gmra.mxu3 %v6385_v8  ;;  %v7031_v8 = vld [vmem:[%s11289_s22 + $0x10] sm:$0xff]  ;;  %v6389_v34 = vor.u32 %v6966_v4, %v6386_v7 }
  0x9b   : > { %1934 = vmatpush.bf16.msrb.mxu2 %v7031_v8  ;;  %1963 = vmatpush.bf16.msrb.mxu3 %v7031_v8 }
  0x9f   : > { %1935 = vmatpush.bf16.msrb.mxu2 %v7030_v2  ;;  %1964 = vmatpush.bf16.msrb.mxu3 %v7030_v2  ;;  %v6965_v2 = vld [vmem:[%s7901_s23 + $0x148] sm:$0xf0] }
  0xa7   : > { %1418 = vmatmul.bf16.gmra.mxu0 %v6117_v35  ;;  %v6393_v35 = vor.u32 %v6970_v15, %v6392_v11 }
  0xa8   : > { %1447 = vmatmul.bf16.gmra.mxu1 %v6121_v36 }
  0xa9   : > { %6325 = vmatmul.msk.bf16.gmra.mxu2 %vm1266_vm0, %v6125_v37 }
  0xaa   : > { %1657 = vmatmul.bf16.gmra.mxu3 %v6413_v20  ;;  %v6397_v20 = vor.u32 %v6967_v16, %v6394_v19 }
  0xb4   : > { %v1288_v9 = vpop.f32.mrf.mxu0 }
  0xb5   : > { %v1317_v10 = vpop.f32.mrf.mxu1  ;;  %v1289_v14 = vadd.f32 %v8168_v38, %v1288_v9  ;;  %v7029_v9 = vld [vmem:[%s11289_s22] sm:$0xff] }
  0xb6   : > { %1936 = vmatpush.bf16.msrb.mxu2 %v7029_v9  ;;  %1965 = vmatpush.bf16.msrb.mxu3 %v7029_v9 }
  0xb7   : > { %v1318_v17 = vadd.f32 %v1317_v10, %v1289_v14  ;;  %1671 = vmatmul.bf16.vlgmr.msra.gmra.mxu0 %v6333_v5  ;;  %v6973_v5 = vld [vmem:[%s7901_s23 + $0x18c] sm:$0xf]  ;;  %v6420_v10 = vld [vmem:[%s7901_s23 + $0x190] sm:$0xf] }
  0xb8   : > { %1700 = vmatmul.bf16.vlgmr.msra.gmra.mxu1 %v6337_v6  ;;  %v6414_v6 = vld [vmem:[%s7901_s23 + $0x1a4] sm:$0xf0]  ;;  %v6422_v14 = vld [vmem:[%s7901_s23 + $0x1ac] sm:$0xf0] }
  0xb9   : > { %1729 = vmatmul.bf16.vlgmr.msra.gmra.mxu2 %v6341_v31  ;;  %v6977_v31 = vld [vmem:[%s7901_s23 + $0x1a8] sm:$0xf0]  ;;  %v6417_v21 = vor.u32 %v6973_v5, %v6414_v6 }
  0xba   : > { %1758 = vmatmul.bf16.vlgmr.msra.gmra.mxu3 %v6345_v13  ;;  %v6974_v13 = vld [vmem:[%s7901_s23 + $0x194] sm:$0xf]  ;;  %v6421_v22 = vor.u32 %v6977_v31, %v6420_v10 }
  0xbb   : > { %v6425_v29 = vor.u32 %v6974_v13, %v6422_v14 }
  0xbc   : > { %v1346_v44 = vpop.f32.mrf.mxu2  ;;  %v8187_v47 = vpop.f32.mrf.mxu0 }
  0xbd   : > { %v8185_v45 = vadd.f32 %v1346_v44, %v1318_v17  ;;  %v8189_v49 = vpop.f32.mrf.mxu1  ;;  %v8199_v51 = vpop.f32.mrf.mxu3  ;;  %v6428_v17 = vld [vmem:[%s7901_s23 + $0x198] sm:$0xf]  ;;  %v1291_v61 = vadd.f32 %v8168_v38, %v8187_v47 }
  0xbe   : > { %v6429_v30 = vor.u32 %v6978_v18, %v6428_v17 }
  0xbf   : > { %v1320_v16 = vadd.f32 %v8189_v49, %v1291_v61  ;;  %v1376_v47 = vadd.f32 %v8199_v51, %v8185_v45 }
  0xc4   : > { %v8204_v55 = vpop.f32.mrf.mxu2  ;;  %v1293_v40 = vpop.f32.mrf.mxu0 }
  0xc5   : > { %v1322_v48 = vpop.f32.mrf.mxu1  ;;  %v1294_v58 = vadd.f32 %v8168_v38, %v1293_v40  ;;  %v8210_v62 = vpop.f32.mrf.mxu3  ;;  %v1349_v19 = vadd.f32 %v8204_v55, %v1320_v16 }
  0xc7   : > { %v1323_v59 = vadd.f32 %v1322_v48, %v1294_v58  ;;  %1676 = vmatmul.bf16.gmra.mxu0 %v6361_v56  ;;  %v6352_v58 = vld [vmem:[%s7901_s23 + $0xf8] sm:$0xf]  ;;  %v1378_v12 = vadd.f32 %v8210_v62, %v1349_v19 }
  0xc8   : > { %1705 = vmatmul.bf16.gmra.mxu1 %v6365_v46 }
  0xc9   : > { %1734 = vmatmul.bf16.gmra.mxu2 %v6369_v57  ;;  %v6954_v57 = vld [vmem:[%s7901_s23 + $0xf4] sm:$0xf] }
  0xca   : > { %1763 = vmatmul.bf16.gmra.mxu3 %v6373_v50  ;;  %v6346_v50 = vld [vmem:[%s7901_s23 + $0x10c] sm:$0xf0] }
  0xcb   : > { %v6349_v7 = vor.u32 %v6954_v57, %v6346_v50  ;;  %v6408_v57 = vld [vmem:[%s7901_s23 + $0x168] sm:$0xf]  ;;  %v6972_v50 = vld [vmem:[%s7901_s23 + $0x180] sm:$0xf0] }
  0xcc   : > { %v1351_v63 = vpop.f32.mrf.mxu2  ;;  %v8214_v0 = vpop.f32.mrf.mxu0 }
  0xcd   : > { %v8212_v60 = vadd.f32 %v1351_v63, %v1323_v59  ;;  %v8216_v3 = vpop.f32.mrf.mxu1  ;;  %v8231_v39 = vpop.f32.mrf.mxu3  ;;  %v6958_v59 = vld [vmem:[%s7901_s23 + $0x110] sm:$0xf0]  ;;  %v1296_v55 = vadd.f32 %v8168_v38, %v8214_v0 }
  0xce   : > { %v6353_v8 = vor.u32 %v6958_v59, %v6352_v58 }
  0xcf   : > { %v1325_v31 = vadd.f32 %v8216_v3, %v1296_v55  ;;  %v6979_v55 = vld [vmem:[%s7901_s23 + $0x1b8] sm:$0xf0] }
  0xd4   : > { %v8229_v33 = vpop.f32.mrf.mxu2  ;;  %v1298_v36 = vpop.f32.mrf.mxu0 }
  0xd5   : > { %v1327_v37 = vpop.f32.mrf.mxu1  ;;  %v1299_v42 = vadd.f32 %v8168_v38, %v1298_v36  ;;  %v8243_v43 = vpop.f32.mrf.mxu3  ;;  %v1354_v0 = vadd.f32 %v8229_v33, %v1325_v31 }
  0xd7   : > { %v1328_v1 = vadd.f32 %v1327_v37, %v1299_v42  ;;  %1681 = vmatmul.bf16.gmra.mxu0 %v6389_v34  ;;  %v6374_v42 = vld [vmem:[%s7901_s23 + $0x144] sm:$0xf0]  ;;  %v1383_v3 = vadd.f32 %v8243_v43, %v1354_v0 }
  0xd8   : > { %1710 = vmatmul.bf16.gmra.mxu1 %v6393_v35 }
  0xd9   : > { %1739 = vmatmul.bf16.gmra.mxu2 %v6397_v20 }
  0xda   : > { %1768 = vmatmul.bf16.gmra.mxu3 %v6401_v23  ;;  %v6961_v23 = vld [vmem:[%s7901_s23 + $0x12c] sm:$0xf] }
  0xdb   : > { %v6377_v51 = vor.u32 %v6961_v23, %v6374_v42 }
  0xdc   : > { %v1356_v24 = vpop.f32.mrf.mxu2  ;;  %v8239_v28 = vpop.f32.mrf.mxu0 }
  0xdd   : > { %v8237_v27 = vadd.f32 %v1356_v24, %v1328_v1  ;;  %v8241_v41 = vpop.f32.mrf.mxu1  ;;  %v8259_v54 = vpop.f32.mrf.mxu3  ;;  %v6380_v1 = vld [vmem:[%s7901_s23 + $0x130] sm:$0xf]  ;;  %v1301_v33 = vadd.f32 %v8168_v38, %v8239_v28 }
  0xde   : > { %v6381_v6 = vor.u32 %v6965_v2, %v6380_v1  ;;  %v6430_v1 = vld [vmem:[%s7901_s23 + $0x1b4] sm:$0xf0]  ;;  %v6436_v2 = vld [vmem:[%s7901_s23 + $0x1a0] sm:$0xf] }
  0xe4   : > { %v8256_v44 = vpop.f32.mrf.mxu2  ;;  %v1303_v25 = vpop.f32.mrf.mxu0 }
  0xe5   : > { %v1332_v26 = vpop.f32.mrf.mxu1  ;;  %v1304_v52 = vadd.f32 %v8168_v38, %v1303_v25  ;;  %v8273_v63 = vpop.f32.mrf.mxu3 }
  0xe7   : > { %v1333_v53 = vadd.f32 %v1332_v26, %v1304_v52  ;;  %1686 = vmatmul.bf16.gmra.mxu0 %v6417_v21  ;;  %v1381_v21 = vadd.f32 %v8231_v39, %v8212_v60  ;;  %v6968_v52 = vld [vmem:[%s7901_s23 + $0x164] sm:$0xf] }
  0xe8   : > { %1715 = vmatmul.bf16.gmra.mxu1 %v6421_v22 }
  0xe9   : > { %1744 = vmatmul.bf16.gmra.mxu2 %v6425_v29 }
  0xea   : > { %1773 = vmatmul.bf16.gmra.mxu3 %v6429_v30 }
  0xec   : > { %v1361_v56 = vpop.f32.mrf.mxu2  ;;  %v8263_v40 = vpop.f32.mrf.mxu0 }
  0xed   : > { %v8261_v46 = vadd.f32 %v1361_v56, %v1333_v53  ;;  %v8265_v48 = vpop.f32.mrf.mxu1  ;;  %v8283_v37 = vpop.f32.mrf.mxu3  ;;  %v6402_v56 = vld [vmem:[%s7901_s23 + $0x17c] sm:$0xf0] }
  0xee   : > { %v6405_v39 = vor.u32 %v6968_v52, %v6402_v56 }
  0xf4   : > { %v8275_v4 = vpop.f32.mrf.mxu2  ;;  %v1404_v11 = vpop.f32.mrf.mxu0 }
  0xf5   : > { %v1433_v15 = vpop.f32.mrf.mxu1  ;;  %v1405_v34 = vadd.f32 %v1404_v11, %v1376_v47  ;;  %v8292_v17 = vpop.f32.mrf.mxu3 }
  0xf7   : > { %1787 = vmatmul.bf16.vlgmr.msrb.gmra.mxu0 %v6349_v7  ;;  %v1434_v49 = vadd.f32 %v1433_v15, %v1405_v34  ;;  %v6409_v7 = vor.u32 %v6972_v50, %v6408_v57  ;;  %v1330_v15 = vadd.f32 %v8241_v41, %v1301_v33 }
  0xf8   : > { %6438 = vmatmul.msk.bf16.vlgmr.msrb.gmra.mxu1 %vm1266_vm0, %v6353_v8 }
  0xf9   : > { %v1359_v28 = vadd.f32 %v8256_v44, %v1330_v15  ;;  %v1306_v44 = vadd.f32 %v8168_v38, %v8263_v40  ;;  %v1391_v40 = vadd.f32 %v8283_v37, %v8261_v46  ;;  %v7043_v15 = vld [vmem:[%s11290_s24 + $0x30] sm:$0xff] }
  0xfb   : > { %v1388_v41 = vadd.f32 %v8273_v63, %v1359_v28 }
  0xfc   : > { %v1462_v32 = vpop.f32.mrf.mxu2  ;;  %v1406_v35 = vpop.f32.mrf.mxu0 }
  0xfd   : > { %v1435_v36 = vpop.f32.mrf.mxu1  ;;  %v1407_v20 = vadd.f32 %v1406_v35, %v1378_v12  ;;  %v1463_v24 = vadd.f32 %v1462_v32, %v1434_v49  ;;  %v1643_v58 = vpop.f32.mrf.mxu3  ;;  %v1386_v32 = vadd.f32 %v8259_v54, %v8237_v27  ;;  %v6975_v49 = vld [vmem:[%s7901_s23 + $0x19c] sm:$0xf]  ;;  %s11291_s23 = sld [smem:[#allocation12_spill]] }
  0xff   : > { %v1436_v5 = vadd.f32 %v1435_v36, %v1407_v20  ;;  %v1837_v13 = vmax.f32 %v1463_v24, 0.0 }
 0x104   : > { %v1464_v45 = vpop.f32.mrf.mxu2  ;;  %v1409_v9 = vpop.f32.mrf.mxu0 }
 0x105   : > { %v1465_v62 = vadd.f32 %v1464_v45, %v1436_v5  ;;  %v1438_v10 = vpop.f32.mrf.mxu1  ;;  %v1410_v25 = vadd.f32 %v1409_v9, %v1381_v21  ;;  %v8310_v12 = vpop.f32.mrf.mxu3  ;;  %v6433_v5 = vor.u32 %v6975_v49, %v6430_v1  ;;  %v6437_v45 = vor.u32 %v6979_v55, %v6436_v2  ;;  %v7041_v49 = vld [vmem:[%s11290_s24 + $0x20] sm:$0xff]  ;;  %v7040_v55 = vld [vmem:[%s11290_s24 + $0x18] sm:$0xff] }
 0x106   : > { %v1335_v9 = vadd.f32 %v8265_v48, %v1306_v44 }
 0x107   : > { %v1838_v14 = vmax.f32 %v1465_v62, 0.0  ;;  %1792 = vmatmul.bf16.gmra.mxu0 %v6377_v51  ;;  %v1439_v53 = vadd.f32 %v1438_v10, %v1410_v25 }
 0x108   : > { %6439 = vmatmul.msk.bf16.gmra.mxu1 %vm1266_vm0, %v6381_v6 }
 0x109   : > { %v1853_v18 = vpack.c.bf16 %v1838_v14, %v1837_v13  ;;  %v1364_v13 = vadd.f32 %v8275_v4, %v1335_v9 }
 0x10b   : > { %1937 = vmatmul.bf16.vlgmr.msrb.gmra.mxu2 %v1853_v18  ;;  %v1393_v18 = vadd.f32 %v8292_v17, %v1364_v13 }
 0x10c   : > { %v1467_v22 = vpop.f32.mrf.mxu2  ;;  %v1411_v26 = vpop.f32.mrf.mxu0 }
 0x10d   : > { %v1440_v29 = vpop.f32.mrf.mxu1  ;;  %v1412_v30 = vadd.f32 %v1411_v26, %v1383_v3  ;;  %v1468_v59 = vadd.f32 %v1467_v22, %v1439_v53  ;;  %v1648_v62 = vpop.f32.mrf.mxu3 }
 0x10f   : > { %v1441_v61 = vadd.f32 %v1440_v29, %v1412_v30  ;;  %v1839_v16 = vmax.f32 %v1468_v59, 0.0  ;;  %v1644_v29 = vadd.f32 %v8168_v38, %v1643_v58 }
 0x114   : > { %v1469_v60 = vpop.f32.mrf.mxu2  ;;  %v1414_v43 = vpop.f32.mrf.mxu0 }
 0x115   : > { %v1470_v8 = vadd.f32 %v1469_v60, %v1441_v61  ;;  %v1443_v11 = vpop.f32.mrf.mxu1  ;;  %v1415_v35 = vadd.f32 %v1414_v43, %v1386_v32  ;;  %v8325_v48 = vpop.f32.mrf.mxu3 }
 0x117   : > { %v1840_v19 = vmax.f32 %v1470_v8, 0.0  ;;  %1797 = vmatmul.bf16.gmra.mxu0 %v6405_v39  ;;  %v1444_v42 = vadd.f32 %v1443_v11, %v1415_v35  ;;  %v7044_v39 = vld [vmem:[%s11290_s24 + $0x38] sm:$0xff] }
 0x118   : > { %6440 = vmatmul.msk.bf16.gmra.mxu1 %vm1266_vm0, %v6409_v7  ;;  %2079 = vmatpush.bf16.msra.mxu0 %v7044_v39  ;;  %v1649_v7 = vadd.f32 %v8168_v38, %v1648_v62 }
 0x119   : > { %v1854_v47 = vpack.c.bf16 %v1840_v19, %v1839_v16  ;;  %2108 = vmatpush.bf16.msra.mxu1 %v7044_v39 }
 0x11b   : > { %1942 = vmatmul.bf16.gmra.mxu2 %v1854_v47 }
 0x11c   : > { %v1472_v34 = vpop.f32.mrf.mxu2  ;;  %v1416_v36 = vpop.f32.mrf.mxu0  ;;  %2080 = vmatpush.bf16.msra.mxu0 %v7043_v15 }
 0x11d   : > { %v1445_v20 = vpop.f32.mrf.mxu1  ;;  %v1417_v23 = vadd.f32 %v1416_v36, %v1388_v41  ;;  %v1473_v24 = vadd.f32 %v1472_v34, %v1444_v42  ;;  %v1653_v59 = vpop.f32.mrf.mxu3  ;;  %2109 = vmatpush.bf16.msra.mxu1 %v7043_v15  ;;  %v7042_v34 = vld [vmem:[%s11290_s24 + $0x28] sm:$0xff] }
 0x11e   : > { %v1654_v35 = vadd.f32 %v8168_v38, %v1653_v59 }
 0x11f   : > { %v1446_v27 = vadd.f32 %v1445_v20, %v1417_v23  ;;  %v1841_v10 = vmax.f32 %v1473_v24, 0.0 }
 0x120   : > { %2081 = vmatpush.bf16.msra.mxu0 %v7042_v34 }
 0x121   : > { %2110 = vmatpush.bf16.msra.mxu1 %v7042_v34 }
 0x124   : > { %v1474_v54 = vpop.f32.mrf.mxu2  ;;  %v1419_v6 = vpop.f32.mrf.mxu0  ;;  %2082 = vmatpush.bf16.msra.mxu0 %v7041_v49 }
 0x125   : > { %v1475_v51 = vadd.f32 %v1474_v54, %v1446_v27  ;;  %v1448_v63 = vpop.f32.mrf.mxu1  ;;  %v1420_v21 = vadd.f32 %v1419_v6, %v1391_v40  ;;  %v8332_v8 = vpop.f32.mrf.mxu3  ;;  %2111 = vmatpush.bf16.msra.mxu1 %v7041_v49  ;;  %v1646_v40 = vadd.f32 %v8168_v38, %v8310_v12 }
 0x127   : > { %v1842_v31 = vmax.f32 %v1475_v51, 0.0  ;;  %1802 = vmatmul.bf16.gmra.mxu0 %v6433_v5  ;;  %v1449_v26 = vadd.f32 %v1448_v63, %v1420_v21  ;;  %v7037_v21 = vld [vmem:[%s11290_s24] sm:$0xff] }
 0x128   : > { %6441 = vmatmul.msk.bf16.gmra.mxu1 %vm1266_vm0, %v6437_v45  ;;  %2083 = vmatpush.bf16.msra.mxu0 %v7040_v55  ;;  %v7039_v45 = vld [vmem:[%s11290_s24 + $0x10] sm:$0xff] }
 0x129   : > { %v1855_v14 = vpack.c.bf16 %v1842_v31, %v1841_v10  ;;  %2112 = vmatpush.bf16.msra.mxu1 %v7040_v55  ;;  %v7038_v10 = vld [vmem:[%s11290_s24 + $0x8] sm:$0xff] }
 0x12b   : > { %1947 = vmatmul.bf16.gmra.mxu2 %v1855_v14 }
 0x12c   : > { %v1477_v0 = vpop.f32.mrf.mxu2  ;;  %v1421_v22 = vpop.f32.mrf.mxu0  ;;  %2084 = vmatpush.bf16.msra.mxu0 %v7039_v45 }
 0x12d   : > { %v1450_v3 = vpop.f32.mrf.mxu1  ;;  %v1422_v25 = vadd.f32 %v1421_v22, %v1393_v18  ;;  %v1478_v30 = vadd.f32 %v1477_v0, %v1449_v26  ;;  %v1658_v41 = vpop.f32.mrf.mxu3  ;;  %2113 = vmatpush.bf16.msra.mxu1 %v7039_v45 }
 0x12e   : > { %v1659_v54 = vadd.f32 %v8168_v38, %v1658_v41 }
 0x12f   : > { %v1451_v52 = vadd.f32 %v1450_v3, %v1422_v25  ;;  %v1843_v37 = vmax.f32 %v1478_v30, 0.0 }
 0x130   : > { %2085 = vmatpush.bf16.msra.mxu0 %v7038_v10 }
 0x131   : > { %2114 = vmatpush.bf16.msra.mxu1 %v7038_v10 }
 0x134   : > { %v1479_v4 = vpop.f32.mrf.mxu2  ;;  %v1672_v56 = vpop.f32.mrf.mxu0  ;;  %2086 = vmatpush.bf16.msra.mxu0 %v7037_v21 }
 0x135   : > { %v1480_v53 = vadd.f32 %v1479_v4, %v1451_v52  ;;  %v1701_v57 = vpop.f32.mrf.mxu1  ;;  %v1673_v46 = vadd.f32 %v1672_v56, %v1644_v29  ;;  %v8348_v1 = vpop.f32.mrf.mxu3  ;;  %2115 = vmatpush.bf16.msra.mxu1 %v7037_v21 }
 0x137   : > { %v1844_v50 = vmax.f32 %v1480_v53, 0.0  ;;  %v1702_v33 = vadd.f32 %v1701_v57, %v1673_v46 }
 0x139   : > { %v1856_v17 = vpack.c.bf16 %v1844_v50, %v1843_v37  ;;  %v1651_v50 = vadd.f32 %v8168_v38, %v8325_v48 }
 0x13b   : > { %1952 = vmatmul.bf16.gmra.mxu2 %v1856_v17 }
 0x13c   : > { %v1674_v61 = vpop.f32.mrf.mxu0  ;;  %v1730_v58 = vpop.f32.mrf.mxu2 }
 0x13d   : > { %v1703_v60 = vpop.f32.mrf.mxu1  ;;  %v1759_v5 = vpop.f32.mrf.mxu3  ;;  %v1675_v0 = vadd.f32 %v1674_v61, %v1646_v40  ;;  %v1731_v22 = vadd.f32 %v1730_v58, %v1702_v33 }
 0x13f   : > { %v1704_v26 = vadd.f32 %v1703_v60, %v1675_v0  ;;  %v1760_v30 = vadd.f32 %v1759_v5, %v1731_v22 }
 0x144   : > { %v1677_v43 = vpop.f32.mrf.mxu0  ;;  %v1732_v28 = vpop.f32.mrf.mxu2 }
 0x145   : > { %v1706_v11 = vpop.f32.mrf.mxu1  ;;  %v1678_v16 = vadd.f32 %v1677_v43, %v1649_v7  ;;  %v1761_v31 = vpop.f32.mrf.mxu3  ;;  %v1733_v52 = vadd.f32 %v1732_v28, %v1704_v26 }
 0x147   : > { %v8337_v19 = vadd.f32 %v1706_v11, %v1678_v16  ;;  %v1762_v53 = vadd.f32 %v1761_v31, %v1733_v52 }
 0x14c   : > { %v1679_v47 = vpop.f32.mrf.mxu0  ;;  %v1735_v36 = vpop.f32.mrf.mxu2 }
 0x14d   : > { %v8339_v32 = vpop.f32.mrf.mxu1  ;;  %v1764_v29 = vpop.f32.mrf.mxu3  ;;  %v1680_v59 = vadd.f32 %v1679_v47, %v1651_v50  ;;  %v1736_v60 = vadd.f32 %v1735_v36, %v8337_v19  ;;  %v1656_v19 = vadd.f32 %v8168_v38, %v8332_v8 }
 0x14f   : > { %v1709_v11 = vadd.f32 %v8339_v32, %v1680_v59  ;;  %v1765_v16 = vadd.f32 %v1764_v29, %v1736_v60  ;;  %v8388_v32 = vld [vmem:[%s11258_s12] ss:$0 sm:$0xff] }
 0x154   : > { %v1682_v20 = vpop.f32.mrf.mxu0  ;;  %v1737_v27 = vpop.f32.mrf.mxu2 }
 0x155   : > { %v1711_v23 = vpop.f32.mrf.mxu1  ;;  %v1683_v42 = vadd.f32 %v1682_v20, %v1654_v35  ;;  %v1766_v33 = vpop.f32.mrf.mxu3  ;;  %v1738_v28 = vadd.f32 %v1737_v27, %v1709_v11 }
 0x157   : > { %v8350_v2 = vadd.f32 %v1711_v23, %v1683_v42  ;;  %v1767_v35 = vadd.f32 %v1766_v33, %v1738_v28 }
 0x15c   : > { %v8355_v44 = vpop.f32.mrf.mxu0  ;;  %v1740_v62 = vpop.f32.mrf.mxu2 }
 0x15d   : > { %v8357_v24 = vpop.f32.mrf.mxu1  ;;  %v1769_v34 = vpop.f32.mrf.mxu3  ;;  %v1685_v42 = vadd.f32 %v8355_v44, %v1656_v19  ;;  %v7049_v19 = vld [vmem:[%s11291_s23 + $0x20] sm:$0xff] }
 0x15f   : > { %v1714_v8 = vadd.f32 %v8357_v24, %v1685_v42  ;;  %v1661_v24 = vadd.f32 %v8168_v38, %v8348_v1 }
 0x164   : > { %v1687_v51 = vpop.f32.mrf.mxu0  ;;  %v1742_v18 = vpop.f32.mrf.mxu2 }
 0x165   : > { %v1716_v6 = vpop.f32.mrf.mxu1  ;;  %v1688_v63 = vadd.f32 %v1687_v51, %v1659_v54  ;;  %v1741_v54 = vadd.f32 %v1740_v62, %v8350_v2  ;;  %v1771_v5 = vpop.f32.mrf.mxu3  ;;  %v1743_v0 = vadd.f32 %v1742_v18, %v1714_v8 }
 0x167   : > { %v8363_v9 = vadd.f32 %v1716_v6, %v1688_v63  ;;  %v1770_v40 = vadd.f32 %v1769_v34, %v1741_v54 }
 0x16c   : > { %v8368_v13 = vpop.f32.mrf.mxu0  ;;  %v8377_v56 = vpop.f32.mrf.mxu2 }
 0x16d   : > { %v8370_v14 = vpop.f32.mrf.mxu1  ;;  %v1774_v52 = vpop.f32.mrf.mxu3 }
 0x174   : > { %v1788_v3 = vpop.f32.mrf.mxu0  ;;  %v1747_v15 = vpop.f32.mrf.mxu2 }
 0x175   : > { %v1817_v25 = vpop.f32.mrf.mxu1  ;;  %v1789_v4 = vadd.f32 %v1788_v3, %v1760_v30 }
 0x177   : > { %v1818_v46 = vadd.f32 %v1817_v25, %v1789_v4  ;;  %v1772_v25 = vadd.f32 %v1771_v5, %v1743_v0 }
 0x179   : > { %v1845_v61 = vmax.f32 %v1818_v46, 0.0 }
 0x17c   : > { %v1790_v12 = vpop.f32.mrf.mxu0 }
 0x17d   : > { %v1819_v57 = vpop.f32.mrf.mxu1  ;;  %v1791_v37 = vadd.f32 %v1790_v12, %v1762_v53  ;;  %v1690_v53 = vadd.f32 %v8368_v13, %v1661_v24 }
 0x17f   : > { %v1820_v17 = vadd.f32 %v1819_v57, %v1791_v37  ;;  %v1746_v57 = vadd.f32 %v8377_v56, %v8363_v9  ;;  %v7052_v56 = vld [vmem:[%s11291_s23 + $0x38] sm:$0xff] }
 0x180   : > { %2229 = vmatpush.bf16.msra.mxu2 %v7052_v56  ;;  %2258 = vmatpush.bf16.msra.mxu3 %v7052_v56 }
 0x181   : > { %v1846_v39 = vmax.f32 %v1820_v17, 0.0  ;;  %v1719_v17 = vadd.f32 %v8370_v14, %v1690_v53  ;;  %v1775_v38 = vadd.f32 %v1774_v52, %v1746_v57 }
 0x183   : > { %v1857_v58 = vpack.c.bf16 %v1846_v39, %v1845_v61  ;;  %v1748_v1 = vadd.f32 %v1747_v15, %v1719_v17  ;;  %v1776_v39 = vpop.f32.mrf.mxu3  ;;  %v7051_v15 = vld [vmem:[%s11291_s23 + $0x30] sm:$0xff] }
 0x184   : > { %v1793_v7 = vpop.f32.mrf.mxu0  ;;  %2230 = vmatpush.bf16.msra.mxu2 %v7051_v15  ;;  %2259 = vmatpush.bf16.msra.mxu3 %v7051_v15  ;;  %v7059_v15 = vld [vmem:[%s11292_s1 + $0x30] sm:$0xff] }
 0x185   : > { %v1822_v43 = vpop.f32.mrf.mxu1  ;;  %1966 = vmatmul.bf16.vlgmr.msrb.gmra.mxu3 %v1857_v58  ;;  %v1794_v41 = vadd.f32 %v1793_v7, %v1765_v16 }
 0x187   : > { %v1823_v23 = vadd.f32 %v1822_v43, %v1794_v41  ;;  %v1777_v43 = vadd.f32 %v1776_v39, %v1748_v1 }
 0x189   : > { %v1847_v55 = vmax.f32 %v1823_v23, 0.0 }
 0x18c   : > { %v1795_v48 = vpop.f32.mrf.mxu0 }
 0x18d   : > { %v1824_v20 = vpop.f32.mrf.mxu1  ;;  %v1796_v47 = vadd.f32 %v1795_v48, %v1767_v35  ;;  %v7050_v48 = vld [vmem:[%s11291_s23 + $0x28] sm:$0xff] }
 0x18e   : > { %v1938_v49 = vpop.f32.mrf.mxu2  ;;  %2231 = vmatpush.bf16.msra.mxu2 %v7050_v48  ;;  %2260 = vmatpush.bf16.msra.mxu3 %v7050_v48 }
 0x18f   : > { %v1825_v36 = vadd.f32 %v1824_v20, %v1796_v47  ;;  %v1939_v51 = vadd.f32 %v8388_v32, %v1938_v49 }
 0x191   : > { %v1848_v27 = vmax.f32 %v1825_v36, 0.0  ;;  %v1987_v21 = vmax.f32 %v1939_v51, 0.0 }
 0x192   : > { %2232 = vmatpush.bf16.msra.mxu2 %v7049_v19  ;;  %2261 = vmatpush.bf16.msra.mxu3 %v7049_v19 }
 0x193   : > { %v1858_v45 = vpack.c.bf16 %v1848_v27, %v1847_v55  ;;  %v7048_v27 = vld [vmem:[%s11291_s23 + $0x18] sm:$0xff] }
 0x194   : > { %v1798_v6 = vpop.f32.mrf.mxu0 }
 0x195   : > { %v1827_v63 = vpop.f32.mrf.mxu1  ;;  %1971 = vmatmul.bf16.gmra.mxu3 %v1858_v45  ;;  %v1799_v22 = vadd.f32 %v1798_v6, %v1770_v40  ;;  %v7045_v40 = vld [vmem:[%s11291_s23] sm:$0xff] }
 0x196   : > { %v1940_v10 = vpop.f32.mrf.mxu2  ;;  %2233 = vmatpush.bf16.msra.mxu2 %v7048_v27  ;;  %2262 = vmatpush.bf16.msra.mxu3 %v7048_v27 }
 0x197   : > { %v1941_v31 = vadd.f32 %v8388_v32, %v1940_v10  ;;  %v1828_v26 = vadd.f32 %v1827_v63, %v1799_v22  ;;  %v7047_v10 = vld [vmem:[%s11291_s23 + $0x10] sm:$0xff] }
 0x199   : > { %v1988_v44 = vmax.f32 %v1941_v31, 0.0  ;;  %v1849_v12 = vmax.f32 %v1828_v26, 0.0  ;;  %v7046_v31 = vld [vmem:[%s11291_s23 + $0x8] sm:$0xff] }
 0x19a   : > { %2234 = vmatpush.bf16.msra.mxu2 %v7047_v10  ;;  %2263 = vmatpush.bf16.msra.mxu3 %v7047_v10  ;;  %v7056_v10 = vld [vmem:[%s11292_s1 + $0x18] sm:$0xff] }
 0x19b   : > { %v2003_v3 = vpack.c.bf16 %v1988_v44, %v1987_v21 }
 0x19c   : > { %v1800_v2 = vpop.f32.mrf.mxu0 }
 0x19d   : > { %2087 = vmatmul.bf16.vlgmr.msra.gmra.mxu0 %v2003_v3  ;;  %v1829_v62 = vpop.f32.mrf.mxu1  ;;  %v1801_v29 = vadd.f32 %v1800_v2, %v1772_v25 }
 0x19e   : > { %v1943_v30 = vpop.f32.mrf.mxu2  ;;  %2235 = vmatpush.bf16.msra.mxu2 %v7046_v31  ;;  %2264 = vmatpush.bf16.msra.mxu3 %v7046_v31  ;;  %v7055_v31 = vld [vmem:[%s11292_s1 + $0x10] sm:$0xff] }
 0x19f   : > { %v1830_v4 = vadd.f32 %v1829_v62, %v1801_v29  ;;  %v1944_v37 = vadd.f32 %v8388_v32, %v1943_v30  ;;  %v8436_v29 = vld [vmem:[%s11259_s13] ss:$0 sm:$0xff] }
 0x1a1   : > { %v1850_v18 = vmax.f32 %v1830_v4, 0.0  ;;  %v1989_v13 = vmax.f32 %v1944_v37, 0.0 }
 0x1a2   : > { %2236 = vmatpush.bf16.msra.mxu2 %v7045_v40  ;;  %2265 = vmatpush.bf16.msra.mxu3 %v7045_v40  ;;  %v7054_v40 = vld [vmem:[%s11292_s1 + $0x8] sm:$0xff] }
 0x1a3   : > { %v1859_v46 = vpack.c.bf16 %v1850_v18, %v1849_v12 }
 0x1a4   : > { %v1803_v50 = vpop.f32.mrf.mxu0 }
 0x1a5   : > { %v1832_v33 = vpop.f32.mrf.mxu1  ;;  %1976 = vmatmul.bf16.gmra.mxu3 %v1859_v46  ;;  %v1804_v58 = vadd.f32 %v1803_v50, %v1775_v38 }
 0x1a6   : > { %v1945_v59 = vpop.f32.mrf.mxu2 }
 0x1a7   : > { %v1946_v61 = vadd.f32 %v8388_v32, %v1945_v59  ;;  %v1833_v11 = vadd.f32 %v1832_v33, %v1804_v58 }
 0x1a9   : > { %v1990_v60 = vmax.f32 %v1946_v61, 0.0  ;;  %v1851_v41 = vmax.f32 %v1833_v11, 0.0 }
 0x1ab   : > { %v2004_v7 = vpack.c.bf16 %v1990_v60, %v1989_v13 }
 0x1ac   : > { %v1805_v9 = vpop.f32.mrf.mxu0 }
 0x1ad   : > { %2092 = vmatmul.bf16.gmra.mxu0 %v2004_v7  ;;  %v1806_v14 = vadd.f32 %v1805_v9, %v1777_v43  ;;  %v1834_v28 = vpop.f32.mrf.mxu1 }
 0x1ae   : > { %v1948_v16 = vpop.f32.mrf.mxu2 }
 0x1af   : > { %v1835_v34 = vadd.f32 %v1834_v28, %v1806_v14  ;;  %v1949_v23 = vadd.f32 %v8388_v32, %v1948_v16  ;;  %v7060_v16 = vld [vmem:[%s11292_s1 + $0x38] sm:$0xff] }
 0x1b0   : > { %2379 = vmatpush.bf16.msrb.mxu0 %v7060_v16  ;;  %2408 = vmatpush.bf16.msrb.mxu1 %v7060_v16 }
 0x1b1   : > { %v1852_v35 = vmax.f32 %v1835_v34, 0.0  ;;  %v1991_v36 = vmax.f32 %v1949_v23, 0.0  ;;  %v7058_v34 = vld [vmem:[%s11292_s1 + $0x28] sm:$0xff] }
 0x1b3   : > { %v1860_v20 = vpack.c.bf16 %v1852_v35, %v1851_v41 }
 0x1b4   : > { %2380 = vmatpush.bf16.msrb.mxu0 %v7059_v15  ;;  %2409 = vmatpush.bf16.msrb.mxu1 %v7059_v15  ;;  %v7068_v15 = vld [vmem:[%s11252_s6 + $0x38] sm:$0xff] }
 0x1b5   : > { %1981 = vmatmul.bf16.gmra.mxu3 %v1860_v20  ;;  %2513 = vmatpush.bf16.msrb.mxu2 %v7068_v15 }
 0x1b6   : > { %v1950_v47 = vpop.f32.mrf.mxu2  ;;  %2542 = vmatpush.bf16.msrb.mxu3 %v7068_v15 }
 0x1b7   : > { %v1951_v49 = vadd.f32 %v8388_v32, %v1950_v47 }
 0x1b8   : > { %2381 = vmatpush.bf16.msrb.mxu0 %v7058_v34  ;;  %2410 = vmatpush.bf16.msrb.mxu1 %v7058_v34 }
 0x1b9   : > { %v1992_v42 = vmax.f32 %v1951_v49, 0.0  ;;  %v7057_v49 = vld [vmem:[%s11292_s1 + $0x20] sm:$0xff] }
 0x1bb   : > { %v2005_v55 = vpack.c.bf16 %v1992_v42, %v1991_v36 }
 0x1bc   : > { %2382 = vmatpush.bf16.msrb.mxu0 %v7057_v49  ;;  %2411 = vmatpush.bf16.msrb.mxu1 %v7057_v49  ;;  %v7066_v49 = vld [vmem:[%s11252_s6 + $0x28] sm:$0xff] }
 0x1bd   : > { %2097 = vmatmul.bf16.gmra.mxu0 %v2005_v55 }
 0x1be   : > { %v1953_v54 = vpop.f32.mrf.mxu2 }
 0x1bf   : > { %v1954_v5 = vadd.f32 %v8388_v32, %v1953_v54 }
 0x1c0   : > { %2383 = vmatpush.bf16.msrb.mxu0 %v7056_v10  ;;  %2412 = vmatpush.bf16.msrb.mxu1 %v7056_v10 }
 0x1c1   : > { %v1993_v6 = vmax.f32 %v1954_v5, 0.0 }
 0x1c4   : > { %2384 = vmatpush.bf16.msrb.mxu0 %v7055_v31  ;;  %2413 = vmatpush.bf16.msrb.mxu1 %v7055_v31 }
 0x1c6   : > { %v1955_v45 = vpop.f32.mrf.mxu2 }
 0x1c7   : > { %v1956_v51 = vadd.f32 %v8388_v32, %v1955_v45 }
 0x1c8   : > { %2385 = vmatpush.bf16.msrb.mxu0 %v7054_v40  ;;  %2414 = vmatpush.bf16.msrb.mxu1 %v7054_v40  ;;  %v7063_v40 = vld [vmem:[%s11252_s6 + $0x10] sm:$0xff] }
 0x1c9   : > { %v1994_v63 = vmax.f32 %v1956_v51, 0.0 }
 0x1cb   : > { %v2006_v8 = vpack.c.bf16 %v1994_v63, %v1993_v6 }
 0x1cd   : > { %2102 = vmatmul.bf16.gmra.mxu0 %v2006_v8 }
 0x208   : > { %v1967_v0 = vpop.f32.mrf.mxu3 }
 0x209   : > { %v1968_v21 = vadd.f32 %v8388_v32, %v1967_v0  ;;  %v7053_v0 = vld [vmem:[%s11292_s1] sm:$0xff] }
 0x20a   : > { %2386 = vmatpush.bf16.msrb.mxu0 %v7053_v0  ;;  %2415 = vmatpush.bf16.msrb.mxu1 %v7053_v0  ;;  %v7062_v0 = vld [vmem:[%s11252_s6 + $0x8] sm:$0xff] }
 0x20b   : > { %v1995_v3 = vmax.f32 %v1968_v21, 0.0 }
 0x210   : > { %v1969_v44 = vpop.f32.mrf.mxu3 }
 0x211   : > { %v1970_v22 = vadd.f32 %v8388_v32, %v1969_v44 }
 0x213   : > { %v1996_v25 = vmax.f32 %v1970_v22, 0.0 }
 0x215   : > { %v2007_v2 = vpack.c.bf16 %v1996_v25, %v1995_v3 }
 0x217   : > { %2116 = vmatmul.bf16.vlgmr.msra.gmra.mxu1 %v2007_v2 }
 0x218   : > { %v1972_v62 = vpop.f32.mrf.mxu3 }
 0x219   : > { %v1973_v30 = vadd.f32 %v8388_v32, %v1972_v62 }
 0x21a   : > { %v2088_v26 = vpop.f32.mrf.mxu0 }
 0x21b   : > { %v2089_v52 = vadd.f32 %v8436_v29, %v2088_v26  ;;  %v1997_v18 = vmax.f32 %v1973_v30, 0.0 }
 0x21d   : > { %v2137_v46 = vmax.f32 %v2089_v52, 0.0 }
 0x220   : > { %v1974_v24 = vpop.f32.mrf.mxu3 }
 0x221   : > { %v1975_v4 = vadd.f32 %v8388_v32, %v1974_v24 }
 0x222   : > { %v2090_v53 = vpop.f32.mrf.mxu0 }
 0x223   : > { %v2091_v12 = vadd.f32 %v8436_v29, %v2090_v53  ;;  %v1998_v57 = vmax.f32 %v1975_v4, 0.0  ;;  %v8483_v53 = vld [vmem:[%s11260_s14] ss:$0 sm:$0xff] }
 0x225   : > { %v2138_v37 = vmax.f32 %v2091_v12, 0.0  ;;  %v2008_v50 = vpack.c.bf16 %v1998_v57, %v1997_v18 }
 0x227   : > { %v2153_v33 = vpack.c.bf16 %v2138_v37, %v2137_v46  ;;  %2121 = vmatmul.bf16.gmra.mxu1 %v2008_v50 }
 0x228   : > { %v1977_v17 = vpop.f32.mrf.mxu3 }
 0x229   : > { %2237 = vmatmul.bf16.vlgmr.msra.gmra.mxu2 %v2153_v33  ;;  %v1978_v61 = vadd.f32 %v8388_v32, %v1977_v17 }
 0x22a   : > { %v2093_v59 = vpop.f32.mrf.mxu0 }
 0x22b   : > { %v2094_v38 = vadd.f32 %v8436_v29, %v2093_v59  ;;  %v1999_v58 = vmax.f32 %v1978_v61, 0.0 }
 0x22d   : > { %v2139_v43 = vmax.f32 %v2094_v38, 0.0 }
 0x230   : > { %v1979_v1 = vpop.f32.mrf.mxu3 }
 0x231   : > { %v1980_v39 = vadd.f32 %v8388_v32, %v1979_v1 }
 0x232   : > { %v2095_v13 = vpop.f32.mrf.mxu0 }
 0x233   : > { %v2096_v60 = vadd.f32 %v8436_v29, %v2095_v13  ;;  %v2000_v7 = vmax.f32 %v1980_v39, 0.0 }
 0x235   : > { %v2140_v9 = vmax.f32 %v2096_v60, 0.0  ;;  %v2009_v56 = vpack.c.bf16 %v2000_v7, %v1999_v58 }
 0x237   : > { %v2154_v11 = vpack.c.bf16 %v2140_v9, %v2139_v43  ;;  %2126 = vmatmul.bf16.gmra.mxu1 %v2009_v56 }
 0x238   : > { %v1982_v14 = vpop.f32.mrf.mxu3 }
 0x239   : > { %2242 = vmatmul.bf16.gmra.mxu2 %v2154_v11  ;;  %v1983_v41 = vadd.f32 %v8388_v32, %v1982_v14 }
 0x23a   : > { %v2098_v28 = vpop.f32.mrf.mxu0 }
 0x23b   : > { %v2099_v35 = vadd.f32 %v8436_v29, %v2098_v28  ;;  %v2001_v19 = vmax.f32 %v1983_v41, 0.0 }
 0x23d   : > { %v2141_v42 = vmax.f32 %v2099_v35, 0.0 }
 0x240   : > { %v1984_v48 = vpop.f32.mrf.mxu3 }
 0x241   : > { %v1985_v20 = vadd.f32 %v8388_v32, %v1984_v48  ;;  %v7067_v48 = vld [vmem:[%s11252_s6 + $0x30] sm:$0xff] }
 0x242   : > { %v2100_v23 = vpop.f32.mrf.mxu0  ;;  %2514 = vmatpush.bf16.msrb.mxu2 %v7067_v48  ;;  %2543 = vmatpush.bf16.msrb.mxu3 %v7067_v48  ;;  %v7073_v48 = vld [vmem:[%s11253_s7 + $0x20] sm:$0xff] }
 0x243   : > { %v2101_v47 = vadd.f32 %v8436_v29, %v2100_v23  ;;  %v2002_v36 = vmax.f32 %v1985_v20, 0.0 }
 0x245   : > { %v2142_v55 = vmax.f32 %v2101_v47, 0.0  ;;  %v2010_v27 = vpack.c.bf16 %v2002_v36, %v2001_v19 }
 0x246   : > { %2515 = vmatpush.bf16.msrb.mxu2 %v7066_v49  ;;  %2544 = vmatpush.bf16.msrb.mxu3 %v7066_v49 }
 0x247   : > { %v2155_v54 = vpack.c.bf16 %v2142_v55, %v2141_v42  ;;  %2131 = vmatmul.bf16.gmra.mxu1 %v2010_v27 }
 0x249   : > { %2247 = vmatmul.bf16.gmra.mxu2 %v2155_v54 }
 0x24a   : > { %v2103_v32 = vpop.f32.mrf.mxu0 }
 0x24b   : > { %v2104_v5 = vadd.f32 %v8436_v29, %v2103_v32 }
 0x24d   : > { %v2143_v6 = vmax.f32 %v2104_v5, 0.0  ;;  %v7064_v5 = vld [vmem:[%s11252_s6 + $0x18] sm:$0xff] }
 0x252   : > { %v2105_v45 = vpop.f32.mrf.mxu0 }
 0x253   : > { %v2106_v51 = vadd.f32 %v8436_v29, %v2105_v45 }
 0x255   : > { %v2144_v63 = vmax.f32 %v2106_v51, 0.0 }
 0x257   : > { %v2156_v8 = vpack.c.bf16 %v2144_v63, %v2143_v6 }
 0x259   : > { %2252 = vmatmul.bf16.gmra.mxu2 %v2156_v8 }
 0x294   : > { %v2117_v21 = vpop.f32.mrf.mxu1 }
 0x295   : > { %v2118_v44 = vadd.f32 %v8436_v29, %v2117_v21  ;;  %v7061_v21 = vld [vmem:[%s11252_s6] sm:$0xff] }
 0x297   : > { %v2145_v25 = vmax.f32 %v2118_v44, 0.0 }
 0x29c   : > { %v2119_v22 = vpop.f32.mrf.mxu1 }
 0x29d   : > { %v2120_v3 = vadd.f32 %v8436_v29, %v2119_v22 }
 0x29f   : > { %v2146_v2 = vmax.f32 %v2120_v3, 0.0 }
 0x2a1   : > { %v2157_v62 = vpack.c.bf16 %v2146_v2, %v2145_v25 }
 0x2a3   : > { %2266 = vmatmul.bf16.vlgmr.msra.gmra.mxu3 %v2157_v62 }
 0x2a4   : > { %v2122_v26 = vpop.f32.mrf.mxu1 }
 0x2a5   : > { %v2123_v30 = vadd.f32 %v8436_v29, %v2122_v26 }
 0x2a7   : > { %v2147_v12 = vmax.f32 %v2123_v30, 0.0 }
 0x2ac   : > { %v2238_v52 = vpop.f32.mrf.mxu2  ;;  %v2124_v24 = vpop.f32.mrf.mxu1 }
 0x2ad   : > { %v2125_v4 = vadd.f32 %v8436_v29, %v2124_v24  ;;  %v2239_v46 = vadd.f32 %v8483_v53, %v2238_v52  ;;  %v8526_v24 = vld [vmem:[%s11261_s15] ss:$0 sm:$0xff] }
 0x2af   : > { %v2148_v18 = vmax.f32 %v2125_v4, 0.0  ;;  %v2287_v17 = vmax.f32 %v2239_v46, 0.0 }
 0x2b1   : > { %v2158_v57 = vpack.c.bf16 %v2148_v18, %v2147_v12 }
 0x2b3   : > { %2271 = vmatmul.bf16.gmra.mxu3 %v2158_v57 }
 0x2b4   : > { %v2240_v37 = vpop.f32.mrf.mxu2  ;;  %v2127_v33 = vpop.f32.mrf.mxu1 }
 0x2b5   : > { %v2241_v50 = vadd.f32 %v8483_v53, %v2240_v37  ;;  %v2128_v38 = vadd.f32 %v8436_v29, %v2127_v33 }
 0x2b7   : > { %v2288_v59 = vmax.f32 %v2241_v50, 0.0  ;;  %v2149_v60 = vmax.f32 %v2128_v38, 0.0 }
 0x2b9   : > { %v2303_v61 = vpack.c.bf16 %v2288_v59, %v2287_v17 }
 0x2bb   : > { %2387 = vmatmul.bf16.vlgmr.msrb.gmra.mxu0 %v2303_v61 }
 0x2bc   : > { %v2243_v1 = vpop.f32.mrf.mxu2  ;;  %v2129_v39 = vpop.f32.mrf.mxu1 }
 0x2bd   : > { %v2130_v13 = vadd.f32 %v8436_v29, %v2129_v39  ;;  %v2244_v43 = vadd.f32 %v8483_v53, %v2243_v1 }
 0x2bf   : > { %v2150_v58 = vmax.f32 %v2130_v13, 0.0  ;;  %v2289_v14 = vmax.f32 %v2244_v43, 0.0 }
 0x2c1   : > { %v2159_v7 = vpack.c.bf16 %v2150_v58, %v2149_v60 }
 0x2c3   : > { %2276 = vmatmul.bf16.gmra.mxu3 %v2159_v7 }
 0x2c4   : > { %v2245_v9 = vpop.f32.mrf.mxu2  ;;  %v2132_v11 = vpop.f32.mrf.mxu1 }
 0x2c5   : > { %v2246_v56 = vadd.f32 %v8483_v53, %v2245_v9  ;;  %v2133_v34 = vadd.f32 %v8436_v29, %v2132_v11 }
 0x2c7   : > { %v2290_v16 = vmax.f32 %v2246_v56, 0.0  ;;  %v2151_v23 = vmax.f32 %v2133_v34, 0.0  ;;  %v7074_v34 = vld [vmem:[%s11253_s7 + $0x28] sm:$0xff] }
 0x2c9   : > { %v2304_v28 = vpack.c.bf16 %v2290_v16, %v2289_v14  ;;  %v7076_v14 = vld [vmem:[%s11253_s7 + $0x38] sm:$0xff] }
 0x2ca   : > { %2663 = vmatpush.bf16.msra.mxu0 %v7076_v14  ;;  %2692 = vmatpush.bf16.msra.mxu1 %v7076_v14 }
 0x2cb   : > { %2392 = vmatmul.bf16.gmra.mxu0 %v2304_v28  ;;  %v7075_v28 = vld [vmem:[%s11253_s7 + $0x30] sm:$0xff] }
 0x2cc   : > { %v2248_v41 = vpop.f32.mrf.mxu2  ;;  %v2134_v35 = vpop.f32.mrf.mxu1 }
 0x2cd   : > { %v2135_v20 = vadd.f32 %v8436_v29, %v2134_v35  ;;  %v2249_v36 = vadd.f32 %v8483_v53, %v2248_v41  ;;  %v7065_v29 = vld [vmem:[%s11252_s6 + $0x20] sm:$0xff] }
 0x2ce   : > { %2516 = vmatpush.bf16.msrb.mxu2 %v7065_v29  ;;  %2545 = vmatpush.bf16.msrb.mxu3 %v7065_v29 }
 0x2cf   : > { %v2152_v47 = vmax.f32 %v2135_v20, 0.0  ;;  %v2291_v27 = vmax.f32 %v2249_v36, 0.0  ;;  %2664 = vmatpush.bf16.msra.mxu0 %v7075_v28  ;;  %2693 = vmatpush.bf16.msra.mxu1 %v7075_v28 }
 0x2d1   : > { %v2160_v19 = vpack.c.bf16 %v2152_v47, %v2151_v23 }
 0x2d2   : > { %2517 = vmatpush.bf16.msrb.mxu2 %v7064_v5  ;;  %2546 = vmatpush.bf16.msrb.mxu3 %v7064_v5  ;;  %v7072_v5 = vld [vmem:[%s11253_s7 + $0x18] sm:$0xff] }
 0x2d3   : > { %2281 = vmatmul.bf16.gmra.mxu3 %v2160_v19  ;;  %2665 = vmatpush.bf16.msra.mxu0 %v7074_v34 }
 0x2d4   : > { %v2250_v42 = vpop.f32.mrf.mxu2  ;;  %2694 = vmatpush.bf16.msra.mxu1 %v7074_v34  ;;  %v7081_v34 = vld [vmem:[%s11254_s8 + $0x20] sm:$0xff] }
 0x2d5   : > { %v2251_v55 = vadd.f32 %v8483_v53, %v2250_v42 }
 0x2d6   : > { %2518 = vmatpush.bf16.msrb.mxu2 %v7063_v40  ;;  %2547 = vmatpush.bf16.msrb.mxu3 %v7063_v40 }
 0x2d7   : > { %v2292_v54 = vmax.f32 %v2251_v55, 0.0  ;;  %2666 = vmatpush.bf16.msra.mxu0 %v7073_v48 }
 0x2d8   : > { %2695 = vmatpush.bf16.msra.mxu1 %v7073_v48  ;;  %v7080_v48 = vld [vmem:[%s11254_s8 + $0x18] sm:$0xff] }
 0x2d9   : > { %v2305_v32 = vpack.c.bf16 %v2292_v54, %v2291_v27 }
 0x2da   : > { %2519 = vmatpush.bf16.msrb.mxu2 %v7062_v0  ;;  %2548 = vmatpush.bf16.msrb.mxu3 %v7062_v0 }
 0x2db   : > { %2397 = vmatmul.bf16.gmra.mxu0 %v2305_v32 }
 0x2dc   : > { %v2253_v45 = vpop.f32.mrf.mxu2  ;;  %2667 = vmatpush.bf16.msra.mxu0 %v7072_v5  ;;  %2696 = vmatpush.bf16.msra.mxu1 %v7072_v5 }
 0x2dd   : > { %v2254_v51 = vadd.f32 %v8483_v53, %v2253_v45  ;;  %v7071_v45 = vld [vmem:[%s11253_s7 + $0x10] sm:$0xff] }
 0x2de   : > { %2520 = vmatpush.bf16.msrb.mxu2 %v7061_v21  ;;  %2549 = vmatpush.bf16.msrb.mxu3 %v7061_v21 }
 0x2df   : > { %v2293_v8 = vmax.f32 %v2254_v51, 0.0  ;;  %v7070_v51 = vld [vmem:[%s11253_s7 + $0x8] sm:$0xff] }
 0x2e0   : > { %2668 = vmatpush.bf16.msra.mxu0 %v7071_v45  ;;  %2697 = vmatpush.bf16.msra.mxu1 %v7071_v45 }
 0x2e4   : > { %v2255_v6 = vpop.f32.mrf.mxu2  ;;  %2669 = vmatpush.bf16.msra.mxu0 %v7070_v51  ;;  %2698 = vmatpush.bf16.msra.mxu1 %v7070_v51 }
 0x2e5   : > { %v2256_v63 = vadd.f32 %v8483_v53, %v2255_v6  ;;  %v7069_v6 = vld [vmem:[%s11253_s7] sm:$0xff] }
 0x2e7   : > { %v2294_v10 = vmax.f32 %v2256_v63, 0.0 }
 0x2e8   : > { %2670 = vmatpush.bf16.msra.mxu0 %v7069_v6  ;;  %2699 = vmatpush.bf16.msra.mxu1 %v7069_v6 }
 0x2e9   : > { %v2306_v31 = vpack.c.bf16 %v2294_v10, %v2293_v8 }
 0x2eb   : > { %2402 = vmatmul.bf16.gmra.mxu0 %v2306_v31 }
 0x326   : > { %v2267_v44 = vpop.f32.mrf.mxu3 }
 0x327   : > { %v2268_v22 = vadd.f32 %v8483_v53, %v2267_v44  ;;  %v8571_v44 = vld [vmem:[%s11262_s16] ss:$0 sm:$0xff] }
 0x329   : > { %v2295_v2 = vmax.f32 %v2268_v22, 0.0 }
 0x32e   : > { %v2269_v3 = vpop.f32.mrf.mxu3 }
 0x32f   : > { %v2270_v25 = vadd.f32 %v8483_v53, %v2269_v3 }
 0x331   : > { %v2296_v62 = vmax.f32 %v2270_v25, 0.0 }
 0x333   : > { %v2307_v26 = vpack.c.bf16 %v2296_v62, %v2295_v2 }
 0x335   : > { %2416 = vmatmul.bf16.vlgmr.msrb.gmra.mxu1 %v2307_v26 }
 0x336   : > { %v2272_v30 = vpop.f32.mrf.mxu3 }
 0x337   : > { %v2273_v4 = vadd.f32 %v8483_v53, %v2272_v30 }
 0x338   : > { %v2388_v52 = vpop.f32.mrf.mxu0 }
 0x339   : > { %v2389_v46 = vadd.f32 %v8526_v24, %v2388_v52  ;;  %v2297_v50 = vmax.f32 %v2273_v4, 0.0 }
 0x33e   : > { %v2274_v12 = vpop.f32.mrf.mxu3 }
 0x33f   : > { %v2275_v18 = vadd.f32 %v8483_v53, %v2274_v12 }
 0x340   : > { %v2390_v57 = vpop.f32.mrf.mxu0 }
 0x341   : > { %v2391_v37 = vadd.f32 %v8526_v24, %v2390_v57  ;;  %v2298_v33 = vmax.f32 %v2275_v18, 0.0 }
 0x343   : > { %v2437_v17 = vpack.c.bf16 %v2391_v37, %v2389_v46  ;;  %v2308_v59 = vpack.c.bf16 %v2298_v33, %v2297_v50 }
 0x345   : > { %2521 = vmatmul.bf16.vlgmr.msrb.gmra.mxu2 %v2437_v17  ;;  %2421 = vmatmul.bf16.gmra.mxu1 %v2308_v59 }
 0x346   : > { %v2277_v61 = vpop.f32.mrf.mxu3 }
 0x347   : > { %v2278_v1 = vadd.f32 %v8483_v53, %v2277_v61 }
 0x348   : > { %v2393_v38 = vpop.f32.mrf.mxu0 }
 0x349   : > { %v2394_v58 = vadd.f32 %v8526_v24, %v2393_v38  ;;  %v2299_v43 = vmax.f32 %v2278_v1, 0.0 }
 0x34e   : > { %v2279_v39 = vpop.f32.mrf.mxu3 }
 0x34f   : > { %v2280_v13 = vadd.f32 %v8483_v53, %v2279_v39 }
 0x350   : > { %v2395_v60 = vpop.f32.mrf.mxu0 }
 0x351   : > { %v2396_v7 = vadd.f32 %v8526_v24, %v2395_v60  ;;  %v2300_v9 = vmax.f32 %v2280_v13, 0.0  ;;  %v7084_v60 = vld [vmem:[%s11254_s8 + $0x38] sm:$0xff] }
 0x352   : > { %2813 = vmatpush.bf16.msra.mxu2 %v7084_v60  ;;  %2842 = vmatpush.bf16.msra.mxu3 %v7084_v60  ;;  %v7092_v60 = vld [vmem:[%s11255_s9 + $0x38] sm:$0xff] }
 0x353   : > { %v2438_v56 = vpack.c.bf16 %v2396_v7, %v2394_v58  ;;  %v2309_v11 = vpack.c.bf16 %v2300_v9, %v2299_v43  ;;  %v7083_v7 = vld [vmem:[%s11254_s8 + $0x30] sm:$0xff]  ;;  %2963 = vmatpush.bf16.msrb.mxu0 %v7092_v60  ;;  %2992 = vmatpush.bf16.msrb.mxu1 %v7092_v60 }
 0x355   : > { %2526 = vmatmul.bf16.gmra.mxu2 %v2438_v56  ;;  %2426 = vmatmul.bf16.gmra.mxu1 %v2309_v11  ;;  %v7082_v11 = vld [vmem:[%s11254_s8 + $0x28] sm:$0xff] }
 0x356   : > { %v2282_v16 = vpop.f32.mrf.mxu3  ;;  %2814 = vmatpush.bf16.msra.mxu2 %v7083_v7  ;;  %2843 = vmatpush.bf16.msra.mxu3 %v7083_v7  ;;  %v7091_v7 = vld [vmem:[%s11255_s9 + $0x30] sm:$0xff] }
 0x357   : > { %v2283_v41 = vadd.f32 %v8483_v53, %v2282_v16  ;;  %2964 = vmatpush.bf16.msrb.mxu0 %v7091_v7  ;;  %2993 = vmatpush.bf16.msrb.mxu1 %v7091_v7  ;;  %v6896_v7 = vld [vmem:[%s11256_s10 + $0x188] sm:$0xf] }
 0x358   : > { %v2398_v15 = vpop.f32.mrf.mxu0 }
 0x359   : > { %v2399_v47 = vadd.f32 %v8526_v24, %v2398_v15  ;;  %v2301_v19 = vmax.f32 %v2283_v41, 0.0 }
 0x35a   : > { %2815 = vmatpush.bf16.msra.mxu2 %v7082_v11  ;;  %2844 = vmatpush.bf16.msra.mxu3 %v7082_v11 }
 0x35e   : > { %v2284_v35 = vpop.f32.mrf.mxu3  ;;  %2816 = vmatpush.bf16.msra.mxu2 %v7081_v34  ;;  %2845 = vmatpush.bf16.msra.mxu3 %v7081_v34 }
 0x35f   : > { %v2285_v20 = vadd.f32 %v8483_v53, %v2284_v35 }
 0x360   : > { %v2400_v23 = vpop.f32.mrf.mxu0 }
 0x361   : > { %v2401_v49 = vadd.f32 %v8526_v24, %v2400_v23  ;;  %v2302_v36 = vmax.f32 %v2285_v20, 0.0 }
 0x362   : > { %2817 = vmatpush.bf16.msra.mxu2 %v7080_v48  ;;  %2846 = vmatpush.bf16.msra.mxu3 %v7080_v48 }
 0x363   : > { %v2439_v42 = vpack.c.bf16 %v2401_v49, %v2399_v47  ;;  %v2310_v55 = vpack.c.bf16 %v2302_v36, %v2301_v19 }
 0x365   : > { %2531 = vmatmul.bf16.gmra.mxu2 %v2439_v42  ;;  %2431 = vmatmul.bf16.gmra.mxu1 %v2310_v55  ;;  %v7079_v55 = vld [vmem:[%s11254_s8 + $0x10] sm:$0xff] }
 0x366   : > { %2818 = vmatpush.bf16.msra.mxu2 %v7079_v55  ;;  %2847 = vmatpush.bf16.msra.mxu3 %v7079_v55  ;;  %v7088_v55 = vld [vmem:[%s11255_s9 + $0x18] sm:$0xff] }
 0x368   : > { %v2403_v29 = vpop.f32.mrf.mxu0 }
 0x369   : > { %v2404_v54 = vadd.f32 %v8526_v24, %v2403_v29  ;;  %v7078_v29 = vld [vmem:[%s11254_s8 + $0x8] sm:$0xff] }
 0x36a   : > { %2819 = vmatpush.bf16.msra.mxu2 %v7078_v29  ;;  %2848 = vmatpush.bf16.msra.mxu3 %v7078_v29  ;;  %v7087_v29 = vld [vmem:[%s11255_s9 + $0x10] sm:$0xff] }
 0x370   : > { %v2405_v27 = vpop.f32.mrf.mxu0 }
 0x371   : > { %v2406_v32 = vadd.f32 %v8526_v24, %v2405_v27  ;;  %v7077_v27 = vld [vmem:[%s11254_s8] sm:$0xff] }
 0x372   : > { %2820 = vmatpush.bf16.msra.mxu2 %v7077_v27  ;;  %2849 = vmatpush.bf16.msra.mxu3 %v7077_v27  ;;  %v7086_v27 = vld [vmem:[%s11255_s9 + $0x8] sm:$0xff] }
 0x373   : > { %v2440_v53 = vpack.c.bf16 %v2406_v32, %v2404_v54 }
 0x375   : > { %2536 = vmatmul.bf16.gmra.mxu2 %v2440_v53 }
 0x3b2   : > { %v2417_v63 = vpop.f32.mrf.mxu1 }
 0x3b3   : > { %v2418_v10 = vadd.f32 %v8526_v24, %v2417_v63 }
 0x3ba   : > { %v2419_v8 = vpop.f32.mrf.mxu1 }
 0x3bb   : > { %v2420_v31 = vadd.f32 %v8526_v24, %v2419_v8 }
 0x3bd   : > { %v2441_v40 = vpack.c.bf16 %v2420_v31, %v2418_v10  ;;  %v8616_v10 = vld [vmem:[%s11263_s17] ss:$0 sm:$0xff] }
 0x3bf   : > { %2550 = vmatmul.bf16.vlgmr.msrb.gmra.mxu3 %v2441_v40 }
 0x3c2   : > { %v2422_v0 = vpop.f32.mrf.mxu1 }
 0x3c3   : > { %v2423_v3 = vadd.f32 %v8526_v24, %v2422_v0 }
 0x3c8   : > { %v2522_v21 = vpop.f32.mrf.mxu2 }
 0x3c9   : > { %v2523_v62 = vadd.f32 %v8571_v44, %v2522_v21 }
 0x3ca   : > { %v2424_v22 = vpop.f32.mrf.mxu1 }
 0x3cb   : > { %v2425_v25 = vadd.f32 %v8526_v24, %v2424_v22  ;;  %v2571_v52 = vmax.f32 %v2523_v62, 0.0 }
 0x3cd   : > { %v2442_v2 = vpack.c.bf16 %v2425_v25, %v2423_v3 }
 0x3cf   : > { %2555 = vmatmul.bf16.gmra.mxu3 %v2442_v2 }
 0x3d0   : > { %v2524_v26 = vpop.f32.mrf.mxu2 }
 0x3d1   : > { %v2525_v30 = vadd.f32 %v8571_v44, %v2524_v26 }
 0x3d2   : > { %v2427_v12 = vpop.f32.mrf.mxu1 }
 0x3d3   : > { %v2572_v4 = vmax.f32 %v2525_v30, 0.0  ;;  %v2428_v37 = vadd.f32 %v8526_v24, %v2427_v12 }
 0x3d5   : > { %v2587_v18 = vpack.c.bf16 %v2572_v4, %v2571_v52 }
 0x3d7   : > { %2671 = vmatmul.bf16.vlgmr.msra.gmra.mxu0 %v2587_v18 }
 0x3d8   : > { %v2527_v57 = vpop.f32.mrf.mxu2 }
 0x3d9   : > { %v2528_v17 = vadd.f32 %v8571_v44, %v2527_v57 }
 0x3da   : > { %v2429_v46 = vpop.f32.mrf.mxu1 }
 0x3db   : > { %v2430_v50 = vadd.f32 %v8526_v24, %v2429_v46  ;;  %v2573_v38 = vmax.f32 %v2528_v17, 0.0 }
 0x3dd   : > { %v2443_v33 = vpack.c.bf16 %v2430_v50, %v2428_v37 }
 0x3df   : > { %2560 = vmatmul.bf16.gmra.mxu3 %v2443_v33 }
 0x3e0   : > { %v2529_v59 = vpop.f32.mrf.mxu2 }
 0x3e1   : > { %v2530_v61 = vadd.f32 %v8571_v44, %v2529_v59 }
 0x3e2   : > { %v2432_v39 = vpop.f32.mrf.mxu1 }
 0x3e3   : > { %v2574_v1 = vmax.f32 %v2530_v61, 0.0  ;;  %v2433_v9 = vadd.f32 %v8526_v24, %v2432_v39 }
 0x3e5   : > { %v2588_v13 = vpack.c.bf16 %v2574_v1, %v2573_v38 }
 0x3e7   : > { %2676 = vmatmul.bf16.gmra.mxu0 %v2588_v13 }
 0x3e8   : > { %v2532_v58 = vpop.f32.mrf.mxu2 }
 0x3e9   : > { %v2533_v16 = vadd.f32 %v8571_v44, %v2532_v58 }
 0x3ea   : > { %v2434_v43 = vpop.f32.mrf.mxu1 }
 0x3eb   : > { %v2435_v56 = vadd.f32 %v8526_v24, %v2434_v43  ;;  %v2575_v24 = vmax.f32 %v2533_v16, 0.0  ;;  %v7090_v43 = vld [vmem:[%s11255_s9 + $0x28] sm:$0xff] }
 0x3ec   : > { %2965 = vmatpush.bf16.msrb.mxu0 %v7090_v43  ;;  %2994 = vmatpush.bf16.msrb.mxu1 %v7090_v43  ;;  %v7145_v43 = vld [vmem:[%s11256_s10 + $0x1a0] sm:$0xf0] }
 0x3ed   : > { %v2444_v14 = vpack.c.bf16 %v2435_v56, %v2433_v9 }
 0x3ef   : > { %2565 = vmatmul.bf16.gmra.mxu3 %v2444_v14 }
 0x3f0   : > { %v2534_v28 = vpop.f32.mrf.mxu2 }
 0x3f1   : > { %v2535_v15 = vadd.f32 %v8571_v44, %v2534_v28 }
 0x3f3   : > { %v2576_v41 = vmax.f32 %v2535_v15, 0.0  ;;  %v7089_v15 = vld [vmem:[%s11255_s9 + $0x20] sm:$0xff] }
 0x3f4   : > { %2966 = vmatpush.bf16.msrb.mxu0 %v7089_v15  ;;  %2995 = vmatpush.bf16.msrb.mxu1 %v7089_v15  ;;  %v7138_v15 = vld [vmem:[%s11256_s10 + $0x168] sm:$0xf0] }
 0x3f5   : > { %v2589_v35 = vpack.c.bf16 %v2576_v41, %v2575_v24 }
 0x3f7   : > { %2681 = vmatmul.bf16.gmra.mxu0 %v2589_v35 }
 0x3f8   : > { %v2537_v20 = vpop.f32.mrf.mxu2  ;;  %2967 = vmatpush.bf16.msrb.mxu0 %v7088_v55  ;;  %2996 = vmatpush.bf16.msrb.mxu1 %v7088_v55 }
 0x3f9   : > { %v2538_v23 = vadd.f32 %v8571_v44, %v2537_v20 }
 0x3fb   : > { %v2577_v19 = vmax.f32 %v2538_v23, 0.0 }
 0x3fc   : > { %2968 = vmatpush.bf16.msrb.mxu0 %v7087_v29  ;;  %2997 = vmatpush.bf16.msrb.mxu1 %v7087_v29 }
 0x400   : > { %v2539_v47 = vpop.f32.mrf.mxu2  ;;  %2969 = vmatpush.bf16.msrb.mxu0 %v7086_v27  ;;  %2998 = vmatpush.bf16.msrb.mxu1 %v7086_v27 }
 0x401   : > { %v2540_v49 = vadd.f32 %v8571_v44, %v2539_v47 }
 0x403   : > { %v2578_v36 = vmax.f32 %v2540_v49, 0.0 }
 0x405   : > { %v2590_v42 = vpack.c.bf16 %v2578_v36, %v2577_v19 }
 0x407   : > { %2686 = vmatmul.bf16.gmra.mxu0 %v2590_v42 }
 0x442   : > { %v2551_v54 = vpop.f32.mrf.mxu3 }
 0x443   : > { %v2552_v32 = vadd.f32 %v8571_v44, %v2551_v54  ;;  %v7085_v54 = vld [vmem:[%s11255_s9] sm:$0xff] }
 0x444   : > { %2970 = vmatpush.bf16.msrb.mxu0 %v7085_v54  ;;  %2999 = vmatpush.bf16.msrb.mxu1 %v7085_v54  ;;  %v6812_v54 = vld [vmem:[%s11256_s10 + $0xe0] sm:$0xf] }
 0x445   : > { %v2579_v45 = vmax.f32 %v2552_v32, 0.0 }
 0x44a   : > { %v2553_v53 = vpop.f32.mrf.mxu3 }
 0x44b   : > { %v2554_v5 = vadd.f32 %v8571_v44, %v2553_v53 }
 0x44d   : > { %v2580_v51 = vmax.f32 %v2554_v5, 0.0 }
 0x44f   : > { %v2591_v6 = vpack.c.bf16 %v2580_v51, %v2579_v45 }
 0x451   : > { %2700 = vmatmul.bf16.vlgmr.msra.gmra.mxu1 %v2591_v6 }
 0x452   : > { %v2556_v63 = vpop.f32.mrf.mxu3 }
 0x453   : > { %v2557_v31 = vadd.f32 %v8571_v44, %v2556_v63 }
 0x454   : > { %v2672_v8 = vpop.f32.mrf.mxu0 }
 0x455   : > { %v2673_v40 = vadd.f32 %v8616_v10, %v2672_v8  ;;  %v2581_v25 = vmax.f32 %v2557_v31, 0.0 }
 0x457   : > { %v2721_v62 = vmax.f32 %v2673_v40, 0.0 }
 0x45a   : > { %v2558_v0 = vpop.f32.mrf.mxu3 }
 0x45b   : > { %v2559_v21 = vadd.f32 %v8571_v44, %v2558_v0 }
 0x45c   : > { %v2674_v22 = vpop.f32.mrf.mxu0 }
 0x45d   : > { %v2675_v3 = vadd.f32 %v8616_v10, %v2674_v22  ;;  %v2582_v2 = vmax.f32 %v2559_v21, 0.0  ;;  %v8663_v22 = vld [vmem:[%s11264_s18] ss:$0 sm:$0xff] }
 0x45f   : > { %v2722_v26 = vmax.f32 %v2675_v3, 0.0  ;;  %v2592_v30 = vpack.c.bf16 %v2582_v2, %v2581_v25 }
 0x461   : > { %v2737_v52 = vpack.c.bf16 %v2722_v26, %v2721_v62  ;;  %2705 = vmatmul.bf16.gmra.mxu1 %v2592_v30 }
 0x462   : > { %v2561_v4 = vpop.f32.mrf.mxu3 }
 0x463   : > { %2821 = vmatmul.bf16.vlgmr.msra.gmra.mxu2 %v2737_v52  ;;  %v2562_v18 = vadd.f32 %v8571_v44, %v2561_v4 }
 0x464   : > { %v2677_v12 = vpop.f32.mrf.mxu0 }
 0x465   : > { %v2678_v57 = vadd.f32 %v8616_v10, %v2677_v12  ;;  %v2583_v17 = vmax.f32 %v2562_v18, 0.0 }
 0x467   : > { %v2723_v61 = vmax.f32 %v2678_v57, 0.0 }
 0x46a   : > { %v2563_v46 = vpop.f32.mrf.mxu3 }
 0x46b   : > { %v2564_v37 = vadd.f32 %v8571_v44, %v2563_v46 }
 0x46c   : > { %v2679_v50 = vpop.f32.mrf.mxu0 }
 0x46d   : > { %v2680_v33 = vadd.f32 %v8616_v10, %v2679_v50  ;;  %v2584_v59 = vmax.f32 %v2564_v37, 0.0 }
 0x46f   : > { %v2724_v38 = vmax.f32 %v2680_v33, 0.0  ;;  %v2593_v1 = vpack.c.bf16 %v2584_v59, %v2583_v17 }
 0x471   : > { %v2738_v39 = vpack.c.bf16 %v2724_v38, %v2723_v61  ;;  %2710 = vmatmul.bf16.gmra.mxu1 %v2593_v1 }
 0x472   : > { %v2566_v13 = vpop.f32.mrf.mxu3 }
 0x473   : > { %2826 = vmatmul.bf16.gmra.mxu2 %v2738_v39  ;;  %v2567_v9 = vadd.f32 %v8571_v44, %v2566_v13 }
 0x474   : > { %v2682_v58 = vpop.f32.mrf.mxu0 }
 0x475   : > { %v2683_v56 = vadd.f32 %v8616_v10, %v2682_v58  ;;  %v2585_v34 = vmax.f32 %v2567_v9, 0.0  ;;  %v7142_v9 = vld [vmem:[%s11256_s10 + $0x18c] sm:$0xf] }
 0x477   : > { %v2725_v41 = vmax.f32 %v2683_v56, 0.0 }
 0x47a   : > { %v2568_v11 = vpop.f32.mrf.mxu3 }
 0x47b   : > { %v2569_v14 = vadd.f32 %v8571_v44, %v2568_v11 }
 0x47c   : > { %v2684_v16 = vpop.f32.mrf.mxu0 }
 0x47d   : > { %v2685_v28 = vadd.f32 %v8616_v10, %v2684_v16  ;;  %v2586_v24 = vmax.f32 %v2569_v14, 0.0  ;;  %v8681_v14 = vor.u32 %v7145_v43, %v6896_v7  ;;  %v6898_v16 = vld [vmem:[%s11256_s10 + $0x1a4] sm:$0xf0]  ;;  %v7132_v7 = vld [vmem:[%s11256_s10 + $0x138] sm:$0xf0] }
 0x47f   : > { %v2726_v35 = vmax.f32 %v2685_v28, 0.0  ;;  %v2594_v48 = vpack.c.bf16 %v2586_v24, %v2585_v34  ;;  %v6868_v28 = vld [vmem:[%s11256_s10 + $0x150] sm:$0xf]  ;;  %v8692_v24 = vor.u32 %v7142_v9, %v6898_v16  ;;  %3413 = vmatpush.bf16.msrb.mxu2 %v8681_v14  ;;  %v6820_v9 = vld [vmem:[%s11256_s10 + $0xe8] sm:$0xf] }
 0x480   : > { %v6792_v16 = vld [vmem:[%s11256_s10 + $0xb0] sm:$0xf] }
 0x481   : > { %v2739_v20 = vpack.c.bf16 %v2726_v35, %v2725_v41  ;;  %2715 = vmatmul.bf16.gmra.mxu1 %v2594_v48  ;;  %v7135_v41 = vld [vmem:[%s11256_s10 + $0x154] sm:$0xf]  ;;  %v6870_v35 = vld [vmem:[%s11256_s10 + $0x16c] sm:$0xf0]  ;;  %3442 = vmatpush.bf16.msrb.mxu3 %v8692_v24 }
 0x483   : > { %2831 = vmatmul.bf16.gmra.mxu2 %v2739_v20  ;;  %v8702_v20 = vor.u32 %v7138_v15, %v6868_v28  ;;  %v7118_v28 = vld [vmem:[%s11256_s10 + $0xc8] sm:$0xf0]  ;;  %v6728_v15 = vld [vmem:[%s11256_s10 + $0x38] sm:$0xf] }
 0x484   : > { %v2687_v44 = vpop.f32.mrf.mxu0 }
 0x485   : > { %v2688_v23 = vadd.f32 %v8616_v10, %v2687_v44  ;;  %v8705_v44 = vor.u32 %v7135_v41, %v6870_v35  ;;  %3414 = vmatpush.bf16.msrb.mxu2 %v8702_v20  ;;  %v7100_v41 = vld [vmem:[%s11256_s10 + $0x3c] sm:$0xf]  ;;  %v8836_v35 = vor.u32 %v7118_v28, %v6792_v16  ;;  %v6878_v16 = vld [vmem:[%s11256_s10 + $0x174] sm:$0xf0] }
 0x487   : > { %v2727_v19 = vmax.f32 %v2688_v23, 0.0  ;;  %v6840_v23 = vld [vmem:[%s11256_s10 + $0x118] sm:$0xf]  ;;  %3443 = vmatpush.bf16.msrb.mxu3 %v8705_v44 }
 0x48c   : > { %v2689_v47 = vpop.f32.mrf.mxu0 }
 0x48d   : > { %v2690_v49 = vadd.f32 %v8616_v10, %v2689_v47  ;;  %v7131_v47 = vld [vmem:[%s11256_s10 + $0x130] sm:$0xf0] }
 0x48e   : > { %v8720_v55 = vor.u32 %v7131_v47, %v6840_v23  ;;  %v6730_v23 = vld [vmem:[%s11256_s10 + $0x54] sm:$0xf0] }
 0x48f   : > { %v2728_v36 = vmax.f32 %v2690_v49, 0.0  ;;  %v8843_v47 = vor.u32 %v7100_v41, %v6730_v23  ;;  %v6856_v41 = vld [vmem:[%s11256_s10 + $0x128] sm:$0xf]  ;;  %v7133_v23 = vld [vmem:[%s11256_s10 + $0x140] sm:$0xf0] }
 0x490   : > { %3415 = vmatpush.bf16.msrb.mxu2 %v8720_v55 }
 0x491   : > { %v2740_v42 = vpack.c.bf16 %v2728_v36, %v2727_v19  ;;  %v6842_v36 = vld [vmem:[%s11256_s10 + $0x134] sm:$0xf0] }
 0x493   : > { %2836 = vmatmul.bf16.gmra.mxu2 %v2740_v42 }
 0x4ce   : > { %v2701_v32 = vpop.f32.mrf.mxu1 }
 0x4cf   : > { %v2702_v53 = vadd.f32 %v8616_v10, %v2701_v32  ;;  %v7124_v32 = vld [vmem:[%s11256_s10 + $0xf8] sm:$0xf0] }
 0x4d1   : > { %v2729_v51 = vmax.f32 %v2702_v53, 0.0 }
 0x4d6   : > { %v2703_v5 = vpop.f32.mrf.mxu1 }
 0x4d7   : > { %v2704_v45 = vadd.f32 %v8616_v10, %v2703_v5  ;;  %v7121_v5 = vld [vmem:[%s11256_s10 + $0xe4] sm:$0xf] }
 0x4d9   : > { %v2730_v6 = vmax.f32 %v2704_v45, 0.0  ;;  %v6814_v45 = vld [vmem:[%s11256_s10 + $0xfc] sm:$0xf0] }
 0x4db   : > { %v2741_v63 = vpack.c.bf16 %v2730_v6, %v2729_v51  ;;  %v8740_v6 = vor.u32 %v7124_v32, %v6812_v54  ;;  %v6702_v32 = vld [vmem:[%s11256_s10 + $0x1c] sm:$0xf0] }
 0x4dd   : > { %2850 = vmatmul.bf16.vlgmr.msra.gmra.mxu3 %v2741_v63  ;;  %3416 = vmatpush.bf16.msrb.mxu2 %v8740_v6 }
 0x4de   : > { %v2706_v8 = vpop.f32.mrf.mxu1 }
 0x4df   : > { %v2707_v31 = vadd.f32 %v8616_v10, %v2706_v8 }
 0x4e1   : > { %v2731_v3 = vmax.f32 %v2707_v31, 0.0  ;;  %v8743_v31 = vor.u32 %v7121_v5, %v6814_v45  ;;  %v6736_v5 = vld [vmem:[%s11256_s10 + $0x40] sm:$0xf]  ;;  %v7104_v45 = vld [vmem:[%s11256_s10 + $0x58] sm:$0xf0] }
 0x4e6   : > { %v2822_v40 = vpop.f32.mrf.mxu2  ;;  %v2708_v0 = vpop.f32.mrf.mxu1 }
 0x4e7   : > { %v2709_v21 = vadd.f32 %v8616_v10, %v2708_v0  ;;  %v2823_v62 = vadd.f32 %v8663_v22, %v2822_v40  ;;  %v6784_v40 = vld [vmem:[%s11256_s10 + $0xa8] sm:$0xf]  ;;  %v7117_v0 = vld [vmem:[%s11256_s10 + $0xc0] sm:$0xf0] }
 0x4e9   : > { %v2732_v25 = vmax.f32 %v2709_v21, 0.0  ;;  %v2871_v4 = vmax.f32 %v2823_v62, 0.0  ;;  %v7114_v21 = vld [vmem:[%s11256_s10 + $0xac] sm:$0xf] }
 0x4eb   : > { %v2742_v2 = vpack.c.bf16 %v2732_v25, %v2731_v3  ;;  %v6786_v3 = vld [vmem:[%s11256_s10 + $0xc4] sm:$0xf0] }
 0x4ec   : > { %v8761_v62 = vor.u32 %v7114_v21, %v6786_v3  ;;  %v6912_v21 = vld [vmem:[%s11256_s10 + $0x198] sm:$0xf]  ;;  %v7147_v3 = vld [vmem:[%s11256_s10 + $0x1b0] sm:$0xf0] }
 0x4ed   : > { %2855 = vmatmul.bf16.gmra.mxu3 %v2742_v2  ;;  %v8758_v2 = vor.u32 %v7117_v0, %v6784_v40 }
 0x4ee   : > { %v2824_v26 = vpop.f32.mrf.mxu2  ;;  %v2711_v52 = vpop.f32.mrf.mxu1 }
 0x4ef   : > { %v2825_v30 = vadd.f32 %v8663_v22, %v2824_v26  ;;  %v2712_v57 = vadd.f32 %v8616_v10, %v2711_v52  ;;  %3417 = vmatpush.bf16.msrb.mxu2 %v8758_v2 }
 0x4f1   : > { %v2872_v12 = vmax.f32 %v2825_v30, 0.0  ;;  %v2733_v33 = vmax.f32 %v2712_v57, 0.0 }
 0x4f3   : > { %v2887_v18 = vpack.c.bf16 %v2872_v12, %v2871_v4 }
 0x4f5   : > { %2971 = vmatmul.bf16.vlgmr.msrb.gmra.mxu0 %v2887_v18 }
 0x4f6   : > { %v2827_v46 = vpop.f32.mrf.mxu2  ;;  %v2713_v37 = vpop.f32.mrf.mxu1 }
 0x4f7   : > { %v2714_v50 = vadd.f32 %v8616_v10, %v2713_v37  ;;  %v2828_v61 = vadd.f32 %v8663_v22, %v2827_v46  ;;  %v6904_v46 = vld [vmem:[%s11256_s10 + $0x190] sm:$0xf]  ;;  %v7146_v37 = vld [vmem:[%s11256_s10 + $0x1a8] sm:$0xf0] }
 0x4f9   : > { %v2734_v17 = vmax.f32 %v2714_v50, 0.0  ;;  %v2873_v13 = vmax.f32 %v2828_v61, 0.0  ;;  %v8773_v50 = vor.u32 %v7146_v37, %v6904_v46  ;;  %v6756_v61 = vld [vmem:[%s11256_s10 + $0x70] sm:$0xf]  ;;  %v7140_v46 = vld [vmem:[%s11256_s10 + $0x178] sm:$0xf0] }
 0x4fa   : > { %v7137_v37 = vld [vmem:[%s11256_s10 + $0x164] sm:$0xf] }
 0x4fb   : > { %v2743_v59 = vpack.c.bf16 %v2734_v17, %v2733_v33  ;;  %3471 = vmatpush.bf16.msra.mxu0 %v8773_v50  ;;  %v6876_v33 = vld [vmem:[%s11256_s10 + $0x158] sm:$0xf]  ;;  %v7139_v17 = vld [vmem:[%s11256_s10 + $0x170] sm:$0xf0] }
 0x4fd   : > { %2860 = vmatmul.bf16.gmra.mxu3 %v2743_v59  ;;  %v8782_v59 = vor.u32 %v7139_v17, %v6876_v33  ;;  %v6886_v33 = vld [vmem:[%s11256_s10 + $0x17c] sm:$0xf0] }
 0x4fe   : > { %v2829_v38 = vpop.f32.mrf.mxu2  ;;  %v2716_v39 = vpop.f32.mrf.mxu1 }
 0x4ff   : > { %v2830_v1 = vadd.f32 %v8663_v22, %v2829_v38  ;;  %v2717_v56 = vadd.f32 %v8616_v10, %v2716_v39  ;;  %v7110_v38 = vld [vmem:[%s11256_s10 + $0x88] sm:$0xf0]  ;;  %3472 = vmatpush.bf16.msra.mxu0 %v8782_v59 }
 0x500   : > { %v8793_v39 = vor.u32 %v7110_v38, %v6756_v61  ;;  %v8933_v61 = vor.u32 %v7137_v37, %v6886_v33 }
 0x501   : > { %v2874_v60 = vmax.f32 %v2830_v1, 0.0  ;;  %v2735_v49 = vmax.f32 %v2717_v56, 0.0  ;;  %v7107_v1 = vld [vmem:[%s11256_s10 + $0x74] sm:$0xf]  ;;  %v7125_v56 = vld [vmem:[%s11256_s10 + $0x100] sm:$0xf0] }
 0x502   : > { %3418 = vmatpush.bf16.msrb.mxu2 %v8793_v39 }
 0x503   : > { %v2888_v58 = vpack.c.bf16 %v2874_v60, %v2873_v13  ;;  %v6758_v13 = vld [vmem:[%s11256_s10 + $0x8c] sm:$0xf0] }
 0x504   : > { %v8799_v60 = vor.u32 %v7107_v1, %v6758_v13 }
 0x505   : > { %2976 = vmatmul.bf16.gmra.mxu0 %v2888_v58  ;;  %v6848_v58 = vld [vmem:[%s11256_s10 + $0x120] sm:$0xf] }
 0x506   : > { %v2832_v11 = vpop.f32.mrf.mxu2  ;;  %v2718_v34 = vpop.f32.mrf.mxu1  ;;  %v8809_v43 = vor.u32 %v7132_v7, %v6848_v58 }
 0x507   : > { %v2719_v48 = vadd.f32 %v8616_v10, %v2718_v34  ;;  %v7128_v10 = vld [vmem:[%s11256_s10 + $0x11c] sm:$0xf]  ;;  %v2833_v29 = vadd.f32 %v8663_v22, %v2832_v11  ;;  %v8818_v11 = vor.u32 %v7125_v56, %v6820_v9  ;;  %v7103_v34 = vld [vmem:[%s11256_s10 + $0x50] sm:$0xf0] }
 0x508   : > { %v8724_v27 = vor.u32 %v7128_v10, %v6842_v36  ;;  %3473 = vmatpush.bf16.msra.mxu0 %v8809_v43  ;;  %v6700_v36 = vld [vmem:[%s11256_s10] sm:$0xf]  ;;  %v7136_v56 = vld [vmem:[%s11256_s10 + $0x15c] sm:$0xf] }
 0x509   : > { %v2736_v19 = vmax.f32 %v2719_v48, 0.0  ;;  %v2875_v63 = vmax.f32 %v2833_v29, 0.0  ;;  %v8838_v48 = vor.u32 %v7103_v34, %v6728_v15  ;;  %v7093_v29 = vld [vmem:[%s11256_s10 + $0x4] sm:$0xf]  ;;  %v8946_v28 = vor.u32 %v7136_v56, %v6878_v16 }
 0x50a   : > { %3444 = vmatpush.bf16.msrb.mxu3 %v8724_v27 }
 0x50b   : > { %v2744_v42 = vpack.c.bf16 %v2736_v19, %v2735_v49  ;;  %3419 = vmatpush.bf16.msrb.mxu2 %v8838_v48  ;;  %v6764_v49 = vld [vmem:[%s11256_s10 + $0x78] sm:$0xf]  ;;  %v7111_v19 = vld [vmem:[%s11256_s10 + $0x90] sm:$0xf0] }
 0x50c   : > { %3474 = vmatpush.bf16.msra.mxu0 %v8818_v11  ;;  %v8854_v10 = vor.u32 %v7111_v19, %v6764_v49  ;;  %v7130_v49 = vld [vmem:[%s11256_s10 + $0x12c] sm:$0xf]  ;;  %v8958_v19 = vor.u32 %v7133_v23, %v6856_v41  ;;  %v6920_v41 = vld [vmem:[%s11256_s10 + $0x1a0] sm:$0xf] }
 0x50d   : > { %2865 = vmatmul.bf16.gmra.mxu3 %v2744_v42  ;;  %v7096_v42 = vld [vmem:[%s11256_s10 + $0x18] sm:$0xf0] }
 0x50e   : > { %v2834_v53 = vpop.f32.mrf.mxu2  ;;  %3445 = vmatpush.bf16.msrb.mxu3 %v8743_v31  ;;  %v8866_v54 = vor.u32 %v7096_v42, %v6700_v36  ;;  %v6858_v36 = vld [vmem:[%s11256_s10 + $0x144] sm:$0xf0] }
 0x50f   : > { %v2835_v51 = vadd.f32 %v8663_v22, %v2834_v53  ;;  %v8871_v53 = vor.u32 %v7093_v29, %v6702_v32  ;;  %v8963_v42 = vor.u32 %v7130_v49, %v6858_v36  ;;  %v8968_v29 = vld [vmem:[%s11265_s19] ss:$0 sm:$0xff]  ;;  %v7129_v32 = vld [vmem:[%s11256_s10 + $0x124] sm:$0xf]  ;;  %v7148_v36 = vld [vmem:[%s11256_s10 + $0x1b8] sm:$0xf0] }
 0x510   : > { %3475 = vmatpush.bf16.msra.mxu0 %v8836_v35  ;;  %3420 = vmatpush.bf16.msrb.mxu2 %v8866_v54 }
 0x511   : > { %v2876_v8 = vmax.f32 %v2835_v51, 0.0  ;;  %v8880_v51 = vor.u32 %v7104_v45, %v6736_v5  ;;  %v6850_v5 = vld [vmem:[%s11256_s10 + $0x13c] sm:$0xf0] }
 0x512   : > { %3446 = vmatpush.bf16.msrb.mxu3 %v8761_v62  ;;  %v8978_v45 = vor.u32 %v7129_v32, %v6850_v5  ;;  %v6800_v5 = vld [vmem:[%s11256_s10 + $0xb8] sm:$0xf] }
 0x513   : > { %v2889_v25 = vpack.c.bf16 %v2876_v8, %v2875_v63  ;;  %v6708_v63 = vld [vmem:[%s11256_s10 + $0x8] sm:$0xf]  ;;  %v7097_v8 = vld [vmem:[%s11256_s10 + $0x20] sm:$0xf0] }
 0x514   : > { %3476 = vmatpush.bf16.msra.mxu0 %v8854_v10  ;;  %v8890_v40 = vor.u32 %v7097_v8, %v6708_v63  ;;  %v6828_v63 = vld [vmem:[%s11256_s10 + $0xf0] sm:$0xf]  ;;  %v7126_v8 = vld [vmem:[%s11256_s10 + $0x108] sm:$0xf0] }
 0x515   : > { %2981 = vmatmul.bf16.gmra.mxu0 %v2889_v25  ;;  %v7144_v25 = vld [vmem:[%s11256_s10 + $0x19c] sm:$0xf] }
 0x516   : > { %v2837_v26 = vpop.f32.mrf.mxu2  ;;  %3447 = vmatpush.bf16.msrb.mxu3 %v8799_v60 }
 0x517   : > { %v2838_v30 = vadd.f32 %v8663_v22, %v2837_v26  ;;  %v8902_v26 = vor.u32 %v7147_v3, %v6912_v21  ;;  %v8989_v21 = vor.u32 %v7126_v8, %v6828_v63  ;;  %v6830_v3 = vld [vmem:[%s11256_s10 + $0x10c] sm:$0xf0]  ;;  %v7119_v63 = vld [vmem:[%s11256_s10 + $0xd0] sm:$0xf0]  ;;  %v7116_v8 = vld [vmem:[%s11256_s10 + $0xbc] sm:$0xf] }
 0x518   : > { %3477 = vmatpush.bf16.msra.mxu0 %v8880_v51 }
 0x519   : > { %v2877_v12 = vmax.f32 %v2838_v30, 0.0  ;;  %v6914_v30 = vld [vmem:[%s11256_s10 + $0x1b4] sm:$0xf0]  ;;  %3529 = vmatpush.bf16.msra.mxu2 %v8902_v26 }
 0x51a   : > { %3448 = vmatpush.bf16.msrb.mxu3 %v8843_v47 }
 0x51c   : > { %3478 = vmatpush.bf16.msra.mxu0 %v8890_v40 }
 0x51e   : > { %v2839_v52 = vpop.f32.mrf.mxu2  ;;  %3449 = vmatpush.bf16.msrb.mxu3 %v8871_v53 }
 0x51f   : > { %v2840_v4 = vadd.f32 %v8663_v22, %v2839_v52  ;;  %v8907_v52 = vor.u32 %v7144_v25, %v6914_v30 }
 0x521   : > { %v2878_v18 = vmax.f32 %v2840_v4, 0.0  ;;  %v7143_v4 = vld [vmem:[%s11256_s10 + $0x194] sm:$0xf] }
 0x522   : > { %3558 = vmatpush.bf16.msra.mxu3 %v8907_v52 }
 0x523   : > { %v2890_v57 = vpack.c.bf16 %v2878_v18, %v2877_v12  ;;  %v6906_v12 = vld [vmem:[%s11256_s10 + $0x1ac] sm:$0xf0]  ;;  %v6884_v18 = vld [vmem:[%s11256_s10 + $0x160] sm:$0xf] }
 0x524   : > { %v8931_v17 = vor.u32 %v7140_v46, %v6884_v18 }
 0x525   : > { %2986 = vmatmul.bf16.gmra.mxu0 %v2890_v57  ;;  %v8920_v57 = vor.u32 %v7143_v4, %v6906_v12 }
 0x526   : > { %3530 = vmatpush.bf16.msra.mxu2 %v8931_v17  ;;  %3559 = vmatpush.bf16.msra.mxu3 %v8933_v61 }
 0x527   : > { %3500 = vmatpush.bf16.msra.mxu1 %v8920_v57 }
 0x52a   : > { %3531 = vmatpush.bf16.msra.mxu2 %v8958_v19  ;;  %3560 = vmatpush.bf16.msra.mxu3 %v8963_v42 }
 0x52b   : > { %3501 = vmatpush.bf16.msra.mxu1 %v8946_v28 }
 0x52e   : > { %3532 = vmatpush.bf16.msra.mxu2 %v8989_v21 }
 0x52f   : > { %3502 = vmatpush.bf16.msra.mxu1 %v8978_v45 }
 0x560   : > { %v2851_v0 = vpop.f32.mrf.mxu3 }
 0x561   : > { %v2852_v38 = vadd.f32 %v8663_v22, %v2851_v0  ;;  %v7123_v0 = vld [vmem:[%s11256_s10 + $0xf4] sm:$0xf] }
 0x562   : > { %v8996_v30 = vor.u32 %v7123_v0, %v6830_v3  ;;  %v9040_v0 = vor.u32 %v7148_v36, %v6920_v41  ;;  %v9042_v3 = vor.u32 %v7119_v63, %v6800_v5  ;;  %v7101_v41 = vld [vmem:[%s11256_s10 + $0x44] sm:$0xf]  ;;  %v6738_v36 = vld [vmem:[%s11256_s10 + $0x5c] sm:$0xf0]  ;;  %v6864_v5 = vld [vmem:[%s11256_s10 + $0x130] sm:$0xf] }
 0x563   : > { %v2879_v58 = vmax.f32 %v2852_v38, 0.0 }
 0x564   : > { %3561 = vmatpush.bf16.msra.mxu3 %v8996_v30  ;;  %3587 = vmatpush.bf16.msrb.mxu0 %v9040_v0 }
 0x565   : > { %3533 = vmatpush.bf16.msra.mxu2 %v9042_v3 }
 0x568   : > { %v2853_v1 = vpop.f32.mrf.mxu3 }
 0x569   : > { %v2854_v13 = vadd.f32 %v8663_v22, %v2853_v1  ;;  %v7122_v1 = vld [vmem:[%s11256_s10 + $0xec] sm:$0xf] }
 0x56b   : > { %v2880_v7 = vmax.f32 %v2854_v13, 0.0  ;;  %v6822_v13 = vld [vmem:[%s11256_s10 + $0x104] sm:$0xf0] }
 0x56d   : > { %v2891_v9 = vpack.c.bf16 %v2880_v7, %v2879_v58 }
 0x56f   : > { %3000 = vmatmul.bf16.vlgmr.msrb.gmra.mxu1 %v2891_v9  ;;  %v9009_v9 = vor.u32 %v7122_v1, %v6822_v13  ;;  %v6772_v1 = vld [vmem:[%s11256_s10 + $0x80] sm:$0xf]  ;;  %v7112_v13 = vld [vmem:[%s11256_s10 + $0x98] sm:$0xf0] }
 0x570   : > { %v2856_v15 = vpop.f32.mrf.mxu3 }
 0x571   : > { %v2857_v25 = vadd.f32 %v8663_v22, %v2856_v15  ;;  %3503 = vmatpush.bf16.msra.mxu1 %v9009_v9  ;;  %v7115_v15 = vld [vmem:[%s11256_s10 + $0xb4] sm:$0xf] }
 0x572   : > { %v2972_v34 = vpop.f32.mrf.mxu0 }
 0x573   : > { %v2973_v4 = vadd.f32 %v8968_v29, %v2972_v34  ;;  %v2881_v33 = vmax.f32 %v2857_v25, 0.0  ;;  %v6794_v34 = vld [vmem:[%s11256_s10 + $0xcc] sm:$0xf0]  ;;  %v6802_v25 = vld [vmem:[%s11256_s10 + $0xd4] sm:$0xf0] }
 0x574   : > { %v9025_v49 = vor.u32 %v7115_v15, %v6794_v34 }
 0x575   : > { %v3021_v58 = vmax.f32 %v2973_v4, 0.0  ;;  %v9048_v4 = vor.u32 %v7116_v8, %v6802_v25  ;;  %v7134_v25 = vld [vmem:[%s11256_s10 + $0x148] sm:$0xf0] }
 0x576   : > { %3504 = vmatpush.bf16.msra.mxu1 %v9025_v49 }
 0x577   : > { %11293 = vst [vmem:[#allocation2_spill] sm:$0xff] %v9048_v4  ;;  %3562 = vmatpush.bf16.msra.mxu3 %v9048_v4 }
 0x578   : > { %v2858_v12 = vpop.f32.mrf.mxu3 }
 0x579   : > { %v2859_v18 = vadd.f32 %v8663_v22, %v2858_v12  ;;  %v7108_v12 = vld [vmem:[%s11256_s10 + $0x7c] sm:$0xf] }
 0x57a   : > { %v2974_v46 = vpop.f32.mrf.mxu0 }
 0x57b   : > { %v2975_v37 = vadd.f32 %v8968_v29, %v2974_v46  ;;  %v2882_v38 = vmax.f32 %v2859_v18, 0.0  ;;  %v6766_v18 = vld [vmem:[%s11256_s10 + $0x94] sm:$0xf0] }
 0x57c   : > { %v9058_v46 = vor.u32 %v7108_v12, %v6766_v18 }
 0x57d   : > { %v3022_v7 = vmax.f32 %v2975_v37, 0.0  ;;  %v2892_v56 = vpack.c.bf16 %v2882_v38, %v2881_v33  ;;  %v6892_v37 = vld [vmem:[%s11256_s10 + $0x168] sm:$0xf]  ;;  %v7141_v33 = vld [vmem:[%s11256_s10 + $0x180] sm:$0xf0] }
 0x57e   : > { %v9067_v38 = vor.u32 %v7141_v33, %v6892_v37  ;;  %3505 = vmatpush.bf16.msra.mxu1 %v9058_v46  ;;  %v9106_v37 = vor.u32 %v7134_v25, %v6864_v5  ;;  %v6836_v5 = vld [vmem:[%s11256_s10 + $0xf8] sm:$0xf] }
 0x57f   : > { %v9011_v16 = vpack.c.bf16 %v3022_v7, %v3021_v58  ;;  %3005 = vmatmul.bf16.gmra.mxu1 %v2892_v56  ;;  %v7109_v58 = vld [vmem:[%s11256_s10 + $0x84] sm:$0xf]  ;;  %v9079_v7 = vor.u32 %v7112_v13, %v6772_v1  ;;  %v6774_v56 = vld [vmem:[%s11256_s10 + $0x9c] sm:$0xf0]  ;;  %v7094_v13 = vld [vmem:[%s11256_s10 + $0xc] sm:$0xf] }
 0x580   : > { %v2861_v23 = vpop.f32.mrf.mxu3  ;;  %3588 = vmatpush.bf16.msrb.mxu0 %v9067_v38  ;;  %v9086_v34 = vor.u32 %v7109_v58, %v6774_v56  ;;  %v6710_v58 = vld [vmem:[%s11256_s10 + $0x24] sm:$0xf0] }
 0x581   : > { %3421 = vmatmul.bf16.vlgmr.msrb.gmra.mxu2 %v9011_v16  ;;  %3450 = vmatmul.bf16.vlgmr.msrb.gmra.mxu3 %v9011_v16  ;;  %v2862_v15 = vadd.f32 %v8663_v22, %v2861_v23  ;;  %v9099_v23 = vor.u32 %v7101_v41, %v6738_v36  ;;  %v9117_v36 = vor.u32 %v7094_v13, %v6710_v58  ;;  %v6744_v13 = vld [vmem:[%s11256_s10 + $0x48] sm:$0xf]  ;;  %v7105_v58 = vld [vmem:[%s11256_s10 + $0x60] sm:$0xf0] }
 0x582   : > { %3479 = vmatmul.bf16.vlgmr.msra.gmra.mxu0 %v9011_v16  ;;  %v2977_v32 = vpop.f32.mrf.mxu0  ;;  %11294 = vst [vmem:[#allocation3_spill] sm:$0xff] %v9086_v34  ;;  %3534 = vmatpush.bf16.msra.mxu2 %v9079_v7 }
 0x583   : > { %v2978_v63 = vadd.f32 %v8968_v29, %v2977_v32  ;;  %3563 = vmatpush.bf16.msra.mxu3 %v9086_v34  ;;  %3506 = vmatpush.bf16.msra.mxu1 %v9099_v23  ;;  %v2883_v32 = vmax.f32 %v2862_v15, 0.0  ;;  %v7127_v15 = vld [vmem:[%s11256_s10 + $0x110] sm:$0xf0] }
 0x584   : > { %3589 = vmatpush.bf16.msrb.mxu0 %v9106_v37  ;;  %v9125_v25 = vor.u32 %v7127_v15, %v6836_v5  ;;  %v6746_v5 = vld [vmem:[%s11256_s10 + $0x64] sm:$0xf0] }
 0x585   : > { %v3023_v56 = vmax.f32 %v2978_v63, 0.0  ;;  %v6808_v63 = vld [vmem:[%s11256_s10 + $0xc0] sm:$0xf]  ;;  %v6780_v15 = vld [vmem:[%s11256_s10 + $0x88] sm:$0xf] }
 0x587   : > { %3507 = vmatpush.bf16.msra.mxu1 %v9117_v36 }
 0x588   : > { %v2863_v8 = vpop.f32.mrf.mxu3  ;;  %3590 = vmatpush.bf16.msrb.mxu0 %v9125_v25 }
 0x589   : > { %v2864_v12 = vadd.f32 %v8663_v22, %v2863_v8 }
 0x58a   : > { %v2979_v18 = vpop.f32.mrf.mxu0 }
 0x58b   : > { %v2980_v33 = vadd.f32 %v8968_v29, %v2979_v18  ;;  %v2884_v1 = vmax.f32 %v2864_v12, 0.0  ;;  %v7120_v18 = vld [vmem:[%s11256_s10 + $0xd8] sm:$0xf0]  ;;  %3616 = vmatpush.bf16.msrb.mxu1 %v8681_v14  ;;  %v6716_v14 = vld [vmem:[%s11256_s10 + $0x10] sm:$0xf] }
 0x58d   : > { %v3024_v41 = vmax.f32 %v2980_v33, 0.0  ;;  %v2893_v8 = vpack.c.bf16 %v2884_v1, %v2883_v32  ;;  %v9139_v32 = vor.u32 %v7120_v18, %v6808_v63 }
 0x58f   : > { %v9127_v12 = vpack.c.bf16 %v3024_v41, %v3023_v56  ;;  %3010 = vmatmul.bf16.gmra.mxu1 %v2893_v8  ;;  %11295 = vst [vmem:[#allocation4_spill] sm:$0xff] %v9139_v32  ;;  %v7102_v56 = vld [vmem:[%s11256_s10 + $0x4c] sm:$0xf]  ;;  %v9152_v41 = vor.u32 %v7105_v58, %v6744_v13  ;;  %v7113_v8 = vld [vmem:[%s11256_s10 + $0xa0] sm:$0xf0]  ;;  %3591 = vmatpush.bf16.msrb.mxu0 %v9139_v32 }
 0x590   : > { %v2866_v33 = vpop.f32.mrf.mxu3  ;;  %v9163_v63 = vor.u32 %v7102_v56, %v6746_v5  ;;  %v9166_v18 = vor.u32 %v7113_v8, %v6780_v15  ;;  %v7098_v13 = vld [vmem:[%s11256_s10 + $0x28] sm:$0xf0]  ;;  %v7095_v56 = vld [vmem:[%s11256_s10 + $0x14] sm:$0xf]  ;;  %v6718_v5 = vld [vmem:[%s11256_s10 + $0x2c] sm:$0xf0]  ;;  %3617 = vmatpush.bf16.msrb.mxu1 %v8702_v20 }
 0x591   : > { %3426 = vmatmul.bf16.gmra.mxu2 %v9127_v12  ;;  %3455 = vmatmul.bf16.gmra.mxu3 %v9127_v12  ;;  %v9175_v58 = vor.u32 %v7098_v13, %v6716_v14  ;;  %v9184_v15 = vor.u32 %v7095_v56, %v6718_v5  ;;  %v6752_v8 = vld [vmem:[%s11256_s10 + $0x50] sm:$0xf]  ;;  %v7106_v14 = vld [vmem:[%s11256_s10 + $0x68] sm:$0xf0]  ;;  %v2867_v13 = vadd.f32 %v8663_v22, %v2866_v33  ;;  %v6724_v5 = vld [vmem:[%s11256_s10 + $0x18] sm:$0xf] }
 0x592   : > { %3484 = vmatmul.bf16.gmra.mxu0 %v9127_v12  ;;  %v2982_v1 = vpop.f32.mrf.mxu0  ;;  %11296 = vst [vmem:[#allocation5_spill] sm:$0xff] %v9163_v63  ;;  %3535 = vmatpush.bf16.msra.mxu2 %v9152_v41  ;;  %v9195_v34 = vor.u32 %v7106_v14, %v6752_v8  ;;  %v7099_v32 = vld [vmem:[%s11256_s10 + $0x30] sm:$0xf0] }
 0x593   : > { %11297 = vst [vmem:[#allocation6_spill] sm:$0xff] %v9166_v18  ;;  %3564 = vmatpush.bf16.msra.mxu3 %v9163_v63  ;;  %3592 = vmatpush.bf16.msrb.mxu0 %v9166_v18  ;;  %v2983_v63 = vadd.f32 %v8968_v29, %v2982_v1  ;;  %v2885_v8 = vmax.f32 %v2867_v13, 0.0  ;;  %v9212_v18 = vor.u32 %v7099_v32, %v6724_v5 }
 0x594   : > { %11298 = vst [vmem:[#allocation7_spill] sm:$0xff] %v9175_v58  ;;  %3618 = vmatpush.bf16.msrb.mxu1 %v8720_v55 }
 0x596   : > { %3536 = vmatpush.bf16.msra.mxu2 %v9175_v58  ;;  %v3025_v58 = vmax.f32 %v2983_v63, 0.0 }
 0x597   : > { %3565 = vmatpush.bf16.msra.mxu3 %v9184_v15  ;;  %3593 = vmatpush.bf16.msrb.mxu0 %v9195_v34 }
 0x598   : > { %v2868_v56 = vpop.f32.mrf.mxu3  ;;  %3619 = vmatpush.bf16.msrb.mxu1 %v8740_v6 }
 0x599   : > { %v2869_v20 = vadd.f32 %v8663_v22, %v2868_v56 }
 0x59a   : > { %v2984_v33 = vpop.f32.mrf.mxu0  ;;  %3645 = vmatpush.bf16.msrb.mxu2 %v8692_v24 }
 0x59b   : > { %v2985_v1 = vadd.f32 %v8968_v29, %v2984_v33  ;;  %3674 = vmatpush.bf16.msrb.mxu3 %v8773_v50  ;;  %v2886_v14 = vmax.f32 %v2869_v20, 0.0  ;;  %3594 = vmatpush.bf16.msrb.mxu0 %v9212_v18  ;;  %v11300_v50 = vld [vmem:[#allocation4_spill] sm:$0xff] }
 0x59c   : > { %3620 = vmatpush.bf16.msrb.mxu1 %v8758_v2 }
 0x59d   : > { %v3026_v4 = vmax.f32 %v2985_v1, 0.0  ;;  %v2894_v22 = vpack.c.bf16 %v2886_v14, %v2885_v8 }
 0x59e   : > { %3646 = vmatpush.bf16.msrb.mxu2 %v8705_v44 }
 0x59f   : > { %v9215_v56 = vpack.c.bf16 %v3026_v4, %v3025_v58  ;;  %3675 = vmatpush.bf16.msrb.mxu3 %v8782_v59  ;;  %3015 = vmatmul.bf16.gmra.mxu1 %v2894_v22  ;;  %v11301_v59 = vld [vmem:[#allocation7_spill] sm:$0xff] }
 0x5a0   : > { %3703 = vmatpush.bf16.msra.mxu0 %v8920_v57  ;;  %3621 = vmatpush.bf16.msrb.mxu1 %v8793_v39  ;;  %v11302_v39 = vld [vmem:[#allocation3_spill] sm:$0xff] }
 0x5a1   : > { %3431 = vmatmul.bf16.gmra.mxu2 %v9215_v56  ;;  %3460 = vmatmul.bf16.gmra.mxu3 %v9215_v56 }
 0x5a2   : > { %3489 = vmatmul.bf16.gmra.mxu0 %v9215_v56  ;;  %v2987_v24 = vpop.f32.mrf.mxu0  ;;  %3647 = vmatpush.bf16.msrb.mxu2 %v8724_v27 }
 0x5a3   : > { %3676 = vmatpush.bf16.msrb.mxu3 %v8809_v43  ;;  %v2988_v44 = vadd.f32 %v8968_v29, %v2987_v24  ;;  %v11304_v43 = vld [vmem:[#allocation5_spill] sm:$0xff] }
 0x5a4   : > { %3704 = vmatpush.bf16.msra.mxu0 %v8946_v28  ;;  %3622 = vmatpush.bf16.msrb.mxu1 %v8838_v48 }
 0x5a5   : > { %v3027_v6 = vmax.f32 %v2988_v44, 0.0 }
 0x5a6   : > { %3648 = vmatpush.bf16.msrb.mxu2 %v8743_v31 }
 0x5a7   : > { %3677 = vmatpush.bf16.msrb.mxu3 %v8818_v11 }
 0x5a8   : > { %3705 = vmatpush.bf16.msra.mxu0 %v8978_v45  ;;  %3623 = vmatpush.bf16.msrb.mxu1 %v8866_v54 }
 0x5aa   : > { %v2989_v55 = vpop.f32.mrf.mxu0  ;;  %3649 = vmatpush.bf16.msrb.mxu2 %v8761_v62  ;;  %v11299_v62 = vld [vmem:[#allocation2_spill] sm:$0xff] }
 0x5ab   : > { %v2990_v27 = vadd.f32 %v8968_v29, %v2989_v55  ;;  %3678 = vmatpush.bf16.msrb.mxu3 %v8836_v35 }
 0x5ac   : > { %3706 = vmatpush.bf16.msra.mxu0 %v9009_v9 }
 0x5ad   : > { %v3028_v31 = vmax.f32 %v2990_v27, 0.0 }
 0x5ae   : > { %3650 = vmatpush.bf16.msrb.mxu2 %v8799_v60  ;;  %v11303_v60 = vld [vmem:[#allocation6_spill] sm:$0xff] }
 0x5af   : > { %v3040_v2 = vpack.c.bf16 %v3028_v31, %v3027_v6  ;;  %3679 = vmatpush.bf16.msrb.mxu3 %v8854_v10  ;;  %3508 = vmatmul.bf16.vlgmr.msra.gmra.mxu1 %v9011_v16 }
 0x5b0   : > { %3707 = vmatpush.bf16.msra.mxu0 %v9025_v49  ;;  %3732 = vmatpush.bf16.msra.mxu1 %v8902_v26 }
 0x5b1   : > { %3436 = vmatmul.bf16.gmra.mxu2 %v3040_v2  ;;  %3465 = vmatmul.bf16.gmra.mxu3 %v3040_v2 }
 0x5b2   : > { %3494 = vmatmul.bf16.gmra.mxu0 %v3040_v2  ;;  %3651 = vmatpush.bf16.msrb.mxu2 %v8843_v47 }
 0x5b3   : > { %3680 = vmatpush.bf16.msrb.mxu3 %v8880_v51 }
 0x5b4   : > { %3708 = vmatpush.bf16.msra.mxu0 %v9058_v46  ;;  %3733 = vmatpush.bf16.msra.mxu1 %v8931_v17 }
 0x5b6   : > { %3652 = vmatpush.bf16.msrb.mxu2 %v8871_v53  ;;  %v9290_v53 = vld [vmem:[%s11266_s20] sm:$0x7f] }
 0x5b7   : > { %3681 = vmatpush.bf16.msrb.mxu3 %v8890_v40  ;;  %v9296_v40 = vperm.slane %v9290_v53, 2  ;;  %v9302_v17 = vperm.slane %v9290_v53, 0 }
 0x5b8   : > { %3709 = vmatpush.bf16.msra.mxu0 %v9099_v23  ;;  %3734 = vmatpush.bf16.msra.mxu1 %v8958_v19 }
 0x5bc   : > { %3710 = vmatpush.bf16.msra.mxu0 %v9117_v36  ;;  %3735 = vmatpush.bf16.msra.mxu1 %v8989_v21 }
 0x5bf   : > { %3513 = vmatmul.bf16.gmra.mxu1 %v9127_v12 }
 0x5c0   : > { %3736 = vmatpush.bf16.msra.mxu1 %v9042_v3 }
 0x5c1   : > { %3537 = vmatmul.bf16.vlgmr.msra.gmra.mxu2 %v9011_v16  ;;  %3566 = vmatmul.bf16.vlgmr.msra.gmra.mxu3 %v9011_v16 }
 0x5c2   : > { %3595 = vmatmul.bf16.vlgmr.msrb.gmra.mxu0 %v9011_v16  ;;  %3761 = vmatpush.bf16.msra.mxu2 %v8907_v52 }
 0x5c3   : > { %3790 = vmatpush.bf16.msra.mxu3 %v9040_v0 }
 0x5c4   : > { %3737 = vmatpush.bf16.msra.mxu1 %v9079_v7 }
 0x5c6   : > { %3762 = vmatpush.bf16.msra.mxu2 %v8933_v61  ;;  %v9305_v61 = vperm.slane %v9290_v53, 1 }
 0x5c7   : > { %3791 = vmatpush.bf16.msra.mxu3 %v9067_v38 }
 0x5c8   : > { %3738 = vmatpush.bf16.msra.mxu1 %v9152_v41 }
 0x5ca   : > { %3763 = vmatpush.bf16.msra.mxu2 %v8963_v42 }
 0x5cb   : > { %3792 = vmatpush.bf16.msra.mxu3 %v9106_v37 }
 0x5cc   : > { %3739 = vmatpush.bf16.msra.mxu1 %v11301_v59 }
 0x5ce   : > { %3764 = vmatpush.bf16.msra.mxu2 %v8996_v30 }
 0x5cf   : > { %3793 = vmatpush.bf16.msra.mxu3 %v9125_v25  ;;  %3518 = vmatmul.bf16.gmra.mxu1 %v9215_v56 }
 0x5d1   : > { %3542 = vmatmul.bf16.gmra.mxu2 %v9127_v12  ;;  %3571 = vmatmul.bf16.gmra.mxu3 %v9127_v12 }
 0x5d2   : > { %3600 = vmatmul.bf16.gmra.mxu0 %v9127_v12  ;;  %3765 = vmatpush.bf16.msra.mxu2 %v11299_v62 }
 0x5d3   : > { %3794 = vmatpush.bf16.msra.mxu3 %v11300_v50 }
 0x5d6   : > { %3766 = vmatpush.bf16.msra.mxu2 %v11302_v39 }
 0x5d7   : > { %3795 = vmatpush.bf16.msra.mxu3 %v11303_v60 }
 0x5da   : > { %3767 = vmatpush.bf16.msra.mxu2 %v11304_v43 }
 0x5db   : > { %3796 = vmatpush.bf16.msra.mxu3 %v9195_v34 }
 0x5de   : > { %3768 = vmatpush.bf16.msra.mxu2 %v9184_v15 }
 0x5df   : > { %3797 = vmatpush.bf16.msra.mxu3 %v9212_v18  ;;  %3523 = vmatmul.bf16.gmra.mxu1 %v3040_v2 }
 0x5e1   : > { %3547 = vmatmul.bf16.gmra.mxu2 %v9215_v56  ;;  %3576 = vmatmul.bf16.gmra.mxu3 %v9215_v56 }
 0x5e2   : > { %3605 = vmatmul.bf16.gmra.mxu0 %v9215_v56 }
 0x5ec   : > { %v3001_v11 = vpop.f32.mrf.mxu1 }
 0x5ed   : > { %v3002_v35 = vadd.f32 %v8968_v29, %v3001_v11 }
 0x5ef   : > { %v3029_v10 = vmax.f32 %v3002_v35, 0.0 }
 0x5f1   : > { %3552 = vmatmul.bf16.gmra.mxu2 %v3040_v2  ;;  %3581 = vmatmul.bf16.gmra.mxu3 %v3040_v2 }
 0x5f2   : > { %3610 = vmatmul.bf16.gmra.mxu0 %v3040_v2 }
 0x5f4   : > { %v3003_v48 = vpop.f32.mrf.mxu1 }
 0x5f5   : > { %v3004_v47 = vadd.f32 %v8968_v29, %v3003_v48 }
 0x5f7   : > { %v3030_v54 = vmax.f32 %v3004_v47, 0.0 }
 0x5f9   : > { %v9292_v51 = vpack.c.bf16 %v3030_v54, %v3029_v10 }
 0x5fb   : > { %3624 = vmatmul.bf16.vlgmr.msrb.gmra.mxu1 %v9292_v51 }
 0x5fc   : > { %v3006_v26 = vpop.f32.mrf.mxu1 }
 0x5fd   : > { %v3007_v19 = vadd.f32 %v8968_v29, %v3006_v26 }
 0x5ff   : > { %v3480_v52 = vpop.f32.mrf.mxu0  ;;  %v3031_v46 = vmax.f32 %v3007_v19, 0.0 }
 0x600   : > { %v3481_v57 = vadd.f32 %v3480_v52, %v9296_v40 }
 0x601   : > { %3653 = vmatmul.bf16.vlgmr.msrb.gmra.mxu2 %v9292_v51  ;;  %3682 = vmatmul.bf16.vlgmr.msrb.gmra.mxu3 %v9292_v51 }
 0x602   : > { %v3821_v28 = vsub.f32 0.0, %v3481_v57  ;;  %3711 = vmatmul.bf16.vlgmr.msra.gmra.mxu0 %v9292_v51 }
 0x604   : > { %v3879_v42 = vmul.f32 1.442695, %v3821_v28  ;;  %v3422_v45 = vpop.f32.mrf.mxu2  ;;  %v3451_v21 = vpop.f32.mrf.mxu3 }
 0x605   : > { %v3423_v30 = vadd.f32 %v3422_v45, %v9302_v17  ;;  %v3452_v9 = vadd.f32 %v3451_v21, %v9305_v61  ;;  %v3008_v16 = vpop.f32.mrf.mxu1 }
 0x606   : > { %7168 = vpow2.f32 %v3879_v42  ;;  %v3009_v49 = vadd.f32 %v8968_v29, %v3008_v16 }
 0x607   : > { %v3819_v0 = vsub.f32 0.0, %v3423_v30  ;;  %v3820_v3 = vsub.f32 0.0, %v3452_v9  ;;  %v3482_v4 = vpop.f32.mrf.mxu0 }
 0x608   : > { %v3032_v38 = vmax.f32 %v3009_v49, 0.0  ;;  %v3483_v7 = vadd.f32 %v3482_v4, %v9296_v40 }
 0x609   : > { %v3875_v34 = vmul.f32 1.442695, %v3819_v0  ;;  %v3877_v23 = vmul.f32 1.442695, %v3820_v3 }
 0x60a   : > { %v9313_v37 = vpack.c.bf16 %v3032_v38, %v3031_v46  ;;  %v3828_v36 = vsub.f32 0.0, %v3483_v7 }
 0x60b   : > { %7170 = vpow2.f32 %v3875_v34 }
 0x60c   : > { %v7169_v25 = vpop.eup %7168  ;;  %7172 = vpow2.f32 %v3877_v23  ;;  %v3893_v12 = vmul.f32 1.442695, %v3828_v36  ;;  %v3424_v32 = vpop.f32.mrf.mxu2  ;;  %3629 = vmatmul.bf16.gmra.mxu1 %v9313_v37 }
 0x60d   : > { %v3453_v41 = vpop.f32.mrf.mxu3  ;;  %v9316_v63 = vadd.f32 1.0, %v7169_v25  ;;  %v3425_v18 = vadd.f32 %v3424_v32, %v9302_v17  ;;  %v3011_v15 = vpop.f32.mrf.mxu1 }
 0x60e   : > { %v3454_v58 = vadd.f32 %v3453_v41, %v9305_v61  ;;  %7174 = vpow2.f32 %v3893_v12  ;;  %v9327_v22 = vadd.f32 %v8968_v29, %v3011_v15 }
 0x60f   : > { %7176 = vrcp.f32 %v9316_v63  ;;  %v3485_v13 = vpop.f32.mrf.mxu0  ;;  %v3826_v5 = vsub.f32 0.0, %v3425_v18  ;;  %vm4076_vm1 = vweird.f32 %v9316_v63  ;;  %v4080_v31 = vand.u32 2147483647, %v9316_v63 }
 0x610   : > { %v3827_v20 = vsub.f32 0.0, %v3454_v58  ;;  %v3486_v33 = vadd.f32 %v3485_v13, %v9296_v40  ;;  %v4082_v2 = vand.u32 2147483648, %v9316_v63  ;;  %v3033_v60 = vmax.f32 %v9327_v22, 0.0 }
 0x611   : > { %v7171_v1 = vpop.eup %7170  ;;  %3658 = vmatmul.bf16.gmra.mxu2 %v9313_v37  ;;  %3687 = vmatmul.bf16.gmra.mxu3 %v9313_v37  ;;  %v3889_v24 = vmul.f32 1.442695, %v3826_v5  ;;  %vm9347_vm2 = vcmp.eq.f32.partialorder %v4080_v31, 8.507059e+37 }
 0x612   : > { %v7173_v8 = vpop.eup %7172  ;;  %v9324_v14 = vadd.f32 1.0, %v7171_v1  ;;  %3716 = vmatmul.bf16.gmra.mxu0 %v9313_v37  ;;  %v3891_v55 = vmul.f32 1.442695, %v3827_v20  ;;  %v3835_v27 = vsub.f32 0.0, %v3486_v33  ;;  %v4083_v52 = vor.u32 1.1754944e-38, %v4082_v2 }
 0x613   : > { %v9330_v56 = vadd.f32 1.0, %v7173_v8 }
 0x614   : > { %v7175_v44 = vpop.eup %7174  ;;  %7178 = vrcp.f32 %v9324_v14  ;;  %v3427_v62 = vpop.f32.mrf.mxu2  ;;  %v4052_v59 = vand.u32 2147483647, %v9324_v14  ;;  %v4054_v39 = vand.u32 2147483648, %v9324_v14  ;;  %v3907_v10 = vmul.f32 1.442695, %v3835_v27 }
 0x615   : > { %v7177_v6 = vpop.eup %7176  ;;  %7180 = vrcp.f32 %v9330_v56  ;;  %v4066_v43 = vand.u32 2147483647, %v9330_v56  ;;  %v4068_v11 = vand.u32 2147483648, %v9330_v56  ;;  %v9343_v35 = vadd.f32 1.0, %v7175_v44  ;;  %v3456_v48 = vpop.f32.mrf.mxu3 }
 0x616   : > { %v4072_v50 = vmul.f32 %v7177_v6, %v9316_v63  ;;  %7182 = vpow2.f32 %v3889_v24  ;;  %v3428_v54 = vadd.f32 %v3427_v62, %v9302_v17  ;;  %vm4048_vm3 = vweird.f32 %v9324_v14  ;;  %v3013_v15 = vpop.f32.mrf.mxu1 }
 0x617   : > { %7184 = vpow2.f32 %v3891_v55  ;;  %vm4077_vm4 = vweird.f32 %v7177_v6  ;;  %vm4062_vm5 = vweird.f32 %v9330_v56  ;;  %v3457_v42 = vadd.f32 %v3456_v48, %v9305_v61  ;;  %v3487_v20 = vpop.f32.mrf.mxu0 }
 0x618   : > { %v4073_v47 = vsub.f32 1.0, %v4072_v50  ;;  %7186 = vrcp.f32 %v9343_v35  ;;  %v3833_v19 = vsub.f32 0.0, %v3428_v54  ;;  %vm9356_vm6 = vcmp.eq.f32.partialorder %v4052_v59, 8.507059e+37  ;;  %vm4078_vm8 = vmor %vm4076_vm1, %vm4077_vm4 }
 0x619   : > { %v4055_v9 = vor.u32 1.1754944e-38, %v4054_v39  ;;  %v4069_v16 = vor.u32 1.1754944e-38, %v4068_v11  ;;  %vm9361_vm7 = vcmp.eq.f32.partialorder %v4066_v43, 8.507059e+37  ;;  %7188 = vpow2.f32 %v3907_v10 }
 0x61a   : > { %v7179_v57 = vpop.eup %7178  ;;  %v4074_v28 = vmul.f32 %v7177_v6, %v4073_v47  ;;  %v3903_v4 = vmul.f32 1.442695, %v3833_v19  ;;  %v4178_v7 = vand.u32 2147483647, %v9343_v35  ;;  %v4180_v34 = vand.u32 2147483648, %v9343_v35 }
 0x61b   : > { %v7181_v45 = vpop.eup %7180  ;;  %v4044_v21 = vmul.f32 %v7179_v57, %v9324_v14  ;;  %v3834_v23 = vsub.f32 0.0, %v3457_v42  ;;  %vm4049_vm9 = vweird.f32 %v7179_v57  ;;  %vm4174_vm11 = vweird.f32 %v9343_v35 }
 0x61c   : > { %v4075_v49 = vadd.f32 %v7177_v6, %v4074_v28  ;;  %v4058_v0 = vmul.f32 %v7181_v45, %v9330_v56  ;;  %v7183_v46 = vpop.eup %7182  ;;  %7190 = vpow2.f32 %v3903_v4  ;;  %vm4063_vm10 = vweird.f32 %v7181_v45  ;;  %vm4050_vm13 = vmor %vm4048_vm3, %vm4049_vm9 }
 0x61d   : > { %v4045_v38 = vsub.f32 1.0, %v4044_v21  ;;  %v7185_v36 = vpop.eup %7184  ;;  %v9375_v32 = vadd.f32 1.0, %v7183_v46  ;;  %vm9385_vm12 = vcmp.eq.f32.partialorder %v4178_v7, 8.507059e+37  ;;  %v4181_v8 = vor.u32 1.1754944e-38, %v4180_v34  ;;  %vm4064_vm14 = vmor %vm4062_vm5, %vm4063_vm10 }
 0x61e   : > { %v4079_v25 = vsel %vm4078_vm8, %v7177_v6, %v4075_v49  ;;  %v4059_v12 = vsub.f32 1.0, %v4058_v0  ;;  %v7187_v41 = vpop.eup %7186  ;;  %v9379_v63 = vadd.f32 1.0, %v7185_v36  ;;  %v3905_v27 = vmul.f32 1.442695, %v3834_v23  ;;  %v9427_v49 = vpop.f32.mrf.mxu1 }
 0x61f   : > { %v4084_v18 = vsel %vm9347_vm2, %v4083_v52, %v4079_v25  ;;  %v4046_v58 = vmul.f32 %v7179_v57, %v4045_v38  ;;  %v4170_v5 = vmul.f32 %v7187_v41, %v9343_v35  ;;  %7192 = vrcp.f32 %v9375_v32  ;;  %v7189_v24 = vpop.eup %7188  ;;  %v3429_v52 = vpop.f32.mrf.mxu2 }
 0x620   : > { %4829 = vst [vmem:[%s9368_s3 + $0x10] sm:$0xff] %v4084_v18  ;;  %v4060_v13 = vmul.f32 %v7181_v45, %v4059_v12  ;;  %7194 = vrcp.f32 %v9379_v63  ;;  %vm4175_vm15 = vweird.f32 %v7187_v41  ;;  %v3014_v31 = vadd.f32 %v8968_v29, %v3013_v15  ;;  %v3458_v35 = vpop.f32.mrf.mxu3 }
 0x621   : > { %v4047_v33 = vadd.f32 %v7179_v57, %v4046_v58  ;;  %v4171_v55 = vsub.f32 1.0, %v4170_v5  ;;  %v3488_v2 = vadd.f32 %v3487_v20, %v9296_v40  ;;  %v4150_v39 = vand.u32 2147483647, %v9375_v32  ;;  %vm4176_vm1 = vmor %vm4174_vm11, %vm4175_vm15 }
 0x622   : > { %v4061_v44 = vadd.f32 %v7181_v45, %v4060_v13  ;;  %v7191_v62 = vpop.eup %7190  ;;  %v4152_v56 = vand.u32 2147483648, %v9375_v32  ;;  %v9404_v11 = vadd.f32 1.0, %v7189_v24  ;;  %v4164_v54 = vand.u32 2147483647, %v9379_v63  ;;  %v3490_v13 = vpop.f32.mrf.mxu0 }
 0x623   : > { %v4051_v6 = vsel %vm4050_vm13, %v7179_v57, %v4047_v33  ;;  %v4172_v59 = vmul.f32 %v7187_v41, %v4171_v55  ;;  %v9406_v48 = vadd.f32 1.0, %v7191_v62  ;;  %v4166_v26 = vand.u32 2147483648, %v9379_v63 }
 0x624   : > { %v4056_v14 = vsel %vm9356_vm6, %v4055_v9, %v4051_v6  ;;  %v4065_v50 = vsel %vm4064_vm14, %v7181_v45, %v4061_v44  ;;  %7196 = vpow2.f32 %v3905_v27  ;;  %vm4146_vm2 = vweird.f32 %v9375_v32 }
 0x625   : > { %4827 = vst [vmem:[%s9368_s3] sm:$0xff] %v4056_v14  ;;  %v4070_v43 = vsel %vm9361_vm7, %v4069_v16, %v4065_v50  ;;  %v7193_v47 = vpop.eup %7192  ;;  %v4173_v10 = vadd.f32 %v7187_v41, %v4172_v59  ;;  %7198 = vrcp.f32 %v9404_v11  ;;  %v3034_v28 = vmax.f32 %v3014_v31, 0.0 }
 0x626   : > { %4828 = vst [vmem:[%s9368_s3 + $0x8] sm:$0xff] %v4070_v43  ;;  %v4142_v57 = vmul.f32 %v7193_v47, %v9375_v32  ;;  %v7195_v19 = vpop.eup %7194  ;;  %vm9417_vm3 = vcmp.eq.f32.partialorder %v4150_v39, 8.507059e+37  ;;  %vm4160_vm4 = vweird.f32 %v9379_v63  ;;  %7200 = vrcp.f32 %v9406_v48 }
 0x627   : > { %v4177_v42 = vsel %vm4176_vm1, %v7187_v41, %v4173_v10  ;;  %v4156_v9 = vmul.f32 %v7195_v19, %v9379_v63  ;;  %v4278_v16 = vand.u32 2147483648, %v9404_v11  ;;  %v4153_v0 = vor.u32 1.1754944e-38, %v4152_v56  ;;  %v3432_v31 = vpop.f32.mrf.mxu2 }
 0x628   : > { %v4182_v21 = vsel %vm9385_vm12, %v4181_v8, %v4177_v42  ;;  %v4143_v30 = vsub.f32 1.0, %v4142_v57  ;;  %vm9430_vm5 = vcmp.eq.f32.partialorder %v4164_v54, 8.507059e+37  ;;  %v4167_v4 = vor.u32 1.1754944e-38, %v4166_v26  ;;  %v3461_v59 = vpop.f32.mrf.mxu3 }
 0x629   : > { %4836 = vst [vmem:[%s9368_s3 + $0x48] sm:$0xff] %v4182_v21  ;;  %v4276_v46 = vand.u32 2147483647, %v9404_v11  ;;  %vm4147_vm6 = vweird.f32 %v7193_v47  ;;  %v4157_v7 = vsub.f32 1.0, %v4156_v9  ;;  %v9437_v34 = vpack.c.bf16 %v3034_v28, %v3033_v60 }
 0x62a   : > { %v4144_v38 = vmul.f32 %v7193_v47, %v4143_v30  ;;  %v7197_v23 = vpop.eup %7196  ;;  %vm4161_vm7 = vweird.f32 %v7195_v19  ;;  %vm4272_vm8 = vweird.f32 %v9404_v11  ;;  %v3842_v36 = vsub.f32 0.0, %v3488_v2  ;;  %vm4148_vm9 = vmor %vm4146_vm2, %vm4147_vm6  ;;  %v3492_v3 = vpop.f32.mrf.mxu0 }
 0x62b   : > { %v3430_v25 = vadd.f32 %v3429_v52, %v9302_v17  ;;  %v7199_v12 = vpop.eup %7198  ;;  %v4158_v18 = vmul.f32 %v7195_v19, %v4157_v7  ;;  %v4279_v58 = vor.u32 1.1754944e-38, %v4278_v16  ;;  %v9441_v15 = vadd.f32 1.0, %v7197_v23  ;;  %3634 = vmatmul.bf16.gmra.mxu1 %v9437_v34  ;;  %3663 = vmatmul.bf16.gmra.mxu2 %v9437_v34  ;;  %vm4162_vm11 = vmor %vm4160_vm4, %vm4161_vm7 }
 0x62c   : > { %v4145_v41 = vadd.f32 %v7193_v47, %v4144_v38  ;;  %v7201_v22 = vpop.eup %7200  ;;  %v4268_v60 = vmul.f32 %v7199_v12, %v9404_v11  ;;  %vm9449_vm10 = vcmp.eq.f32.partialorder %v4276_v46, 8.507059e+37  ;;  %v4248_v20 = vand.u32 2147483647, %v9406_v48  ;;  %3692 = vmatmul.bf16.gmra.mxu3 %v9437_v34  ;;  %3721 = vmatmul.bf16.gmra.mxu0 %v9437_v34 }
 0x62d   : > { %v3921_v33 = vmul.f32 1.442695, %v3842_v36  ;;  %v3840_v1 = vsub.f32 0.0, %v3430_v25  ;;  %v4159_v24 = vadd.f32 %v7195_v19, %v4158_v18  ;;  %v4240_v32 = vmul.f32 %v7201_v22, %v9406_v48 }
 0x62e   : > { %v4149_v8 = vsel %vm4148_vm9, %v7193_v47, %v4145_v41  ;;  %v3459_v44 = vadd.f32 %v3458_v35, %v9305_v61  ;;  %v4269_v27 = vsub.f32 1.0, %v4268_v60  ;;  %v4250_v6 = vand.u32 2147483648, %v9406_v48  ;;  %v3018_v47 = vpop.f32.mrf.mxu1 }
 0x62f   : > { %v4154_v55 = vsel %vm9417_vm3, %v4153_v0, %v4149_v8  ;;  %7202 = vrcp.f32 %v9441_v15  ;;  %v4163_v2 = vsel %vm4162_vm11, %v7195_v19, %v4159_v24  ;;  %vm4273_vm12 = vweird.f32 %v7199_v12  ;;  %v3434_v18 = vpop.f32.mrf.mxu2 }
 0x630   : > { %4834 = vst [vmem:[%s9368_s3 + $0x38] sm:$0xff] %v4154_v55  ;;  %v4241_v62 = vsub.f32 1.0, %v4240_v32  ;;  %vm4244_vm13 = vweird.f32 %v9406_v48  ;;  %v4168_v14 = vsel %vm9430_vm5, %v4167_v4, %v4163_v2  ;;  %v4270_v50 = vmul.f32 %v7199_v12, %v4269_v27  ;;  %vm4274_vm1 = vmor %vm4272_vm8, %vm4273_vm12 }
 0x631   : > { %7204 = vpow2.f32 %v3921_v33  ;;  %v3917_v63 = vmul.f32 1.442695, %v3840_v1  ;;  %4835 = vst [vmem:[%s9368_s3 + $0x40] sm:$0xff] %v4168_v14  ;;  %vm4245_vm14 = vweird.f32 %v7201_v22  ;;  %vm9470_vm15 = vcmp.eq.f32.partialorder %v4248_v20, 8.507059e+37 }
 0x632   : > { %v4242_v39 = vmul.f32 %v7201_v22, %v4241_v62  ;;  %v3841_v56 = vsub.f32 0.0, %v3459_v44  ;;  %v4271_v10 = vadd.f32 %v7199_v12, %v4270_v50  ;;  %v4251_v54 = vor.u32 1.1754944e-38, %v4250_v6  ;;  %vm4246_vm2 = vmor %vm4244_vm13, %vm4245_vm14 }
 0x633   : > { %7206 = vpow2.f32 %v3917_v63  ;;  %v3491_v26 = vadd.f32 %v3490_v13, %v9296_v40  ;;  %v3433_v28 = vadd.f32 %v3432_v31, %v9302_v17  ;;  %v3462_v19 = vadd.f32 %v3461_v59, %v9305_v61 }
 0x634   : > { %v4243_v52 = vadd.f32 %v7201_v22, %v4242_v39  ;;  %v3919_v57 = vmul.f32 1.442695, %v3841_v56  ;;  %v4275_v45 = vsel %vm4274_vm1, %v7199_v12, %v4271_v10  ;;  %v4262_v35 = vand.u32 2147483647, %v9441_v15 }
 0x635   : > { %v7203_v42 = vpop.eup %7202  ;;  %v3849_v21 = vsub.f32 0.0, %v3491_v26  ;;  %v3019_v11 = vadd.f32 %v8968_v29, %v3018_v47  ;;  %v4280_v30 = vsel %vm9449_vm10, %v4279_v58, %v4275_v45  ;;  %v3017_v0 = vadd.f32 %v8968_v29, %v9427_v49 }
 0x636   : > { %v4247_v9 = vsel %vm4246_vm2, %v7201_v22, %v4243_v52  ;;  %v4254_v16 = vmul.f32 %v7203_v42, %v9441_v15  ;;  %4843 = vst [vmem:[%s9368_s3 + $0x80] sm:$0xff] %v4280_v30  ;;  %7208 = vpow2.f32 %v3919_v57  ;;  %v3847_v38 = vsub.f32 0.0, %v3433_v28 }
 0x637   : > { %v7205_v4 = vpop.eup %7204  ;;  %v4252_v48 = vsel %vm9470_vm15, %v4251_v54, %v4247_v9  ;;  %v3935_v46 = vmul.f32 1.442695, %v3849_v21  ;;  %v3848_v36 = vsub.f32 0.0, %v3462_v19  ;;  %v3036_v25 = vmax.f32 %v3019_v11, 0.0 }
 0x638   : > { %4841 = vst [vmem:[%s9368_s3 + $0x70] sm:$0xff] %v4252_v48  ;;  %v4255_v7 = vsub.f32 1.0, %v4254_v16  ;;  %v9494_v23 = vadd.f32 1.0, %v7205_v4  ;;  %v4264_v41 = vand.u32 2147483648, %v9441_v15  ;;  %v3931_v29 = vmul.f32 1.442695, %v3847_v38 }
 0x639   : > { %v7207_v12 = vpop.eup %7206  ;;  %7210 = vpow2.f32 %v3935_v46  ;;  %v3493_v49 = vadd.f32 %v3492_v3, %v9296_v40  ;;  %vm4259_vm3 = vweird.f32 %v7203_v42  ;;  %v3035_v13 = vmax.f32 %v3017_v0, 0.0 }
 0x63a   : > { %v4256_v58 = vmul.f32 %v7203_v42, %v4255_v7  ;;  %7212 = vrcp.f32 %v9494_v23  ;;  %vm4258_vm4 = vweird.f32 %v9441_v15  ;;  %v9500_v22 = vadd.f32 1.0, %v7207_v12 }
 0x63b   : > { %7214 = vpow2.f32 %v3931_v29  ;;  %v3933_v60 = vmul.f32 1.442695, %v3848_v36  ;;  %v9502_v20 = vpack.c.bf16 %v3036_v25, %v3035_v13  ;;  %v3856_v33 = vsub.f32 0.0, %v3493_v49  ;;  %vm4260_vm5 = vmor %vm4258_vm4, %vm4259_vm3  ;;  %v3463_v13 = vpop.f32.mrf.mxu3 }
 0x63c   : > { %v4257_v5 = vadd.f32 %v7203_v42, %v4256_v58  ;;  %v3435_v1 = vadd.f32 %v3434_v18, %v9302_v17  ;;  %v7209_v8 = vpop.eup %7208  ;;  %v4265_v24 = vor.u32 1.1754944e-38, %v4264_v41  ;;  %v4374_v32 = vand.u32 2147483647, %v9494_v23 }
 0x63d   : > { %7216 = vrcp.f32 %v9500_v22  ;;  %vm4263_vm6 = vcmp.eq.f32.partialorder %v4262_v35, 8.507059e+37  ;;  %v4376_v15 = vand.u32 2147483648, %v9494_v23  ;;  %v9508_v55 = vadd.f32 1.0, %v7209_v8  ;;  %3639 = vmatmul.bf16.gmra.mxu1 %v9502_v20  ;;  %3668 = vmatmul.bf16.gmra.mxu2 %v9502_v20  ;;  %v9570_v8 = vpop.f32.mrf.mxu2 }
 0x63e   : > { %v4261_v44 = vsel %vm4260_vm5, %v7203_v42, %v4257_v5  ;;  %7218 = vpow2.f32 %v3933_v60  ;;  %v3949_v31 = vmul.f32 1.442695, %v3856_v33  ;;  %3697 = vmatmul.bf16.gmra.mxu3 %v9502_v20  ;;  %3726 = vmatmul.bf16.gmra.mxu0 %v9502_v20  ;;  %v4346_v62 = vand.u32 2147483647, %v9500_v22 }
 0x63f   : > { %v7211_v27 = vpop.eup %7210  ;;  %v4266_v6 = vsel %vm4263_vm6, %v4265_v24, %v4261_v44  ;;  %7220 = vrcp.f32 %v9508_v55  ;;  %v3854_v14 = vsub.f32 0.0, %v3435_v1  ;;  %vm4370_vm7 = vweird.f32 %v9494_v23  ;;  %v3495_v1 = vpop.f32.mrf.mxu0 }
 0x640   : > { %v7213_v2 = vpop.eup %7212  ;;  %4842 = vst [vmem:[%s9368_s3 + $0x78] sm:$0xff] %v4266_v6  ;;  %vm9519_vm8 = vcmp.eq.f32.partialorder %v4374_v32, 8.507059e+37  ;;  %v9523_v39 = vadd.f32 1.0, %v7211_v27  ;;  %v4377_v43 = vor.u32 1.1754944e-38, %v4376_v15  ;;  %v4348_v56 = vand.u32 2147483648, %v9500_v22 }
 0x641   : > { %v7215_v50 = vpop.eup %7214  ;;  %v4366_v63 = vmul.f32 %v7213_v2, %v9494_v23  ;;  %7222 = vpow2.f32 %v3949_v31  ;;  %v4360_v26 = vand.u32 2147483647, %v9508_v55  ;;  %v4362_v52 = vand.u32 2147483648, %v9508_v55 }
 0x642   : > { %v9526_v47 = vadd.f32 1.0, %v7215_v50  ;;  %7224 = vrcp.f32 %v9523_v39  ;;  %vm4342_vm9 = vweird.f32 %v9500_v22  ;;  %vm9533_vm10 = vcmp.eq.f32.partialorder %v4346_v62, 8.507059e+37 }
 0x643   : > { %v7217_v10 = vpop.eup %7216  ;;  %v4367_v54 = vsub.f32 1.0, %v4366_v63  ;;  %v3945_v19 = vmul.f32 1.442695, %v3854_v14  ;;  %vm4371_vm11 = vweird.f32 %v7213_v2  ;;  %v4474_v35 = vand.u32 2147483648, %v9523_v39  ;;  %v3466_v3 = vpop.f32.mrf.mxu3 }
 0x644   : > { %v4338_v57 = vmul.f32 %v7217_v10, %v9500_v22  ;;  %v7219_v42 = vpop.eup %7218  ;;  %7226 = vrcp.f32 %v9526_v47  ;;  %v4349_v30 = vor.u32 1.1754944e-38, %v4348_v56  ;;  %vm4356_vm12 = vweird.f32 %v9508_v55  ;;  %vm4372_vm15 = vmor %vm4370_vm7, %vm4371_vm11 }
 0x645   : > { %v4368_v45 = vmul.f32 %v7213_v2, %v4367_v54  ;;  %v7221_v21 = vpop.eup %7220  ;;  %v4472_v9 = vand.u32 2147483647, %v9523_v39  ;;  %vm4343_vm13 = vweird.f32 %v7217_v10  ;;  %vm9542_vm14 = vcmp.eq.f32.partialorder %v4360_v26, 8.507059e+37 }
 0x646   : > { %v4339_v11 = vsub.f32 1.0, %v4338_v57  ;;  %v4352_v0 = vmul.f32 %v7221_v21, %v9508_v55  ;;  %v4363_v4 = vor.u32 1.1754944e-38, %v4362_v52  ;;  %v4444_v38 = vand.u32 2147483647, %v9526_v47  ;;  %vm4344_vm4 = vmor %vm4342_vm9, %vm4343_vm13  ;;  %v3509_v55 = vpop.f32.mrf.mxu1 }
 0x647   : > { %v4369_v16 = vadd.f32 %v7213_v2, %v4368_v45  ;;  %v7223_v48 = vpop.eup %7222  ;;  %v9549_v7 = vadd.f32 1.0, %v7219_v42  ;;  %7228 = vpow2.f32 %v3945_v19  ;;  %vm4468_vm1 = vweird.f32 %v9523_v39 }
 0x648   : > { %v4340_v46 = vmul.f32 %v7217_v10, %v4339_v11  ;;  %v7225_v36 = vpop.eup %7224  ;;  %v4353_v12 = vsub.f32 1.0, %v4352_v0  ;;  %v4475_v41 = vor.u32 1.1754944e-38, %v4474_v35  ;;  %vm9555_vm2 = vcmp.eq.f32.partialorder %v4472_v9, 8.507059e+37 }
 0x649   : > { %v4373_v25 = vsel %vm4372_vm15, %v7213_v2, %v4369_v16  ;;  %v4464_v23 = vmul.f32 %v7225_v36, %v9523_v39  ;;  %vm4440_vm3 = vweird.f32 %v9526_v47  ;;  %v9560_v58 = vadd.f32 1.0, %v7223_v48 }
 0x64a   : > { %v4378_v29 = vsel %vm9519_vm8, %v4377_v43, %v4373_v25  ;;  %v4341_v49 = vadd.f32 %v7217_v10, %v4340_v46  ;;  %v9562_v60 = vpop.eup %7226  ;;  %v4354_v5 = vmul.f32 %v7221_v21, %v4353_v12  ;;  %vm4357_vm5 = vweird.f32 %v7221_v21  ;;  %v3439_v25 = vpop.f32.mrf.mxu2 }
 0x64b   : > { %4850 = vst [vmem:[%s9368_s3 + $0xb8] sm:$0xff] %v4378_v29  ;;  %v4446_v33 = vand.u32 2147483648, %v9526_v47  ;;  %7230 = vrcp.f32 %v9549_v7  ;;  %v4465_v32 = vsub.f32 1.0, %v4464_v23  ;;  %v4436_v44 = vmul.f32 %v9562_v60, %v9526_v47  ;;  %vm4358_vm8 = vmor %vm4356_vm12, %vm4357_vm5 }
 0x64c   : > { %v4345_v24 = vsel %vm4344_vm4, %v7217_v10, %v4341_v49  ;;  %vm9574_vm6 = vcmp.eq.f32.partialorder %v4444_v38, 8.507059e+37  ;;  %v4355_v27 = vadd.f32 %v7221_v21, %v4354_v5  ;;  %vm4469_vm7 = vweird.f32 %v7225_v36 }
 0x64d   : > { %v4350_v22 = vsel %vm9533_vm10, %v4349_v30, %v4345_v24  ;;  %v3464_v6 = vadd.f32 %v3463_v13, %v9305_v61  ;;  %v7229_v31 = vpop.eup %7228  ;;  %v4466_v2 = vmul.f32 %v7225_v36, %v4465_v32  ;;  %v4437_v62 = vsub.f32 1.0, %v4436_v44  ;;  %3740 = vmatmul.bf16.vlgmr.msra.gmra.mxu1 %v9292_v51  ;;  %3769 = vmatmul.bf16.vlgmr.msra.gmra.mxu2 %v9292_v51  ;;  %vm4470_vm10 = vmor %vm4468_vm1, %vm4469_vm7 }
 0x64e   : > { %4848 = vst [vmem:[%s9368_s3 + $0xa8] sm:$0xff] %v4350_v22  ;;  %v4458_v14 = vand.u32 2147483647, %v9549_v7  ;;  %7232 = vrcp.f32 %v9560_v58  ;;  %v4359_v50 = vsel %vm4358_vm8, %v7221_v21, %v4355_v27  ;;  %vm4441_vm9 = vweird.f32 %v9562_v60  ;;  %3798 = vmatmul.bf16.vlgmr.msra.gmra.mxu3 %v9292_v51 }
 0x64f   : > { %v4460_v63 = vand.u32 2147483648, %v9549_v7  ;;  %v4572_v59 = vand.u32 2147483648, %v9560_v58  ;;  %v4364_v43 = vsel %vm9542_vm14, %v4363_v4, %v4359_v50  ;;  %v4467_v56 = vadd.f32 %v7225_v36, %v4466_v2  ;;  %vm4442_vm13 = vmor %vm4440_vm3, %vm4441_vm9 }
 0x650   : > { %v4438_v10 = vmul.f32 %v9562_v60, %v4437_v62  ;;  %v9596_v54 = vadd.f32 1.0, %v7229_v31  ;;  %4849 = vst [vmem:[%s9368_s3 + $0xb0] sm:$0xff] %v4364_v43  ;;  %v4447_v52 = vor.u32 1.1754944e-38, %v4446_v33  ;;  %vm4454_vm11 = vweird.f32 %v9549_v7 }
 0x651   : > { %v7231_v26 = vpop.eup %7230  ;;  %v4570_v51 = vand.u32 2147483647, %v9560_v58  ;;  %v3855_v57 = vsub.f32 0.0, %v3464_v6  ;;  %v4471_v28 = vsel %vm4470_vm10, %v7225_v36, %v4467_v56  ;;  %vm9606_vm12 = vcmp.eq.f32.partialorder %v4458_v14, 8.507059e+37  ;;  %v3497_v36 = vpop.f32.mrf.mxu0 }
 0x652   : > { %v4439_v19 = vadd.f32 %v9562_v60, %v4438_v10  ;;  %v4450_v42 = vmul.f32 %v7231_v26, %v9549_v7  ;;  %v3496_v35 = vadd.f32 %v3495_v1, %v9296_v40  ;;  %v4476_v39 = vsel %vm9555_vm2, %v4475_v41, %v4471_v28 }
 0x653   : > { %v4461_v21 = vor.u32 1.1754944e-38, %v4460_v63  ;;  %vm4566_vm14 = vweird.f32 %v9560_v58  ;;  %v4573_v11 = vor.u32 1.1754944e-38, %v4572_v59  ;;  %7234 = vrcp.f32 %v9596_v54  ;;  %4857 = vst [vmem:[%s9368_s3 + $0xf0] sm:$0xff] %v4476_v39 }
 0x654   : > { %v7233_v30 = vpop.eup %7232  ;;  %v4443_v9 = vsel %vm4442_vm13, %v9562_v60, %v4439_v19  ;;  %v4451_v16 = vsub.f32 1.0, %v4450_v42  ;;  %vm4455_vm15 = vweird.f32 %v7231_v26  ;;  %v3947_v0 = vmul.f32 1.442695, %v3855_v57 }
 0x655   : > { %v4448_v4 = vsel %vm9574_vm6, %v4447_v52, %v4443_v9  ;;  %v4562_v47 = vmul.f32 %v7233_v30, %v9560_v58  ;;  %vm9624_vm1 = vcmp.eq.f32.partialorder %v4570_v51, 8.507059e+37  ;;  %v4542_v46 = vand.u32 2147483647, %v9596_v54  ;;  %vm4456_vm3 = vmor %vm4454_vm11, %vm4455_vm15 }
 0x656   : > { %v4544_v38 = vand.u32 2147483648, %v9596_v54  ;;  %4855 = vst [vmem:[%s9368_s3 + $0xe0] sm:$0xff] %v4448_v4  ;;  %v4452_v12 = vmul.f32 %v7231_v26, %v4451_v16  ;;  %vm4567_vm2 = vweird.f32 %v7233_v30  ;;  %7236 = vpow2.f32 %v3947_v0 }
 0x657   : > { %v3863_v41 = vsub.f32 0.0, %v3496_v35  ;;  %v4563_v29 = vsub.f32 1.0, %v4562_v47  ;;  %v9632_v49 = vperm.slane %v9290_v53, 3  ;;  %v3438_v23 = vadd.f32 %v9570_v8, %v9302_v17  ;;  %v3511_v8 = vpop.f32.mrf.mxu1  ;;  %vm4568_vm5 = vmor %vm4566_vm14, %vm4567_vm2  ;;  %v3468_v35 = vpop.f32.mrf.mxu3 }
 0x658   : > { %v3467_v18 = vadd.f32 %v3466_v3, %v9305_v61  ;;  %v4453_v13 = vadd.f32 %v7231_v26, %v4452_v12  ;;  %v3498_v5 = vadd.f32 %v3497_v36, %v9296_v40  ;;  %v3440_v33 = vadd.f32 %v3439_v25, %v9302_v17 }
 0x659   : > { %v3963_v60 = vmul.f32 1.442695, %v3863_v41  ;;  %v7235_v1 = vpop.eup %7234  ;;  %v4564_v24 = vmul.f32 %v7233_v30, %v4563_v29  ;;  %v3510_v53 = vadd.f32 %v3509_v55, %v9632_v49  ;;  %v3861_v32 = vsub.f32 0.0, %v3438_v23 }
 0x65a   : > { %v3862_v44 = vsub.f32 0.0, %v3467_v18  ;;  %v4457_v15 = vsel %vm4456_vm3, %v7231_v26, %v4453_v13  ;;  %v4534_v22 = vmul.f32 %v7235_v1, %v9596_v54  ;;  %vm4539_vm4 = vweird.f32 %v7235_v1 }
 0x65b   : > { %7238 = vpow2.f32 %v3963_v60  ;;  %v4462_v27 = vsel %vm9606_vm12, %v4461_v21, %v4457_v15  ;;  %v4565_v6 = vadd.f32 %v7233_v30, %v4564_v24  ;;  %v3822_v31 = vsub.f32 0.0, %v3510_v53 }
 0x65c   : > { %v3959_v2 = vmul.f32 1.442695, %v3861_v32  ;;  %v7237_v7 = vpop.eup %7236  ;;  %4856 = vst [vmem:[%s9368_s3 + $0xe8] sm:$0xff] %v4462_v27  ;;  %v4535_v62 = vsub.f32 1.0, %v4534_v22  ;;  %v3961_v14 = vmul.f32 1.442695, %v3862_v44  ;;  %v3512_v63 = vadd.f32 %v3511_v8, %v9632_v49 }
 0x65d   : > { %v3870_v50 = vsub.f32 0.0, %v3498_v5  ;;  %v4569_v59 = vsel %vm4568_vm5, %v7233_v30, %v4565_v6  ;;  %v9651_v55 = vadd.f32 1.0, %v7237_v7  ;;  %v3881_v43 = vmul.f32 1.442695, %v3822_v31  ;;  %3745 = vmatmul.bf16.gmra.mxu1 %v9313_v37  ;;  %3774 = vmatmul.bf16.gmra.mxu2 %v9313_v37 }
 0x65e   : > { %7240 = vpow2.f32 %v3959_v2  ;;  %v4574_v56 = vsel %vm9624_vm1, %v4573_v11, %v4569_v59  ;;  %v4536_v10 = vmul.f32 %v7235_v1, %v4535_v62  ;;  %vm4538_vm6 = vweird.f32 %v9596_v54  ;;  %3803 = vmatmul.bf16.gmra.mxu3 %v9313_v37 }
 0x65f   : > { %7242 = vpow2.f32 %v3961_v14  ;;  %v3977_v26 = vmul.f32 1.442695, %v3870_v50  ;;  %4864 = vst [vmem:[%s9368_s3 + $0x128] sm:$0xff] %v4574_v56  ;;  %v3829_v51 = vsub.f32 0.0, %v3512_v63  ;;  %v3868_v57 = vsub.f32 0.0, %v3440_v33  ;;  %vm4540_vm7 = vmor %vm4538_vm6, %vm4539_vm4  ;;  %v3514_v25 = vpop.f32.mrf.mxu1 }
 0x660   : > { %7244 = vrcp.f32 %v9651_v55  ;;  %v4537_v52 = vadd.f32 %v7235_v1, %v4536_v10  ;;  %v4545_v28 = vor.u32 1.1754944e-38, %v4544_v38  ;;  %vm4543_vm8 = vcmp.eq.f32.partialorder %v4542_v46, 8.507059e+37 }
 0x661   : > { %v7239_v58 = vpop.eup %7238  ;;  %7246 = vpow2.f32 %v3881_v43  ;;  %v3895_v45 = vmul.f32 1.442695, %v3829_v51  ;;  %v4556_v21 = vand.u32 2147483647, %v9651_v55  ;;  %v3973_v11 = vmul.f32 1.442695, %v3868_v57 }
 0x662   : > { %v9662_v19 = vadd.f32 1.0, %v7239_v58  ;;  %v4541_v42 = vsel %vm4540_vm7, %v7235_v1, %v4537_v52  ;;  %7248 = vpow2.f32 %v3977_v26  ;;  %v4558_v9 = vand.u32 2147483648, %v9651_v55 }
 0x663   : > { %v4546_v37 = vsel %vm4543_vm8, %v4545_v28, %v4541_v42  ;;  %v9675_v54 = vadd.f32 %v3468_v35, %v9305_v61  ;;  %vm4552_vm9 = vweird.f32 %v9651_v55  ;;  %vm9681_vm10 = vcmp.eq.f32.partialorder %v4556_v21, 8.507059e+37 }
 0x664   : > { %v7241_v39 = vpop.eup %7240  ;;  %7250 = vrcp.f32 %v9662_v19  ;;  %4862 = vst [vmem:[%s9368_s3 + $0x118] sm:$0xff] %v4546_v37  ;;  %v4668_v48 = vand.u32 2147483647, %v9662_v19  ;;  %v4670_v38 = vand.u32 2147483648, %v9662_v19  ;;  %v4559_v29 = vor.u32 1.1754944e-38, %v4558_v9 }
 0x665   : > { %v7243_v30 = vpop.eup %7242  ;;  %v9670_v16 = vadd.f32 1.0, %v7241_v39  ;;  %7252 = vpow2.f32 %v3895_v45  ;;  %vm4664_vm11 = vweird.f32 %v9662_v19  ;;  %v3869_v60 = vsub.f32 0.0, %v9675_v54 }
 0x666   : > { %v7245_v0 = vpop.eup %7244  ;;  %v9672_v3 = vadd.f32 1.0, %v7243_v30  ;;  %vm9695_vm13 = vcmp.eq.f32.partialorder %v4668_v48, 8.507059e+37  ;;  %v9700_v24 = vadd.f32 %v3514_v25, %v9632_v49  ;;  %v4671_v32 = vor.u32 1.1754944e-38, %v4670_v38 }
 0x667   : > { %v7247_v4 = vpop.eup %7246  ;;  %v4548_v47 = vmul.f32 %v7245_v0, %v9651_v55  ;;  %7254 = vrcp.f32 %v9670_v16  ;;  %v4640_v13 = vand.u32 2147483647, %v9670_v16  ;;  %vm4553_vm12 = vweird.f32 %v7245_v0 }
 0x668   : > { %v9686_v36 = vadd.f32 1.0, %v7247_v4  ;;  %7256 = vpow2.f32 %v3973_v11  ;;  %v7249_v12 = vpop.eup %7248  ;;  %vm4636_vm14 = vweird.f32 %v9670_v16  ;;  %v4642_v44 = vand.u32 2147483648, %v9670_v16  ;;  %vm9711_vm15 = vmor %vm4552_vm9, %vm4553_vm12  ;;  %v3538_v4 = vpop.f32.mrf.mxu2 }
 0x669   : > { %v4549_v41 = vsub.f32 1.0, %v4548_v47  ;;  %7258 = vrcp.f32 %v9672_v3  ;;  %v4654_v8 = vand.u32 2147483647, %v9672_v3  ;;  %v9706_v31 = vadd.f32 1.0, %v7249_v12 }
 0x66a   : > { %v7251_v23 = vpop.eup %7250  ;;  %7260 = vrcp.f32 %v9686_v36  ;;  %v4096_v18 = vand.u32 2147483648, %v9686_v36  ;;  %v4094_v6 = vand.u32 2147483647, %v9686_v36  ;;  %vm9718_vm2 = vcmp.eq.f32.partialorder %v4640_v13, 8.507059e+37 }
 0x66b   : > { %v4550_v5 = vmul.f32 %v7245_v0, %v4549_v41  ;;  %v4660_v33 = vmul.f32 %v7251_v23, %v9662_v19  ;;  %v7253_v53 = vpop.eup %7252  ;;  %vm4665_vm1 = vweird.f32 %v7251_v23  ;;  %vm4650_vm3 = vweird.f32 %v9672_v3  ;;  %v3596_v19 = vpop.f32.mrf.mxu0 }
 0x66c   : > { %v9715_v62 = vor.u32 1.1754944e-38, %v4096_v18  ;;  %vm4090_vm4 = vweird.f32 %v9686_v36  ;;  %7262 = vrcp.f32 %v9706_v31  ;;  %v9727_v43 = vadd.f32 1.0, %v7253_v53  ;;  %vm4666_vm7 = vmor %vm4664_vm11, %vm4665_vm1 }
 0x66d   : > { %v7255_v15 = vpop.eup %7254  ;;  %v4551_v22 = vadd.f32 %v7245_v0, %v4550_v5  ;;  %v4661_v27 = vsub.f32 1.0, %v4660_v33  ;;  %3750 = vmatmul.bf16.gmra.mxu1 %v9437_v34  ;;  %3779 = vmatmul.bf16.gmra.mxu2 %v9437_v34  ;;  %v4643_v58 = vor.u32 1.1754944e-38, %v4642_v44  ;;  %vm9737_vm5 = vcmp.eq.f32.partialorder %v4094_v6, 8.507059e+37  ;;  %v3516_v6 = vpop.f32.mrf.mxu1 }
 0x66e   : > { %v7257_v2 = vpop.eup %7256  ;;  %v4632_v14 = vmul.f32 %v7255_v15, %v9670_v16  ;;  %3808 = vmatmul.bf16.gmra.mxu3 %v9437_v34  ;;  %vm9741_vm6 = vcmp.eq.f32.partialorder %v4654_v8, 8.507059e+37  ;;  %v4656_v45 = vand.u32 2147483648, %v9672_v3  ;;  %vm4637_vm8 = vweird.f32 %v7255_v15 }
 0x66f   : > { %v7259_v63 = vpop.eup %7258  ;;  %v4555_v59 = vsel %vm9711_vm15, %v7245_v0, %v4551_v22  ;;  %v4662_v55 = vmul.f32 %v7251_v23, %v4661_v27  ;;  %v9749_v39 = vadd.f32 1.0, %v7257_v2  ;;  %7264 = vrcp.f32 %v9727_v43  ;;  %vm4638_vm11 = vmor %vm4636_vm14, %vm4637_vm8  ;;  %v3567_v27 = vpop.f32.mrf.mxu3 }
 0x670   : > { %v7261_v56 = vpop.eup %7260  ;;  %v4560_v10 = vsel %vm9681_vm10, %v4559_v29, %v4555_v59  ;;  %v4633_v26 = vsub.f32 1.0, %v4632_v14  ;;  %v4646_v52 = vmul.f32 %v7259_v63, %v9672_v3  ;;  %vm4651_vm9 = vweird.f32 %v7259_v63 }
 0x671   : > { %4863 = vst [vmem:[%s9368_s3 + $0x120] sm:$0xff] %v4560_v10  ;;  %v4663_v51 = vadd.f32 %v7251_v23, %v4662_v55  ;;  %v4086_v57 = vmul.f32 %v7261_v56, %v9686_v36  ;;  %v4766_v0 = vand.u32 2147483647, %v9706_v31  ;;  %vm4091_vm10 = vweird.f32 %v7261_v56  ;;  %vm4652_vm12 = vmor %vm4650_vm3, %vm4651_vm9 }
 0x672   : > { %v4634_v34 = vmul.f32 %v7255_v15, %v4633_v26  ;;  %v4647_v35 = vsub.f32 1.0, %v4646_v52  ;;  %v7263_v47 = vpop.eup %7262  ;;  %v4768_v46 = vand.u32 2147483648, %v9706_v31  ;;  %v4192_v38 = vand.u32 2147483647, %v9727_v43  ;;  %vm4092_vm14 = vmor %vm4090_vm4, %vm4091_vm10 }
 0x673   : > { %v4667_v37 = vsel %vm4666_vm7, %v7251_v23, %v4663_v51  ;;  %v4087_v21 = vsub.f32 1.0, %v4086_v57  ;;  %v4758_v41 = vmul.f32 %v7263_v47, %v9706_v31  ;;  %v4194_v29 = vand.u32 2147483648, %v9727_v43  ;;  %v3598_v51 = vpop.f32.mrf.mxu0  ;;  %v3540_v57 = vpop.f32.mrf.mxu2 }
 0x674   : > { %v4672_v11 = vsel %vm9695_vm13, %v4671_v32, %v4667_v37  ;;  %v4635_v30 = vadd.f32 %v7255_v15, %v4634_v34  ;;  %v4648_v9 = vmul.f32 %v7259_v63, %v4647_v35  ;;  %v4657_v16 = vor.u32 1.1754944e-38, %v4656_v45 }
 0x675   : > { %4871 = vst [vmem:[%s9368_s3 + $0x160] sm:$0xff] %v4672_v11  ;;  %v4088_v48 = vmul.f32 %v7261_v56, %v4087_v21  ;;  %vm4762_vm13 = vweird.f32 %v9706_v31  ;;  %v4759_v5 = vsub.f32 1.0, %v4758_v41  ;;  %vm9772_vm15 = vcmp.eq.f32.partialorder %v4766_v0, 8.507059e+37  ;;  %v7265_v3 = vpop.eup %7264 }
 0x676   : > { %v4639_v25 = vsel %vm4638_vm11, %v7255_v15, %v4635_v30  ;;  %v4649_v12 = vadd.f32 %v7259_v63, %v4648_v9  ;;  %vm4188_vm1 = vweird.f32 %v9727_v43  ;;  %7266 = vrcp.f32 %v9749_v39 }
 0x677   : > { %v4089_v23 = vadd.f32 %v7261_v56, %v4088_v48  ;;  %v4644_v18 = vsel %vm9718_vm2, %v4643_v58, %v4639_v25  ;;  %vm4763_vm2 = vweird.f32 %v7263_v47  ;;  %v4769_v36 = vor.u32 1.1754944e-38, %v4768_v46  ;;  %v3569_v41 = vpop.f32.mrf.mxu3 }
 0x678   : > { %4869 = vst [vmem:[%s9368_s3 + $0x150] sm:$0xff] %v4644_v18  ;;  %v4653_v13 = vsel %vm4652_vm12, %v7259_v63, %v4649_v12  ;;  %v4760_v44 = vmul.f32 %v7263_v47, %v4759_v5  ;;  %v4184_v8 = vmul.f32 %v7265_v3, %v9727_v43  ;;  %vm9785_vm3 = vcmp.eq.f32.partialorder %v4192_v38, 8.507059e+37  ;;  %v7616_v63 = vld [vmem:[%s11266_s20] sm:$0x7f] }
 0x679   : > { %v4093_v1 = vsel %vm4092_vm14, %v7261_v56, %v4089_v23  ;;  %v4658_v53 = vsel %vm9741_vm6, %v4657_v16, %v4653_v13  ;;  %v4195_v22 = vor.u32 1.1754944e-38, %v4194_v29  ;;  %vm4189_vm4 = vweird.f32 %v7265_v3 }
 0x67a   : > { %v4098_v32 = vsel %vm9737_vm5, %v9715_v62, %v4093_v1  ;;  %4870 = vst [vmem:[%s9368_s3 + $0x158] sm:$0xff] %v4658_v53  ;;  %v4738_v2 = vand.u32 2147483647, %v9749_v39  ;;  %v3975_v7 = vmul.f32 1.442695, %v3869_v60  ;;  %v3836_v62 = vsub.f32 0.0, %v9700_v24  ;;  %vm4764_vm5 = vmor %vm4762_vm13, %vm4763_vm2 }
 0x67b   : > { %4830 = vst [vmem:[%s9368_s3 + $0x18] sm:$0xff] %v4098_v32  ;;  %v4761_v14 = vadd.f32 %v7263_v47, %v4760_v44  ;;  %v4185_v50 = vsub.f32 1.0, %v4184_v8  ;;  %v9797_v59 = vperm.slane %v7616_v63, 6  ;;  %v9799_v55 = vperm.slane %v7616_v63, 4  ;;  %vm4190_vm6 = vmor %vm4188_vm1, %vm4189_vm4 }
 0x67c   : > { %7268 = vpow2.f32 %v3975_v7  ;;  %v3909_v56 = vmul.f32 1.442695, %v3836_v62  ;;  %v9804_v54 = vperm.slane %v7616_v63, 5  ;;  %v3517_v60 = vadd.f32 %v3516_v6, %v9632_v49  ;;  %v7267_v24 = vpop.eup %7266  ;;  %v3601_v6 = vpop.f32.mrf.mxu0 }
 0x67d   : > { %v4765_v10 = vsel %vm4764_vm5, %v7263_v47, %v4761_v14  ;;  %v4186_v26 = vmul.f32 %v7265_v3, %v4185_v50  ;;  %v3597_v58 = vadd.f32 %v3596_v19, %v9797_v59  ;;  %v3539_v52 = vadd.f32 %v3538_v4, %v9799_v55  ;;  %3755 = vmatmul.bf16.gmra.mxu1 %v9502_v20 }
 0x67e   : > { %v4770_v31 = vsel %vm9772_vm15, %v4769_v36, %v4765_v10  ;;  %v4730_v28 = vmul.f32 %v7267_v24, %v9749_v39  ;;  %v4740_v42 = vand.u32 2147483648, %v9749_v39  ;;  %7270 = vpow2.f32 %v3909_v56  ;;  %3784 = vmatmul.bf16.gmra.mxu2 %v9502_v20  ;;  %3813 = vmatmul.bf16.gmra.mxu3 %v9502_v20 }
 0x67f   : > { %4878 = vst [vmem:[%s9368_s3 + $0x198] sm:$0xff] %v4770_v31  ;;  %v4187_v45 = vadd.f32 %v7265_v3, %v4186_v26  ;;  %v3825_v34 = vsub.f32 0.0, %v3597_v58  ;;  %v3823_v35 = vsub.f32 0.0, %v3539_v52  ;;  %v3568_v37 = vadd.f32 %v3567_v27, %v9804_v54  ;;  %v3519_v27 = vpop.f32.mrf.mxu1 }
 0x680   : > { %v4731_v21 = vsub.f32 1.0, %v4730_v28  ;;  %v3843_v11 = vsub.f32 0.0, %v3517_v60  ;;  %v3599_v30 = vadd.f32 %v3598_v51, %v9797_v59  ;;  %v3541_v9 = vadd.f32 %v3540_v57, %v9799_v55 }
 0x681   : > { %v4191_v0 = vsel %vm4190_vm6, %v7265_v3, %v4187_v45  ;;  %v3887_v19 = vmul.f32 1.442695, %v3825_v34  ;;  %v3883_v4 = vmul.f32 1.442695, %v3823_v35  ;;  %v3824_v47 = vsub.f32 0.0, %v3568_v37 }
 0x682   : > { %v7269_v48 = vpop.eup %7268  ;;  %v4196_v46 = vsel %vm9785_vm3, %v4195_v22, %v4191_v0  ;;  %v4732_v38 = vmul.f32 %v7267_v24, %v4731_v21  ;;  %vm4735_vm7 = vweird.f32 %v7267_v24  ;;  %v3832_v20 = vsub.f32 0.0, %v3599_v30 }
 0x683   : > { %4837 = vst [vmem:[%s9368_s3 + $0x50] sm:$0xff] %v4196_v46  ;;  %v9826_v43 = vadd.f32 1.0, %v7269_v48  ;;  %7272 = vpow2.f32 %v3887_v19  ;;  %v3885_v25 = vmul.f32 1.442695, %v3824_v47  ;;  %v3830_v12 = vsub.f32 0.0, %v3541_v9 }
 0x684   : > { %v7271_v29 = vpop.eup %7270  ;;  %v4733_v23 = vadd.f32 %v7267_v24, %v4732_v38  ;;  %vm4734_vm8 = vweird.f32 %v9749_v39  ;;  %vm4739_vm9 = vcmp.eq.f32.partialorder %v4738_v2, 8.507059e+37  ;;  %7274 = vpow2.f32 %v3883_v4 }
 0x685   : > { %vm4736_vm10 = vmor %vm4734_vm8, %vm4735_vm7  ;;  %v4741_v18 = vor.u32 1.1754944e-38, %v4740_v42  ;;  %7276 = vrcp.f32 %v9826_v43  ;;  %v3923_v16 = vmul.f32 1.442695, %v3843_v11  ;;  %v3901_v13 = vmul.f32 1.442695, %v3832_v20 }
 0x686   : > { %v4737_v5 = vsel %vm4736_vm10, %v7267_v24, %v4733_v23  ;;  %v9830_v33 = vadd.f32 1.0, %v7271_v29  ;;  %7278 = vpow2.f32 %v3885_v25  ;;  %v3570_v3 = vadd.f32 %v3569_v41, %v9804_v54 }
 0x687   : > { %v4742_v1 = vsel %vm4739_vm9, %v4741_v18, %v4737_v5  ;;  %v3897_v53 = vmul.f32 1.442695, %v3830_v12  ;;  %v4752_v36 = vand.u32 2147483647, %v9826_v43  ;;  %v4754_v39 = vand.u32 2147483648, %v9826_v43  ;;  %v3521_v20 = vpop.f32.mrf.mxu1 }
 0x688   : > { %4876 = vst [vmem:[%s9368_s3 + $0x188] sm:$0xff] %v4742_v1  ;;  %7280 = vrcp.f32 %v9830_v33  ;;  %v4292_v8 = vand.u32 2147483648, %v9830_v33  ;;  %v3831_v22 = vsub.f32 0.0, %v3570_v3  ;;  %vm4748_vm11 = vweird.f32 %v9826_v43 }
 0x689   : > { %v7273_v32 = vpop.eup %7272  ;;  %7282 = vpow2.f32 %v3923_v16  ;;  %v4290_v7 = vand.u32 2147483647, %v9830_v33  ;;  %vm9845_vm12 = vcmp.eq.f32.partialorder %v4752_v36, 8.507059e+37  ;;  %v4755_v56 = vor.u32 1.1754944e-38, %v4754_v39 }
 0x68a   : > { %v7275_v44 = vpop.eup %7274  ;;  %v9838_v15 = vadd.f32 1.0, %v7273_v32  ;;  %7284 = vpow2.f32 %v3901_v13  ;;  %vm4286_vm13 = vweird.f32 %v9830_v33  ;;  %v9853_v60 = vadd.f32 %v3519_v27, %v9632_v49 }
 0x68b   : > { %v7277_v2 = vpop.eup %7276  ;;  %v9842_v62 = vadd.f32 1.0, %v7275_v44  ;;  %7286 = vpow2.f32 %v3897_v53  ;;  %v9856_v24 = vadd.f32 %v3601_v6, %v9797_v59  ;;  %v4293_v58 = vor.u32 1.1754944e-38, %v4292_v8 }
 0x68c   : > { %v7279_v14 = vpop.eup %7278  ;;  %v4744_v50 = vmul.f32 %v7277_v2, %v9826_v43  ;;  %7288 = vrcp.f32 %v9838_v15  ;;  %v9860_v51 = vmul.f32 1.442695, %v3831_v22  ;;  %vm4749_vm14 = vweird.f32 %v7277_v2 }
 0x68d   : > { %7290 = vrcp.f32 %v9842_v62  ;;  %v9858_v52 = vadd.f32 1.0, %v7279_v14  ;;  %vm9863_vm15 = vcmp.eq.f32.partialorder %v4290_v7, 8.507059e+37  ;;  %v4136_v42 = vand.u32 2147483647, %v9838_v15  ;;  %vm4750_vm4 = vmor %vm4748_vm11, %vm4749_vm14 }
 0x68e   : > { %v7281_v10 = vpop.eup %7280  ;;  %v4745_v26 = vsub.f32 1.0, %v4744_v50  ;;  %v4138_v45 = vand.u32 2147483648, %v9838_v15  ;;  %v4108_v37 = vand.u32 2147483647, %v9842_v62  ;;  %v4110_v21 = vand.u32 2147483648, %v9842_v62 }
 0x68f   : > { %v7283_v57 = vpop.eup %7282  ;;  %v4282_v31 = vmul.f32 %v7281_v10, %v9830_v33  ;;  %7292 = vrcp.f32 %v9858_v52  ;;  %vm4132_vm1 = vweird.f32 %v9838_v15  ;;  %v3850_v9 = vsub.f32 0.0, %v9853_v60 }
 0x690   : > { %v7285_v34 = vpop.eup %7284  ;;  %v4746_v35 = vmul.f32 %v7277_v2, %v4745_v26  ;;  %v3839_v0 = vsub.f32 0.0, %v9856_v24  ;;  %vm4287_vm2 = vweird.f32 %v7281_v10  ;;  %vm4104_vm3 = vweird.f32 %v9842_v62  ;;  %v3603_v24 = vpop.f32.mrf.mxu0 }
 0x691   : > { %v7287_v11 = vpop.eup %7286  ;;  %v4283_v30 = vsub.f32 1.0, %v4282_v31  ;;  %v9876_v47 = vadd.f32 1.0, %v7283_v57  ;;  %vm9882_vm5 = vcmp.eq.f32.partialorder %v4136_v42, 8.507059e+37  ;;  %v4139_v25 = vor.u32 1.1754944e-38, %v4138_v45  ;;  %vm4288_vm8 = vmor %vm4286_vm13, %vm4287_vm2  ;;  %v3543_v31 = vpop.f32.mrf.mxu2 }
 0x692   : > { %v7289_v19 = vpop.eup %7288  ;;  %v4747_v4 = vadd.f32 %v7277_v2, %v4746_v35  ;;  %vm9887_vm6 = vcmp.eq.f32.partialorder %v4108_v37, 8.507059e+37  ;;  %v4111_v23 = vor.u32 1.1754944e-38, %v4110_v21  ;;  %v9891_v18 = vadd.f32 1.0, %v7285_v34 }
 0x693   : > { %v7291_v48 = vpop.eup %7290  ;;  %v4284_v46 = vmul.f32 %v7281_v10, %v4283_v30  ;;  %v4128_v38 = vmul.f32 %v7289_v19, %v9838_v15  ;;  %vm4118_vm7 = vweird.f32 %v9858_v52  ;;  %7294 = vrcp.f32 %v9876_v47 }
 0x694   : > { %v4751_v12 = vsel %vm4750_vm4, %v7277_v2, %v4747_v4  ;;  %v4100_v41 = vmul.f32 %v7291_v48, %v9842_v62  ;;  %v4122_v1 = vand.u32 2147483647, %v9858_v52  ;;  %v4124_v53 = vand.u32 2147483648, %v9858_v52 }
 0x695   : > { %v4756_v43 = vsel %vm9845_vm12, %v4755_v56, %v4751_v12  ;;  %v4285_v16 = vadd.f32 %v7281_v10, %v4284_v46  ;;  %v4129_v13 = vsub.f32 1.0, %v4128_v38  ;;  %v7293_v5 = vpop.eup %7292  ;;  %v9903_v36 = vadd.f32 1.0, %v7287_v11  ;;  %v3572_v38 = vpop.f32.mrf.mxu3 }
 0x696   : > { %4877 = vst [vmem:[%s9368_s3 + $0x190] sm:$0xff] %v4756_v43  ;;  %v4101_v3 = vsub.f32 1.0, %v4100_v41  ;;  %vm4133_vm9 = vweird.f32 %v7289_v19  ;;  %v4114_v44 = vmul.f32 %v7293_v5, %v9858_v52  ;;  %vm4105_vm10 = vweird.f32 %v7291_v48 }
 0x697   : > { %v4289_v39 = vsel %vm4288_vm8, %v7281_v10, %v4285_v16  ;;  %v4130_v32 = vmul.f32 %v7289_v19, %v4129_v13  ;;  %v4388_v33 = vand.u32 2147483647, %v9876_v47  ;;  %v4390_v2 = vand.u32 2147483648, %v9876_v47  ;;  %vm4134_vm11 = vmor %vm4132_vm1, %vm4133_vm9 }
 0x698   : > { %v4294_v8 = vsel %vm9863_vm15, %v4293_v58, %v4289_v39  ;;  %v4102_v22 = vmul.f32 %v7291_v48, %v4101_v3  ;;  %v4115_v6 = vsub.f32 1.0, %v4114_v44  ;;  %7296 = vrcp.f32 %v9891_v18  ;;  %vm4106_vm13 = vmor %vm4104_vm3, %vm4105_vm10 }
 0x699   : > { %4844 = vst [vmem:[%s9368_s3 + $0x88] sm:$0xff] %v4294_v8  ;;  %v4131_v27 = vadd.f32 %v7289_v19, %v4130_v32  ;;  %vm9914_vm12 = vcmp.eq.f32.partialorder %v4122_v1, 8.507059e+37  ;;  %v4125_v50 = vor.u32 1.1754944e-38, %v4124_v53  ;;  %7298 = vrcp.f32 %v9903_v36  ;;  %v7295_v63 = vpop.eup %7294 }
 0x69a   : > { %v4103_v7 = vadd.f32 %v7291_v48, %v4102_v22  ;;  %v4116_v10 = vmul.f32 %v7293_v5, %v4115_v6  ;;  %vm4119_vm14 = vweird.f32 %v7293_v5  ;;  %vm4384_vm15 = vweird.f32 %v9876_v47 }
 0x69b   : > { %v4135_v56 = vsel %vm4134_vm11, %v7289_v19, %v4131_v27  ;;  %v4380_v58 = vmul.f32 %v7295_v63, %v9876_v47  ;;  %vm9925_vm1 = vcmp.eq.f32.partialorder %v4388_v33, 8.507059e+37  ;;  %v4391_v42 = vor.u32 1.1754944e-38, %v4390_v2  ;;  %vm4120_vm2 = vmor %vm4118_vm7, %vm4119_vm14 }
 0x69c   : > { %v4140_v15 = vsel %vm9882_vm5, %v4139_v25, %v4135_v56  ;;  %v4107_v26 = vsel %vm4106_vm13, %v7291_v48, %v4103_v7  ;;  %v4117_v28 = vadd.f32 %v7293_v5, %v4116_v10  ;;  %v4234_v45 = vand.u32 2147483647, %v9891_v18  ;;  %v3545_v10 = vpop.f32.mrf.mxu2 }
 0x69d   : > { %4833 = vst.msk [vmem:[%s9368_s3 + $0x30] sm:$0xff] %vm1266_vm0, %v4140_v15  ;;  %v4112_v62 = vsel %vm9887_vm6, %v4111_v23, %v4107_v26  ;;  %v4381_v34 = vsub.f32 1.0, %v4380_v58  ;;  %vm4230_vm3 = vweird.f32 %v9891_v18  ;;  %v4236_v35 = vand.u32 2147483648, %v9891_v18 }
 0x69e   : > { %4831 = vst [vmem:[%s9368_s3 + $0x20] sm:$0xff] %v4112_v62  ;;  %v4206_v37 = vand.u32 2147483647, %v9903_v36  ;;  %7300 = vpow2.f32 %v9860_v51  ;;  %v7297_v21 = vpop.eup %7296  ;;  %v4121_v11 = vsel %vm4120_vm2, %v7293_v5, %v4117_v28  ;;  %vm4202_vm4 = vweird.f32 %v9903_v36 }
 0x69f   : > { %v3937_v30 = vmul.f32 1.442695, %v3850_v9  ;;  %v3915_v52 = vmul.f32 1.442695, %v3839_v0  ;;  %v3544_v19 = vadd.f32 %v3543_v31, %v9799_v55  ;;  %v7299_v4 = vpop.eup %7298  ;;  %v4126_v48 = vsel %vm9914_vm12, %v4125_v50, %v4121_v11  ;;  %v3574_v11 = vpop.f32.mrf.mxu3 }
 0x6a0   : > { %v4382_v46 = vmul.f32 %v7295_v63, %v4381_v34  ;;  %vm4385_vm5 = vweird.f32 %v7295_v63  ;;  %v4226_v51 = vmul.f32 %v7297_v21, %v9891_v18  ;;  %4832 = vst [vmem:[%s9368_s3 + $0x28] sm:$0xff] %v4126_v48  ;;  %vm4231_vm6 = vweird.f32 %v7297_v21 }
 0x6a1   : > { %v4198_v60 = vmul.f32 %v7299_v4, %v9903_v36  ;;  %v4208_v9 = vand.u32 2147483648, %v9903_v36  ;;  %7302 = vpow2.f32 %v3937_v30  ;;  %v3837_v12 = vsub.f32 0.0, %v3544_v19  ;;  %vm4386_vm7 = vmor %vm4384_vm15, %vm4385_vm5 }
 0x6a2   : > { %v4383_v0 = vadd.f32 %v7295_v63, %v4382_v46  ;;  %v4227_v25 = vsub.f32 1.0, %v4226_v51  ;;  %7304 = vpow2.f32 %v3915_v52  ;;  %vm4203_vm8 = vweird.f32 %v7299_v4  ;;  %vm4232_vm10 = vmor %vm4230_vm3, %vm4231_vm6 }
 0x6a3   : > { %v4199_v41 = vsub.f32 1.0, %v4198_v60  ;;  %v3573_v29 = vadd.f32 %v3572_v38, %v9804_v54  ;;  %v3522_v23 = vadd.f32 %v3521_v20, %v9632_v49  ;;  %v3911_v5 = vmul.f32 1.442695, %v3837_v12  ;;  %vm4204_vm12 = vmor %vm4202_vm4, %vm4203_vm8 }
 0x6a4   : > { %v7301_v43 = vpop.eup %7300  ;;  %v4387_v16 = vsel %vm4386_vm7, %v7295_v63, %v4383_v0  ;;  %v4228_v13 = vmul.f32 %v7297_v21, %v4227_v25  ;;  %v3604_v3 = vadd.f32 %v3603_v24, %v9797_v59  ;;  %vm4235_vm9 = vcmp.eq.f32.partialorder %v4234_v45, 8.507059e+37 }
 0x6a5   : > { %v4392_v1 = vsel %vm9925_vm1, %v4391_v42, %v4387_v16  ;;  %v4200_v53 = vmul.f32 %v7299_v4, %v4199_v41  ;;  %v9960_v39 = vadd.f32 1.0, %v7301_v43  ;;  %v3838_v47 = vsub.f32 0.0, %v3573_v29 }
 0x6a6   : > { %4851 = vst [vmem:[%s9368_s3 + $0xc0] sm:$0xff] %v4392_v1  ;;  %v4229_v32 = vadd.f32 %v7297_v21, %v4228_v13  ;;  %v4237_v44 = vor.u32 1.1754944e-38, %v4236_v35  ;;  %7306 = vpow2.f32 %v3911_v5  ;;  %vm4207_vm11 = vcmp.eq.f32.partialorder %v4206_v37, 8.507059e+37 }
 0x6a7   : > { %v7303_v8 = vpop.eup %7302  ;;  %v4201_v22 = vadd.f32 %v7299_v4, %v4200_v53  ;;  %v4209_v33 = vor.u32 1.1754944e-38, %v4208_v9  ;;  %7308 = vrcp.f32 %v9960_v39  ;;  %v3913_v7 = vmul.f32 1.442695, %v3838_v47 }
 0x6a8   : > { %v7305_v27 = vpop.eup %7304  ;;  %v4233_v6 = vsel %vm4232_vm10, %v7297_v21, %v4229_v32  ;;  %v9970_v2 = vadd.f32 1.0, %v7303_v8  ;;  %v3857_v14 = vsub.f32 0.0, %v3522_v23  ;;  %v3846_v56 = vsub.f32 0.0, %v3604_v3 }
 0x6a9   : > { %v4238_v50 = vsel %vm4235_vm9, %v4237_v44, %v4233_v6  ;;  %v4205_v18 = vsel %vm4204_vm12, %v7299_v4, %v4201_v22  ;;  %v9972_v63 = vadd.f32 1.0, %v7305_v27  ;;  %v4220_v26 = vand.u32 2147483647, %v9960_v39 }
 0x6aa   : > { %4840 = vst.msk [vmem:[%s9368_s3 + $0x68] sm:$0xff] %vm1266_vm0, %v4238_v50  ;;  %v4210_v15 = vsel %vm4207_vm11, %v4209_v33, %v4205_v18  ;;  %v4222_v58 = vand.u32 2147483648, %v9960_v39  ;;  %7310 = vrcp.f32 %v9970_v2  ;;  %v3951_v57 = vmul.f32 1.442695, %v3857_v14  ;;  %v3524_v14 = vpop.f32.mrf.mxu1  ;;  %v3606_v50 = vpop.f32.mrf.mxu0 }
 0x6ab   : > { %4838 = vst [vmem:[%s9368_s3 + $0x58] sm:$0xff] %v4210_v15  ;;  %7312 = vrcp.f32 %v9972_v63  ;;  %v3546_v31 = vadd.f32 %v3545_v10, %v9799_v55  ;;  %vm4216_vm13 = vweird.f32 %v9960_v39  ;;  %v4486_v28 = vand.u32 2147483647, %v9970_v2 }
 0x6ac   : > { %v7307_v36 = vpop.eup %7306  ;;  %7314 = vpow2.f32 %v3913_v7  ;;  %v4488_v42 = vand.u32 2147483648, %v9970_v2  ;;  %vm9988_vm14 = vcmp.eq.f32.partialorder %v4220_v26, 8.507059e+37  ;;  %v4223_v37 = vor.u32 1.1754944e-38, %v4222_v58 }
 0x6ad   : > { %v7309_v62 = vpop.eup %7308  ;;  %v9985_v45 = vadd.f32 1.0, %v7307_v36  ;;  %v3929_v21 = vmul.f32 1.442695, %v3846_v56  ;;  %vm4482_vm15 = vweird.f32 %v9970_v2  ;;  %v4332_v30 = vand.u32 2147483647, %v9972_v63 }
 0x6ae   : > { %v4212_v34 = vmul.f32 %v7309_v62, %v9960_v39  ;;  %v4334_v52 = vand.u32 2147483648, %v9972_v63  ;;  %vm4328_vm1 = vweird.f32 %v9972_v63  ;;  %v3844_v48 = vsub.f32 0.0, %v3546_v31 }
 0x6af   : > { %7316 = vrcp.f32 %v9985_v45  ;;  %vm9998_vm2 = vcmp.eq.f32.partialorder %v4486_v28, 8.507059e+37  ;;  %v4489_v20 = vor.u32 1.1754944e-38, %v4488_v42  ;;  %v3575_v60 = vadd.f32 %v3574_v11, %v9804_v54 }
 0x6b0   : > { %v7311_v19 = vpop.eup %7310  ;;  %v4213_v4 = vsub.f32 1.0, %v4212_v34  ;;  %7318 = vpow2.f32 %v3951_v57  ;;  %vm4217_vm3 = vweird.f32 %v7309_v62  ;;  %vm10004_vm4 = vcmp.eq.f32.partialorder %v4332_v30, 8.507059e+37 }
 0x6b1   : > { %v7313_v46 = vpop.eup %7312  ;;  %v4478_v51 = vmul.f32 %v7311_v19, %v9970_v2  ;;  %7320 = vpow2.f32 %v3929_v21  ;;  %v4335_v41 = vor.u32 1.1754944e-38, %v4334_v52  ;;  %vm4300_vm5 = vweird.f32 %v9985_v45  ;;  %vm4218_vm6 = vmor %vm4216_vm13, %vm4217_vm3 }
 0x6b2   : > { %v7315_v9 = vpop.eup %7314  ;;  %v4214_v24 = vmul.f32 %v7309_v62, %v4213_v4  ;;  %v4324_v0 = vmul.f32 %v7313_v46, %v9972_v63  ;;  %v3925_v16 = vmul.f32 1.442695, %v3844_v48  ;;  %vm4483_vm7 = vweird.f32 %v7311_v19  ;;  %v3548_v48 = vpop.f32.mrf.mxu2 }
 0x6b3   : > { %v4479_v25 = vsub.f32 1.0, %v4478_v51  ;;  %v10008_v29 = vadd.f32 1.0, %v7315_v9  ;;  %v3845_v3 = vsub.f32 0.0, %v3575_v60  ;;  %vm4329_vm8 = vweird.f32 %v7313_v46  ;;  %vm4484_vm9 = vmor %vm4482_vm15, %vm4483_vm7 }
 0x6b4   : > { %v4215_v23 = vadd.f32 %v7309_v62, %v4214_v24  ;;  %v4325_v43 = vsub.f32 1.0, %v4324_v0  ;;  %v4304_v22 = vand.u32 2147483647, %v9985_v45  ;;  %v4306_v39 = vand.u32 2147483648, %v9985_v45  ;;  %vm4330_vm10 = vmor %vm4328_vm1, %vm4329_vm8 }
 0x6b5   : > { %v7317_v13 = vpop.eup %7316  ;;  %v4480_v5 = vmul.f32 %v7311_v19, %v4479_v25  ;;  %7322 = vrcp.f32 %v10008_v29  ;;  %v3927_v10 = vmul.f32 1.442695, %v3845_v3  ;;  %v4318_v57 = vand.u32 2147483647, %v10008_v29 }
 0x6b6   : > { %v7319_v1 = vpop.eup %7318  ;;  %v4219_v53 = vsel %vm4218_vm6, %v7309_v62, %v4215_v23  ;;  %v4326_v47 = vmul.f32 %v7313_v46, %v4325_v43  ;;  %v4296_v32 = vmul.f32 %v7317_v13, %v9985_v45  ;;  %7324 = vpow2.f32 %v3925_v16 }
 0x6b7   : > { %v4224_v44 = vsel %vm9988_vm14, %v4223_v37, %v4219_v53  ;;  %v4481_v8 = vadd.f32 %v7311_v19, %v4480_v5  ;;  %v7321_v33 = vpop.eup %7320  ;;  %v10022_v7 = vadd.f32 1.0, %v7319_v1  ;;  %vm4301_vm11 = vweird.f32 %v7317_v13 }
 0x6b8   : > { %4839 = vst [vmem:[%s9368_s3 + $0x60] sm:$0xff] %v4224_v44  ;;  %v4327_v27 = vadd.f32 %v7313_v46, %v4326_v47  ;;  %v4297_v6 = vsub.f32 1.0, %v4296_v32  ;;  %v10027_v56 = vadd.f32 1.0, %v7321_v33  ;;  %v3525_v63 = vadd.f32 %v3524_v14, %v9632_v49  ;;  %vm4302_vm12 = vmor %vm4300_vm5, %vm4301_vm11  ;;  %v3526_v44 = vpop.f32.mrf.mxu1 }
 0x6b9   : > { %v4485_v18 = vsel %vm4484_vm9, %v7311_v19, %v4481_v8  ;;  %7326 = vrcp.f32 %v10022_v7  ;;  %v3607_v31 = vadd.f32 %v3606_v50, %v9797_v59  ;;  %v4320_v42 = vand.u32 2147483648, %v10008_v29 }
 0x6ba   : > { %v4490_v2 = vsel %vm9998_vm2, %v4489_v20, %v4485_v18  ;;  %v4331_v15 = vsel %vm4330_vm10, %v7313_v46, %v4327_v27  ;;  %v4298_v26 = vmul.f32 %v7317_v13, %v4297_v6  ;;  %7328 = vrcp.f32 %v10027_v56 }
 0x6bb   : > { %v7323_v58 = vpop.eup %7322  ;;  %4858 = vst [vmem:[%s9368_s3 + $0xf8] sm:$0xff] %v4490_v2  ;;  %v4336_v36 = vsel %vm10004_vm4, %v4335_v41, %v4331_v15  ;;  %vm4305_vm13 = vcmp.eq.f32.partialorder %v4304_v22, 8.507059e+37  ;;  %v4307_v34 = vor.u32 1.1754944e-38, %v4306_v39  ;;  %vm4314_vm14 = vweird.f32 %v10008_v29 }
 0x6bc   : > { %4847 = vst.msk [vmem:[%s9368_s3 + $0xa0] sm:$0xff] %vm1266_vm0, %v4336_v36  ;;  %v4299_v62 = vadd.f32 %v7317_v13, %v4298_v26  ;;  %v4310_v28 = vmul.f32 %v7323_v58, %v10008_v29  ;;  %v4584_v35 = vand.u32 2147483647, %v10022_v7  ;;  %v7325_v37 = vpop.eup %7324  ;;  %v4586_v30 = vand.u32 2147483648, %v10022_v7 }
 0x6bd   : > { %7330 = vpow2.f32 %v3927_v10  ;;  %vm10049_vm15 = vcmp.eq.f32.partialorder %v4318_v57, 8.507059e+37  ;;  %v10053_v45 = vadd.f32 1.0, %v7325_v37  ;;  %v3864_v4 = vsub.f32 0.0, %v3525_v63 }
 0x6be   : > { %v4303_v21 = vsel %vm4302_vm12, %v7317_v13, %v4299_v62  ;;  %v4311_v11 = vsub.f32 1.0, %v4310_v28  ;;  %vm4315_vm1 = vweird.f32 %v7323_v58  ;;  %v4321_v38 = vor.u32 1.1754944e-38, %v4320_v42  ;;  %v3577_v13 = vpop.f32.mrf.mxu3  ;;  %v3608_v42 = vpop.f32.mrf.mxu0 }
 0x6bf   : > { %v4308_v52 = vsel %vm4305_vm13, %v4307_v34, %v4303_v21  ;;  %v7327_v46 = vpop.eup %7326  ;;  %v3853_v20 = vsub.f32 0.0, %v3607_v31  ;;  %vm4580_vm2 = vweird.f32 %v10022_v7  ;;  %vm10058_vm3 = vcmp.eq.f32.partialorder %v4584_v35, 8.507059e+37  ;;  %vm4316_vm4 = vmor %vm4314_vm14, %vm4315_vm1 }
 0x6c0   : > { %4845 = vst [vmem:[%s9368_s3 + $0x90] sm:$0xff] %v4308_v52  ;;  %v4312_v51 = vmul.f32 %v7323_v58, %v4311_v11  ;;  %v4576_v60 = vmul.f32 %v7327_v46, %v10022_v7  ;;  %7332 = vrcp.f32 %v10053_v45  ;;  %v7329_v24 = vpop.eup %7328  ;;  %v4587_v25 = vor.u32 1.1754944e-38, %v4586_v30 }
 0x6c1   : > { %v3965_v12 = vmul.f32 1.442695, %v3864_v4  ;;  %v3549_v41 = vadd.f32 %v3548_v48, %v9799_v55  ;;  %v4422_v43 = vmul.f32 %v7329_v24, %v10027_v56  ;;  %vm4426_vm5 = vweird.f32 %v10027_v56 }
 0x6c2   : > { %v4313_v0 = vadd.f32 %v7323_v58, %v4312_v51  ;;  %v4577_v23 = vsub.f32 1.0, %v4576_v60  ;;  %v3943_v16 = vmul.f32 1.442695, %v3853_v20  ;;  %vm4581_vm6 = vweird.f32 %v7327_v46 }
 0x6c3   : > { %v7331_v5 = vpop.eup %7330  ;;  %v4430_v1 = vand.u32 2147483647, %v10027_v56  ;;  %7334 = vpow2.f32 %v3965_v12  ;;  %v4423_v29 = vsub.f32 1.0, %v4422_v43  ;;  %v4432_v8 = vand.u32 2147483648, %v10027_v56  ;;  %vm4582_vm8 = vmor %vm4580_vm2, %vm4581_vm6 }
 0x6c4   : > { %v4317_v3 = vsel %vm4316_vm4, %v7323_v58, %v4313_v0  ;;  %v4578_v47 = vmul.f32 %v7327_v46, %v4577_v23  ;;  %v10071_v32 = vadd.f32 1.0, %v7331_v5  ;;  %7336 = vpow2.f32 %v3943_v16 }
 0x6c5   : > { %v4322_v53 = vsel %vm10049_vm15, %v4321_v38, %v4317_v3  ;;  %v3851_v22 = vsub.f32 0.0, %v3549_v41  ;;  %v3578_v39 = vadd.f32 %v3577_v13, %v9804_v54  ;;  %v4424_v6 = vmul.f32 %v7329_v24, %v4423_v29  ;;  %v3550_v38 = vpop.f32.mrf.mxu2 }
 0x6c6   : > { %4846 = vst [vmem:[%s9368_s3 + $0x98] sm:$0xff] %v4322_v53  ;;  %v7333_v33 = vpop.eup %7332  ;;  %v4579_v27 = vadd.f32 %v7327_v46, %v4578_v47  ;;  %vm4427_vm7 = vweird.f32 %v7329_v24  ;;  %7338 = vrcp.f32 %v10071_v32  ;;  %v4402_v50 = vand.u32 2147483647, %v10053_v45  ;;  %v3579_v43 = vpop.f32.mrf.mxu3 }
 0x6c7   : > { %v4394_v14 = vmul.f32 %v7333_v33, %v10053_v45  ;;  %v4404_v18 = vand.u32 2147483648, %v10053_v45  ;;  %v3527_v10 = vadd.f32 %v3526_v44, %v9632_v49  ;;  %v4425_v15 = vadd.f32 %v7329_v24, %v4424_v6  ;;  %vm4428_vm9 = vmor %vm4426_vm5, %vm4427_vm7 }
 0x6c8   : > { %v4583_v2 = vsel %vm4582_vm8, %v7327_v46, %v4579_v27  ;;  %v3939_v26 = vmul.f32 1.442695, %v3851_v22  ;;  %v3852_v58 = vsub.f32 0.0, %v3578_v39  ;;  %vm4431_vm10 = vcmp.eq.f32.partialorder %v4430_v1, 8.507059e+37 }
 0x6c9   : > { %v7335_v36 = vpop.eup %7334  ;;  %v4588_v57 = vsel %vm10058_vm3, %v4587_v25, %v4583_v2  ;;  %v4433_v7 = vor.u32 1.1754944e-38, %v4432_v8  ;;  %v4395_v63 = vsub.f32 1.0, %v4394_v14  ;;  %v4429_v31 = vsel %vm4428_vm9, %v7329_v24, %v4425_v15 }
 0x6ca   : > { %4865 = vst [vmem:[%s9368_s3 + $0x130] sm:$0xff] %v4588_v57  ;;  %v10089_v62 = vadd.f32 1.0, %v7335_v36  ;;  %7340 = vpow2.f32 %v3939_v26  ;;  %v3941_v28 = vmul.f32 1.442695, %v3852_v58  ;;  %v7337_v34 = vpop.eup %7336  ;;  %vm4399_vm11 = vweird.f32 %v7333_v33 }
 0x6cb   : > { %v4434_v35 = vsel %vm4431_vm10, %v4433_v7, %v4429_v31  ;;  %v4396_v37 = vmul.f32 %v7333_v33, %v4395_v63  ;;  %v3871_v21 = vsub.f32 0.0, %v3527_v10  ;;  %vm4398_vm12 = vweird.f32 %v10053_v45 }
 0x6cc   : > { %v7339_v11 = vpop.eup %7338  ;;  %4854 = vst.msk [vmem:[%s9368_s3 + $0xd8] sm:$0xff] %vm1266_vm0, %v4434_v35  ;;  %vm10094_vm13 = vcmp.eq.f32.partialorder %v4402_v50, 8.507059e+37  ;;  %v4405_v30 = vor.u32 1.1754944e-38, %v4404_v18  ;;  %7342 = vrcp.f32 %v10089_v62  ;;  %v10100_v4 = vadd.f32 1.0, %v7337_v34  ;;  %vm4400_vm14 = vmor %vm4398_vm12, %vm4399_vm11  ;;  %v3611_v18 = vpop.f32.mrf.mxu0 }
 0x6cd   : > { %v4397_v52 = vadd.f32 %v7333_v33, %v4396_v37  ;;  %v4408_v19 = vmul.f32 %v7339_v11, %v10071_v32  ;;  %v3609_v48 = vadd.f32 %v3608_v42, %v9797_v59  ;;  %v4416_v46 = vand.u32 2147483647, %v10071_v32 }
 0x6ce   : > { %v4418_v45 = vand.u32 2147483648, %v10071_v32  ;;  %7344 = vpow2.f32 %v3941_v28  ;;  %v3979_v51 = vmul.f32 1.442695, %v3871_v21  ;;  %vm4412_vm15 = vweird.f32 %v10071_v32 }
 0x6cf   : > { %v4401_v20 = vsel %vm4400_vm14, %v7333_v33, %v4397_v52  ;;  %v4409_v60 = vsub.f32 1.0, %v4408_v19  ;;  %7346 = vrcp.f32 %v10100_v4  ;;  %vm4413_vm1 = vweird.f32 %v7339_v11 }
 0x6d0   : > { %v7341_v9 = vpop.eup %7340  ;;  %v4406_v24 = vsel %vm10094_vm13, %v4405_v30, %v4401_v20  ;;  %v4682_v0 = vand.u32 2147483647, %v10089_v62  ;;  %7348 = vpow2.f32 %v3979_v51  ;;  %v3860_v41 = vsub.f32 0.0, %v3609_v48  ;;  %vm4414_vm4 = vmor %vm4412_vm15, %vm4413_vm1 }
 0x6d1   : > { %4852 = vst [vmem:[%s9368_s3 + $0xc8] sm:$0xff] %v4406_v24  ;;  %v4410_v25 = vmul.f32 %v7339_v11, %v4409_v60  ;;  %v10111_v12 = vadd.f32 1.0, %v7341_v9  ;;  %v3551_v23 = vadd.f32 %v3550_v38, %v9799_v55  ;;  %vm10114_vm2 = vcmp.eq.f32.partialorder %v4416_v46, 8.507059e+37  ;;  %v3553_v9 = vpop.f32.mrf.mxu2 }
 0x6d2   : > { %v7343_v16 = vpop.eup %7342  ;;  %v4419_v5 = vor.u32 1.1754944e-38, %v4418_v45  ;;  %vm4678_vm3 = vweird.f32 %v10089_v62  ;;  %v4684_v3 = vand.u32 2147483648, %v10089_v62  ;;  %v4528_v47 = vand.u32 2147483647, %v10100_v4 }
 0x6d3   : > { %v4411_v1 = vadd.f32 %v7339_v11, %v4410_v25  ;;  %v4674_v53 = vmul.f32 %v7343_v16, %v10089_v62  ;;  %7350 = vrcp.f32 %v10111_v12  ;;  %vm10126_vm5 = vcmp.eq.f32.partialorder %v4682_v0, 8.507059e+37 }
 0x6d4   : > { %v7345_v29 = vpop.eup %7344  ;;  %v4530_v8 = vand.u32 2147483648, %v10100_v4  ;;  %v3957_v22 = vmul.f32 1.442695, %v3860_v41  ;;  %v3580_v39 = vadd.f32 %v3579_v43, %v9804_v54  ;;  %v3858_v50 = vsub.f32 0.0, %v3551_v23 }
 0x6d5   : > { %v7347_v33 = vpop.eup %7346  ;;  %v4415_v27 = vsel %vm4414_vm4, %v7339_v11, %v4411_v1  ;;  %v4675_v6 = vsub.f32 1.0, %v4674_v53  ;;  %v10132_v14 = vadd.f32 1.0, %v7345_v29  ;;  %v4685_v2 = vor.u32 1.1754944e-38, %v4684_v3 }
 0x6d6   : > { %v7349_v10 = vpop.eup %7348  ;;  %v4420_v32 = vsel %vm10114_vm2, %v4419_v5, %v4415_v27  ;;  %v4520_v15 = vmul.f32 %v7347_v33, %v10100_v4  ;;  %vm4524_vm6 = vweird.f32 %v10100_v4  ;;  %vm4679_vm7 = vweird.f32 %v7343_v16 }
 0x6d7   : > { %4853 = vst [vmem:[%s9368_s3 + $0xd0] sm:$0xff] %v4420_v32  ;;  %v4676_v26 = vmul.f32 %v7343_v16, %v4675_v6  ;;  %vm10139_vm8 = vcmp.eq.f32.partialorder %v4528_v47, 8.507059e+37  ;;  %7352 = vrcp.f32 %v10132_v14  ;;  %v4531_v57 = vor.u32 1.1754944e-38, %v4530_v8  ;;  %vm4680_vm9 = vmor %vm4678_vm3, %vm4679_vm7  ;;  %v3613_v8 = vpop.f32.mrf.mxu0 }
 0x6d8   : > { %v4521_v36 = vsub.f32 1.0, %v4520_v15  ;;  %v10144_v7 = vadd.f32 1.0, %v7349_v10  ;;  %v3612_v63 = vadd.f32 %v3611_v18, %v9797_v59  ;;  %7354 = vpow2.f32 %v3957_v22  ;;  %v3625_v18 = vpop.f32.mrf.mxu1 }
 0x6d9   : > { %v7351_v31 = vpop.eup %7350  ;;  %v4677_v28 = vadd.f32 %v7343_v16, %v4676_v26  ;;  %v3953_v42 = vmul.f32 1.442695, %v3858_v50  ;;  %v3859_v34 = vsub.f32 0.0, %v3580_v39  ;;  %vm4525_vm10 = vweird.f32 %v7347_v33 }
 0x6da   : > { %v4522_v35 = vmul.f32 %v7347_v33, %v4521_v36  ;;  %v4492_v37 = vmul.f32 %v7351_v31, %v10111_v12  ;;  %vm4496_vm11 = vweird.f32 %v10111_v12  ;;  %v4500_v11 = vand.u32 2147483647, %v10111_v12  ;;  %vm4526_vm12 = vmor %vm4524_vm6, %vm4525_vm10 }
 0x6db   : > { %v4681_v21 = vsel %vm4680_vm9, %v7343_v16, %v4677_v28  ;;  %v4502_v56 = vand.u32 2147483648, %v10111_v12  ;;  %7356 = vrcp.f32 %v10144_v7  ;;  %v4514_v62 = vand.u32 2147483647, %v10132_v14  ;;  %v3582_v16 = vpop.f32.mrf.mxu3 }
 0x6dc   : > { %v4686_v30 = vsel %vm10126_vm5, %v4685_v2, %v4681_v21  ;;  %v4523_v52 = vadd.f32 %v7347_v33, %v4522_v35  ;;  %v4493_v19 = vsub.f32 1.0, %v4492_v37  ;;  %v4516_v46 = vand.u32 2147483648, %v10132_v14 }
 0x6dd   : > { %v7353_v48 = vpop.eup %7352  ;;  %4872 = vst [vmem:[%s9368_s3 + $0x168] sm:$0xff] %v4686_v30  ;;  %7358 = vpow2.f32 %v3953_v42  ;;  %v3955_v45 = vmul.f32 1.442695, %v3859_v34  ;;  %v3867_v51 = vsub.f32 0.0, %v3612_v63  ;;  %vm4497_vm13 = vweird.f32 %v7351_v31 }
 0x6de   : > { %v4527_v38 = vsel %vm4526_vm12, %v7347_v33, %v4523_v52  ;;  %v4494_v20 = vmul.f32 %v7351_v31, %v4493_v19  ;;  %v4506_v60 = vmul.f32 %v7353_v48, %v10132_v14  ;;  %v7355_v24 = vpop.eup %7354  ;;  %vm10164_vm14 = vcmp.eq.f32.partialorder %v4500_v11, 8.507059e+37  ;;  %vm4498_vm1 = vmor %vm4496_vm11, %vm4497_vm13 }
 0x6df   : > { %v4532_v0 = vsel %vm10139_vm8, %v4531_v57, %v4527_v38  ;;  %v4503_v4 = vor.u32 1.1754944e-38, %v4502_v56  ;;  %7360 = vpow2.f32 %v3955_v45  ;;  %vm4510_vm15 = vweird.f32 %v10132_v14 }
 0x6e0   : > { %4861 = vst.msk [vmem:[%s9368_s3 + $0x110] sm:$0xff] %vm1266_vm0, %v4532_v0  ;;  %v4495_v41 = vadd.f32 %v7351_v31, %v4494_v20  ;;  %v4507_v23 = vsub.f32 1.0, %v4506_v60  ;;  %v10171_v43 = vadd.f32 1.0, %v7355_v24  ;;  %vm10176_vm2 = vcmp.eq.f32.partialorder %v4514_v62, 8.507059e+37  ;;  %v3555_v24 = vpop.f32.mrf.mxu2 }
 0x6e1   : > { %v7357_v13 = vpop.eup %7356  ;;  %v4517_v3 = vor.u32 1.1754944e-38, %v4516_v46  ;;  %v3971_v1 = vmul.f32 1.442695, %v3867_v51  ;;  %v3554_v53 = vadd.f32 %v3553_v9, %v9799_v55  ;;  %vm4511_vm3 = vweird.f32 %v7353_v48 }
 0x6e2   : > { %v4499_v47 = vsel %vm4498_vm1, %v7351_v31, %v4495_v41  ;;  %v4508_v29 = vmul.f32 %v7353_v48, %v4507_v23  ;;  %v4772_v44 = vmul.f32 %v7357_v13, %v10144_v7  ;;  %vm4776_vm4 = vweird.f32 %v10144_v7  ;;  %vm4512_vm5 = vmor %vm4510_vm15, %vm4511_vm3 }
 0x6e3   : > { %v7359_v22 = vpop.eup %7358  ;;  %v4504_v12 = vsel %vm10164_vm14, %v4503_v4, %v4499_v47  ;;  %7362 = vrcp.f32 %v10171_v43  ;;  %v3583_v39 = vadd.f32 %v3582_v16, %v9804_v54  ;;  %v4780_v6 = vand.u32 2147483647, %v10144_v7  ;;  %v3584_v16 = vpop.f32.mrf.mxu3 }
 0x6e4   : > { %4859 = vst [vmem:[%s9368_s3 + $0x100] sm:$0xff] %v4504_v12  ;;  %v4509_v33 = vadd.f32 %v7353_v48, %v4508_v29  ;;  %v4773_v27 = vsub.f32 1.0, %v4772_v44  ;;  %v10189_v50 = vadd.f32 1.0, %v7359_v22  ;;  %v4782_v32 = vand.u32 2147483648, %v10144_v7 }
 0x6e5   : > { %v7361_v10 = vpop.eup %7360  ;;  %7364 = vpow2.f32 %v3971_v1  ;;  %v3865_v2 = vsub.f32 0.0, %v3554_v53  ;;  %v3614_v15 = vadd.f32 %v3613_v8, %v9797_v59  ;;  %vm4777_vm6 = vweird.f32 %v7357_v13 }
 0x6e6   : > { %v4513_v26 = vsel %vm4512_vm5, %v7353_v48, %v4509_v33  ;;  %v4774_v58 = vmul.f32 %v7357_v13, %v4773_v27  ;;  %7366 = vrcp.f32 %v10189_v50  ;;  %v4626_v57 = vand.u32 2147483647, %v10171_v43  ;;  %vm4778_vm8 = vmor %vm4776_vm4, %vm4777_vm6 }
 0x6e7   : > { %v4518_v36 = vsel %vm10176_vm2, %v4517_v3, %v4513_v26  ;;  %v3866_v63 = vsub.f32 0.0, %v3583_v39  ;;  %v3626_v14 = vadd.f32 %v3625_v18, %v9302_v17  ;;  %vm4781_vm7 = vcmp.eq.f32.partialorder %v4780_v6, 8.507059e+37 }
 0x6e8   : > { %4860 = vst [vmem:[%s9368_s3 + $0x108] sm:$0xff] %v4518_v36  ;;  %v4775_v31 = vadd.f32 %v7357_v13, %v4774_v58  ;;  %v10202_v28 = vadd.f32 1.0, %v7361_v10  ;;  %v3967_v42 = vmul.f32 1.442695, %v3865_v2  ;;  %v4783_v35 = vor.u32 1.1754944e-38, %v4782_v32  ;;  %v3654_v18 = vpop.f32.mrf.mxu2 }
 0x6e9   : > { %v7363_v34 = vpop.eup %7362  ;;  %vm4622_vm9 = vweird.f32 %v10171_v43  ;;  %v4628_v37 = vand.u32 2147483648, %v10171_v43  ;;  %v3874_v21 = vsub.f32 0.0, %v3614_v15  ;;  %v4598_v30 = vand.u32 2147483647, %v10189_v50 }
 0x6ea   : > { %v4779_v11 = vsel %vm4778_vm8, %v7357_v13, %v4775_v31  ;;  %v4618_v56 = vmul.f32 %v7363_v34, %v10171_v43  ;;  %7368 = vrcp.f32 %v10202_v28  ;;  %vm10211_vm10 = vcmp.eq.f32.partialorder %v4626_v57, 8.507059e+37 }
 0x6eb   : > { %v7365_v52 = vpop.eup %7364  ;;  %v4784_v19 = vsel %vm4781_vm7, %v4783_v35, %v4779_v11  ;;  %v3969_v7 = vmul.f32 1.442695, %v3866_v63  ;;  %v4883_v48 = vsub.f32 0.0, %v3626_v14  ;;  %7370 = vpow2.f32 %v3967_v42  ;;  %v3712_v11 = vpop.f32.mrf.mxu0 }
 0x6ec   : > { %v7367_v46 = vpop.eup %7366  ;;  %4879 = vst [vmem:[%s9368_s3 + $0x1a0] sm:$0xff] %v4784_v19  ;;  %v4619_v45 = vsub.f32 1.0, %v4618_v56  ;;  %v10216_v51 = vadd.f32 1.0, %v7365_v52  ;;  %v3985_v38 = vmul.f32 1.442695, %v3874_v21  ;;  %v4629_v20 = vor.u32 1.1754944e-38, %v4628_v37  ;;  %v3627_v56 = vpop.f32.mrf.mxu1 }
 0x6ed   : > { %v4590_v60 = vmul.f32 %v7367_v46, %v10189_v50  ;;  %vm4594_vm11 = vweird.f32 %v10189_v50  ;;  %v4600_v9 = vand.u32 2147483648, %v10189_v50  ;;  %vm4623_vm12 = vweird.f32 %v7363_v34 }
 0x6ee   : > { %v4620_v0 = vmul.f32 %v7363_v34, %v4619_v45  ;;  %vm10221_vm13 = vcmp.eq.f32.partialorder %v4598_v30, 8.507059e+37  ;;  %7372 = vrcp.f32 %v10216_v51  ;;  %v4612_v41 = vand.u32 2147483647, %v10202_v28  ;;  %vm4624_vm14 = vmor %vm4622_vm9, %vm4623_vm12 }
 0x6ef   : > { %v4591_v4 = vsub.f32 1.0, %v4590_v60  ;;  %7374 = vpow2.f32 %v3969_v7  ;;  %v4939_v23 = vmul.f32 1.442695, %v4883_v48  ;;  %v4614_v3 = vand.u32 2147483648, %v10202_v28 }
 0x6f0   : > { %v7369_v13 = vpop.eup %7368  ;;  %v4621_v5 = vadd.f32 %v7363_v34, %v4620_v0  ;;  %7376 = vpow2.f32 %v3985_v38  ;;  %v3556_v1 = vadd.f32 %v3555_v24, %v9799_v55  ;;  %vm4595_vm15 = vweird.f32 %v7367_v46 }
 0x6f1   : > { %v4592_v53 = vmul.f32 %v7367_v46, %v4591_v4  ;;  %v4601_v47 = vor.u32 1.1754944e-38, %v4600_v9  ;;  %v4604_v29 = vmul.f32 %v7369_v13, %v10202_v28  ;;  %v7371_v44 = vpop.eup %7370  ;;  %7378 = vpow2.f32 %v4939_v23  ;;  %vm4596_vm1 = vmor %vm4594_vm11, %vm4595_vm15 }
 0x6f2   : > { %v4625_v8 = vsel %vm4624_vm14, %v7363_v34, %v4621_v5  ;;  %v3872_v22 = vsub.f32 0.0, %v3556_v1  ;;  %v3585_v12 = vadd.f32 %v3584_v16, %v9804_v54  ;;  %v10235_v6 = vadd.f32 1.0, %v7371_v44 }
 0x6f3   : > { %v4630_v39 = vsel %vm10211_vm10, %v4629_v20, %v4625_v8  ;;  %v4593_v33 = vadd.f32 %v7367_v46, %v4592_v53  ;;  %v4605_v27 = vsub.f32 1.0, %v4604_v29  ;;  %vm4608_vm2 = vweird.f32 %v10202_v28 }
 0x6f4   : > { %v7373_v43 = vpop.eup %7372  ;;  %4868 = vst.msk [vmem:[%s9368_s3 + $0x148] sm:$0xff] %vm1266_vm0, %v4630_v39  ;;  %vm10242_vm3 = vcmp.eq.f32.partialorder %v4612_v41, 8.507059e+37  ;;  %v4615_v10 = vor.u32 1.1754944e-38, %v4614_v3  ;;  %v3981_v32 = vmul.f32 1.442695, %v3872_v22  ;;  %vm4609_vm4 = vweird.f32 %v7369_v13 }
 0x6f5   : > { %v7375_v2 = vpop.eup %7374  ;;  %v4597_v15 = vsel %vm4596_vm1, %v7367_v46, %v4593_v33  ;;  %v4606_v26 = vmul.f32 %v7369_v13, %v4605_v27  ;;  %v4716_v58 = vmul.f32 %v7373_v43, %v10216_v51  ;;  %v4724_v57 = vand.u32 2147483647, %v10216_v51  ;;  %vm4610_vm5 = vmor %vm4608_vm2, %vm4609_vm4 }
 0x6f6   : > { %v7377_v36 = vpop.eup %7376  ;;  %v4602_v50 = vsel %vm10221_vm13, %v4601_v47, %v4597_v15  ;;  %v4726_v63 = vand.u32 2147483648, %v10216_v51  ;;  %7380 = vrcp.f32 %v10235_v6  ;;  %v10253_v42 = vadd.f32 1.0, %v7375_v2 }
 0x6f7   : > { %4866 = vst [vmem:[%s9368_s3 + $0x138] sm:$0xff] %v4602_v50  ;;  %v4607_v14 = vadd.f32 %v7369_v13, %v4606_v26  ;;  %v4717_v31 = vsub.f32 1.0, %v4716_v58  ;;  %v3873_v34 = vsub.f32 0.0, %v3585_v12  ;;  %v7379_v35 = vpop.eup %7378  ;;  %vm4721_vm6 = vweird.f32 %v7373_v43 }
 0x6f8   : > { %v4696_v37 = vand.u32 2147483647, %v10235_v6  ;;  %v10258_v21 = vadd.f32 1.0, %v7377_v36  ;;  %7382 = vpow2.f32 %v3981_v32  ;;  %v4698_v19 = vand.u32 2147483648, %v10235_v6 }
 0x6f9   : > { %v4611_v30 = vsel %vm4610_vm5, %v7369_v13, %v4607_v14  ;;  %v4718_v52 = vmul.f32 %v7373_v43, %v4717_v31  ;;  %7384 = vrcp.f32 %v10253_v42  ;;  %vm4720_vm7 = vweird.f32 %v10216_v51 }
 0x6fa   : > { %v4616_v62 = vsel %vm10242_vm3, %v4615_v10, %v4611_v30  ;;  %vm10265_vm8 = vcmp.eq.f32.partialorder %v4724_v57, 8.507059e+37  ;;  %v4727_v7 = vor.u32 1.1754944e-38, %v4726_v63  ;;  %7386 = vrcp.f32 %v10258_v21  ;;  %vm4722_vm9 = vmor %vm4720_vm7, %vm4721_vm6 }
 0x6fb   : > { %4867 = vst [vmem:[%s9368_s3 + $0x140] sm:$0xff] %v4616_v62  ;;  %v4719_v48 = vadd.f32 %v7373_v43, %v4718_v52  ;;  %v3713_v46 = vadd.f32 %v3712_v11, %v9632_v49  ;;  %v10273_v45 = vadd.f32 %v3627_v56, %v9302_v17  ;;  %vm4692_vm10 = vweird.f32 %v10235_v6 }
 0x6fc   : > { %v7381_v38 = vpop.eup %7380  ;;  %v4710_v51 = vand.u32 2147483647, %v10253_v42  ;;  %v10278_v20 = vadd.f32 1.0, %v7379_v35  ;;  %v3983_v60 = vmul.f32 1.442695, %v3873_v34  ;;  %vm10281_vm11 = vcmp.eq.f32.partialorder %v4696_v37, 8.507059e+37 }
 0x6fd   : > { %v4723_v9 = vsel %vm4722_vm9, %v7373_v43, %v4719_v48  ;;  %v4688_v24 = vmul.f32 %v7381_v38, %v10235_v6  ;;  %v4699_v25 = vor.u32 1.1754944e-38, %v4698_v19  ;;  %v4712_v23 = vand.u32 2147483648, %v10253_v42 }
 0x6fe   : > { %v7383_v4 = vpop.eup %7382  ;;  %v4728_v41 = vsel %vm10265_vm8, %v4727_v7, %v4723_v9  ;;  %v4822_v16 = vand.u32 2147483647, %v10258_v21  ;;  %7388 = vrcp.f32 %v10278_v20  ;;  %vm4706_vm12 = vweird.f32 %v10253_v42  ;;  %v3630_v9 = vpop.f32.mrf.mxu1 }
 0x6ff   : > { %v7385_v13 = vpop.eup %7384  ;;  %4875 = vst.msk [vmem:[%s9368_s3 + $0x180] sm:$0xff] %vm1266_vm0, %v4728_v41  ;;  %v4689_v5 = vsub.f32 1.0, %v4688_v24  ;;  %v4824_v3 = vand.u32 2147483648, %v10258_v21  ;;  %v10294_v1 = vadd.f32 1.0, %v7383_v4  ;;  %vm4693_vm13 = vweird.f32 %v7381_v38 }
 0x700   : > { %v4702_v53 = vmul.f32 %v7385_v13, %v10253_v42  ;;  %vm10297_vm14 = vcmp.eq.f32.partialorder %v4710_v51, 8.507059e+37  ;;  %vm4818_vm15 = vweird.f32 %v10258_v21  ;;  %7390 = vpow2.f32 %v3983_v60  ;;  %v7387_v44 = vpop.eup %7386  ;;  %vm4694_vm3 = vmor %vm4692_vm10, %vm4693_vm13  ;;  %v3714_v60 = vpop.f32.mrf.mxu0 }
 0x701   : > { %v4886_v29 = vsub.f32 0.0, %v3713_v46  ;;  %v4690_v8 = vmul.f32 %v7381_v38, %v4689_v5  ;;  %v5116_v22 = vand.u32 2147483647, %v10278_v20  ;;  %v5118_v12 = vand.u32 2147483648, %v10278_v20  ;;  %v3683_v46 = vpop.f32.mrf.mxu3 }
 0x702   : > { %7392 = vrcp.f32 %v10294_v1  ;;  %v4703_v39 = vsub.f32 1.0, %v4702_v53  ;;  %v4713_v33 = vor.u32 1.1754944e-38, %v4712_v23  ;;  %v4814_v27 = vmul.f32 %v7387_v44, %v10258_v21  ;;  %v3656_v23 = vpop.f32.mrf.mxu2 }
 0x703   : > { %vm10306_vm1 = vcmp.eq.f32.partialorder %v4822_v16, 8.507059e+37  ;;  %v4691_v10 = vadd.f32 %v7381_v38, %v4690_v8  ;;  %v4825_v32 = vor.u32 1.1754944e-38, %v4824_v3  ;;  %vm5112_vm2 = vweird.f32 %v10278_v20 }
 0x704   : > { %v4945_v2 = vmul.f32 1.442695, %v4886_v29  ;;  %v7389_v15 = vpop.eup %7388  ;;  %v4704_v26 = vmul.f32 %v7385_v13, %v4703_v39  ;;  %vm4707_vm4 = vweird.f32 %v7385_v13  ;;  %v4815_v58 = vsub.f32 1.0, %v4814_v27 }
 0x705   : > { %v4890_v36 = vsub.f32 0.0, %v10273_v45  ;;  %v4695_v50 = vsel %vm4694_vm3, %v7381_v38, %v4691_v10  ;;  %vm4819_vm5 = vweird.f32 %v7387_v44  ;;  %v5108_v57 = vmul.f32 %v7389_v15, %v10278_v20  ;;  %vm4708_vm7 = vmor %vm4706_vm12, %vm4707_vm4 }
 0x706   : > { %vm10316_vm6 = vcmp.eq.f32.partialorder %v5116_v22, 8.507059e+37  ;;  %v5119_v14 = vor.u32 1.1754944e-38, %v5118_v12  ;;  %v7391_v31 = vpop.eup %7390  ;;  %v4700_v6 = vsel %vm10281_vm11, %v4699_v25, %v4695_v50  ;;  %v4705_v34 = vadd.f32 %v7385_v13, %v4704_v26  ;;  %vm4820_vm8 = vmor %vm4818_vm15, %vm4819_vm5 }
 0x707   : > { %v4816_v35 = vmul.f32 %v7387_v44, %v4815_v58  ;;  %v3655_v37 = vadd.f32 %v3654_v18, %v9305_v61  ;;  %4873 = vst [vmem:[%s9368_s3 + $0x170] sm:$0xff] %v4700_v6  ;;  %v5109_v56 = vsub.f32 1.0, %v5108_v57  ;;  %v10327_v30 = vadd.f32 1.0, %v7391_v31 }
 0x708   : > { %v7393_v11 = vpop.eup %7392  ;;  %7394 = vpow2.f32 %v4945_v2  ;;  %v4953_v52 = vmul.f32 1.442695, %v4890_v36  ;;  %v4709_v19 = vsel %vm4708_vm7, %v7385_v13, %v4705_v34  ;;  %v4796_v7 = vand.u32 2147483648, %v10294_v1 }
 0x709   : > { %v4817_v62 = vadd.f32 %v7387_v44, %v4816_v35  ;;  %v4786_v28 = vmul.f32 %v7393_v11, %v10294_v1  ;;  %v4714_v48 = vsel %vm10297_vm14, %v4713_v33, %v4709_v19  ;;  %v5110_v42 = vmul.f32 %v7389_v15, %v5109_v56  ;;  %v3685_v36 = vpop.f32.mrf.mxu3 }
 0x70a   : > { %vm5113_vm9 = vweird.f32 %v7389_v15  ;;  %7396 = vrcp.f32 %v10327_v30  ;;  %4874 = vst [vmem:[%s9368_s3 + $0x178] sm:$0xff] %v4714_v48  ;;  %vm4790_vm10 = vweird.f32 %v10294_v1  ;;  %v4794_v51 = vand.u32 2147483647, %v10294_v1 }
 0x70b   : > { %v4821_v45 = vsel %vm4820_vm8, %v7387_v44, %v4817_v62  ;;  %v4787_v38 = vsub.f32 1.0, %v4786_v28  ;;  %v5111_v21 = vadd.f32 %v7389_v15, %v5110_v42  ;;  %7398 = vpow2.f32 %v4953_v52  ;;  %vm5114_vm11 = vmor %vm5112_vm2, %vm5113_vm9 }
 0x70c   : > { %v4826_v24 = vsel %vm10306_vm1, %v4825_v32, %v4821_v45  ;;  %v4884_v0 = vsub.f32 0.0, %v3655_v37  ;;  %vm4791_vm12 = vweird.f32 %v7393_v11  ;;  %v4797_v4 = vor.u32 1.1754944e-38, %v4796_v7 }
 0x70d   : > { %4882 = vst.msk [vmem:[%s9368_s3 + $0x1b8] sm:$0xff] %vm1266_vm0, %v4826_v24  ;;  %v4788_v25 = vmul.f32 %v7393_v11, %v4787_v38  ;;  %v3684_v41 = vadd.f32 %v3683_v46, %v9296_v40  ;;  %v5115_v13 = vsel %vm5114_vm11, %v7389_v15, %v5111_v21  ;;  %v3715_v3 = vadd.f32 %v3714_v60, %v9632_v49  ;;  %vm4792_vm13 = vmor %vm4790_vm10, %vm4791_vm12  ;;  %v3717_v38 = vpop.f32.mrf.mxu0 }
 0x70e   : > { %v7395_v16 = vpop.eup %7394  ;;  %v4941_v5 = vmul.f32 1.442695, %v4884_v0  ;;  %v3631_v53 = vadd.f32 %v3630_v9, %v9302_v17  ;;  %v5120_v47 = vsel %vm10316_vm6, %v5119_v14, %v5115_v13  ;;  %v3657_v39 = vadd.f32 %v3656_v23, %v9305_v61 }
 0x70f   : > { %v4789_v29 = vadd.f32 %v7393_v11, %v4788_v25  ;;  %v10352_v20 = vadd.f32 1.0, %v7395_v16  ;;  %v4885_v44 = vsub.f32 0.0, %v3684_v41  ;;  %5891 = vst [vmem:[%s9368_s3 + $0x1c0] sm:$0xff] %v5120_v47  ;;  %v4893_v22 = vsub.f32 0.0, %v3715_v3  ;;  %v3632_v3 = vpop.f32.mrf.mxu1 }
 0x710   : > { %v7397_v8 = vpop.eup %7396  ;;  %7400 = vpow2.f32 %v4941_v5  ;;  %v4897_v12 = vsub.f32 0.0, %v3631_v53  ;;  %vm4795_vm14 = vcmp.eq.f32.partialorder %v4794_v51, 8.507059e+37  ;;  %v4891_v1 = vsub.f32 0.0, %v3657_v39 }
 0x711   : > { %v4793_v33 = vsel %vm4792_vm13, %v7393_v11, %v4789_v29  ;;  %v4800_v27 = vmul.f32 %v7397_v8, %v10327_v30  ;;  %7402 = vrcp.f32 %v10352_v20  ;;  %v7399_v43 = vpop.eup %7398  ;;  %v4943_v2 = vmul.f32 1.442695, %v4885_v44 }
 0x712   : > { %v4798_v18 = vsel %vm4795_vm14, %v4797_v4, %v4793_v33  ;;  %v10362_v32 = vadd.f32 1.0, %v7399_v43  ;;  %vm4804_vm15 = vweird.f32 %v10327_v30  ;;  %v4810_v15 = vand.u32 2147483648, %v10327_v30 }
 0x713   : > { %4880 = vst [vmem:[%s9368_s3 + $0x1a8] sm:$0xff] %v4798_v18  ;;  %v4801_v10 = vsub.f32 1.0, %v4800_v27  ;;  %v4959_v26 = vmul.f32 1.442695, %v4893_v22  ;;  %v4967_v58 = vmul.f32 1.442695, %v4897_v12  ;;  %vm4805_vm1 = vweird.f32 %v7397_v8 }
 0x714   : > { %v4808_v57 = vand.u32 2147483647, %v10327_v30  ;;  %7404 = vrcp.f32 %v10362_v32  ;;  %v5158_v14 = vand.u32 2147483647, %v10352_v20  ;;  %v5160_v31 = vand.u32 2147483648, %v10352_v20  ;;  %vm4806_vm2 = vmor %vm4804_vm15, %vm4805_vm1 }
 0x715   : > { %v4802_v50 = vmul.f32 %v7397_v8, %v4801_v10  ;;  %7406 = vpow2.f32 %v4943_v2  ;;  %v4955_v6 = vmul.f32 1.442695, %v4891_v1  ;;  %v3686_v11 = vadd.f32 %v3685_v36, %v9296_v40 }
 0x716   : > { %v7401_v63 = vpop.eup %7400  ;;  %7408 = vpow2.f32 %v4959_v26  ;;  %v4811_v56 = vor.u32 1.1754944e-38, %v4810_v15  ;;  %vm4809_vm3 = vcmp.eq.f32.partialorder %v4808_v57, 8.507059e+37  ;;  %v5214_v62 = vand.u32 2147483647, %v10362_v32  ;;  %v3659_v26 = vpop.f32.mrf.mxu2 }
 0x717   : > { %v7403_v34 = vpop.eup %7402  ;;  %v4803_v35 = vadd.f32 %v7397_v8, %v4802_v50  ;;  %v10370_v37 = vadd.f32 1.0, %v7401_v63  ;;  %7410 = vpow2.f32 %v4967_v58  ;;  %vm5154_vm4 = vweird.f32 %v10352_v20 }
 0x718   : > { %v5150_v52 = vmul.f32 %v7403_v34, %v10352_v20  ;;  %vm10380_vm5 = vcmp.eq.f32.partialorder %v5158_v14, 8.507059e+37  ;;  %v5161_v42 = vor.u32 1.1754944e-38, %v5160_v31  ;;  %v5216_v46 = vand.u32 2147483648, %v10362_v32 }
 0x719   : > { %v4807_v19 = vsel %vm4806_vm2, %v7397_v8, %v4803_v35  ;;  %7412 = vrcp.f32 %v10370_v37  ;;  %v4892_v45 = vsub.f32 0.0, %v3686_v11  ;;  %vm5155_vm6 = vweird.f32 %v7403_v34 }
 0x71a   : > { %v4812_v28 = vsel %vm4809_vm3, %v4811_v56, %v4807_v19  ;;  %v5151_v7 = vsub.f32 1.0, %v5150_v52  ;;  %7414 = vpow2.f32 %v4955_v6  ;;  %v7405_v48 = vpop.eup %7404  ;;  %vm5210_vm7 = vweird.f32 %v10362_v32  ;;  %vm5156_vm9 = vmor %vm5154_vm4, %vm5155_vm6 }
 0x71b   : > { %4881 = vst [vmem:[%s9368_s3 + $0x1b0] sm:$0xff] %v4812_v28  ;;  %v7407_v51 = vpop.eup %7406  ;;  %v5206_v9 = vmul.f32 %v7405_v48, %v10362_v32  ;;  %vm10387_vm8 = vcmp.eq.f32.partialorder %v5214_v62, 8.507059e+37  ;;  %v5130_v0 = vand.u32 2147483647, %v10370_v37  ;;  %v5132_v25 = vand.u32 2147483648, %v10370_v37 }
 0x71c   : > { %v5152_v60 = vmul.f32 %v7403_v34, %v5151_v7  ;;  %v7409_v24 = vpop.eup %7408  ;;  %v10393_v4 = vadd.f32 1.0, %v7407_v51  ;;  %v3718_v5 = vadd.f32 %v3717_v38, %v9632_v49  ;;  %v5217_v47 = vor.u32 1.1754944e-38, %v5216_v46  ;;  %v3688_v51 = vpop.f32.mrf.mxu3 }
 0x71d   : > { %v7411_v41 = vpop.eup %7410  ;;  %v5207_v16 = vsub.f32 1.0, %v5206_v9  ;;  %v10395_v13 = vadd.f32 1.0, %v7409_v24  ;;  %vm5126_vm10 = vweird.f32 %v10370_v37  ;;  %v4957_v29 = vmul.f32 1.442695, %v4892_v45 }
 0x71e   : > { %v5153_v23 = vadd.f32 %v7403_v34, %v5152_v60  ;;  %7416 = vrcp.f32 %v10393_v4  ;;  %vm5211_vm11 = vweird.f32 %v7405_v48  ;;  %vm10406_vm12 = vcmp.eq.f32.partialorder %v5130_v0, 8.507059e+37 }
 0x71f   : > { %v7413_v53 = vpop.eup %7412  ;;  %v5208_v22 = vmul.f32 %v7405_v48, %v5207_v16  ;;  %7418 = vrcp.f32 %v10395_v13  ;;  %v3633_v20 = vadd.f32 %v3632_v3, %v9302_v17  ;;  %v5133_v18 = vor.u32 1.1754944e-38, %v5132_v25  ;;  %vm5212_vm13 = vmor %vm5210_vm7, %vm5211_vm11 }
 0x720   : > { %v7415_v44 = vpop.eup %7414  ;;  %v5157_v8 = vsel %vm5156_vm9, %v7403_v34, %v5153_v23  ;;  %v5122_v12 = vmul.f32 %v7413_v53, %v10370_v37  ;;  %v4900_v10 = vsub.f32 0.0, %v3718_v5  ;;  %v5144_v2 = vand.u32 2147483647, %v10393_v4 }
 0x721   : > { %v5162_v39 = vsel %vm10380_vm5, %v5161_v42, %v5157_v8  ;;  %v5209_v27 = vadd.f32 %v7405_v48, %v5208_v22  ;;  %v10416_v1 = vadd.f32 1.0, %v7411_v41  ;;  %v10418_v15 = vadd.f32 1.0, %v7415_v44 }
 0x722   : > { %5894 = vst [vmem:[%s9368_s3 + $0x1d8] sm:$0xff] %v5162_v39  ;;  %v5123_v43 = vsub.f32 1.0, %v5122_v12  ;;  %7420 = vpow2.f32 %v4957_v29  ;;  %vm5127_vm14 = vweird.f32 %v7413_v53  ;;  %v5146_v50 = vand.u32 2147483648, %v10393_v4 }
 0x723   : > { %v5213_v58 = vsel %vm5212_vm13, %v7405_v48, %v5209_v27  ;;  %v5256_v32 = vand.u32 2147483647, %v10395_v13  ;;  %v5258_v14 = vand.u32 2147483648, %v10395_v13  ;;  %7422 = vrcp.f32 %v10416_v1  ;;  %vm5128_vm15 = vmor %vm5126_vm10, %vm5127_vm14 }
 0x724   : > { %v5124_v36 = vmul.f32 %v7413_v53, %v5123_v43  ;;  %v7417_v57 = vpop.eup %7416  ;;  %v5218_v63 = vsel %vm10387_vm8, %v5217_v47, %v5213_v58  ;;  %v4904_v34 = vsub.f32 0.0, %v3633_v20  ;;  %v3660_v35 = vadd.f32 %v3659_v26, %v9305_v61  ;;  %v3719_v20 = vpop.f32.mrf.mxu0 }
 0x725   : > { %5898 = vst [vmem:[%s9368_s3 + $0x1f8] sm:$0xff] %v5218_v63  ;;  %v5136_v6 = vmul.f32 %v7417_v57, %v10393_v4  ;;  %v7419_v11 = vpop.eup %7418  ;;  %vm5140_vm1 = vweird.f32 %v10393_v4  ;;  %vm10432_vm2 = vcmp.eq.f32.partialorder %v5144_v2, 8.507059e+37  ;;  %7424 = vrcp.f32 %v10418_v15  ;;  %v3635_v2 = vpop.f32.mrf.mxu1 }
 0x726   : > { %v5125_v31 = vadd.f32 %v7413_v53, %v5124_v36  ;;  %v4973_v52 = vmul.f32 1.442695, %v4900_v10  ;;  %v5147_v28 = vor.u32 1.1754944e-38, %v5146_v50  ;;  %v5248_v7 = vmul.f32 %v7419_v11, %v10395_v13  ;;  %v3661_v50 = vpop.f32.mrf.mxu2 }
 0x727   : > { %v5137_v62 = vsub.f32 1.0, %v5136_v6  ;;  %vm5252_vm3 = vweird.f32 %v10395_v13  ;;  %vm10441_vm4 = vcmp.eq.f32.partialorder %v5256_v32, 8.507059e+37  ;;  %v5259_v42 = vor.u32 1.1754944e-38, %v5258_v14 }
 0x728   : > { %v5129_v19 = vsel %vm5128_vm15, %v7413_v53, %v5125_v31  ;;  %v7421_v48 = vpop.eup %7420  ;;  %vm5141_vm5 = vweird.f32 %v7417_v57  ;;  %v5249_v45 = vsub.f32 1.0, %v5248_v7  ;;  %vm5308_vm6 = vweird.f32 %v10416_v1 }
 0x729   : > { %v5134_v30 = vsel %vm10406_vm12, %v5133_v18, %v5129_v19  ;;  %v5138_v46 = vmul.f32 %v7417_v57, %v5137_v62  ;;  %v10447_v38 = vadd.f32 1.0, %v7421_v48  ;;  %v7423_v60 = vpop.eup %7422  ;;  %vm5253_vm7 = vweird.f32 %v7419_v11  ;;  %vm5142_vm9 = vmor %vm5140_vm1, %vm5141_vm5 }
 0x72a   : > { %5892 = vst [vmem:[%s9368_s3 + $0x1c8] sm:$0xff] %v5134_v30  ;;  %v5312_v9 = vand.u32 2147483647, %v10416_v1  ;;  %v5314_v24 = vand.u32 2147483648, %v10416_v1  ;;  %7426 = vpow2.f32 %v4973_v52  ;;  %v5250_v0 = vmul.f32 %v7419_v11, %v5249_v45  ;;  %vm5254_vm10 = vmor %vm5252_vm3, %vm5253_vm7  ;;  %v3690_v45 = vpop.f32.mrf.mxu3 }
 0x72b   : > { %v5139_v21 = vadd.f32 %v7417_v57, %v5138_v46  ;;  %v5304_v25 = vmul.f32 %v7423_v60, %v10416_v1  ;;  %vm5224_vm8 = vweird.f32 %v10418_v15  ;;  %v4981_v41 = vmul.f32 1.442695, %v4904_v34  ;;  %v7425_v23 = vpop.eup %7424 }
 0x72c   : > { %v5228_v16 = vand.u32 2147483647, %v10418_v15  ;;  %7428 = vrcp.f32 %v10447_v38  ;;  %v4898_v5 = vsub.f32 0.0, %v3660_v35  ;;  %v3689_v3 = vadd.f32 %v3688_v51, %v9296_v40 }
 0x72d   : > { %v5143_v53 = vsel %vm5142_vm9, %v7417_v57, %v5139_v21  ;;  %v5251_v47 = vadd.f32 %v7419_v11, %v5250_v0  ;;  %v5305_v29 = vsub.f32 1.0, %v5304_v25  ;;  %v5220_v44 = vmul.f32 %v7425_v23, %v10418_v15 }
 0x72e   : > { %v5148_v8 = vsel %vm10432_vm2, %v5147_v28, %v5143_v53  ;;  %vm5309_vm11 = vweird.f32 %v7423_v60  ;;  %vm10465_vm12 = vcmp.eq.f32.partialorder %v5312_v9, 8.507059e+37  ;;  %v5315_v22 = vor.u32 1.1754944e-38, %v5314_v24 }
 0x72f   : > { %5893 = vst [vmem:[%s9368_s3 + $0x1d0] sm:$0xff] %v5148_v8  ;;  %v5255_v12 = vsel %vm5254_vm10, %v7419_v11, %v5251_v47  ;;  %v5306_v39 = vmul.f32 %v7423_v60, %v5305_v29  ;;  %v5221_v33 = vsub.f32 1.0, %v5220_v44  ;;  %7430 = vpow2.f32 %v4981_v41  ;;  %vm5310_vm14 = vmor %vm5308_vm6, %vm5309_vm11  ;;  %v3722_v47 = vpop.f32.mrf.mxu0 }
 0x730   : > { %v7427_v27 = vpop.eup %7426  ;;  %v5260_v43 = vsel %vm10441_vm4, %v5259_v42, %v5255_v12  ;;  %v5230_v13 = vand.u32 2147483648, %v10418_v15  ;;  %v4969_v18 = vmul.f32 1.442695, %v4898_v5  ;;  %v4899_v10 = vsub.f32 0.0, %v3689_v3 }
 0x731   : > { %5901 = vst [vmem:[%s9368_s3 + $0x210] sm:$0xff] %v5260_v43  ;;  %v5307_v26 = vadd.f32 %v7423_v60, %v5306_v39  ;;  %v5222_v58 = vmul.f32 %v7425_v23, %v5221_v33  ;;  %vm5225_vm13 = vweird.f32 %v7425_v23  ;;  %v10474_v36 = vadd.f32 1.0, %v7427_v27 }
 0x732   : > { %v7429_v57 = vpop.eup %7428  ;;  %vm10479_vm15 = vcmp.eq.f32.partialorder %v5228_v16, 8.507059e+37  ;;  %7432 = vpow2.f32 %v4969_v18  ;;  %v4971_v32 = vmul.f32 1.442695, %v4899_v10  ;;  %v3720_v14 = vadd.f32 %v3719_v20, %v9632_v49  ;;  %vm5226_vm1 = vmor %vm5224_vm8, %vm5225_vm13 }
 0x733   : > { %v5311_v31 = vsel %vm5310_vm14, %v7423_v60, %v5307_v26  ;;  %v5223_v6 = vadd.f32 %v7425_v23, %v5222_v58  ;;  %v5234_v34 = vmul.f32 %v7429_v57, %v10447_v38  ;;  %v3636_v35 = vadd.f32 %v3635_v2, %v9302_v17 }
 0x734   : > { %v5316_v1 = vsel %vm10465_vm12, %v5315_v22, %v5311_v31  ;;  %v5231_v11 = vor.u32 1.1754944e-38, %v5230_v13  ;;  %7434 = vrcp.f32 %v10474_v36  ;;  %v3662_v56 = vadd.f32 %v3661_v50, %v9305_v61 }
 0x735   : > { %v7431_v52 = vpop.eup %7430  ;;  %5905 = vst [vmem:[%s9368_s3 + $0x230] sm:$0xff] %v5316_v1  ;;  %v5227_v19 = vsel %vm5226_vm1, %v7425_v23, %v5223_v6  ;;  %v5235_v62 = vsub.f32 1.0, %v5234_v34  ;;  %v5242_v28 = vand.u32 2147483647, %v10447_v38  ;;  %7436 = vpow2.f32 %v4971_v32 }
 0x736   : > { %v5232_v7 = vsel %vm10479_vm15, %v5231_v11, %v5227_v19  ;;  %v5244_v48 = vand.u32 2147483648, %v10447_v38  ;;  %v10497_v30 = vadd.f32 1.0, %v7431_v52  ;;  %v4907_v15 = vsub.f32 0.0, %v3720_v14 }
 0x737   : > { %5899 = vst [vmem:[%s9368_s3 + $0x200] sm:$0xff] %v5232_v7  ;;  %v5236_v37 = vmul.f32 %v7429_v57, %v5235_v62  ;;  %vm5239_vm2 = vweird.f32 %v7429_v57  ;;  %v5354_v42 = vand.u32 2147483647, %v10474_v36  ;;  %v4911_v46 = vsub.f32 0.0, %v3636_v35 }
 0x738   : > { %v7433_v51 = vpop.eup %7432  ;;  %vm5238_vm3 = vweird.f32 %v10447_v38  ;;  %v5356_v60 = vand.u32 2147483648, %v10474_v36  ;;  %7438 = vrcp.f32 %v10497_v30  ;;  %v4905_v9 = vsub.f32 0.0, %v3662_v56 }
 0x739   : > { %v5237_v24 = vadd.f32 %v7429_v57, %v5236_v37  ;;  %vm5243_vm4 = vcmp.eq.f32.partialorder %v5242_v28, 8.507059e+37  ;;  %v10504_v21 = vadd.f32 1.0, %v7433_v51  ;;  %v4987_v0 = vmul.f32 1.442695, %v4907_v15  ;;  %vm5240_vm5 = vmor %vm5238_vm3, %vm5239_vm2 }
 0x73a   : > { %v7435_v25 = vpop.eup %7434  ;;  %v5245_v41 = vor.u32 1.1754944e-38, %v5244_v48  ;;  %vm5350_vm6 = vweird.f32 %v10474_v36  ;;  %v4995_v23 = vmul.f32 1.442695, %v4911_v46  ;;  %v3691_v16 = vadd.f32 %v3690_v45, %v9296_v40  ;;  %v3637_v46 = vpop.f32.mrf.mxu1 }
 0x73b   : > { %v7437_v38 = vpop.eup %7436  ;;  %v5241_v5 = vsel %vm5240_vm5, %v7429_v57, %v5237_v24  ;;  %v5346_v3 = vmul.f32 %v7435_v25, %v10474_v36  ;;  %vm10509_vm7 = vcmp.eq.f32.partialorder %v5354_v42, 8.507059e+37  ;;  %7440 = vrcp.f32 %v10504_v21  ;;  %v3664_v24 = vpop.f32.mrf.mxu2 }
 0x73c   : > { %v5246_v29 = vsel %vm5243_vm4, %v5245_v41, %v5241_v5  ;;  %v5357_v44 = vor.u32 1.1754944e-38, %v5356_v60  ;;  %v5410_v8 = vand.u32 2147483647, %v10497_v30  ;;  %v4983_v4 = vmul.f32 1.442695, %v4905_v9 }
 0x73d   : > { %5900 = vst [vmem:[%s9368_s3 + $0x208] sm:$0xff] %v5246_v29  ;;  %v5347_v22 = vsub.f32 1.0, %v5346_v3  ;;  %v10516_v12 = vadd.f32 1.0, %v7437_v38  ;;  %7442 = vpow2.f32 %v4987_v0  ;;  %v4906_v39 = vsub.f32 0.0, %v3691_v16 }
 0x73e   : > { %v7439_v33 = vpop.eup %7438  ;;  %vm5406_vm8 = vweird.f32 %v10497_v30  ;;  %v5412_v20 = vand.u32 2147483648, %v10497_v30  ;;  %7444 = vpow2.f32 %v4995_v23  ;;  %v3723_v27 = vadd.f32 %v3722_v47, %v9632_v49 }
 0x73f   : > { %v5348_v43 = vmul.f32 %v7435_v25, %v5347_v22  ;;  %vm5351_vm9 = vweird.f32 %v7435_v25  ;;  %v5402_v13 = vmul.f32 %v7439_v33, %v10497_v30  ;;  %7446 = vrcp.f32 %v10516_v12 }
 0x740   : > { %vm10523_vm10 = vcmp.eq.f32.partialorder %v5410_v8, 8.507059e+37  ;;  %v5326_v10 = vand.u32 2147483647, %v10504_v21  ;;  %v5328_v2 = vand.u32 2147483648, %v10504_v21  ;;  %7448 = vpow2.f32 %v4983_v4  ;;  %vm5352_vm11 = vmor %vm5350_vm6, %vm5351_vm9 }
 0x741   : > { %v7441_v26 = vpop.eup %7440  ;;  %v5349_v58 = vadd.f32 %v7435_v25, %v5348_v43  ;;  %v5403_v50 = vsub.f32 1.0, %v5402_v13  ;;  %v4985_v57 = vmul.f32 1.442695, %v4906_v39  ;;  %v4914_v63 = vsub.f32 0.0, %v3723_v27  ;;  %v3693_v43 = vpop.f32.mrf.mxu3 }
 0x742   : > { %vm5407_vm12 = vweird.f32 %v7439_v33  ;;  %v5413_v32 = vor.u32 1.1754944e-38, %v5412_v20  ;;  %v5318_v14 = vmul.f32 %v7441_v26, %v10504_v21  ;;  %vm5322_vm13 = vweird.f32 %v10504_v21 }
 0x743   : > { %v7443_v31 = vpop.eup %7442  ;;  %v5353_v6 = vsel %vm5352_vm11, %v7435_v25, %v5349_v58  ;;  %v5404_v34 = vmul.f32 %v7439_v33, %v5403_v50  ;;  %7450 = vpow2.f32 %v4985_v57  ;;  %v5001_v35 = vmul.f32 1.442695, %v4914_v63  ;;  %vm5408_vm15 = vmor %vm5406_vm8, %vm5407_vm12 }
 0x744   : > { %v7445_v1 = vpop.eup %7444  ;;  %v5358_v11 = vsel %vm10509_vm7, %v5357_v44, %v5353_v6  ;;  %v5319_v56 = vsub.f32 1.0, %v5318_v14  ;;  %vm10535_vm14 = vcmp.eq.f32.partialorder %v5326_v10, 8.507059e+37  ;;  %v10539_v52 = vadd.f32 1.0, %v7443_v31 }
 0x745   : > { %v7447_v19 = vpop.eup %7446  ;;  %5908 = vst [vmem:[%s9368_s3 + $0x248] sm:$0xff] %v5358_v11  ;;  %v5405_v62 = vadd.f32 %v7439_v33, %v5404_v34  ;;  %v5329_v28 = vor.u32 1.1754944e-38, %v5328_v2  ;;  %v5340_v7 = vand.u32 2147483647, %v10516_v12  ;;  %v10543_v48 = vadd.f32 1.0, %v7445_v1  ;;  %v3724_v34 = vpop.f32.mrf.mxu0 }
 0x746   : > { %v7449_v15 = vpop.eup %7448  ;;  %v5320_v37 = vmul.f32 %v7441_v26, %v5319_v56  ;;  %vm5323_vm1 = vweird.f32 %v7441_v26  ;;  %v5332_v42 = vmul.f32 %v7447_v19, %v10516_v12  ;;  %7452 = vrcp.f32 %v10539_v52 }
 0x747   : > { %v5409_v45 = vsel %vm5408_vm15, %v7439_v33, %v5405_v62  ;;  %vm5336_vm2 = vweird.f32 %v10516_v12  ;;  %v5342_v51 = vand.u32 2147483648, %v10516_v12  ;;  %7454 = vpow2.f32 %v5001_v35  ;;  %vm5324_vm3 = vmor %vm5322_vm13, %vm5323_vm1 }
 0x748   : > { %v5414_v60 = vsel %vm10523_vm10, %v5413_v32, %v5409_v45  ;;  %v5321_v9 = vadd.f32 %v7441_v26, %v5320_v37  ;;  %v5333_v30 = vsub.f32 1.0, %v5332_v42  ;;  %7456 = vrcp.f32 %v10543_v48 }
 0x749   : > { %v7451_v0 = vpop.eup %7450  ;;  %5912 = vst [vmem:[%s9368_s3 + $0x268] sm:$0xff] %v5414_v60  ;;  %vm10559_vm4 = vcmp.eq.f32.partialorder %v5340_v7, 8.507059e+37  ;;  %v5452_v41 = vand.u32 2147483647, %v10539_v52  ;;  %v5454_v23 = vand.u32 2147483648, %v10539_v52  ;;  %v3638_v16 = vadd.f32 %v3637_v46, %v9302_v17 }
 0x74a   : > { %v5325_v38 = vsel %vm5324_vm3, %v7441_v26, %v5321_v9  ;;  %v5334_v5 = vmul.f32 %v7447_v19, %v5333_v30  ;;  %vm5337_vm5 = vweird.f32 %v7447_v19  ;;  %v10566_v3 = vadd.f32 1.0, %v7449_v15 }
 0x74b   : > { %v5330_v53 = vsel %vm10535_vm14, %v5329_v28, %v5325_v38  ;;  %v5343_v21 = vor.u32 1.1754944e-38, %v5342_v51  ;;  %v10570_v47 = vadd.f32 1.0, %v7451_v0  ;;  %v10573_v29 = vadd.f32 %v3664_v24, %v9305_v61  ;;  %vm5338_vm6 = vmor %vm5336_vm2, %vm5337_vm5  ;;  %v3666_v0 = vpop.f32.mrf.mxu2 }
 0x74c   : > { %v7453_v44 = vpop.eup %7452  ;;  %5906 = vst [vmem:[%s9368_s3 + $0x238] sm:$0xff] %v5330_v53  ;;  %v5335_v8 = vadd.f32 %v7447_v19, %v5334_v5  ;;  %v5508_v4 = vand.u32 2147483647, %v10543_v48  ;;  %v5510_v22 = vand.u32 2147483648, %v10543_v48  ;;  %7458 = vrcp.f32 %v10566_v3 }
 0x74d   : > { %v7455_v39 = vpop.eup %7454  ;;  %v5444_v33 = vmul.f32 %v7453_v44, %v10539_v52  ;;  %vm5448_vm7 = vweird.f32 %v10539_v52  ;;  %vm10583_vm8 = vcmp.eq.f32.partialorder %v5452_v41, 8.507059e+37  ;;  %v5455_v27 = vor.u32 1.1754944e-38, %v5454_v23  ;;  %v3640_v52 = vpop.f32.mrf.mxu1 }
 0x74e   : > { %v7457_v13 = vpop.eup %7456  ;;  %v5339_v18 = vsel %vm5338_vm6, %v7447_v19, %v5335_v8  ;;  %v5426_v10 = vand.u32 2147483648, %v10566_v3  ;;  %7460 = vrcp.f32 %v10570_v47  ;;  %v4918_v2 = vsub.f32 0.0, %v3638_v16  ;;  %v3695_v16 = vpop.f32.mrf.mxu3 }
 0x74f   : > { %v5344_v12 = vsel %vm10559_vm4, %v5343_v21, %v5339_v18  ;;  %v5445_v26 = vsub.f32 1.0, %v5444_v33  ;;  %v5500_v58 = vmul.f32 %v7457_v13, %v10543_v48  ;;  %v5424_v50 = vand.u32 2147483647, %v10566_v3 }
 0x750   : > { %5907 = vst [vmem:[%s9368_s3 + $0x240] sm:$0xff] %v5344_v12  ;;  %vm5449_vm9 = vweird.f32 %v7453_v44  ;;  %vm5504_vm10 = vweird.f32 %v10543_v48  ;;  %vm10595_vm11 = vcmp.eq.f32.partialorder %v5508_v4, 8.507059e+37  ;;  %v5511_v63 = vor.u32 1.1754944e-38, %v5510_v22 }
 0x751   : > { %v5446_v32 = vmul.f32 %v7453_v44, %v5445_v26  ;;  %v5501_v14 = vsub.f32 1.0, %v5500_v58  ;;  %v5438_v31 = vand.u32 2147483647, %v10570_v47  ;;  %v10600_v6 = vadd.f32 1.0, %v7455_v39  ;;  %vm5450_vm1 = vmor %vm5448_vm7, %vm5449_vm9 }
 0x752   : > { %v7459_v35 = vpop.eup %7458  ;;  %vm5505_vm12 = vweird.f32 %v7457_v13  ;;  %vm5420_vm13 = vweird.f32 %v10566_v3  ;;  %v5427_v1 = vor.u32 1.1754944e-38, %v5426_v10  ;;  %v5440_v11 = vand.u32 2147483648, %v10570_v47 }
 0x753   : > { %v5447_v56 = vadd.f32 %v7453_v44, %v5446_v32  ;;  %v5502_v36 = vmul.f32 %v7457_v13, %v5501_v14  ;;  %v5416_v19 = vmul.f32 %v7459_v35, %v10566_v3  ;;  %vm10605_vm14 = vcmp.eq.f32.partialorder %v5424_v50, 8.507059e+37  ;;  %vm5506_vm3 = vmor %vm5504_vm10, %vm5505_vm12 }
 0x754   : > { %vm5434_vm15 = vweird.f32 %v10570_v47  ;;  %v5009_v28 = vmul.f32 1.442695, %v4918_v2  ;;  %v7461_v7 = vpop.eup %7460  ;;  %7462 = vrcp.f32 %v10600_v6  ;;  %v4912_v15 = vsub.f32 0.0, %v10573_v29 }
 0x755   : > { %v3694_v37 = vadd.f32 %v3693_v43, %v9296_v40  ;;  %v3725_v42 = vadd.f32 %v3724_v34, %v9632_v49  ;;  %v5451_v46 = vsel %vm5450_vm1, %v7453_v44, %v5447_v56  ;;  %v5503_v45 = vadd.f32 %v7457_v13, %v5502_v36  ;;  %v3642_v34 = vpop.f32.mrf.mxu1 }
 0x756   : > { %v5417_v51 = vsub.f32 1.0, %v5416_v19  ;;  %v5430_v60 = vmul.f32 %v7461_v7, %v10570_v47  ;;  %vm10618_vm2 = vcmp.eq.f32.partialorder %v5438_v31, 8.507059e+37  ;;  %v5456_v30 = vsel %vm10583_vm8, %v5455_v27, %v5451_v46  ;;  %v3727_v31 = vpop.f32.mrf.mxu0 }
 0x757   : > { %vm5421_vm4 = vweird.f32 %v7459_v35  ;;  %vm5435_vm5 = vweird.f32 %v7461_v7  ;;  %v5441_v24 = vor.u32 1.1754944e-38, %v5440_v11  ;;  %5915 = vst [vmem:[%s9368_s3 + $0x280] sm:$0xff] %v5456_v30  ;;  %v5507_v25 = vsel %vm5506_vm3, %v7457_v13, %v5503_v45 }
 0x758   : > { %v5418_v41 = vmul.f32 %v7459_v35, %v5417_v51  ;;  %v5431_v23 = vsub.f32 1.0, %v5430_v60  ;;  %7464 = vpow2.f32 %v5009_v28  ;;  %v5512_v38 = vsel %vm10595_vm11, %v5511_v63, %v5507_v25  ;;  %vm5422_vm6 = vmor %vm5420_vm13, %vm5421_vm4 }
 0x759   : > { %v4997_v5 = vmul.f32 1.442695, %v4912_v15  ;;  %v4913_v53 = vsub.f32 0.0, %v3694_v37  ;;  %v4921_v21 = vsub.f32 0.0, %v3725_v42  ;;  %5919 = vst [vmem:[%s9368_s3 + $0x2a0] sm:$0xff] %v5512_v38  ;;  %v3641_v44 = vadd.f32 %v3640_v52, %v9302_v17  ;;  %vm5436_vm7 = vmor %vm5434_vm15, %vm5435_vm5 }
 0x75a   : > { %v5419_v48 = vadd.f32 %v7459_v35, %v5418_v41  ;;  %v5432_v29 = vmul.f32 %v7461_v7, %v5431_v23  ;;  %v3667_v8 = vadd.f32 %v3666_v0, %v9305_v61  ;;  %v7463_v4 = vpop.eup %7462  ;;  %v3696_v33 = vadd.f32 %v3695_v16, %v9296_v40 }
 0x75b   : > { %7466 = vpow2.f32 %v4997_v5  ;;  %v4999_v22 = vmul.f32 1.442695, %v4913_v53  ;;  %v5015_v39 = vmul.f32 1.442695, %v4921_v21  ;;  %v5542_v43 = vmul.f32 %v7463_v4, %v10600_v6 }
 0x75c   : > { %v5423_v20 = vsel %vm5422_vm6, %v7459_v35, %v5419_v48  ;;  %v5433_v27 = vadd.f32 %v7461_v7, %v5432_v29  ;;  %v5552_v13 = vand.u32 2147483648, %v10600_v6  ;;  %v4925_v3 = vsub.f32 0.0, %v3641_v44 }
 0x75d   : > { %v5428_v18 = vsel %vm10605_vm14, %v5427_v1, %v5423_v20  ;;  %7468 = vpow2.f32 %v4999_v22  ;;  %v4919_v10 = vsub.f32 0.0, %v3667_v8  ;;  %v5543_v26 = vsub.f32 1.0, %v5542_v43 }
 0x75e   : > { %v7465_v2 = vpop.eup %7464  ;;  %5913 = vst [vmem:[%s9368_s3 + $0x270] sm:$0xff] %v5428_v18  ;;  %v5437_v12 = vsel %vm5436_vm7, %v7461_v7, %v5433_v27  ;;  %7470 = vpow2.f32 %v5015_v39  ;;  %v4920_v58 = vsub.f32 0.0, %v3696_v33  ;;  %v5023_v63 = vmul.f32 1.442695, %v4925_v3 }
 0x75f   : > { %v5442_v50 = vsel %vm10618_vm2, %v5441_v24, %v5437_v12  ;;  %v10647_v57 = vadd.f32 1.0, %v7465_v2  ;;  %v5011_v32 = vmul.f32 1.442695, %v4919_v10  ;;  %v5544_v14 = vmul.f32 %v7463_v4, %v5543_v26 }
 0x760   : > { %5914 = vst [vmem:[%s9368_s3 + $0x278] sm:$0xff] %v5442_v50  ;;  %vm5547_vm8 = vweird.f32 %v7463_v4  ;;  %v5550_v47 = vand.u32 2147483647, %v10600_v6  ;;  %vm5546_vm9 = vweird.f32 %v10600_v6  ;;  %v5013_v56 = vmul.f32 1.442695, %v4920_v58 }
 0x761   : > { %v7467_v35 = vpop.eup %7466  ;;  %7472 = vrcp.f32 %v10647_v57  ;;  %v5545_v1 = vadd.f32 %v7463_v4, %v5544_v14  ;;  %vm5548_vm10 = vmor %vm5546_vm9, %vm5547_vm8  ;;  %v5553_v19 = vor.u32 1.1754944e-38, %v5552_v13  ;;  %v3728_v62 = vadd.f32 %v3727_v31, %v9632_v49 }
 0x762   : > { %v10653_v11 = vadd.f32 1.0, %v7467_v35  ;;  %7474 = vpow2.f32 %v5023_v63  ;;  %v3643_v28 = vadd.f32 %v3642_v34, %v9302_v17  ;;  %vm5551_vm11 = vcmp.eq.f32.partialorder %v5550_v47, 8.507059e+37  ;;  %v3669_v47 = vpop.f32.mrf.mxu2 }
 0x763   : > { %v7469_v36 = vpop.eup %7468  ;;  %7476 = vpow2.f32 %v5011_v32  ;;  %v5549_v15 = vsel %vm5548_vm10, %v7463_v4, %v5545_v1  ;;  %v5606_v6 = vand.u32 2147483647, %v10647_v57  ;;  %v5608_v42 = vand.u32 2147483648, %v10647_v57 }
 0x764   : > { %v7471_v7 = vpop.eup %7470  ;;  %7478 = vrcp.f32 %v10653_v11  ;;  %v5554_v37 = vsel %vm5551_vm11, %v5553_v19, %v5549_v15  ;;  %v10660_v46 = vadd.f32 1.0, %v7469_v36  ;;  %v5522_v60 = vand.u32 2147483647, %v10653_v11  ;;  %v3698_v19 = vpop.f32.mrf.mxu3 }
 0x765   : > { %v10662_v45 = vadd.f32 1.0, %v7471_v7  ;;  %5922 = vst [vmem:[%s9368_s3 + $0x2b8] sm:$0xff] %v5554_v37  ;;  %7480 = vpow2.f32 %v5013_v56  ;;  %v4928_v17 = vsub.f32 0.0, %v3728_v62  ;;  %v4932_v9 = vsub.f32 0.0, %v3643_v28 }
 0x766   : > { %7482 = vrcp.f32 %v10660_v46  ;;  %vm5602_vm12 = vweird.f32 %v10647_v57  ;;  %vm10669_vm13 = vcmp.eq.f32.partialorder %v5606_v6, 8.507059e+37  ;;  %v5609_v25 = vor.u32 1.1754944e-38, %v5608_v42 }
 0x767   : > { %v7473_v51 = vpop.eup %7472  ;;  %7484 = vrcp.f32 %v10662_v45  ;;  %vm5518_vm14 = vweird.f32 %v10653_v11  ;;  %v5524_v41 = vand.u32 2147483648, %v10653_v11  ;;  %v5536_v23 = vand.u32 2147483647, %v10660_v46 }
 0x768   : > { %v7475_v52 = vpop.eup %7474  ;;  %v5598_v30 = vmul.f32 %v7473_v51, %v10647_v57  ;;  %v5538_v5 = vand.u32 2147483648, %v10660_v46  ;;  %vm10683_vm15 = vcmp.eq.f32.partialorder %v5522_v60, 8.507059e+37  ;;  %v5648_v44 = vand.u32 2147483647, %v10662_v45 }
 0x769   : > { %v7477_v0 = vpop.eup %7476  ;;  %v10678_v53 = vadd.f32 1.0, %v7475_v52  ;;  %v5029_v8 = vmul.f32 1.442695, %v4928_v17  ;;  %v10688_v4 = vmul.f32 1.442695, %v4932_v9  ;;  %vm5603_vm1 = vweird.f32 %v7473_v51 }
 0x76a   : > { %v7479_v16 = vpop.eup %7478  ;;  %v5599_v38 = vsub.f32 1.0, %v5598_v30  ;;  %v10680_v21 = vadd.f32 1.0, %v7477_v0  ;;  %v5650_v33 = vand.u32 2147483648, %v10662_v45  ;;  %v5525_v43 = vor.u32 1.1754944e-38, %v5524_v41  ;;  %vm5604_vm5 = vmor %vm5602_vm12, %vm5603_vm1  ;;  %v3729_v0 = vpop.f32.mrf.mxu0 }
 0x76b   : > { %v5514_v48 = vmul.f32 %v7479_v16, %v10653_v11  ;;  %v7481_v22 = vpop.eup %7480  ;;  %7486 = vrcp.f32 %v10678_v53  ;;  %vm5532_vm2 = vweird.f32 %v10660_v46  ;;  %vm10695_vm3 = vcmp.eq.f32.partialorder %v5536_v23, 8.507059e+37 }
 0x76c   : > { %v5600_v39 = vmul.f32 %v7473_v51, %v5599_v38  ;;  %v7483_v20 = vpop.eup %7482  ;;  %7488 = vrcp.f32 %v10680_v21  ;;  %v5539_v2 = vor.u32 1.1754944e-38, %v5538_v5  ;;  %vm5644_vm4 = vweird.f32 %v10662_v45 }
 0x76d   : > { %v5515_v27 = vsub.f32 1.0, %v5514_v48  ;;  %v7485_v13 = vpop.eup %7484  ;;  %v5528_v3 = vmul.f32 %v7483_v20, %v10660_v46  ;;  %vm5519_vm6 = vweird.f32 %v7479_v16  ;;  %vm10703_vm7 = vcmp.eq.f32.partialorder %v5648_v44, 8.507059e+37 }
 0x76e   : > { %v5601_v18 = vadd.f32 %v7473_v51, %v5600_v39  ;;  %v5640_v26 = vmul.f32 %v7485_v13, %v10662_v45  ;;  %v5651_v32 = vor.u32 1.1754944e-38, %v5650_v33  ;;  %v5704_v14 = vand.u32 2147483647, %v10678_v53  ;;  %vm5520_vm9 = vmor %vm5518_vm14, %vm5519_vm6  ;;  %v3671_v39 = vpop.f32.mrf.mxu2 }
 0x76f   : > { %v5516_v12 = vmul.f32 %v7479_v16, %v5515_v27  ;;  %v5529_v63 = vsub.f32 1.0, %v5528_v3  ;;  %vm5700_vm8 = vweird.f32 %v10678_v53  ;;  %v10711_v35 = vadd.f32 1.0, %v7481_v22  ;;  %v3700_v3 = vpop.f32.mrf.mxu3 }
 0x770   : > { %v5605_v50 = vsel %vm5604_vm5, %v7473_v51, %v5601_v18  ;;  %v5641_v34 = vsub.f32 1.0, %v5640_v26  ;;  %vm5533_vm10 = vweird.f32 %v7483_v20  ;;  %v5706_v36 = vand.u32 2147483648, %v10678_v53 }
 0x771   : > { %v5610_v31 = vsel %vm10669_vm13, %v5609_v25, %v5605_v50  ;;  %v5517_v57 = vadd.f32 %v7479_v16, %v5516_v12  ;;  %v7487_v1 = vpop.eup %7486  ;;  %v5530_v56 = vmul.f32 %v7483_v20, %v5529_v63  ;;  %7490 = vpow2.f32 %v5029_v8  ;;  %vm5534_vm13 = vmor %vm5532_vm2, %vm5533_vm10 }
 0x772   : > { %5926 = vst [vmem:[%s9368_s3 + $0x2d8] sm:$0xff] %v5610_v31  ;;  %v7489_v62 = vpop.eup %7488  ;;  %v5642_v7 = vmul.f32 %v7485_v13, %v5641_v34  ;;  %vm5645_vm11 = vweird.f32 %v7485_v13  ;;  %v5696_v15 = vmul.f32 %v7487_v1, %v10678_v53  ;;  %vm5616_vm12 = vweird.f32 %v10680_v21 }
 0x773   : > { %v5521_v28 = vsel %vm5520_vm9, %v7479_v16, %v5517_v57  ;;  %v5531_v37 = vadd.f32 %v7483_v20, %v5530_v56  ;;  %v5612_v11 = vmul.f32 %v7489_v62, %v10680_v21  ;;  %v5620_v60 = vand.u32 2147483647, %v10680_v21  ;;  %vm5646_vm14 = vmor %vm5644_vm4, %vm5645_vm11  ;;  %v3741_v16 = vpop.f32.mrf.mxu1 }
 0x774   : > { %v5526_v6 = vsel %vm10683_vm15, %v5525_v43, %v5521_v28  ;;  %v5643_v42 = vadd.f32 %v7485_v13, %v5642_v7  ;;  %v5697_v51 = vsub.f32 1.0, %v5696_v15  ;;  %7492 = vrcp.f32 %v10711_v35 }
 0x775   : > { %5920 = vst [vmem:[%s9368_s3 + $0x2a8] sm:$0xff] %v5526_v6  ;;  %v5535_v17 = vsel %vm5534_vm13, %v7483_v20, %v5531_v37  ;;  %vm5701_vm15 = vweird.f32 %v7487_v1  ;;  %v5613_v9 = vsub.f32 1.0, %v5612_v11  ;;  %v5622_v52 = vand.u32 2147483648, %v10680_v21 }
 0x776   : > { %v5540_v46 = vsel %vm10695_vm3, %v5539_v2, %v5535_v17  ;;  %v5647_v30 = vsel %vm5646_vm14, %v7485_v13, %v5643_v42  ;;  %v5698_v24 = vmul.f32 %v7487_v1, %v5697_v51  ;;  %7494 = vpow2.f32 %v10688_v4  ;;  %vm5702_vm3 = vmor %vm5700_vm8, %vm5701_vm15  ;;  %v3770_v42 = vpop.f32.mrf.mxu2 }
 0x777   : > { %v7491_v25 = vpop.eup %7490  ;;  %5921 = vst [vmem:[%s9368_s3 + $0x2b0] sm:$0xff] %v5540_v46  ;;  %v5652_v41 = vsel %vm10703_vm7, %v5651_v32, %v5647_v30  ;;  %vm10737_vm1 = vcmp.eq.f32.partialorder %v5704_v14, 8.507059e+37  ;;  %v5614_v23 = vmul.f32 %v7489_v62, %v5613_v9  ;;  %vm5617_vm2 = vweird.f32 %v7489_v62  ;;  %v3799_v30 = vpop.f32.mrf.mxu3 }
 0x778   : > { %5929 = vst [vmem:[%s9368_s3 + $0x2f0] sm:$0xff] %v5652_v41  ;;  %v5699_v38 = vadd.f32 %v7487_v1, %v5698_v24  ;;  %v5707_v5 = vor.u32 1.1754944e-38, %v5706_v36  ;;  %v10742_v48 = vadd.f32 1.0, %v7491_v25  ;;  %v3670_v29 = vadd.f32 %v3669_v47, %v9305_v61  ;;  %vm5618_vm5 = vmor %vm5616_vm12, %vm5617_vm2 }
 0x779   : > { %v5615_v44 = vadd.f32 %v7489_v62, %v5614_v23  ;;  %vm10748_vm4 = vcmp.eq.f32.partialorder %v5620_v60, 8.507059e+37  ;;  %v3699_v4 = vadd.f32 %v3698_v19, %v9296_v40  ;;  %v3730_v22 = vadd.f32 %v3729_v0, %v9632_v49 }
 0x77a   : > { %v7493_v33 = vpop.eup %7492  ;;  %v5703_v20 = vsel %vm5702_vm3, %v7487_v1, %v5699_v38  ;;  %v5623_v53 = vor.u32 1.1754944e-38, %v5622_v52  ;;  %7496 = vrcp.f32 %v10742_v48  ;;  %v3742_v27 = vadd.f32 %v3741_v16, %v9799_v55 }
 0x77b   : > { %v5708_v43 = vsel %vm10737_vm1, %v5707_v5, %v5703_v20  ;;  %v5619_v13 = vsel %vm5618_vm5, %v7489_v62, %v5615_v44  ;;  %v5626_v18 = vmul.f32 %v7493_v33, %v10711_v35  ;;  %v5634_v49 = vand.u32 2147483647, %v10711_v35  ;;  %v3743_v15 = vpop.f32.mrf.mxu1 }
 0x77c   : > { %v7495_v10 = vpop.eup %7494  ;;  %5933 = vst [vmem:[%s9368_s3 + $0x310] sm:$0xff] %v5708_v43  ;;  %v5624_v21 = vsel %vm10748_vm4, %v5623_v53, %v5619_v13  ;;  %v5636_v2 = vand.u32 2147483648, %v10711_v35  ;;  %v4926_v12 = vsub.f32 0.0, %v3670_v29  ;;  %v3672_v26 = vadd.f32 %v3671_v39, %v9305_v61 }
 0x77d   : > { %5927 = vst [vmem:[%s9368_s3 + $0x2e0] sm:$0xff] %v5624_v21  ;;  %v5627_v58 = vsub.f32 1.0, %v5626_v18  ;;  %v10769_v50 = vadd.f32 1.0, %v7495_v10  ;;  %v4927_v63 = vsub.f32 0.0, %v3699_v4  ;;  %v4935_v32 = vsub.f32 0.0, %v3730_v22 }
 0x77e   : > { %vm5630_vm6 = vweird.f32 %v10711_v35  ;;  %v5025_v14 = vmul.f32 1.442695, %v4926_v12  ;;  %v4887_v47 = vsub.f32 0.0, %v3742_v27  ;;  %vm5631_vm7 = vweird.f32 %v7493_v33 }
 0x77f   : > { %v5628_v31 = vmul.f32 %v7493_v33, %v5627_v58  ;;  %v5746_v57 = vand.u32 2147483647, %v10742_v48  ;;  %7498 = vrcp.f32 %v10769_v50  ;;  %v5027_v1 = vmul.f32 1.442695, %v4927_v63  ;;  %vm5632_vm9 = vmor %vm5630_vm6, %vm5631_vm7 }
 0x780   : > { %v7497_v34 = vpop.eup %7496  ;;  %7500 = vpow2.f32 %v5025_v14  ;;  %v5043_v61 = vmul.f32 1.442695, %v4935_v32  ;;  %v4933_v56 = vsub.f32 0.0, %v3672_v26  ;;  %vm5635_vm8 = vcmp.eq.f32.partialorder %v5634_v49, 8.507059e+37 }
 0x781   : > { %v5629_v36 = vadd.f32 %v7493_v33, %v5628_v31  ;;  %v5637_v19 = vor.u32 1.1754944e-38, %v5636_v2  ;;  %v5738_v62 = vmul.f32 %v7497_v34, %v10742_v48  ;;  %vm5742_vm10 = vweird.f32 %v10742_v48 }
 0x782   : > { %v5748_v28 = vand.u32 2147483648, %v10742_v48  ;;  %7502 = vpow2.f32 %v5027_v1  ;;  %v4947_v7 = vmul.f32 1.442695, %v4887_v47  ;;  %v3701_v11 = vadd.f32 %v3700_v3, %v9296_v40 }
 0x783   : > { %v5633_v6 = vsel %vm5632_vm9, %v7493_v33, %v5629_v36  ;;  %v5739_v37 = vsub.f32 1.0, %v5738_v62  ;;  %7504 = vpow2.f32 %v5043_v61  ;;  %vm10780_vm11 = vcmp.eq.f32.partialorder %v5746_v57, 8.507059e+37  ;;  %v3746_v10 = vpop.f32.mrf.mxu1 }
 0x784   : > { %v5638_v51 = vsel %vm5635_vm8, %v5637_v19, %v5633_v6  ;;  %7506 = vpow2.f32 %v4947_v7  ;;  %v5039_v35 = vmul.f32 1.442695, %v4933_v56  ;;  %vm5743_vm12 = vweird.f32 %v7497_v34 }
 0x785   : > { %v7499_v17 = vpop.eup %7498  ;;  %5928 = vst [vmem:[%s9368_s3 + $0x2e8] sm:$0xff] %v5638_v51  ;;  %v5740_v9 = vmul.f32 %v7497_v34, %v5739_v37  ;;  %v4934_v52 = vsub.f32 0.0, %v3701_v11  ;;  %v3744_v46 = vadd.f32 %v3743_v15, %v9799_v55  ;;  %v5749_v0 = vor.u32 1.1754944e-38, %v5748_v28  ;;  %vm5744_vm14 = vmor %vm5742_vm10, %vm5743_vm12 }
 0x786   : > { %v7501_v24 = vpop.eup %7500  ;;  %v5794_v40 = vmul.f32 %v7499_v17, %v10769_v50  ;;  %vm5798_vm13 = vweird.f32 %v10769_v50  ;;  %v3771_v25 = vadd.f32 %v3770_v42, %v9804_v54  ;;  %v5802_v45 = vand.u32 2147483647, %v10769_v50 }
 0x787   : > { %v5741_v41 = vadd.f32 %v7497_v34, %v5740_v9  ;;  %v10790_v23 = vadd.f32 1.0, %v7501_v24  ;;  %v5041_v16 = vmul.f32 1.442695, %v4934_v52  ;;  %v5804_v29 = vand.u32 2147483648, %v10769_v50 }
 0x788   : > { %v7503_v38 = vpop.eup %7502  ;;  %v5795_v5 = vsub.f32 1.0, %v5794_v40  ;;  %7508 = vpow2.f32 %v5039_v35  ;;  %v10796_v44 = vadd.f32 %v3799_v30, %v9797_v59  ;;  %vm5799_vm15 = vweird.f32 %v7499_v17 }
 0x789   : > { %v7505_v8 = vpop.eup %7504  ;;  %v5745_v4 = vsel %vm5744_vm14, %v7497_v34, %v5741_v41  ;;  %7510 = vrcp.f32 %v10790_v23  ;;  %v4894_v22 = vsub.f32 0.0, %v3744_v46  ;;  %v10801_v20 = vadd.f32 1.0, %v7503_v38  ;;  %vm5800_vm2 = vmor %vm5798_vm13, %vm5799_vm15 }
 0x78a   : > { %v7507_v39 = vpop.eup %7506  ;;  %v5750_v33 = vsel %vm10780_vm11, %v5749_v0, %v5745_v4  ;;  %v5796_v48 = vmul.f32 %v7499_v17, %v5795_v5  ;;  %v4888_v53 = vsub.f32 0.0, %v3771_v25  ;;  %vm10804_vm1 = vcmp.eq.f32.partialorder %v5802_v45, 8.507059e+37 }
 0x78b   : > { %5936 = vst [vmem:[%s9368_s3 + $0x328] sm:$0xff] %v5750_v33  ;;  %v10808_v43 = vadd.f32 1.0, %v7505_v8  ;;  %v10810_v13 = vadd.f32 1.0, %v7507_v39  ;;  %7512 = vpow2.f32 %v5041_v16  ;;  %v5718_v49 = vand.u32 2147483647, %v10790_v23 }
 0x78c   : > { %v5797_v18 = vadd.f32 %v7499_v17, %v5796_v48  ;;  %v5720_v3 = vand.u32 2147483648, %v10790_v23  ;;  %7514 = vrcp.f32 %v10801_v20  ;;  %v5805_v21 = vor.u32 1.1754944e-38, %v5804_v29 }
 0x78d   : > { %7516 = vrcp.f32 %v10808_v43  ;;  %v4961_v2 = vmul.f32 1.442695, %v4894_v22  ;;  %v4889_v12 = vsub.f32 0.0, %v10796_v44  ;;  %v5734_v63 = vand.u32 2147483648, %v10801_v20 }
 0x78e   : > { %v7509_v26 = vpop.eup %7508  ;;  %v5801_v58 = vsel %vm5800_vm2, %v7499_v17, %v5797_v18  ;;  %7518 = vrcp.f32 %v10810_v13  ;;  %v4949_v32 = vmul.f32 1.442695, %v4888_v53  ;;  %vm5714_vm3 = vweird.f32 %v10790_v23 }
 0x78f   : > { %v7511_v14 = vpop.eup %7510  ;;  %v5806_v47 = vsel %vm10804_vm1, %v5805_v21, %v5801_v58  ;;  %v5732_v50 = vand.u32 2147483647, %v10801_v20  ;;  %v10827_v31 = vadd.f32 %v3746_v10, %v9799_v55  ;;  %vm10831_vm4 = vcmp.eq.f32.partialorder %v5718_v49, 8.507059e+37 }
 0x790   : > { %5940 = vst [vmem:[%s9368_s3 + $0x348] sm:$0xff] %v5806_v47  ;;  %v5710_v57 = vmul.f32 %v7511_v14, %v10790_v23  ;;  %v5721_v1 = vor.u32 1.1754944e-38, %v5720_v3  ;;  %v5844_v61 = vand.u32 2147483647, %v10808_v43  ;;  %vm5728_vm5 = vweird.f32 %v10801_v20 }
 0x791   : > { %v7513_v56 = vpop.eup %7512  ;;  %v5846_v36 = vand.u32 2147483648, %v10808_v43  ;;  %v10838_v19 = vadd.f32 1.0, %v7509_v26  ;;  %7520 = vpow2.f32 %v4961_v2  ;;  %v5735_v7 = vor.u32 1.1754944e-38, %v5734_v63  ;;  %v3772_v2 = vpop.f32.mrf.mxu2 }
 0x792   : > { %v7515_v62 = vpop.eup %7514  ;;  %v5711_v28 = vsub.f32 1.0, %v5710_v57  ;;  %vm5840_vm6 = vweird.f32 %v10808_v43  ;;  %v5172_v15 = vand.u32 2147483647, %v10810_v13  ;;  %7522 = vpow2.f32 %v4949_v32 }
 0x793   : > { %v7517_v6 = vpop.eup %7516  ;;  %vm5715_vm7 = vweird.f32 %v7511_v14  ;;  %v5724_v37 = vmul.f32 %v7515_v62, %v10801_v20  ;;  %vm10843_vm8 = vcmp.eq.f32.partialorder %v5732_v50, 8.507059e+37  ;;  %vm5168_vm9 = vweird.f32 %v10810_v13 }
 0x794   : > { %v5174_v42 = vand.u32 2147483648, %v10810_v13  ;;  %v10849_v51 = vadd.f32 1.0, %v7513_v56  ;;  %v7519_v60 = vpop.eup %7518  ;;  %v5712_v35 = vmul.f32 %v7511_v14, %v5711_v28  ;;  %v5836_v17 = vmul.f32 %v7517_v6, %v10808_v43  ;;  %vm5716_vm13 = vmor %vm5714_vm3, %vm5715_vm7 }
 0x795   : > { %vm10852_vm10 = vcmp.eq.f32.partialorder %v5844_v61, 8.507059e+37  ;;  %7524 = vrcp.f32 %v10838_v19  ;;  %v5725_v52 = vsub.f32 1.0, %v5724_v37  ;;  %v5847_v46 = vor.u32 1.1754944e-38, %v5846_v36 }
 0x796   : > { %v5164_v30 = vmul.f32 %v7519_v60, %v10810_v13  ;;  %v4951_v24 = vmul.f32 1.442695, %v4889_v12  ;;  %v5713_v0 = vadd.f32 %v7511_v14, %v5712_v35  ;;  %vm5729_vm11 = vweird.f32 %v7515_v62  ;;  %v3801_v12 = vpop.f32.mrf.mxu3 }
 0x797   : > { %v5837_v40 = vsub.f32 1.0, %v5836_v17  ;;  %vm10858_vm12 = vcmp.eq.f32.partialorder %v5172_v15, 8.507059e+37  ;;  %v7521_v41 = vpop.eup %7520  ;;  %v5726_v45 = vmul.f32 %v7515_v62, %v5725_v52  ;;  %v5175_v38 = vor.u32 1.1754944e-38, %v5174_v42  ;;  %vm5730_vm2 = vmor %vm5728_vm5, %vm5729_vm11 }
 0x798   : > { %v5165_v16 = vsub.f32 1.0, %v5164_v30  ;;  %7526 = vrcp.f32 %v10849_v51  ;;  %v7523_v5 = vpop.eup %7522  ;;  %v5717_v29 = vsel %vm5716_vm13, %v7511_v14, %v5713_v0  ;;  %vm5841_vm14 = vweird.f32 %v7517_v6  ;;  %v3748_v14 = vpop.f32.mrf.mxu1 }
 0x799   : > { %v5838_v44 = vmul.f32 %v7517_v6, %v5837_v40  ;;  %vm5169_vm15 = vweird.f32 %v7519_v60  ;;  %v5722_v8 = vsel %vm10831_vm4, %v5721_v1, %v5717_v29  ;;  %v5727_v4 = vadd.f32 %v7515_v62, %v5726_v45  ;;  %vm5842_vm3 = vmor %vm5840_vm6, %vm5841_vm14 }
 0x79a   : > { %v5166_v22 = vmul.f32 %v7519_v60, %v5165_v16  ;;  %vm5812_vm1 = vweird.f32 %v10838_v19  ;;  %5934 = vst [vmem:[%s9368_s3 + $0x318] sm:$0xff] %v5722_v8  ;;  %v5816_v33 = vand.u32 2147483647, %v10838_v19  ;;  %v5818_v48 = vand.u32 2147483648, %v10838_v19  ;;  %vm5170_vm4 = vmor %vm5168_vm9, %vm5169_vm15  ;;  %v3775_v16 = vpop.f32.mrf.mxu2 }
 0x79b   : > { %v7525_v23 = vpop.eup %7524  ;;  %v5839_v39 = vadd.f32 %v7517_v6, %v5838_v44  ;;  %v10875_v53 = vadd.f32 1.0, %v7521_v41  ;;  %v5731_v27 = vsel %vm5730_vm2, %v7515_v62, %v5727_v4  ;;  %v10880_v3 = vadd.f32 1.0, %v7523_v5 }
 0x79c   : > { %v5167_v18 = vadd.f32 %v7519_v60, %v5166_v22  ;;  %v5808_v49 = vmul.f32 %v7525_v23, %v10838_v19  ;;  %v5736_v20 = vsel %vm10843_vm8, %v5735_v7, %v5731_v27  ;;  %v5830_v21 = vand.u32 2147483647, %v10849_v51 }
 0x79d   : > { %v5843_v10 = vsel %vm5842_vm3, %v7517_v6, %v5839_v39  ;;  %v5832_v43 = vand.u32 2147483648, %v10849_v51  ;;  %5935 = vst [vmem:[%s9368_s3 + $0x320] sm:$0xff] %v5736_v20  ;;  %7528 = vrcp.f32 %v10875_v53  ;;  %vm10896_vm5 = vcmp.eq.f32.partialorder %v5816_v33, 8.507059e+37 }
 0x79e   : > { %v7527_v26 = vpop.eup %7526  ;;  %v5848_v58 = vsel %vm10852_vm10, %v5847_v46, %v5843_v10  ;;  %v5171_v63 = vsel %vm5170_vm4, %v7519_v60, %v5167_v18  ;;  %v5809_v32 = vsub.f32 1.0, %v5808_v49  ;;  %vm5826_vm6 = vweird.f32 %v10849_v51 }
 0x79f   : > { %5943 = vst [vmem:[%s9368_s3 + $0x360] sm:$0xff] %v5848_v58  ;;  %v5176_v13 = vsel %vm10858_vm12, %v5175_v38, %v5171_v63  ;;  %v5822_v50 = vmul.f32 %v7527_v26, %v10849_v51  ;;  %vm5813_vm7 = vweird.f32 %v7525_v23  ;;  %v5819_v34 = vor.u32 1.1754944e-38, %v5818_v48  ;;  %v3804_v38 = vpop.f32.mrf.mxu3 }
 0x7a0   : > { %5895 = vst [vmem:[%s9368_s3 + $0x1e0] sm:$0xff] %v5176_v13  ;;  %v5810_v57 = vmul.f32 %v7525_v23, %v5809_v32  ;;  %7530 = vrcp.f32 %v10880_v3  ;;  %vm10904_vm8 = vcmp.eq.f32.partialorder %v5830_v21, 8.507059e+37  ;;  %v5833_v56 = vor.u32 1.1754944e-38, %v5832_v43  ;;  %vm5814_vm10 = vmor %vm5812_vm1, %vm5813_vm7  ;;  %v3751_v8 = vpop.f32.mrf.mxu1 }
 0x7a1   : > { %v5823_v1 = vsub.f32 1.0, %v5822_v50  ;;  %v5270_v36 = vand.u32 2147483647, %v10875_v53  ;;  %vm5827_vm9 = vweird.f32 %v7527_v26  ;;  %v5272_v28 = vand.u32 2147483648, %v10875_v53 }
 0x7a2   : > { %v5811_v62 = vadd.f32 %v7525_v23, %v5810_v57  ;;  %7532 = vpow2.f32 %v4951_v24  ;;  %vm5266_vm11 = vweird.f32 %v10875_v53  ;;  %v5186_v15 = vand.u32 2147483647, %v10880_v3  ;;  %vm5828_vm14 = vmor %vm5826_vm6, %vm5827_vm9 }
 0x7a3   : > { %v5824_v7 = vmul.f32 %v7527_v26, %v5823_v1  ;;  %v5188_v6 = vand.u32 2147483648, %v10880_v3  ;;  %v4901_v37 = vsub.f32 0.0, %v10827_v31  ;;  %v7529_v11 = vpop.eup %7528  ;;  %v3773_v60 = vadd.f32 %v3772_v2, %v9804_v54 }
 0x7a4   : > { %v5815_v42 = vsel %vm5814_vm10, %v7525_v23, %v5811_v62  ;;  %v3802_v35 = vadd.f32 %v3801_v12, %v9797_v59  ;;  %v3749_v17 = vadd.f32 %v3748_v14, %v9799_v55  ;;  %v5262_v52 = vmul.f32 %v7529_v11, %v10875_v53 }
 0x7a5   : > { %v5820_v19 = vsel %vm10896_vm5, %v5819_v34, %v5815_v42  ;;  %v5825_v9 = vadd.f32 %v7527_v26, %v5824_v7  ;;  %vm10922_vm12 = vcmp.eq.f32.partialorder %v5270_v36, 8.507059e+37  ;;  %vm5182_vm13 = vweird.f32 %v10880_v3 }
 0x7a6   : > { %v7531_v31 = vpop.eup %7530  ;;  %5941 = vst [vmem:[%s9368_s3 + $0x350] sm:$0xff] %v5820_v19  ;;  %v4975_v30 = vmul.f32 1.442695, %v4901_v37  ;;  %v4895_v24 = vsub.f32 0.0, %v3773_v60  ;;  %v4896_v0 = vsub.f32 0.0, %v3802_v35  ;;  %v4908_v40 = vsub.f32 0.0, %v3749_v17 }
 0x7a7   : > { %v5829_v25 = vsel %vm5828_vm14, %v7527_v26, %v5825_v9  ;;  %v5263_v41 = vsub.f32 1.0, %v5262_v52  ;;  %vm5267_vm15 = vweird.f32 %v7529_v11  ;;  %v5178_v45 = vmul.f32 %v7531_v31, %v10880_v3  ;;  %v3777_v3 = vpop.f32.mrf.mxu2 }
 0x7a8   : > { %v7533_v5 = vpop.eup %7532  ;;  %v5834_v29 = vsel %vm10904_vm8, %v5833_v56, %v5829_v25  ;;  %7534 = vpow2.f32 %v4975_v30  ;;  %v4963_v44 = vmul.f32 1.442695, %v4895_v24  ;;  %v4965_v51 = vmul.f32 1.442695, %v4896_v0  ;;  %vm5268_vm2 = vmor %vm5266_vm11, %vm5267_vm15 }
 0x7a9   : > { %5942 = vst [vmem:[%s9368_s3 + $0x358] sm:$0xff] %v5834_v29  ;;  %v5264_v4 = vmul.f32 %v7529_v11, %v5263_v41  ;;  %v5179_v22 = vsub.f32 1.0, %v5178_v45  ;;  %v10935_v23 = vadd.f32 1.0, %v7533_v5  ;;  %v4989_v39 = vmul.f32 1.442695, %v4908_v40 }
 0x7aa   : > { %vm5183_vm1 = vweird.f32 %v7531_v31  ;;  %7536 = vpow2.f32 %v4963_v44  ;;  %v3776_v33 = vadd.f32 %v3775_v16, %v9804_v54  ;;  %v3805_v48 = vadd.f32 %v3804_v38, %v9797_v59 }
 0x7ab   : > { %v5265_v27 = vadd.f32 %v7529_v11, %v5264_v4  ;;  %v5180_v18 = vmul.f32 %v7531_v31, %v5179_v22  ;;  %7538 = vrcp.f32 %v10935_v23  ;;  %v3752_v49 = vadd.f32 %v3751_v8, %v9799_v55  ;;  %vm5184_vm4 = vmor %vm5182_vm13, %vm5183_vm1 }
 0x7ac   : > { %v5273_v20 = vor.u32 1.1754944e-38, %v5272_v28  ;;  %vm10944_vm3 = vcmp.eq.f32.partialorder %v5186_v15, 8.507059e+37  ;;  %7540 = vpow2.f32 %v4965_v51  ;;  %v4902_v21 = vsub.f32 0.0, %v3776_v33  ;;  %v3806_v28 = vpop.f32.mrf.mxu3 }
 0x7ad   : > { %v5269_v43 = vsel %vm5268_vm2, %v7529_v11, %v5265_v27  ;;  %v5181_v2 = vadd.f32 %v7531_v31, %v5180_v18  ;;  %7542 = vpow2.f32 %v4989_v39  ;;  %v4903_v12 = vsub.f32 0.0, %v3805_v48  ;;  %v11010_v48 = vpop.f32.mrf.mxu1 }
 0x7ae   : > { %v7535_v26 = vpop.eup %7534  ;;  %v5274_v58 = vsel %vm10922_vm12, %v5273_v20, %v5269_v43  ;;  %v5189_v53 = vor.u32 1.1754944e-38, %v5188_v6  ;;  %v5200_v63 = vand.u32 2147483647, %v10935_v23  ;;  %v4977_v32 = vmul.f32 1.442695, %v4902_v21 }
 0x7af   : > { %5902 = vst [vmem:[%s9368_s3 + $0x218] sm:$0xff] %v5274_v58  ;;  %v5185_v14 = vsel %vm5184_vm4, %v7531_v31, %v5181_v2  ;;  %v10955_v13 = vadd.f32 1.0, %v7535_v26  ;;  %v4979_v47 = vmul.f32 1.442695, %v4903_v12  ;;  %v4915_v50 = vsub.f32 0.0, %v3752_v49  ;;  %v11020_v21 = vpop.f32.mrf.mxu2 }
 0x7b0   : > { %v7537_v57 = vpop.eup %7536  ;;  %v5190_v34 = vsel %vm10944_vm3, %v5189_v53, %v5185_v14  ;;  %v5202_v1 = vand.u32 2147483648, %v10935_v23  ;;  %7544 = vpow2.f32 %v4977_v32  ;;  %vm5196_vm5 = vweird.f32 %v10935_v23 }
 0x7b1   : > { %v7539_v61 = vpop.eup %7538  ;;  %5896 = vst [vmem:[%s9368_s3 + $0x1e8] sm:$0xff] %v5190_v34  ;;  %7546 = vrcp.f32 %v10955_v13  ;;  %v10964_v62 = vadd.f32 1.0, %v7537_v57  ;;  %vm10966_vm6 = vcmp.eq.f32.partialorder %v5200_v63, 8.507059e+37  ;;  %v5003_v37 = vmul.f32 1.442695, %v4915_v50 }
 0x7b2   : > { %v7541_v56 = vpop.eup %7540  ;;  %v5192_v36 = vmul.f32 %v7539_v61, %v10935_v23  ;;  %7548 = vpow2.f32 %v4979_v47  ;;  %v5203_v42 = vor.u32 1.1754944e-38, %v5202_v1  ;;  %v10974_v60 = vadd.f32 %v3777_v3, %v9804_v54 }
 0x7b3   : > { %v7543_v7 = vpop.eup %7542  ;;  %v10970_v6 = vadd.f32 1.0, %v7541_v56  ;;  %7550 = vrcp.f32 %v10964_v62  ;;  %v5368_v35 = vand.u32 2147483647, %v10955_v13  ;;  %v5370_v17 = vand.u32 2147483648, %v10955_v13 }
 0x7b4   : > { %v5193_v11 = vsub.f32 1.0, %v5192_v36  ;;  %v10980_v19 = vadd.f32 %v3806_v28, %v9797_v59  ;;  %vm5197_vm7 = vweird.f32 %v7539_v61  ;;  %v5286_v46 = vand.u32 2147483648, %v10964_v62 }
 0x7b5   : > { %7552 = vrcp.f32 %v10970_v6  ;;  %v10983_v31 = vadd.f32 1.0, %v7543_v7  ;;  %vm5364_vm8 = vweird.f32 %v10955_v13  ;;  %v5284_v24 = vand.u32 2147483647, %v10964_v62  ;;  %vm5198_vm9 = vmor %vm5196_vm5, %vm5197_vm7 }
 0x7b6   : > { %v7545_v9 = vpop.eup %7544  ;;  %v5194_v52 = vmul.f32 %v7539_v61, %v5193_v11  ;;  %7554 = vpow2.f32 %v5003_v37  ;;  %v5298_v41 = vand.u32 2147483647, %v10970_v6  ;;  %v5300_v45 = vand.u32 2147483648, %v10970_v6 }
 0x7b7   : > { %v7547_v30 = vpop.eup %7546  ;;  %v10987_v0 = vadd.f32 1.0, %v7545_v9  ;;  %vm10994_vm10 = vcmp.eq.f32.partialorder %v5368_v35, 8.507059e+37  ;;  %v5371_v5 = vor.u32 1.1754944e-38, %v5370_v17  ;;  %vm5280_vm11 = vweird.f32 %v10964_v62  ;;  %v3782_v38 = vpop.f32.mrf.mxu2 }
 0x7b8   : > { %v5195_v40 = vadd.f32 %v7539_v61, %v5194_v52  ;;  %v5360_v25 = vmul.f32 %v7547_v30, %v10955_v13  ;;  %v7549_v16 = vpop.eup %7548  ;;  %7556 = vrcp.f32 %v10983_v31  ;;  %v5287_v8 = vor.u32 1.1754944e-38, %v5286_v46  ;;  %v3809_v46 = vpop.f32.mrf.mxu3 }
 0x7b9   : > { %v7551_v29 = vpop.eup %7550  ;;  %vm5294_vm12 = vweird.f32 %v10970_v6  ;;  %7558 = vrcp.f32 %v10987_v0  ;;  %vm5365_vm13 = vweird.f32 %v7547_v30  ;;  %vm11005_vm14 = vcmp.eq.f32.partialorder %v5284_v24, 8.507059e+37 }
 0x7ba   : > { %v5199_v44 = vsel %vm5198_vm9, %v7539_v61, %v5195_v40  ;;  %v5361_v51 = vsub.f32 1.0, %v5360_v25  ;;  %v5276_v23 = vmul.f32 %v7551_v29, %v10964_v62  ;;  %v5468_v33 = vand.u32 2147483648, %v10983_v31  ;;  %vm5366_vm4 = vmor %vm5364_vm8, %vm5365_vm13  ;;  %v3756_v40 = vpop.f32.mrf.mxu1 }
 0x7bb   : > { %v7553_v4 = vpop.eup %7552  ;;  %v5204_v22 = vsel %vm10966_vm6, %v5203_v42, %v5199_v44  ;;  %vm11015_vm15 = vcmp.eq.f32.partialorder %v5298_v41, 8.507059e+37  ;;  %v5301_v20 = vor.u32 1.1754944e-38, %v5300_v45  ;;  %v5466_v10 = vand.u32 2147483647, %v10983_v31 }
 0x7bc   : > { %5897 = vst.msk [vmem:[%s9368_s3 + $0x1f0] sm:$0xff] %vm1266_vm0, %v5204_v22  ;;  %v5362_v27 = vmul.f32 %v7547_v30, %v5361_v51  ;;  %v5290_v18 = vmul.f32 %v7553_v4, %v10970_v6  ;;  %v7555_v43 = vpop.eup %7554  ;;  %v5277_v2 = vsub.f32 1.0, %v5276_v23  ;;  %vm5281_vm1 = vweird.f32 %v7551_v29 }
 0x7bd   : > { %v5382_v12 = vand.u32 2147483647, %v10987_v0  ;;  %v11023_v26 = vadd.f32 1.0, %v7549_v16  ;;  %vm5295_vm2 = vweird.f32 %v7553_v4  ;;  %vm5462_vm3 = vweird.f32 %v10983_v31  ;;  %vm5282_vm8 = vmor %vm5280_vm11, %vm5281_vm1 }
 0x7be   : > { %v5363_v58 = vadd.f32 %v7547_v30, %v5362_v27  ;;  %v5291_v53 = vsub.f32 1.0, %v5290_v18  ;;  %v5384_v63 = vand.u32 2147483648, %v10987_v0  ;;  %v7557_v32 = vpop.eup %7556  ;;  %v5278_v14 = vmul.f32 %v7551_v29, %v5277_v2  ;;  %vm5296_vm9 = vmor %vm5294_vm12, %vm5295_vm2 }
 0x7bf   : > { %v5469_v47 = vor.u32 1.1754944e-38, %v5468_v33  ;;  %vm5378_vm5 = vweird.f32 %v10987_v0  ;;  %7560 = vrcp.f32 %v11023_v26  ;;  %v11032_v50 = vadd.f32 1.0, %v7555_v43  ;;  %v7559_v57 = vpop.eup %7558 }
 0x7c0   : > { %v5367_v34 = vsel %vm5366_vm4, %v7547_v30, %v5363_v58  ;;  %v5292_v1 = vmul.f32 %v7553_v4, %v5291_v53  ;;  %v5458_v61 = vmul.f32 %v7557_v32, %v10983_v31  ;;  %vm11035_vm6 = vcmp.eq.f32.partialorder %v5466_v10, 8.507059e+37 }
 0x7c1   : > { %v4909_v13 = vsub.f32 0.0, %v10974_v60  ;;  %v5372_v56 = vsel %vm10994_vm10, %v5371_v5, %v5367_v34  ;;  %v5279_v36 = vadd.f32 %v7551_v29, %v5278_v14  ;;  %v5374_v28 = vmul.f32 %v7559_v57, %v10987_v0 }
 0x7c2   : > { %vm11043_vm7 = vcmp.eq.f32.partialorder %v5382_v12, 8.507059e+37  ;;  %5909 = vst [vmem:[%s9368_s3 + $0x250] sm:$0xff] %v5372_v56  ;;  %v5293_v15 = vadd.f32 %v7553_v4, %v5292_v1  ;;  %v5459_v37 = vsub.f32 1.0, %v5458_v61  ;;  %v5385_v11 = vor.u32 1.1754944e-38, %v5384_v63 }
 0x7c3   : > { %v5396_v42 = vand.u32 2147483647, %v11023_v26  ;;  %v5283_v60 = vsel %vm5282_vm8, %v7551_v29, %v5279_v36  ;;  %v5375_v35 = vsub.f32 1.0, %v5374_v28  ;;  %v5398_v17 = vand.u32 2147483648, %v11023_v26  ;;  %v3785_v28 = vpop.f32.mrf.mxu2 }
 0x7c4   : > { %7562 = vrcp.f32 %v11032_v50  ;;  %v5288_v62 = vsel %vm11005_vm14, %v5287_v8, %v5283_v60  ;;  %v5297_v9 = vsel %vm5296_vm9, %v7553_v4, %v5293_v15  ;;  %v5460_v52 = vmul.f32 %v7557_v32, %v5459_v37 }
 0x7c5   : > { %vm5463_vm10 = vweird.f32 %v7557_v32  ;;  %v7561_v30 = vpop.eup %7560  ;;  %5903 = vst [vmem:[%s9368_s3 + $0x220] sm:$0xff] %v5288_v62  ;;  %v5302_v24 = vsel %vm11015_vm15, %v5301_v20, %v5297_v9  ;;  %v5376_v6 = vmul.f32 %v7559_v57, %v5375_v35  ;;  %vm5379_vm11 = vweird.f32 %v7559_v57 }
 0x7c6   : > { %vm5392_vm12 = vweird.f32 %v11023_v26  ;;  %5904 = vst.msk [vmem:[%s9368_s3 + $0x228] sm:$0xff] %vm1266_vm0, %v5302_v24  ;;  %v5461_v25 = vadd.f32 %v7557_v32, %v5460_v52  ;;  %v5388_v41 = vmul.f32 %v7561_v30, %v11023_v26  ;;  %vm11066_vm13 = vcmp.eq.f32.partialorder %v5396_v42, 8.507059e+37  ;;  %vm5464_vm14 = vmor %vm5462_vm3, %vm5463_vm10 }
 0x7c7   : > { %v5399_v16 = vor.u32 1.1754944e-38, %v5398_v17  ;;  %v5377_v5 = vadd.f32 %v7559_v57, %v5376_v6  ;;  %vm5393_vm15 = vweird.f32 %v7561_v30  ;;  %v4991_v29 = vmul.f32 1.442695, %v4909_v13  ;;  %vm5380_vm1 = vmor %vm5378_vm5, %vm5379_vm11  ;;  %v3758_v13 = vpop.f32.mrf.mxu1 }
 0x7c8   : > { %v4910_v44 = vsub.f32 0.0, %v10980_v19  ;;  %v5465_v51 = vsel %vm5464_vm14, %v7557_v32, %v5461_v25  ;;  %v5389_v8 = vsub.f32 1.0, %v5388_v41  ;;  %v5564_v4 = vand.u32 2147483647, %v11032_v50  ;;  %vm5394_vm3 = vmor %vm5392_vm12, %vm5393_vm15 }
 0x7c9   : > { %v3754_v22 = vadd.f32 %v11010_v48, %v9799_v55  ;;  %v5470_v23 = vsel %vm11035_vm6, %v5469_v47, %v5465_v51  ;;  %v5381_v39 = vsel %vm5380_vm1, %v7559_v57, %v5377_v5  ;;  %v5566_v33 = vand.u32 2147483648, %v11032_v50  ;;  %v3811_v57 = vpop.f32.mrf.mxu3 }
 0x7ca   : > { %v7563_v31 = vpop.eup %7562  ;;  %7564 = vpow2.f32 %v4991_v29  ;;  %5916 = vst [vmem:[%s9368_s3 + $0x288] sm:$0xff] %v5470_v23  ;;  %v5386_v19 = vsel %vm11043_vm7, %v5385_v11, %v5381_v39  ;;  %v5390_v0 = vmul.f32 %v7561_v30, %v5389_v8  ;;  %v4993_v18 = vmul.f32 1.442695, %v4910_v44 }
 0x7cb   : > { %v5556_v27 = vmul.f32 %v7563_v31, %v11032_v50  ;;  %vm5561_vm2 = vweird.f32 %v7563_v31  ;;  %5910 = vst [vmem:[%s9368_s3 + $0x258] sm:$0xff] %v5386_v19  ;;  %v4922_v49 = vsub.f32 0.0, %v3754_v22  ;;  %v3781_v48 = vadd.f32 %v11020_v21, %v9804_v54 }
 0x7cc   : > { %v3810_v20 = vadd.f32 %v3809_v46, %v9797_v59  ;;  %v5391_v10 = vadd.f32 %v7561_v30, %v5390_v0  ;;  %v3757_v2 = vadd.f32 %v3756_v40, %v9799_v55  ;;  %v3783_v12 = vadd.f32 %v3782_v38, %v9804_v54 }
 0x7cd   : > { %v5557_v43 = vsub.f32 1.0, %v5556_v27  ;;  %7566 = vpow2.f32 %v4993_v18  ;;  %v5017_v58 = vmul.f32 1.442695, %v4922_v49  ;;  %v4916_v53 = vsub.f32 0.0, %v3781_v48 }
 0x7ce   : > { %v4917_v63 = vsub.f32 0.0, %v3810_v20  ;;  %v5395_v32 = vsel %vm5394_vm3, %v7561_v30, %v5391_v10  ;;  %v4929_v21 = vsub.f32 0.0, %v3757_v2  ;;  %v4923_v47 = vsub.f32 0.0, %v3783_v12 }
 0x7cf   : > { %v5558_v14 = vmul.f32 %v7563_v31, %v5557_v43  ;;  %v5400_v1 = vsel %vm11066_vm13, %v5399_v16, %v5395_v32  ;;  %7568 = vpow2.f32 %v5017_v58  ;;  %v5005_v61 = vmul.f32 1.442695, %v4916_v53 }
 0x7d0   : > { %v7565_v34 = vpop.eup %7564  ;;  %v5007_v3 = vmul.f32 1.442695, %v4917_v63  ;;  %5911 = vst.msk [vmem:[%s9368_s3 + $0x260] sm:$0xff] %vm1266_vm0, %v5400_v1  ;;  %vm5560_vm4 = vweird.f32 %v11032_v50  ;;  %v5031_v36 = vmul.f32 1.442695, %v4929_v21  ;;  %v5567_v7 = vor.u32 1.1754944e-38, %v5566_v33 }
 0x7d1   : > { %v5559_v26 = vadd.f32 %v7563_v31, %v5558_v14  ;;  %v11101_v56 = vadd.f32 1.0, %v7565_v34  ;;  %vm5562_vm5 = vmor %vm5560_vm4, %vm5561_vm2  ;;  %7570 = vpow2.f32 %v5005_v61  ;;  %v5019_v15 = vmul.f32 1.442695, %v4923_v47  ;;  %v3814_v8 = vpop.f32.mrf.mxu3 }
 0x7d2   : > { %v3812_v37 = vadd.f32 %v3811_v57, %v9797_v59  ;;  %vm5565_vm6 = vcmp.eq.f32.partialorder %v5564_v4, 8.507059e+37  ;;  %v3759_v42 = vadd.f32 %v3758_v13, %v9799_v55  ;;  %v3786_v17 = vadd.f32 %v3785_v28, %v9804_v54 }
 0x7d3   : > { %v5563_v11 = vsel %vm5562_vm5, %v7563_v31, %v5559_v26  ;;  %7572 = vrcp.f32 %v11101_v56  ;;  %v7567_v60 = vpop.eup %7566  ;;  %v5480_v46 = vand.u32 2147483647, %v11101_v56  ;;  %v5482_v30 = vand.u32 2147483648, %v11101_v56 }
 0x7d4   : > { %v5568_v50 = vsel %vm5565_vm6, %v5567_v7, %v5563_v11  ;;  %7574 = vpow2.f32 %v5007_v3  ;;  %v4924_v35 = vsub.f32 0.0, %v3812_v37  ;;  %v11109_v62 = vadd.f32 1.0, %v7567_v60 }
 0x7d5   : > { %5923 = vst [vmem:[%s9368_s3 + $0x2c0] sm:$0xff] %v5568_v50  ;;  %7576 = vpow2.f32 %v5031_v36  ;;  %v7569_v9 = vpop.eup %7568  ;;  %v4936_v6 = vsub.f32 0.0, %v3759_v42  ;;  %v4930_v40 = vsub.f32 0.0, %v3786_v17  ;;  %vm5476_vm7 = vweird.f32 %v11101_v56 }
 0x7d6   : > { %7578 = vpow2.f32 %v5019_v15  ;;  %v5021_v52 = vmul.f32 1.442695, %v4924_v35  ;;  %v11114_v24 = vadd.f32 1.0, %v7569_v9  ;;  %v5496_v41 = vand.u32 2147483648, %v11109_v62 }
 0x7d7   : > { %7580 = vrcp.f32 %v11109_v62  ;;  %v7571_v55 = vpop.eup %7570  ;;  %v5494_v5 = vand.u32 2147483647, %v11109_v62  ;;  %vm11123_vm8 = vcmp.eq.f32.partialorder %v5480_v46, 8.507059e+37  ;;  %v5483_v51 = vor.u32 1.1754944e-38, %v5482_v30 }
 0x7d8   : > { %v11117_v45 = vadd.f32 1.0, %v7571_v55  ;;  %7582 = vpow2.f32 %v5021_v52  ;;  %vm5490_vm9 = vweird.f32 %v11109_v62  ;;  %v11131_v23 = vmul.f32 1.442695, %v4936_v6 }
 0x7d9   : > { %v7573_v25 = vpop.eup %7572  ;;  %7584 = vrcp.f32 %v11114_v24  ;;  %v11133_v39 = vmul.f32 1.442695, %v4930_v40  ;;  %v5497_v19 = vor.u32 1.1754944e-38, %v5496_v41  ;;  %v5662_v0 = vand.u32 2147483647, %v11114_v24 }
 0x7da   : > { %v7575_v16 = vpop.eup %7574  ;;  %v5472_v38 = vmul.f32 %v7573_v25, %v11101_v56  ;;  %7586 = vrcp.f32 %v11117_v45  ;;  %v5664_v27 = vand.u32 2147483648, %v11114_v24  ;;  %vm5477_vm10 = vweird.f32 %v7573_v25 }
 0x7db   : > { %v7577_v29 = vpop.eup %7576  ;;  %v11129_v31 = vadd.f32 1.0, %v7575_v16  ;;  %vm11140_vm11 = vcmp.eq.f32.partialorder %v5494_v5, 8.507059e+37  ;;  %v11145_v10 = vadd.f32 %v3814_v8, %v9797_v59  ;;  %vm5658_vm12 = vweird.f32 %v11114_v24  ;;  %vm5478_vm14 = vmor %vm5476_vm7, %vm5477_vm10  ;;  %v3787_v8 = vpop.f32.mrf.mxu2 }
 0x7dc   : > { %v7579_v4 = vpop.eup %7578  ;;  %v5473_v22 = vsub.f32 1.0, %v5472_v38  ;;  %v11137_v18 = vadd.f32 1.0, %v7577_v29  ;;  %v5578_v2 = vand.u32 2147483647, %v11117_v45  ;;  %v5580_v12 = vand.u32 2147483648, %v11117_v45 }
 0x7dd   : > { %v7581_v33 = vpop.eup %7580  ;;  %7588 = vrcp.f32 %v11129_v31  ;;  %vm5574_vm13 = vweird.f32 %v11117_v45  ;;  %v11153_v32 = vadd.f32 1.0, %v7579_v4  ;;  %vm11159_vm1 = vcmp.eq.f32.partialorder %v5662_v0, 8.507059e+37 }
 0x7de   : > { %v5474_v49 = vmul.f32 %v7573_v25, %v5473_v22  ;;  %v5486_v48 = vmul.f32 %v7581_v33, %v11109_v62  ;;  %v7583_v43 = vpop.eup %7582  ;;  %7590 = vrcp.f32 %v11137_v18  ;;  %vm5491_vm15 = vweird.f32 %v7581_v33 }
 0x7df   : > { %v7585_v58 = vpop.eup %7584  ;;  %v5665_v57 = vor.u32 1.1754944e-38, %v5664_v27  ;;  %v5592_v3 = vand.u32 2147483647, %v11129_v31  ;;  %vm11167_vm2 = vcmp.eq.f32.partialorder %v5578_v2, 8.507059e+37  ;;  %v5594_v36 = vand.u32 2147483648, %v11129_v31  ;;  %vm5492_vm3 = vmor %vm5490_vm9, %vm5491_vm15 }
 0x7e0   : > { %v5475_v53 = vadd.f32 %v7573_v25, %v5474_v49  ;;  %v5487_v63 = vsub.f32 1.0, %v5486_v48  ;;  %v7587_v14 = vpop.eup %7586  ;;  %v5654_v21 = vmul.f32 %v7585_v58, %v11114_v24  ;;  %v5581_v15 = vor.u32 1.1754944e-38, %v5580_v12 }
 0x7e1   : > { %v5570_v61 = vmul.f32 %v7587_v14, %v11117_v45  ;;  %7592 = vrcp.f32 %v11153_v32  ;;  %vm5659_vm4 = vweird.f32 %v7585_v58  ;;  %vm5588_vm5 = vweird.f32 %v11129_v31 }
 0x7e2   : > { %v5479_v34 = vsel %vm5478_vm14, %v7573_v25, %v5475_v53  ;;  %v5488_v1 = vmul.f32 %v7581_v33, %v5487_v63  ;;  %v5655_v26 = vsub.f32 1.0, %v5654_v21  ;;  %vm5756_vm6 = vweird.f32 %v11137_v18  ;;  %vm5660_vm9 = vmor %vm5658_vm12, %vm5659_vm4 }
 0x7e3   : > { %v5484_v13 = vsel %vm11123_vm8, %v5483_v51, %v5479_v34  ;;  %v5571_v7 = vsub.f32 1.0, %v5570_v61  ;;  %v7589_v37 = vpop.eup %7588  ;;  %vm5575_vm7 = vweird.f32 %v7587_v14  ;;  %vm11180_vm8 = vcmp.eq.f32.partialorder %v5592_v3, 8.507059e+37 }
 0x7e4   : > { %5917 = vst [vmem:[%s9368_s3 + $0x290] sm:$0xff] %v5484_v13  ;;  %v5489_v28 = vadd.f32 %v7581_v33, %v5488_v1  ;;  %v5656_v11 = vmul.f32 %v7585_v58, %v5655_v26  ;;  %v7591_v42 = vpop.eup %7590  ;;  %v5584_v35 = vmul.f32 %v7589_v37, %v11129_v31  ;;  %v5595_v52 = vor.u32 1.1754944e-38, %v5594_v36  ;;  %vm5576_vm10 = vmor %vm5574_vm13, %vm5575_vm7 }
 0x7e5   : > { %v5572_v50 = vmul.f32 %v7587_v14, %v5571_v7  ;;  %v5752_v46 = vmul.f32 %v7591_v42, %v11137_v18  ;;  %v5760_v6 = vand.u32 2147483647, %v11137_v18  ;;  %v5762_v40 = vand.u32 2147483648, %v11137_v18 }
 0x7e6   : > { %v5493_v60 = vsel %vm5492_vm3, %v7581_v33, %v5489_v28  ;;  %v5657_v9 = vadd.f32 %v7585_v58, %v5656_v11  ;;  %v5585_v55 = vsub.f32 1.0, %v5584_v35  ;;  %v11195_v16 = vadd.f32 1.0, %v7583_v43  ;;  %v3816_v43 = vpop.f32.mrf.mxu3 }
 0x7e7   : > { %v5498_v62 = vsel %vm11140_vm11, %v5497_v19, %v5493_v60  ;;  %v5573_v30 = vadd.f32 %v7587_v14, %v5572_v50  ;;  %vm5589_vm11 = vweird.f32 %v7589_v37  ;;  %v5753_v41 = vsub.f32 1.0, %v5752_v46  ;;  %v7593_v38 = vpop.eup %7592 }
 0x7e8   : > { %5918 = vst.msk [vmem:[%s9368_s3 + $0x298] sm:$0xff] %vm1266_vm0, %v5498_v62  ;;  %v5661_v25 = vsel %vm5660_vm9, %v7585_v58, %v5657_v9  ;;  %v5586_v29 = vmul.f32 %v7589_v37, %v5585_v55  ;;  %7594 = vpow2.f32 %v11131_v23  ;;  %vm5757_vm12 = vweird.f32 %v7591_v42  ;;  %vm5590_vm14 = vmor %vm5588_vm5, %vm5589_vm11 }
 0x7e9   : > { %v5666_v24 = vsel %vm11159_vm1, %v5665_v57, %v5661_v25  ;;  %v5577_v5 = vsel %vm5576_vm10, %v7587_v14, %v5573_v30  ;;  %v5754_v51 = vmul.f32 %v7591_v42, %v5753_v41  ;;  %v5668_v45 = vmul.f32 %v7593_v38, %v11153_v32  ;;  %vm5758_vm15 = vmor %vm5756_vm6, %vm5757_vm12 }
 0x7ea   : > { %5930 = vst [vmem:[%s9368_s3 + $0x2f8] sm:$0xff] %v5666_v24  ;;  %v5582_v44 = vsel %vm11167_vm2, %v5581_v15, %v5577_v5  ;;  %v5587_v4 = vadd.f32 %v7589_v37, %v5586_v29  ;;  %vm11205_vm13 = vcmp.eq.f32.partialorder %v5760_v6, 8.507059e+37  ;;  %v5676_v33 = vand.u32 2147483647, %v11153_v32 }
 0x7eb   : > { %5924 = vst [vmem:[%s9368_s3 + $0x2c8] sm:$0xff] %v5582_v44  ;;  %7596 = vrcp.f32 %v11195_v16  ;;  %v5755_v23 = vadd.f32 %v7591_v42, %v5754_v51  ;;  %v5763_v19 = vor.u32 1.1754944e-38, %v5762_v40  ;;  %v5669_v0 = vsub.f32 1.0, %v5668_v45 }
 0x7ec   : > { %v5678_v27 = vand.u32 2147483648, %v11153_v32  ;;  %v5591_v49 = vsel %vm5590_vm14, %v7589_v37, %v5587_v4  ;;  %7598 = vpow2.f32 %v11133_v39  ;;  %v4931_v48 = vsub.f32 0.0, %v11145_v10 }
 0x7ed   : > { %v3788_v20 = vadd.f32 %v3787_v8, %v9804_v54  ;;  %v5596_v31 = vsel %vm11180_vm8, %v5595_v52, %v5591_v49  ;;  %v5759_v2 = vsel %vm5758_vm15, %v7591_v42, %v5755_v23  ;;  %v5670_v12 = vmul.f32 %v7593_v38, %v5669_v0 }
 0x7ee   : > { %vm5673_vm1 = vweird.f32 %v7593_v38  ;;  %v7595_v58 = vpop.eup %7594  ;;  %5925 = vst.msk [vmem:[%s9368_s3 + $0x2d0] sm:$0xff] %vm1266_vm0, %v5596_v31  ;;  %v5764_v18 = vsel %vm11205_vm13, %v5763_v19, %v5759_v2  ;;  %v5035_v53 = vmul.f32 1.442695, %v4931_v48  ;;  %vm5672_vm2 = vweird.f32 %v11153_v32 }
 0x7ef   : > { %v4937_v63 = vsub.f32 0.0, %v3788_v20  ;;  %5937 = vst [vmem:[%s9368_s3 + $0x330] sm:$0xff] %v5764_v18  ;;  %v5671_v39 = vadd.f32 %v7593_v38, %v5670_v12  ;;  %v5104_v54 = vadd.f32 1.0, %v7595_v58  ;;  %v3817_v10 = vadd.f32 %v3816_v43, %v9797_v59  ;;  %vm5674_vm3 = vmor %vm5672_vm2, %vm5673_vm1 }
 0x7f0   : > { %v5679_v21 = vor.u32 1.1754944e-38, %v5678_v27  ;;  %7600 = vpow2.f32 %v5035_v53  ;;  %vm5677_vm4 = vcmp.eq.f32.partialorder %v5676_v33, 8.507059e+37  ;;  %v5692_v26 = vand.u32 2147483648, %v11195_v16 }
 0x7f1   : > { %v7597_v14 = vpop.eup %7596  ;;  %v5047_v47 = vmul.f32 1.442695, %v4937_v63  ;;  %v5675_v57 = vsel %vm5674_vm3, %v7593_v38, %v5671_v39  ;;  %7602 = vrcp.f32 %v5104_v54  ;;  %v4938_v32 = vsub.f32 0.0, %v3817_v10 }
 0x7f2   : > { %v5682_v34 = vmul.f32 %v7597_v14, %v11195_v16  ;;  %v7599_v1 = vpop.eup %7598  ;;  %v5680_v61 = vsel %vm5677_vm4, %v5679_v21, %v5675_v57  ;;  %vm5687_vm5 = vweird.f32 %v7597_v14  ;;  %v5690_v56 = vand.u32 2147483647, %v11195_v16 }
 0x7f3   : > { %5931 = vst [vmem:[%s9368_s3 + $0x300] sm:$0xff] %v5680_v61  ;;  %v5098_v13 = vadd.f32 1.0, %v7599_v1  ;;  %7604 = vpow2.f32 %v5047_v47  ;;  %v5049_v28 = vmul.f32 1.442695, %v4938_v32  ;;  %vm5686_vm6 = vweird.f32 %v11195_v16 }
 0x7f4   : > { %v5683_v3 = vsub.f32 1.0, %v5682_v34  ;;  %vm5688_vm7 = vmor %vm5686_vm6, %vm5687_vm5  ;;  %v5693_v11 = vor.u32 1.1754944e-38, %v5692_v26  ;;  %vm5691_vm8 = vcmp.eq.f32.partialorder %v5690_v56, 8.507059e+37  ;;  %v5858_v62 = vand.u32 2147483647, %v5104_v54 }
 0x7f5   : > { %7606 = vrcp.f32 %v5098_v13  ;;  %v5860_v46 = vand.u32 2147483648, %v5104_v54  ;;  %vm5854_vm10 = vweird.f32 %v5104_v54  ;;  %v5774_v38 = vand.u32 2147483647, %v5098_v13 }
 0x7f6   : > { %v5684_v59 = vmul.f32 %v7597_v14, %v5683_v3  ;;  %v7601_v36 = vpop.eup %7600  ;;  %7608 = vpow2.f32 %v5049_v28  ;;  %vm5859_vm11 = vcmp.eq.f32.partialorder %v5858_v62, 8.507059e+37  ;;  %v5776_v24 = vand.u32 2147483648, %v5098_v13 }
 0x7f7   : > { %v7603_v7 = vpop.eup %7602  ;;  %v5099_v37 = vadd.f32 1.0, %v7601_v36  ;;  %v5861_v16 = vor.u32 1.1754944e-38, %v5860_v46  ;;  %vm5770_vm14 = vweird.f32 %v5098_v13  ;;  %vm5775_vm1 = vcmp.eq.f32.partialorder %v5774_v38, 8.507059e+37 }
 0x7f8   : > { %v5685_v15 = vadd.f32 %v7597_v14, %v5684_v59  ;;  %v5850_v42 = vmul.f32 %v7603_v7, %v5104_v54  ;;  %vm5855_vm9 = vweird.f32 %v7603_v7  ;;  %v5777_v33 = vor.u32 1.1754944e-38, %v5776_v24 }
 0x7f9   : > { %v7605_v60 = vpop.eup %7604  ;;  %7610 = vrcp.f32 %v5099_v37  ;;  %vm5856_vm12 = vmor %vm5854_vm10, %vm5855_vm9  ;;  %v5788_v23 = vand.u32 2147483647, %v5099_v37  ;;  %v5790_v19 = vand.u32 2147483648, %v5099_v37  ;;  %vm5784_vm3 = vweird.f32 %v5099_v37 }
 0x7fa   : > { %v5689_v50 = vsel %vm5688_vm7, %v7597_v14, %v5685_v15  ;;  %v5851_v17 = vsub.f32 1.0, %v5850_v42  ;;  %v5105_v9 = vadd.f32 1.0, %v7605_v60 }
 0x7fb   : > { %v5694_v35 = vsel %vm5691_vm8, %v5693_v11, %v5689_v50  ;;  %v7607_v52 = vpop.eup %7606  ;;  %vm5789_vm5 = vcmp.eq.f32.partialorder %v5788_v23, 8.507059e+37  ;;  %v5791_v2 = vor.u32 1.1754944e-38, %v5790_v19 }
 0x7fc   : > { %5932 = vst.msk [vmem:[%s9368_s3 + $0x308] sm:$0xff] %vm1266_vm0, %v5694_v35  ;;  %v5852_v30 = vmul.f32 %v7603_v7, %v5851_v17  ;;  %v5766_v55 = vmul.f32 %v7607_v52, %v5098_v13  ;;  %7612 = vrcp.f32 %v5105_v9  ;;  %v7609_v6 = vpop.eup %7608  ;;  %vm5771_vm13 = vweird.f32 %v7607_v52 }
 0x7fd   : > { %v5106_v5 = vadd.f32 1.0, %v7609_v6  ;;  %vm5772_vm15 = vmor %vm5770_vm14, %vm5771_vm13  ;;  %v5872_v12 = vand.u32 2147483647, %v5105_v9  ;;  %v5874_v58 = vand.u32 2147483648, %v5105_v9  ;;  %vm5868_vm7 = vweird.f32 %v5105_v9 }
 0x7fe   : > { %v5853_v40 = vadd.f32 %v7603_v7, %v5852_v30  ;;  %v5767_v25 = vsub.f32 1.0, %v5766_v55 }
 0x7ff   : > { %v7611_v41 = vpop.eup %7610  ;;  %7614 = vrcp.f32 %v5106_v5  ;;  %vm5873_vm9 = vcmp.eq.f32.partialorder %v5872_v12, 8.507059e+37  ;;  %v5875_v14 = vor.u32 1.1754944e-38, %v5874_v58  ;;  %v5888_v21 = vand.u32 2147483648, %v5106_v5 }
 0x800   : > { %v5857_v29 = vsel %vm5856_vm12, %v7603_v7, %v5853_v40  ;;  %v5768_v44 = vmul.f32 %v7607_v52, %v5767_v25  ;;  %v5780_v51 = vmul.f32 %v7611_v41, %v5099_v37  ;;  %vm5785_vm2 = vweird.f32 %v7611_v41 }
 0x801   : > { %v5862_v45 = vsel %vm5859_vm11, %v5861_v16, %v5857_v29  ;;  %vm5786_vm4 = vmor %vm5784_vm3, %vm5785_vm2  ;;  %v5886_v34 = vand.u32 2147483647, %v5106_v5  ;;  %vm5882_vm11 = vweird.f32 %v5106_v5  ;;  %v5889_v3 = vor.u32 1.1754944e-38, %v5888_v21 }
 0x802   : > { %5944 = vst [vmem:[%s9368_s3 + $0x368] sm:$0xff] %v5862_v45  ;;  %v5769_v8 = vadd.f32 %v7607_v52, %v5768_v44  ;;  %v5781_v4 = vsub.f32 1.0, %v5780_v51  ;;  %v7613_v22 = vpop.eup %7612 }
 0x803   : > { %v5864_v49 = vmul.f32 %v7613_v22, %v5105_v9  ;;  %vm5869_vm6 = vweird.f32 %v7613_v22  ;;  %vm5887_vm13 = vcmp.eq.f32.partialorder %v5886_v34, 8.507059e+37 }
 0x804   : > { %v5773_v0 = vsel %vm5772_vm15, %v7607_v52, %v5769_v8  ;;  %v5782_v27 = vmul.f32 %v7611_v41, %v5781_v4  ;;  %vm5870_vm8 = vmor %vm5868_vm7, %vm5869_vm6 }
 0x805   : > { %v5778_v48 = vsel %vm5775_vm1, %v5777_v33, %v5773_v0  ;;  %v5865_v43 = vsub.f32 1.0, %v5864_v49  ;;  %v7615_v31 = vpop.eup %7614 }
 0x806   : > { %5938 = vst [vmem:[%s9368_s3 + $0x338] sm:$0xff] %v5778_v48  ;;  %v5783_v20 = vadd.f32 %v7611_v41, %v5782_v27  ;;  %v5878_v63 = vmul.f32 %v7615_v31, %v5106_v5  ;;  %vm5883_vm10 = vweird.f32 %v7615_v31 }
 0x807   : > { %v5866_v53 = vmul.f32 %v7613_v22, %v5865_v43  ;;  %vm5884_vm12 = vmor %vm5882_vm11, %vm5883_vm10 }
 0x808   : > { %v5787_v18 = vsel %vm5786_vm4, %v7611_v41, %v5783_v20  ;;  %v5879_v10 = vsub.f32 1.0, %v5878_v63 }
 0x809   : > { %v5792_v39 = vsel %vm5789_vm5, %v5791_v2, %v5787_v18  ;;  %v5867_v54 = vadd.f32 %v7613_v22, %v5866_v53 }
 0x80a   : > { %5939 = vst.msk [vmem:[%s9368_s3 + $0x340] sm:$0xff] %vm1266_vm0, %v5792_v39  ;;  %v5880_v57 = vmul.f32 %v7615_v31, %v5879_v10 }
 0x80b   : > { %v5871_v47 = vsel %vm5870_vm8, %v7613_v22, %v5867_v54 }
 0x80c   : > { %v5876_v1 = vsel %vm5873_vm9, %v5875_v14, %v5871_v47  ;;  %v5881_v61 = vadd.f32 %v7615_v31, %v5880_v57 }
 0x80d   : > { %5945 = vst [vmem:[%s9368_s3 + $0x370] sm:$0xff] %v5876_v1 }
 0x80e   : > { %v5885_v13 = vsel %vm5884_vm12, %v7615_v31, %v5881_v61 }
 0x80f   : > { %v5890_v32 = vsel %vm5887_vm13, %v5889_v3, %v5885_v13 }
 0x810   : > { %5946 = vst.msk [vmem:[%s9368_s3 + $0x378] sm:$0xff] %vm1266_vm0, %v5890_v32 }
 0x811 PF: > { %s31_s2 = sadd.s32 1, %s7623_s2  }
 0x812   : > { %p28_p4 = scmp.ge.s32.totalorder %s31_s2, 6  }
 0x814   :  { %30 = sbr.rel (!%p28_p4) target bundleno = 7 (0x7), region = 134 }

</bundles_post_ra>
